<compile_context>
chip_gen: v5e
topology: v5e:2x2
jax: 0.10.0
libtpu: 0.0.40
codegen_flags: <defaults>
</compile_context>

<pallas_src>
import jax
import jax.numpy as jnp
from jax.experimental import pallas as pl
from jax.experimental.pallas import tpu as pltpu

K = 64          # STNkd k (default in the module)
BN_EPS = 1e-5
VMEM_LIMIT = 32 * 1024 * 1024   # fits v5e/v6e/v7x (v7x has only 64 MiB physical)

_CHUNK_CANDIDATES = (2048, 1024, 512, 256, 128)   # largest first (amortize per-step overhead)
_CT = 256                                         # conv3 output-channel tile


# --------------------------------------------------------------------------
# Fused kernel: conv1-3 (+folded BN, ReLU) -> online max-pool -> FC head
# --------------------------------------------------------------------------
def _make_kernel(chunk, n_total, n_chunks, needs_mask):
    n_ct = 1024 // _CT

    def kernel(x_ref, w1, b1, w2, b2, w3, b3, w4, b4, w5, b5, w6, b6,
               o_ref, acc_ref):
        n = pl.program_id(1)

        # acc_ref is the running (8, 1024) max-pool accumulator for the current
        # batch element; re-initialize at the first chunk of each batch element.
        @pl.when(n == 0)
        def _init():
            acc_ref[...] = jnp.full(acc_ref.shape, -jnp.inf, acc_ref.dtype)

        # NCW block (K, chunk): transpose in-kernel (XLU work hides under the
        # MXU matmuls) instead of a wrapper-side HBM transpose pass, then cast
        # once to bf16 (MXU-native inputs, f32 accumulation).
        xt = jnp.transpose(x_ref[0], (1, 0)).astype(jnp.bfloat16)      # (chunk, K)

        h = jnp.dot(xt, w1[...], preferred_element_type=jnp.float32) + b1[...]
        h = jnp.maximum(h, 0.0)                                        # (chunk, 64) f32
        h = jnp.dot(h.astype(jnp.bfloat16), w2[...],
                    preferred_element_type=jnp.float32) + b2[...]
        h2 = jnp.maximum(h, 0.0).astype(jnp.bfloat16)                  # (chunk, 128)

        if needs_mask:
            # Padded tail rows must be masked to -inf before the max:
            # ReLU(bias) of fake rows can exceed the real per-channel max.
            row = jax.lax.broadcasted_iota(jnp.int32, (chunk, 1), 0)
            valid = (n * chunk + row) < n_total

        # conv3 tiled over output channels: the live f32 intermediate is only
        # (chunk, _CT), and each tile folds into the (8, 1024) accumulator with
        # pure VPU element-wise maxes (no per-chunk cross-sublane XLU reduce).
        for t in range(n_ct):
            sl = slice(t * _CT, (t + 1) * _CT)
            h3 = jnp.dot(h2, w3[:, sl],
                         preferred_element_type=jnp.float32) + b3[:, sl]
            h3 = jnp.maximum(h3, 0.0)                                  # (chunk, _CT)
            if needs_mask:
                h3 = jnp.where(valid, h3, -jnp.inf)
            if chunk % 8 == 0:
                part = jnp.max(h3.reshape(chunk // 8, 8, _CT), axis=0)  # (8, _CT)
            else:
                part = jnp.max(h3, axis=0, keepdims=True)               # (1, _CT), bcast
            acc_ref[:, sl] = jnp.maximum(acc_ref[:, sl], part)

        # FC head fused into the last chunk: no second kernel launch, no
        # (B, 1024) HBM round trip; FC weight DMA overlaps the conv compute.
        @pl.when(n == n_chunks - 1)
        def _finalize():
            g = jnp.max(acc_ref[...], axis=0, keepdims=True)            # (1, 1024)
            f = jnp.maximum(jnp.dot(g.astype(jnp.bfloat16), w4[...],
                                    preferred_element_type=jnp.float32) + b4[...], 0.0)
            f = jnp.maximum(jnp.dot(f.astype(jnp.bfloat16), w5[...],
                                    preferred_element_type=jnp.float32) + b5[...], 0.0)
            # b6 already has the +identity folded in.
            o_ref[0] = jnp.dot(f.astype(jnp.bfloat16), w6[...],
                               preferred_element_type=jnp.float32) + b6[...]

    return kernel


# --------------------------------------------------------------------------
# Wrapper
# --------------------------------------------------------------------------
def _const_spec(arr):
    """Whole-array block with a constant index map (fetched once, stays resident)."""
    zeros = (0,) * arr.ndim
    return pl.BlockSpec(arr.shape, lambda b, n, _z=zeros: _z)


def _pick_chunk(n):
    """Largest chunk (multiple of 128, good MXU fill) dividing N exactly; else
    the candidate minimizing padded work, with a cdiv grid + tail masking."""
    for c in _CHUNK_CANDIDATES:
        if n >= c and n % c == 0:
            return c, False
    if n < _CHUNK_CANDIDATES[-1]:
        return n, False          # tiny N: single full-N chunk (full-dim block is legal)
    best = min((c for c in _CHUNK_CANDIDATES if c <= n),
               key=lambda c: (pl.cdiv(n, c) * c, -c))
    return best, True


def stnkd_forward(x_bkn, params):
    """x_bkn: (B, K, N) float32 (PyTorch NCW layout).  Returns (B, K, K)."""
    B, k, N = x_bkn.shape
    assert k == K

    (w1, b1, w2, b2, w3, b3, w4, b4, w5, b5, w6, b6) = params
    # Cast matmul weights to bf16 once (MXU-native, halves weight DMA bytes).
    w1b, w2b, w3b, w4b, w5b, w6b = (
        w.astype(jnp.bfloat16) for w in (w1, w2, w3, w4, w5, w6))
    # Fold the +identity into the fc3 bias: the kernel emits the final result.
    b6i = b6 + jnp.eye(K, dtype=jnp.float32).reshape(1, K * K)

    chunk, needs_mask = _pick_chunk(N)
    n_chunks = pl.cdiv(N, chunk)

    consts = (w1b, b1, w2b, b2, w3b, b3, w4b, b4, w5b, b5, w6b, b6i)
    kernel = _make_kernel(chunk=chunk, n_total=N, n_chunks=n_chunks,
                          needs_mask=needs_mask)

    out = pl.pallas_call(
        kernel,
        out_shape=jax.ShapeDtypeStruct((B, 1, K * K), jnp.float32),
        grid=(B, n_chunks),
        in_specs=[pl.BlockSpec((1, K, chunk), lambda b, n: (b, 0, n))]
                 + [_const_spec(p) for p in consts],
        out_specs=pl.BlockSpec((1, 1, K * K), lambda b, n: (b, 0, 0)),
        scratch_shapes=[pltpu.VMEM((8, 1024), jnp.float32)],
        compiler_params=pltpu.CompilerParams(
            dimension_semantics=("parallel", "arbitrary"),
            vmem_limit_bytes=VMEM_LIMIT,
        ),
    )(x_bkn, *consts)

    return out.reshape(B, K, K)


# --------------------------------------------------------------------------
# Parameter construction (inference-mode BN folding) and pure-JAX reference
# --------------------------------------------------------------------------
def fold_bn(w, b, gamma, beta, mean, var, eps=BN_EPS):
    """Fold inference-mode BatchNorm into a (Cin, Cout) weight and (1, Cout) bias."""
    scale = gamma / jnp.sqrt(var + eps)
    w_f = w * scale[None, :]
    b_f = (b - mean) * scale + beta
    return w_f.astype(jnp.float32), b_f[None, :].astype(jnp.float32)


def init_params(key):
    ks = jax.random.split(key, 32)
    i = iter(range(32))

    def mat(shape, scale=0.05):
        return scale * jax.random.normal(ks[next(i)], shape, jnp.float32)

    def bn(c):
        gamma = 1.0 + 0.1 * jax.random.normal(ks[next(i)], (c,), jnp.float32)
        beta = 0.1 * jax.random.normal(ks[next(i)], (c,), jnp.float32)
        mean = 0.1 * jax.random.normal(ks[next(i)], (c,), jnp.float32)
        var = 0.5 + jax.random.uniform(ks[next(i)], (c,), jnp.float32)
        return gamma, beta, mean, var

    # Conv weights stored as (Cin, Cout) == torch weight (Cout, Cin, 1) transposed.
    w1, b1 = fold_bn(mat((K, 64)), mat((64,)), *bn(64))
    w2, b2 = fold_bn(mat((64, 128)), mat((128,)), *bn(128))
    w3, b3 = fold_bn(mat((128, 1024)), mat((1024,)), *bn(1024))
    # Linear weights stored as (in, out) == torch weight (out, in) transposed.
    w4, b4 = fold_bn(mat((1024, 512)), mat((512,)), *bn(512))
    w5, b5 = fold_bn(mat((512, 256)), mat((256,)), *bn(256))
    w6 = mat((256, K * K))
    b6 = mat((K * K,))[None, :]
    return (w1, b1, w2, b2, w3, b3, w4, b4, w5, b5, w6, b6)


def stnkd_reference(x_bkn, params):
    """Pure-JAX f32 reference mirroring the PyTorch forward (inference-mode BN)."""
    (w1, b1, w2, b2, w3, b3, w4, b4, w5, b5, w6, b6) = params
    x = jnp.transpose(x_bkn, (0, 2, 1))                     # (B, N, K)
    h = jnp.maximum(x @ w1 + b1, 0.0)
    h = jnp.maximum(h @ w2 + b2, 0.0)
    h = jnp.maximum(h @ w3 + b3, 0.0)
    g = jnp.max(h, axis=1)                                  # (B, 1024)
    f = jnp.maximum(g @ w4 + b4, 0.0)
    f = jnp.maximum(f @ w5 + b5, 0.0)
    out = f @ w6 + b6                                       # (B, K*K)
    out = out + jnp.eye(K, dtype=jnp.float32).reshape(1, K * K)
    return out.reshape(-1, K, K)


if __name__ == "__main__":
    key = jax.random.PRNGKey(0)
    kx, kp = jax.random.split(key)

    # Small test shapes; N=768 -> 3 chunks of 256, exercising the online max-pool
    # accumulator (init / accumulate / fused-FC finalize) across grid steps.
    B, N = 2, 768
    x = jax.random.normal(kx, (B, K, N), jnp.float32)       # PyTorch NCW layout (B, k, N)
    params = init_params(kp)

    y = jax.block_until_ready(stnkd_forward(x, params))
    y_ref = stnkd_reference(x, params)

    assert y.shape == (B, K, K)
    # bf16 matmul inputs with f32 accumulation -> relaxed tolerance vs f32 reference.
    assert jnp.allclose(y, y_ref, rtol=3e-2, atol=3e-2), "Pallas output mismatch vs reference"

    print("KERNEL_OK")
</pallas_src>

<mosaic_0001>
module attributes {stable_mosaic.version = 11 : i64} {
  func.func @kernel(%arg0: i32, %arg1: i32, %arg2: memref<1x64x256xf32, #tpu.memory_space<vmem>>, %arg3: memref<64x64xbf16, #tpu.memory_space<vmem>>, %arg4: memref<1x64xf32, #tpu.memory_space<vmem>>, %arg5: memref<64x128xbf16, #tpu.memory_space<vmem>>, %arg6: memref<1x128xf32, #tpu.memory_space<vmem>>, %arg7: memref<128x1024xbf16, #tpu.memory_space<vmem>>, %arg8: memref<1x1024xf32, #tpu.memory_space<vmem>>, %arg9: memref<1024x512xbf16, #tpu.memory_space<vmem>>, %arg10: memref<1x512xf32, #tpu.memory_space<vmem>>, %arg11: memref<512x256xbf16, #tpu.memory_space<vmem>>, %arg12: memref<1x256xf32, #tpu.memory_space<vmem>>, %arg13: memref<256x4096xbf16, #tpu.memory_space<vmem>>, %arg14: memref<1x4096xf32, #tpu.memory_space<vmem>>, %arg15: memref<1x1x4096xf32, #tpu.memory_space<vmem>>, %arg16: memref<8x1024xf32, #tpu.memory_space<vmem>>) attributes {dimension_semantics = [#tpu.dimension_semantics<parallel>, #tpu.dimension_semantics<arbitrary>], iteration_bounds = array<i64: 2, 3>, scalar_prefetch = 0 : i64, scratch_operands = 1 : i64, tpu.core_type = #tpu.core_type<tc>, window_params = [{transform_indices = @transform_0, window_bounds = array<i64: 1, 64, 256>}, {pipeline_mode = #tpu.pipeline_mode<synchronous>, transform_indices = @transform_1, window_bounds = array<i64: 64, 64>}, {pipeline_mode = #tpu.pipeline_mode<synchronous>, transform_indices = @transform_2, window_bounds = array<i64: 1, 64>}, {pipeline_mode = #tpu.pipeline_mode<synchronous>, transform_indices = @transform_3, window_bounds = array<i64: 64, 128>}, {pipeline_mode = #tpu.pipeline_mode<synchronous>, transform_indices = @transform_4, window_bounds = array<i64: 1, 128>}, {pipeline_mode = #tpu.pipeline_mode<synchronous>, transform_indices = @transform_5, window_bounds = array<i64: 128, 1024>}, {pipeline_mode = #tpu.pipeline_mode<synchronous>, transform_indices = @transform_6, window_bounds = array<i64: 1, 1024>}, {pipeline_mode = #tpu.pipeline_mode<synchronous>, transform_indices = @transform_7, window_bounds = array<i64: 1024, 512>}, {pipeline_mode = #tpu.pipeline_mode<synchronous>, transform_indices = @transform_8, window_bounds = array<i64: 1, 512>}, {pipeline_mode = #tpu.pipeline_mode<synchronous>, transform_indices = @transform_9, window_bounds = array<i64: 512, 256>}, {pipeline_mode = #tpu.pipeline_mode<synchronous>, transform_indices = @transform_10, window_bounds = array<i64: 1, 256>}, {pipeline_mode = #tpu.pipeline_mode<synchronous>, transform_indices = @transform_11, window_bounds = array<i64: 256, 4096>}, {pipeline_mode = #tpu.pipeline_mode<synchronous>, transform_indices = @transform_12, window_bounds = array<i64: 1, 4096>}, {transform_indices = @transform_13, window_bounds = array<i64: 1, 1, 4096>}]} {
    %c0_i32 = arith.constant 0 : i32
    %0 = arith.cmpi eq, %arg1, %c0_i32 : i32
    %1 = arith.extui %0 : i1 to i32
    %c0_i32_0 = arith.constant 0 : i32
    %2 = arith.cmpi ne, %1, %c0_i32_0 : i32
    scf.if %2 {
      %cst_56 = arith.constant 0xFF800000 : f32
      %74 = vector.broadcast %cst_56 : f32 to vector<8x1024xf32>
      %c0_57 = arith.constant 0 : index
      %c0_58 = arith.constant 0 : index
      %75 = vector.load %arg16[%c0_57, %c0_58] : memref<8x1024xf32, #tpu.memory_space<vmem>>, vector<8x1024xf32>
      tpu.vector_store %arg16[%c0_57, %c0_58], %74 {strides = array<i32>} : memref<8x1024xf32, #tpu.memory_space<vmem>>, vector<8x1024xf32>,
    } else {
    }
    %c0 = arith.constant 0 : index
    %c0_1 = arith.constant 0 : index
    %c0_2 = arith.constant 0 : index
    %3 = vector.load %arg2[%c0, %c0_1, %c0_2] : memref<1x64x256xf32, #tpu.memory_space<vmem>>, vector<1x64x256xf32>
    %4 = vector.shape_cast %3 : vector<1x64x256xf32> to vector<64x256xf32>
    %5 = tpu.transpose %4, [1, 0] : vector<64x256xf32> -> vector<256x64xf32>
    %6 = arith.truncf %5 : vector<256x64xf32> to vector<256x64xbf16>
    %c0_3 = arith.constant 0 : index
    %c0_4 = arith.constant 0 : index
    %7 = vector.load %arg3[%c0_3, %c0_4] : memref<64x64xbf16, #tpu.memory_space<vmem>>, vector<64x64xbf16>
    %cst = arith.constant dense<0.000000e+00> : vector<256x64xf32>
    %8 = tpu.matmul %6, %7, %cst {dimension_numbers = #tpu.dot_dimension_numbers<[1], [0], [0], [1], [0, 0, 1, 1], [], []>} : vector<256x64xbf16>, vector<64x64xbf16>, vector<256x64xf32> -> vector<256x64xf32>
    %c0_5 = arith.constant 0 : index
    %c0_6 = arith.constant 0 : index
    %9 = vector.load %arg4[%c0_5, %c0_6] : memref<1x64xf32, #tpu.memory_space<vmem>>, vector<1x64xf32>
    %10 = vector.broadcast %9 : vector<1x64xf32> to vector<256x64xf32>
    %11 = arith.addf %8, %10 : vector<256x64xf32>
    %cst_7 = arith.constant 0.000000e+00 : f32
    %12 = vector.broadcast %cst_7 : f32 to vector<256x64xf32>
    %13 = arith.maximumf %11, %12 : vector<256x64xf32>
    %14 = arith.truncf %13 : vector<256x64xf32> to vector<256x64xbf16>
    %c0_8 = arith.constant 0 : index
    %c0_9 = arith.constant 0 : index
    %15 = vector.load %arg5[%c0_8, %c0_9] : memref<64x128xbf16, #tpu.memory_space<vmem>>, vector<64x128xbf16>
    %cst_10 = arith.constant dense<0.000000e+00> : vector<256x128xf32>
    %16 = tpu.matmul %14, %15, %cst_10 {dimension_numbers = #tpu.dot_dimension_numbers<[1], [0], [0], [1], [0, 0, 1, 1], [], []>} : vector<256x64xbf16>, vector<64x128xbf16>, vector<256x128xf32> -> vector<256x128xf32>
    %c0_11 = arith.constant 0 : index
    %c0_12 = arith.constant 0 : index
    %17 = vector.load %arg6[%c0_11, %c0_12] : memref<1x128xf32, #tpu.memory_space<vmem>>, vector<1x128xf32>
    %18 = vector.broadcast %17 : vector<1x128xf32> to vector<256x128xf32>
    %19 = arith.addf %16, %18 : vector<256x128xf32>
    %cst_13 = arith.constant 0.000000e+00 : f32
    %20 = vector.broadcast %cst_13 : f32 to vector<256x128xf32>
    %21 = arith.maximumf %19, %20 : vector<256x128xf32>
    %22 = arith.truncf %21 : vector<256x128xf32> to vector<256x128xbf16>
    %c0_14 = arith.constant 0 : index
    %c0_15 = arith.constant 0 : index
    %23 = vector.load %arg7[%c0_14, %c0_15] : memref<128x1024xbf16, #tpu.memory_space<vmem>>, vector<128x256xbf16>
    %cst_16 = arith.constant dense<0.000000e+00> : vector<256x256xf32>
    %24 = tpu.matmul %22, %23, %cst_16 {dimension_numbers = #tpu.dot_dimension_numbers<[1], [0], [0], [1], [0, 0, 1, 1], [], []>} : vector<256x128xbf16>, vector<128x256xbf16>, vector<256x256xf32> -> vector<256x256xf32>
    %c0_17 = arith.constant 0 : index
    %c0_18 = arith.constant 0 : index
    %25 = vector.load %arg8[%c0_17, %c0_18] : memref<1x1024xf32, #tpu.memory_space<vmem>>, vector<1x256xf32>
    %26 = vector.broadcast %25 : vector<1x256xf32> to vector<256x256xf32>
    %27 = arith.addf %24, %26 : vector<256x256xf32>
    %cst_19 = arith.constant 0.000000e+00 : f32
    %28 = vector.broadcast %cst_19 : f32 to vector<256x256xf32>
    %29 = arith.maximumf %27, %28 : vector<256x256xf32>
    %30 = vector.shape_cast %29 : vector<256x256xf32> to vector<32x8x256xf32>
    %cst_20 = arith.constant dense<0xFF800000> : vector<8x256xf32>
    %31 = vector.multi_reduction <maximumf>, %30, %cst_20 [0] : vector<32x8x256xf32> to vector<8x256xf32>
    %c0_21 = arith.constant 0 : index
    %c0_22 = arith.constant 0 : index
    %32 = vector.load %arg16[%c0_21, %c0_22] : memref<8x1024xf32, #tpu.memory_space<vmem>>, vector<8x256xf32>
    %33 = arith.maximumf %32, %31 : vector<8x256xf32>
    %c0_23 = arith.constant 0 : index
    %c0_24 = arith.constant 0 : index
    %34 = vector.load %arg16[%c0_23, %c0_24] : memref<8x1024xf32, #tpu.memory_space<vmem>>, vector<8x256xf32>
    tpu.vector_store %arg16[%c0_23, %c0_24], %33 {strides = array<i32>} : memref<8x1024xf32, #tpu.memory_space<vmem>>, vector<8x256xf32>,
    %c0_25 = arith.constant 0 : index
    %c256 = arith.constant 256 : index
    %35 = vector.load %arg7[%c0_25, %c256] : memref<128x1024xbf16, #tpu.memory_space<vmem>>, vector<128x256xbf16>
    %cst_26 = arith.constant dense<0.000000e+00> : vector<256x256xf32>
    %36 = tpu.matmul %22, %35, %cst_26 {dimension_numbers = #tpu.dot_dimension_numbers<[1], [0], [0], [1], [0, 0, 1, 1], [], []>} : vector<256x128xbf16>, vector<128x256xbf16>, vector<256x256xf32> -> vector<256x256xf32>
    %c0_27 = arith.constant 0 : index
    %c256_28 = arith.constant 256 : index
    %37 = vector.load %arg8[%c0_27, %c256_28] : memref<1x1024xf32, #tpu.memory_space<vmem>>, vector<1x256xf32>
    %38 = vector.broadcast %37 : vector<1x256xf32> to vector<256x256xf32>
    %39 = arith.addf %36, %38 : vector<256x256xf32>
    %cst_29 = arith.constant 0.000000e+00 : f32
    %40 = vector.broadcast %cst_29 : f32 to vector<256x256xf32>
    %41 = arith.maximumf %39, %40 : vector<256x256xf32>
    %42 = vector.shape_cast %41 : vector<256x256xf32> to vector<32x8x256xf32>
    %cst_30 = arith.constant dense<0xFF800000> : vector<8x256xf32>
    %43 = vector.multi_reduction <maximumf>, %42, %cst_30 [0] : vector<32x8x256xf32> to vector<8x256xf32>
    %c0_31 = arith.constant 0 : index
    %c256_32 = arith.constant 256 : index
    %44 = vector.load %arg16[%c0_31, %c256_32] : memref<8x1024xf32, #tpu.memory_space<vmem>>, vector<8x256xf32>
    %45 = arith.maximumf %44, %43 : vector<8x256xf32>
    %c0_33 = arith.constant 0 : index
    %c256_34 = arith.constant 256 : index
    %46 = vector.load %arg16[%c0_33, %c256_34] : memref<8x1024xf32, #tpu.memory_space<vmem>>, vector<8x256xf32>
    tpu.vector_store %arg16[%c0_33, %c256_34], %45 {strides = array<i32>} : memref<8x1024xf32, #tpu.memory_space<vmem>>, vector<8x256xf32>,
    %c0_35 = arith.constant 0 : index
    %c512 = arith.constant 512 : index
    %47 = vector.load %arg7[%c0_35, %c512] : memref<128x1024xbf16, #tpu.memory_space<vmem>>, vector<128x256xbf16>
    %cst_36 = arith.constant dense<0.000000e+00> : vector<256x256xf32>
    %48 = tpu.matmul %22, %47, %cst_36 {dimension_numbers = #tpu.dot_dimension_numbers<[1], [0], [0], [1], [0, 0, 1, 1], [], []>} : vector<256x128xbf16>, vector<128x256xbf16>, vector<256x256xf32> -> vector<256x256xf32>
    %c0_37 = arith.constant 0 : index
    %c512_38 = arith.constant 512 : index
    %49 = vector.load %arg8[%c0_37, %c512_38] : memref<1x1024xf32, #tpu.memory_space<vmem>>, vector<1x256xf32>
    %50 = vector.broadcast %49 : vector<1x256xf32> to vector<256x256xf32>
    %51 = arith.addf %48, %50 : vector<256x256xf32>
    %cst_39 = arith.constant 0.000000e+00 : f32
    %52 = vector.broadcast %cst_39 : f32 to vector<256x256xf32>
    %53 = arith.maximumf %51, %52 : vector<256x256xf32>
    %54 = vector.shape_cast %53 : vector<256x256xf32> to vector<32x8x256xf32>
    %cst_40 = arith.constant dense<0xFF800000> : vector<8x256xf32>
    %55 = vector.multi_reduction <maximumf>, %54, %cst_40 [0] : vector<32x8x256xf32> to vector<8x256xf32>
    %c0_41 = arith.constant 0 : index
    %c512_42 = arith.constant 512 : index
    %56 = vector.load %arg16[%c0_41, %c512_42] : memref<8x1024xf32, #tpu.memory_space<vmem>>, vector<8x256xf32>
    %57 = arith.maximumf %56, %55 : vector<8x256xf32>
    %c0_43 = arith.constant 0 : index
    %c512_44 = arith.constant 512 : index
    %58 = vector.load %arg16[%c0_43, %c512_44] : memref<8x1024xf32, #tpu.memory_space<vmem>>, vector<8x256xf32>
    tpu.vector_store %arg16[%c0_43, %c512_44], %57 {strides = array<i32>} : memref<8x1024xf32, #tpu.memory_space<vmem>>, vector<8x256xf32>,
    %c0_45 = arith.constant 0 : index
    %c768 = arith.constant 768 : index
    %59 = vector.load %arg7[%c0_45, %c768] : memref<128x1024xbf16, #tpu.memory_space<vmem>>, vector<128x256xbf16>
    %cst_46 = arith.constant dense<0.000000e+00> : vector<256x256xf32>
    %60 = tpu.matmul %22, %59, %cst_46 {dimension_numbers = #tpu.dot_dimension_numbers<[1], [0], [0], [1], [0, 0, 1, 1], [], []>} : vector<256x128xbf16>, vector<128x256xbf16>, vector<256x256xf32> -> vector<256x256xf32>
    %c0_47 = arith.constant 0 : index
    %c768_48 = arith.constant 768 : index
    %61 = vector.load %arg8[%c0_47, %c768_48] : memref<1x1024xf32, #tpu.memory_space<vmem>>, vector<1x256xf32>
    %62 = vector.broadcast %61 : vector<1x256xf32> to vector<256x256xf32>
    %63 = arith.addf %60, %62 : vector<256x256xf32>
    %cst_49 = arith.constant 0.000000e+00 : f32
    %64 = vector.broadcast %cst_49 : f32 to vector<256x256xf32>
    %65 = arith.maximumf %63, %64 : vector<256x256xf32>
    %66 = vector.shape_cast %65 : vector<256x256xf32> to vector<32x8x256xf32>
    %cst_50 = arith.constant dense<0xFF800000> : vector<8x256xf32>
    %67 = vector.multi_reduction <maximumf>, %66, %cst_50 [0] : vector<32x8x256xf32> to vector<8x256xf32>
    %c0_51 = arith.constant 0 : index
    %c768_52 = arith.constant 768 : index
    %68 = vector.load %arg16[%c0_51, %c768_52] : memref<8x1024xf32, #tpu.memory_space<vmem>>, vector<8x256xf32>
    %69 = arith.maximumf %68, %67 : vector<8x256xf32>
    %c0_53 = arith.constant 0 : index
    %c768_54 = arith.constant 768 : index
    %70 = vector.load %arg16[%c0_53, %c768_54] : memref<8x1024xf32, #tpu.memory_space<vmem>>, vector<8x256xf32>
    tpu.vector_store %arg16[%c0_53, %c768_54], %69 {strides = array<i32>} : memref<8x1024xf32, #tpu.memory_space<vmem>>, vector<8x256xf32>,
    %c2_i32 = arith.constant 2 : i32
    %71 = arith.cmpi eq, %arg1, %c2_i32 : i32
    %72 = arith.extui %71 : i1 to i32
    %c0_i32_55 = arith.constant 0 : i32
    %73 = arith.cmpi ne, %72, %c0_i32_55 : i32
    scf.if %73 {
      %c0_56 = arith.constant 0 : index
      %c0_57 = arith.constant 0 : index
      %74 = vector.load %arg16[%c0_56, %c0_57] : memref<8x1024xf32, #tpu.memory_space<vmem>>, vector<8x1024xf32>
      %cst_58 = arith.constant dense<0xFF800000> : vector<1024xf32>
      %75 = vector.multi_reduction <maximumf>, %74, %cst_58 [0] : vector<8x1024xf32> to vector<1024xf32>
      %76 = vector.shape_cast %75 : vector<1024xf32> to vector<1x1024xf32>
      %77 = arith.truncf %76 : vector<1x1024xf32> to vector<1x1024xbf16>
      %c0_59 = arith.constant 0 : index
      %c0_60 = arith.constant 0 : index
      %78 = vector.load %arg9[%c0_59, %c0_60] : memref<1024x512xbf16, #tpu.memory_space<vmem>>, vector<1024x512xbf16>
      %cst_61 = arith.constant dense<0.000000e+00> : vector<1x512xf32>
      %79 = tpu.matmul %77, %78, %cst_61 {dimension_numbers = #tpu.dot_dimension_numbers<[1], [0], [0], [1], [0, 0, 1, 1], [], []>} : vector<1x1024xbf16>, vector<1024x512xbf16>, vector<1x512xf32> -> vector<1x512xf32>
      %c0_62 = arith.constant 0 : index
      %c0_63 = arith.constant 0 : index
      %80 = vector.load %arg10[%c0_62, %c0_63] : memref<1x512xf32, #tpu.memory_space<vmem>>, vector<1x512xf32>
      %81 = arith.addf %79, %80 : vector<1x512xf32>
      %cst_64 = arith.constant 0.000000e+00 : f32
      %82 = vector.broadcast %cst_64 : f32 to vector<1x512xf32>
      %83 = arith.maximumf %81, %82 : vector<1x512xf32>
      %84 = arith.truncf %83 : vector<1x512xf32> to vector<1x512xbf16>
      %c0_65 = arith.constant 0 : index
      %c0_66 = arith.constant 0 : index
      %85 = vector.load %arg11[%c0_65, %c0_66] : memref<512x256xbf16, #tpu.memory_space<vmem>>, vector<512x256xbf16>
      %cst_67 = arith.constant dense<0.000000e+00> : vector<1x256xf32>
      %86 = tpu.matmul %84, %85, %cst_67 {dimension_numbers = #tpu.dot_dimension_numbers<[1], [0], [0], [1], [0, 0, 1, 1], [], []>} : vector<1x512xbf16>, vector<512x256xbf16>, vector<1x256xf32> -> vector<1x256xf32>
      %c0_68 = arith.constant 0 : index
      %c0_69 = arith.constant 0 : index
      %87 = vector.load %arg12[%c0_68, %c0_69] : memref<1x256xf32, #tpu.memory_space<vmem>>, vector<1x256xf32>
      %88 = arith.addf %86, %87 : vector<1x256xf32>
      %cst_70 = arith.constant 0.000000e+00 : f32
      %89 = vector.broadcast %cst_70 : f32 to vector<1x256xf32>
      %90 = arith.maximumf %88, %89 : vector<1x256xf32>
      %91 = arith.truncf %90 : vector<1x256xf32> to vector<1x256xbf16>
      %c0_71 = arith.constant 0 : index
      %c0_72 = arith.constant 0 : index
      %92 = vector.load %arg13[%c0_71, %c0_72] : memref<256x4096xbf16, #tpu.memory_space<vmem>>, vector<256x4096xbf16>
      %cst_73 = arith.constant dense<0.000000e+00> : vector<1x4096xf32>
      %93 = tpu.matmul %91, %92, %cst_73 {dimension_numbers = #tpu.dot_dimension_numbers<[1], [0], [0], [1], [0, 0, 1, 1], [], []>} : vector<1x256xbf16>, vector<256x4096xbf16>, vector<1x4096xf32> -> vector<1x4096xf32>
      %c0_74 = arith.constant 0 : index
      %c0_75 = arith.constant 0 : index
      %94 = vector.load %arg14[%c0_74, %c0_75] : memref<1x4096xf32, #tpu.memory_space<vmem>>, vector<1x4096xf32>
      %95 = arith.addf %93, %94 : vector<1x4096xf32>
      %c0_76 = arith.constant 0 : index
      %c0_77 = arith.constant 0 : index
      %c0_78 = arith.constant 0 : index
      %96 = vector.load %arg15[%c0_76, %c0_77, %c0_78] : memref<1x1x4096xf32, #tpu.memory_space<vmem>>, vector<1x1x4096xf32>
      %97 = vector.shape_cast %96 : vector<1x1x4096xf32> to vector<1x4096xf32>
      %98 = vector.shape_cast %95 : vector<1x4096xf32> to vector<1x1x4096xf32>
      tpu.vector_store %arg15[%c0_76, %c0_77, %c0_78], %98 {strides = array<i32>} : memref<1x1x4096xf32, #tpu.memory_space<vmem>>, vector<1x1x4096xf32>,
    } else {
    }
    return
  }
  func.func @transform_0(%arg0: i32, %arg1: i32) -> (i32, i32, i32) {
    %c0_i32 = arith.constant 0 : i32
    %c0_i32_0 = arith.constant 0 : i32
    return %arg0, %c0_i32, %arg1 : i32, i32, i32
  }
  func.func @transform_1(%arg0: i32, %arg1: i32) -> (i32, i32) {
    %c0_i32 = arith.constant 0 : i32
    %c0_i32_0 = arith.constant 0 : i32
    %c0_i32_1 = arith.constant 0 : i32
    return %c0_i32, %c0_i32_0 : i32, i32
  }
  func.func @transform_2(%arg0: i32, %arg1: i32) -> (i32, i32) {
    %c0_i32 = arith.constant 0 : i32
    %c0_i32_0 = arith.constant 0 : i32
    %c0_i32_1 = arith.constant 0 : i32
    return %c0_i32, %c0_i32_0 : i32, i32
  }
  func.func @transform_3(%arg0: i32, %arg1: i32) -> (i32, i32) {
    %c0_i32 = arith.constant 0 : i32
    %c0_i32_0 = arith.constant 0 : i32
    %c0_i32_1 = arith.constant 0 : i32
    return %c0_i32, %c0_i32_0 : i32, i32
  }
  func.func @transform_4(%arg0: i32, %arg1: i32) -> (i32, i32) {
    %c0_i32 = arith.constant 0 : i32
    %c0_i32_0 = arith.constant 0 : i32
    %c0_i32_1 = arith.constant 0 : i32
    return %c0_i32, %c0_i32_0 : i32, i32
  }
  func.func @transform_5(%arg0: i32, %arg1: i32) -> (i32, i32) {
    %c0_i32 = arith.constant 0 : i32
    %c0_i32_0 = arith.constant 0 : i32
    %c0_i32_1 = arith.constant 0 : i32
    return %c0_i32, %c0_i32_0 : i32, i32
  }
  func.func @transform_6(%arg0: i32, %arg1: i32) -> (i32, i32) {
    %c0_i32 = arith.constant 0 : i32
    %c0_i32_0 = arith.constant 0 : i32
    %c0_i32_1 = arith.constant 0 : i32
    return %c0_i32, %c0_i32_0 : i32, i32
  }
  func.func @transform_7(%arg0: i32, %arg1: i32) -> (i32, i32) {
    %c0_i32 = arith.constant 0 : i32
    %c0_i32_0 = arith.constant 0 : i32
    %c0_i32_1 = arith.constant 0 : i32
    return %c0_i32, %c0_i32_0 : i32, i32
  }
  func.func @transform_8(%arg0: i32, %arg1: i32) -> (i32, i32) {
    %c0_i32 = arith.constant 0 : i32
    %c0_i32_0 = arith.constant 0 : i32
    %c0_i32_1 = arith.constant 0 : i32
    return %c0_i32, %c0_i32_0 : i32, i32
  }
  func.func @transform_9(%arg0: i32, %arg1: i32) -> (i32, i32) {
    %c0_i32 = arith.constant 0 : i32
    %c0_i32_0 = arith.constant 0 : i32
    %c0_i32_1 = arith.constant 0 : i32
    return %c0_i32, %c0_i32_0 : i32, i32
  }
  func.func @transform_10(%arg0: i32, %arg1: i32) -> (i32, i32) {
    %c0_i32 = arith.constant 0 : i32
    %c0_i32_0 = arith.constant 0 : i32
    %c0_i32_1 = arith.constant 0 : i32
    return %c0_i32, %c0_i32_0 : i32, i32
  }
  func.func @transform_11(%arg0: i32, %arg1: i32) -> (i32, i32) {
    %c0_i32 = arith.constant 0 : i32
    %c0_i32_0 = arith.constant 0 : i32
    %c0_i32_1 = arith.constant 0 : i32
    return %c0_i32, %c0_i32_0 : i32, i32
  }
  func.func @transform_12(%arg0: i32, %arg1: i32) -> (i32, i32) {
    %c0_i32 = arith.constant 0 : i32
    %c0_i32_0 = arith.constant 0 : i32
    %c0_i32_1 = arith.constant 0 : i32
    return %c0_i32, %c0_i32_0 : i32, i32
  }
  func.func @transform_13(%arg0: i32, %arg1: i32) -> (i32, i32, i32) {
    %c0_i32 = arith.constant 0 : i32
    %c0_i32_0 = arith.constant 0 : i32
    %c0_i32_1 = arith.constant 0 : i32
    return %arg0, %c0_i32, %c0_i32_0 : i32, i32, i32
  }
}

</mosaic_0001>

<bundles_post_ra>
// kernel: tpu_custom_call.1
= control target key start
LH: loop header
LB: loop body
LE: loop exit
PB: predicated region body
PF: predicated region fallthrough
CT: control target
= control target key end

     0   :  { %s16485_s0 = inlined_call_operand.hbm [shape: f32[2,64,768], index: 0, kind: input, shape index: {}]   ;;  %s16486_s1 = inlined_call_operand.hbm [shape: bf16[64,64], index: 1, kind: input, shape index: {}]   ;;  %s16487_s2 = inlined_call_operand.hbm [shape: f32[1,64], index: 2, kind: input, shape index: {}]   ;;  %s16488_s3 = inlined_call_operand.hbm [shape: bf16[64,128], index: 3, kind: input, shape index: {}]   ;;  %s16489_s4 = inlined_call_operand.hbm [shape: f32[1,128], index: 4, kind: input, shape index: {}]   ;;  %s16490_s5 = inlined_call_operand.hbm [shape: bf16[128,1024], index: 5, kind: input, shape index: {}]   ;;  %s16491_s6 = inlined_call_operand.hbm [shape: f32[1,1024], index: 6, kind: input, shape index: {}]   ;;  %s16492_s7 = inlined_call_operand.hbm [shape: bf16[1024,512], index: 7, kind: input, shape index: {}]   ;;  %s16493_s8 = inlined_call_operand.hbm [shape: f32[1,512], index: 8, kind: input, shape index: {}]   ;;  %s16494_s9 = inlined_call_operand.hbm [shape: bf16[512,256], index: 9, kind: input, shape index: {}]   ;;  %s16495_s10 = inlined_call_operand.hbm [shape: f32[1,256], index: 10, kind: input, shape index: {}]   ;;  %s16496_s11 = inlined_call_operand.hbm [shape: bf16[256,4096], index: 11, kind: input, shape index: {}]   ;;  %s16497_s12 = inlined_call_operand.hbm [shape: f32[1,4096], index: 12, kind: input, shape index: {}]   ;;  %s16498_s13 = inlined_call_operand.hbm [shape: f32[2,1,4096], index: 13, kind: output, shape index: {}]  }
   0x1   :  { %16509 = sst [smem:[#allocation41_spill]] %s16485_s0 }
   0x2   :  { %16510 = sst [smem:[#allocation42_spill]] %s16486_s1 }
   0x3   :  { %16511 = sst [smem:[#allocation43_spill]] %s16487_s2 }
   0x4   :  { %16512 = sst [smem:[#allocation44_spill]] %s16488_s3 }
   0x5   :  { %16513 = sst [smem:[#allocation45_spill]] %s16489_s4 }
   0x6   :  { %16514 = sst [smem:[#allocation46_spill]] %s16490_s5 }
   0x7   :  { %16515 = sst [smem:[#allocation47_spill]] %s16491_s6 }
   0x8   :  { %16516 = sst [smem:[#allocation48_spill]] %s16492_s7 }
   0x9   :  { %16517 = sst [smem:[#allocation49_spill]] %s16493_s8 }
   0xa   :  { %16518 = sst [smem:[#allocation50_spill]] %s16494_s9 }
   0xb   :  { %16519 = sst [smem:[#allocation51_spill]] %s16495_s10 }
   0xc   :  { %16520 = sst [smem:[#allocation52_spill]] %s16496_s11 }
   0xd   :  { %16521 = sst [smem:[#allocation53_spill]] %s16497_s12 }
   0xe   :  { %16522 = sst [smem:[#allocation54_spill]] %s16498_s13 }
   0xf   :  { %18 = vsyncpa [#allocation4], 0 }
  0x10   :  { %20 = vsyncpa [#allocation4 + $0x1], 0 }
  0x11   :  { %21 = vsyncpa [#allocation7], 0 }
  0x12   :  { %22 = vsyncpa [#allocation10], 0 }
  0x13   :  { %23 = vsyncpa [#allocation13], 0 }
  0x14   :  { %24 = vsyncpa [#allocation16], 0 }
  0x15   :  { %25 = vsyncpa [#allocation19], 0 }
  0x16   :  { %26 = vsyncpa [#allocation22], 0 }
  0x17   :  { %27 = vsyncpa [#allocation5], 0 }
  0x18   :  { %29 = vsyncpa [#allocation5 + $0x1], 0  ;;  %s15172_s25 = smov 0   ;;  %s15174_s26 = smov 0  }
  0x19   :  { %s15176_s27 = smov 0   ;;  %s15178_s28 = smov 0  }
  0x1a   :  { %s15180_s29 = smov 0   ;;  %s15182_s30 = smov 0  }
  0x1b   :  { %s15184_s14 = smov 0   ;;  %s15186_s15 = smov 0  }
  0x1c   :  { %s15188_s16 = smov 0   ;;  %s15190_s17 = smov 0  }
  0x1d   :  { %s15192_s18 = smov 0  }
  0x1e LB: > { %16523 = sst [smem:[#allocation33_spill]] %s15037_s25  ;;  %s16500_s19 = sadd.s32 4294967295, %s15077_s18   ;;  %s15077_s18 = sphi %s15192_s18, %s35_s18   ;;  %s15073_s17 = sphi %s15190_s17, %s16578_s17   ;;  %s15069_s16 = sphi %s15188_s16, %s16577_s16   ;;  %s15065_s15 = sphi %s15186_s15, %s16576_s15   ;;  %s15061_s14 = sphi %s15184_s14, %s16575_s14   ;;  %s15057_s30 = sphi %s15182_s30, %s16574_s30   ;;  %s15053_s29 = sphi %s15180_s29, %s16573_s29   ;;  %s15049_s28 = sphi %s15178_s28, %s16572_s28   ;;  %s15045_s27 = sphi %s15176_s27, %s16571_s27   ;;  %s15041_s26 = sphi %s15174_s26, %s16570_s26   ;;  %s15037_s25 = sphi %s15172_s25, %s16569_s25  }
  0x1f   : > { %16524 = sst [smem:[#allocation34_spill]] %s15041_s26  ;;  %p9695_p0 = scmp.ge.s32.totalorder %s15077_s18, 1 }
  0x20   : > { %16525 = sst [smem:[#allocation35_spill]] %s15045_s27  ;;  %p15231_p1 = scmp.eq.s32.totalorder %s16500_s19, 0 }
  0x21   : > { %16526 = sst [smem:[#allocation36_spill]] %s15049_s28  ;;  %p358_p2 = scmp.lt.s32.totalorder %s15077_s18, 7 }
  0x22   : > { %16527 = sst [smem:[#allocation37_spill]] %s15061_s14  ;;  %s15079_s13 = smov [#allocation6]  }
  0x23   : > { %16528 = sst [smem:[#allocation38_spill]] %s15065_s15  ;;  %p15239_p3 = pnand %p9695_p0, %p358_p2 }
  0x24   : > { %s16529_s20 = scalar_select %p15231_p1, 1, 0 }
  0x25   : > { %s16531_s1 = sld [smem:[#allocation42_spill]]  ;;  %p14354_p4 = pneg %p15239_p3 }
  0x26   : > { %16530 = sst [smem:[#allocation39_spill]] %s16529_s20  ;;  %s371_s15 = sshll.u32 %s15079_s13, 4  ;;  %s372_s15 = int_to_ptr.vmem [resolvable:$true] %s371_s15 }
  0x27   : > { %s16532_s24 = scalar_select %p15239_p3, 1, 0 }
  0x28   : > { %p15247_p5 = pnand %p14354_p4, %p15231_p1  ;;  %s16535_s3 = sld [smem:[#allocation44_spill]] }
  0x29   : > { %16533 = sst [smem:[#allocation40_spill]] %s16532_s24  ;;  %s15080_s22 = smov 64  }
  0x2a   : > { %s15082_s24 = smov [#allocation9]   ;;  %s16536_s5 = sld [smem:[#allocation46_spill]] }
  0x2b   : > { %s369_s23 = sshll.u32 %s16531_s1, 4  ;;  %s15081_s1 = smov 4   ;;  %s370_s23 = int_to_ptr.hbm [resolvable:$true] %s369_s23 }
  0x2c   : > { %14357 = dma.hbm_to_vmem [thread:$0]  (!%p15247_p5), %s370_s23, 512, %s372_s15, [#allocation7], %s15080_s22, %s15080_s22, %s15081_s1  }
  0x2d   : > { %s397_s13 = sshll.u32 %s15082_s24, 4  ;;  %s15083_s0 = smov [#allocation12]   ;;  %s398_s13 = int_to_ptr.vmem [resolvable:$true] %s397_s13 }
  0x2e   : > { %s395_s21 = sshll.u32 %s16535_s3, 4  ;;  %s423_s14 = sshll.u32 %s15083_s0, 4  ;;  %s396_s21 = int_to_ptr.hbm [resolvable:$true] %s395_s21  ;;  %s424_s14 = int_to_ptr.vmem [resolvable:$true] %s423_s14 }
  0x2f   : > { %14363 = dma.hbm_to_vmem [thread:$0]  (!%p15247_p5), %s396_s21, 512, %s398_s13, [#allocation10], %s15080_s22, %s15080_s22, %s15081_s1  }
  0x30   : > { %s421_s26 = sshll.u32 %s16536_s5, 4  ;;  %s16537_s7 = sld [smem:[#allocation48_spill]]  ;;  %s422_s26 = int_to_ptr.hbm [resolvable:$true] %s421_s26 }
  0x31   : > { %s15084_s12 = smov 512   ;;  %s15085_s15 = smov 32  }
  0x32   : > { %14369 = dma.hbm_to_vmem [thread:$0]  (!%p15247_p5), %s422_s26, 8192, %s424_s14, [#allocation13], %s15084_s12, %s15084_s12, %s15085_s15  }
  0x33   : > { %s15086_s25 = smov [#allocation15]   ;;  %s16507_s23 = smov 256  }
  0x34   : > { %s449_s20 = sshll.u32 %s15086_s25, 4  ;;  %s16508_s24 = smov 16   ;;  %s450_s20 = int_to_ptr.vmem [resolvable:$true] %s449_s20 }
  0x35   : > { %s16538_s9 = sld [smem:[#allocation50_spill]]  ;;  %s15089_s27 = smov [#allocation18]  }
  0x36   : > { %s447_s28 = sshll.u32 %s16537_s7, 4  ;;  %s475_s12 = sshll.u32 %s15089_s27, 4  ;;  %s448_s28 = int_to_ptr.hbm [resolvable:$true] %s447_s28  ;;  %s476_s12 = int_to_ptr.vmem [resolvable:$true] %s475_s12 }
  0x37   : > { %14375 = dma.hbm_to_vmem [thread:$0]  (!%p15247_p5), %s448_s28, 32768, %s450_s20, [#allocation16], %s16507_s23, %s16507_s23, %s16508_s24  }
  0x38   : > { %s16539_s11 = sld [smem:[#allocation52_spill]]  ;;  %s15090_s0 = smov 128  }
  0x39   : > { %s15091_s14 = smov 8   ;;  %s15092_s28 = smov [#allocation21]  }
  0x3a   : > { %s501_s15 = sshll.u32 %s15092_s28, 4  ;;  %s16540_s2 = sld [smem:[#allocation43_spill]]  ;;  %s502_s15 = int_to_ptr.vmem [resolvable:$true] %s501_s15 }
  0x3b   : > { %s473_s3 = sshll.u32 %s16538_s9, 4  ;;  %s15093_s21 = smov 2048   ;;  %s474_s3 = int_to_ptr.hbm [resolvable:$true] %s473_s3 }
  0x3c   : > { %14381 = dma.hbm_to_vmem [thread:$0]  (!%p15247_p5), %s474_s3, 8192, %s476_s12, [#allocation19], %s15090_s0, %s15090_s0, %s15091_s14  }
  0x3d   : > { %s15094_s27 = smov [#allocation8]   ;;  %s16541_s4 = sld [smem:[#allocation45_spill]] }
  0x3e   : > { %s499_s13 = sshll.u32 %s16539_s11, 4  ;;  %s386_s26 = sshll.u32 %s15094_s27, 4  ;;  %s500_s13 = int_to_ptr.hbm [resolvable:$true] %s499_s13  ;;  %s387_s26 = int_to_ptr.vmem [resolvable:$true] %s386_s26 }
  0x3f   : > { %14387 = dma.hbm_to_vmem [thread:$0]  (!%p15247_p5), %s500_s13, 65536, %s502_s15, [#allocation22], %s15093_s21, %s15093_s21, %s15090_s0  }
  0x40   : > { %s384_s1 = sshll.u32 %s16540_s2, 4  ;;  %s16542_s6 = sld [smem:[#allocation47_spill]]  ;;  %s385_s1 = int_to_ptr.hbm [resolvable:$true] %s384_s1 }
  0x41   : > { %14360 = dma.hbm_to_vmem [thread:$0]  (!%p15247_p5), %s385_s1, 16, %s387_s26, [#allocation7]  }
  0x42   : > { %s15095_s25 = smov [#allocation11]   ;;  %s15096_s13 = smov [#allocation14]  }
  0x43   : > { %s410_s3 = sshll.u32 %s16541_s4, 4  ;;  %s412_s20 = sshll.u32 %s15095_s25, 4  ;;  %s411_s3 = int_to_ptr.hbm [resolvable:$true] %s410_s3  ;;  %s413_s20 = int_to_ptr.vmem [resolvable:$true] %s412_s20 }
  0x44   : > { %14366 = dma.hbm_to_vmem [thread:$0]  (!%p15247_p5), %s411_s3, 16, %s413_s20, [#allocation10]  }
  0x45   : > { %s438_s0 = sshll.u32 %s15096_s13, 4  ;;  %s16543_s8 = sld [smem:[#allocation49_spill]]  ;;  %s439_s0 = int_to_ptr.vmem [resolvable:$true] %s438_s0 }
  0x46   : > { %s436_s28 = sshll.u32 %s16542_s6, 4  ;;  %s16544_s10 = sld [smem:[#allocation51_spill]]  ;;  %s437_s28 = int_to_ptr.hbm [resolvable:$true] %s436_s28 }
  0x47   : > { %14372 = dma.hbm_to_vmem [thread:$0]  (!%p15247_p5), %s437_s28, 128, %s439_s0, [#allocation13]  }
  0x48   : > { %s15097_s22 = smov [#allocation17]   ;;  %s15098_s12 = smov [#allocation20]  }
  0x49   : > { %s464_s3 = sshll.u32 %s15097_s22, 4  ;;  %s490_s14 = sshll.u32 %s15098_s12, 4  ;;  %s465_s3 = int_to_ptr.vmem [resolvable:$true] %s464_s3  ;;  %s491_s14 = int_to_ptr.vmem [resolvable:$true] %s490_s14 }
  0x4a   : > { %s16545_s20 = sld [smem:[#allocation53_spill]]  ;;  %s15099_s0 = smov [#allocation23]  }
  0x4b   : > { %s462_s21 = sshll.u32 %s16543_s8, 4  ;;  %s16546_s23 = sld [smem:[#allocation36_spill]]  ;;  %s463_s21 = int_to_ptr.hbm [resolvable:$true] %s462_s21 }
  0x4c   : > { %s488_s26 = sshll.u32 %s16544_s10, 4  ;;  %s516_s15 = sshll.u32 %s15099_s0, 4  ;;  %s489_s26 = int_to_ptr.hbm [resolvable:$true] %s488_s26  ;;  %s517_s15 = int_to_ptr.vmem [resolvable:$true] %s516_s15 }
  0x4d   : > { %14378 = dma.hbm_to_vmem [thread:$0]  (!%p15247_p5), %s463_s21, 64, %s465_s3, [#allocation16]  }
  0x4e   : > { %14384 = dma.hbm_to_vmem [thread:$0]  (!%p15247_p5), %s489_s26, 32, %s491_s14, [#allocation19]  }
  0x4f   : > { %s16547_s21 = sld [smem:[#allocation35_spill]]  ;;  %s9694_s27 = sadd.s32 4294967294, %s15077_s18  }
  0x50   : > { %s514_s13 = sshll.u32 %s16545_s20, 4  ;;  %s16548_s1 = sld [smem:[#allocation34_spill]]  ;;  %s515_s13 = int_to_ptr.hbm [resolvable:$true] %s514_s13 }
  0x51   : > { %14390 = dma.hbm_to_vmem [thread:$0]  (!%p15247_p5), %s515_s13, 512, %s517_s15, [#allocation22]  }
  0x52   : > { %s44_s3 = sadd.s32 1, %s15069_s16  ;;  %s47_s12 = sadd.s32 1, %s15073_s17 }
  0x53   : > { %p45_p6 = scmp.ge.s32.totalorder %s44_s3, 3  ;;  %s16550_s28 = sld [smem:[#allocation33_spill]] }
  0x54   : > { %s56_s26 = sadd.s32 1, %s15057_s30  ;;  %p63_p7 = scmp.ne.s32.totalorder %s15057_s30, %s15053_s29 }
  0x55   : > { %p64_p8 = scmp.eq.s32.totalorder %s15077_s18, 0  ;;  %s16580_s3 = smov (%p45_p6, %s44_s3), 0 }
  0x56   : > { %s16582_s12 = smov (!%p45_p6, %s47_s12), %s15073_s17  ;;  %s52_s19 = ssub.s32 %s15069_s16, %s16580_s3 }
  0x57   : > { %p15323_p9 = por %p64_p8, %p63_p7  ;;  %p49_p10 = scmp.ge.s32.totalorder %s16582_s12, 2 }
  0x58   : > { %p69_p11 = scmp.ne.s32.totalorder %s15053_s29, %s16546_s23  ;;  %s334_s25 = sadd.s32 1, %s16547_s21 }
  0x59   : > { %p344_p12 = scmp.ne.s32.totalorder %s16547_s21, %s16548_s1  ;;  %s16584_s12 = smov (%p49_p10, %s16582_s12), 0 }
  0x5a   : > { %p15336_p13 = por %p15231_p1, %p69_p11  ;;  %s16553_s13 = sadd.s32 4294967295, %s15077_s18  }
  0x5b   : > { %p345_p0 = scmp.eq.s32.totalorder %s16553_s13, 5  ;;  %s51_s0 = ssub.s32 %s15073_s17, %s16584_s12 }
  0x5c   : > { %p350_p2 = scmp.ne.s32.totalorder %s16548_s1, %s16550_s28  ;;  %s53_s15 = sor.u32 %s52_s19, %s51_s0 }
  0x5d   : > { %p332_p4 = scmp.eq.s32.totalorder %s51_s0, 0  ;;  %p54_p5 = scmp.eq.s32.totalorder %s53_s15, 0 }
  0x5e   : > { %p15346_p6 = por %p345_p0, %p344_p12  ;;  %p351_p7 = scmp.eq.s32.totalorder %s9694_s27, 5 }
  0x5f   : > { %s16586_s21 = smov (!%p332_p4, %s16547_s21), %s334_s25  ;;  %p14411_p8 = scmp.lt.s32.totalorder %s15077_s18, 6 }
  0x60   : > { %s15354_s22 = scalar_select %p54_p5, %s15057_s30, %s56_s26  }
  0x61   : > { %s527_s24 = sand.u32 1, %s15057_s30   ;;  %s9710_s2 = sshll.u32 %s15069_s16, 1 }
  0x62   : > { %p15359_p10 = por %p351_p7, %p350_p2  ;;  %s9709_s1 = sshll.u32 %s527_s24, 7 }
  0x63   : > { %s14301_s28 = smul.u32 48, %s15073_s17  ;;  %p14392_p11 = pnand %p14411_p8, %p15323_p9 }
  0x64   : > { %s531_s0 = scalar_lea.vmem [#allocation3], %s9709_s1  ;;  %s16556_s5 = sld [smem:[#allocation41_spill]] }
  0x65   : > { %s536_s19 = sadd.s32 %s14301_s28, %s9710_s2  ;;  %s541_s15 = sshll.u32 %s531_s0, 4  ;;  %s542_s15 = int_to_ptr.vmem [resolvable:$true] %s541_s15 }
  0x66   : > { %s9711_s4 = sshll.u32 %s536_s19, 3  ;;  %s528_s7 = scalar_lea.sflag [#allocation4], %s527_s24 }
  0x67   : > { %s15100_s8 = smov 768   ;;  %s16557_s9 = smov 16  }
  0x68   : > { %s16558_s10 = smov 256   ;;  %553 = sbr.rel (%p15239_p3) target bundleno = 2534 (0x9e6), region = 72 }
  0x69   : > { %s555_s2 = sand.u32 (!%p15239_p3), 1, %s15053_s29  }
  0x6a   : > { %s538_s27 = scalar_lea.hbm %s16556_s5, %s9711_s4  ;;  %s9713_s14 = sshll.u32 (!%p15239_p3), %s555_s2, 7 }
  0x6b   : > { %s539_s6 = sshll.u32 %s538_s27, 4  ;;  %s556_s1 = scalar_lea.sflag (!%p15239_p3), [#allocation4], %s555_s2  ;;  %s540_s6 = int_to_ptr.hbm [resolvable:$true] %s539_s6 }
  0x6c   : > { %14394 = dma.hbm_to_vmem [thread:$0]  (!%p14392_p11), %s540_s6, 2048, %s542_s15, %s528_s7, %s15100_s8, %s16558_s10, %s16557_s9  }
  0x6d   : > { %s15374_s28 = scalar_lea.vmem [#allocation3], %s9713_s14 }
  0x6e   : > { %15004 = dma.done.wait (%p15336_p13), %s556_s1, 2048  }
  0x6f   : > { %15006 = vsyncadd (%p15336_p13), %s556_s1, 4294965248 }
  0x70   : > { %15008 = dma.done.wait (%p15231_p1), [#allocation7], 528  }
  0x71   : > { %15010 = vsyncadd (%p15231_p1), [#allocation7], 4294966768 }
  0x72   : > { %15012 = dma.done.wait (%p15231_p1), [#allocation10], 528  }
  0x73   : > { %15014 = vsyncadd (%p15231_p1), [#allocation10], 4294966768 }
  0x74   : > { %15016 = dma.done.wait (%p15231_p1), [#allocation13], 8320  }
  0x75   : > { %15018 = vsyncadd (%p15231_p1), [#allocation13], 4294958976 }
  0x76   : > { %15020 = dma.done.wait (%p15231_p1), [#allocation16], 32832  }
  0x77   : > { %15022 = vsyncadd (%p15231_p1), [#allocation16], 4294934464 }
  0x78   : > { %15024 = dma.done.wait (%p15231_p1), [#allocation19], 8224  }
  0x79   : > { %15026 = vsyncadd (%p15231_p1), [#allocation19], 4294959072 }
  0x7a   : > { %15028 = dma.done.wait (%p15231_p1), [#allocation22], 66048  }
  0x7b   : > { %15030 = vsyncadd (%p15231_p1), [#allocation22], 4294901248  ;;  %s16561_s5 = sld [smem:[#allocation34_spill]] }
  0x7c   : > { %s16562_s9 = sld [smem:[#allocation37_spill]] }
  0x81   : > { %s660_s6 = sand.u32 1, %s16561_s5  }
  0x82   : > { %s9726_s7 = sshll.u32 %s660_s6, 5  ;;  %p9727_p3 = scmp.ne.s32.totalorder %s16562_s9, 0 }
  0x83   : > { %s15407_s8 = scalar_lea.vmem [#allocation24], %s9726_s7 }
  0x84   : > { %668 = sbr.rel (%p9727_p3) target bundleno = 146 (0x92), region = 128 }
  0x89   : > { %v15101_v0 = vmov -inf  }
  0x8a   : > { %669 = vst [vmem:[#allocation2 + $0x30] sm:$0xff] %v15101_v0 }
  0x8b   : > { %670 = vst [vmem:[#allocation2] sm:$0xff] %v15101_v0 }
  0x8c   : > { %671 = vst [vmem:[#allocation2 + $0x18] sm:$0xff] %v15101_v0 }
  0x8d   : > { %672 = vst [vmem:[#allocation2 + $0x10] sm:$0xff] %v15101_v0 }
  0x8e   : > { %673 = vst [vmem:[#allocation2 + $0x8] sm:$0xff] %v15101_v0 }
  0x8f   : > { %674 = vst [vmem:[#allocation2 + $0x20] sm:$0xff] %v15101_v0 }
  0x90   : > { %675 = vst [vmem:[#allocation2 + $0x28] sm:$0xff] %v15101_v0 }
  0x91   : > { %676 = vst [vmem:[#allocation2 + $0x38] sm:$0xff] %v15101_v0 }
  0x92 PF: > { %v677_v1 = vld [vmem:[%s15374_s28] sm:$0xff]  ;;  %v679_v2 = vld [vmem:[%s15374_s28 + $0x10] sm:$0xff]  ;;  %v678_v5 = vld [vmem:[%s15374_s28 + $0x8] sm:$0xff]  ;;  %vm809_vm0 = vcmask 523264   ;;  %s16563_s10 = sld [smem:[#allocation37_spill]] }
  0x93   : > { %693 = vxpose.xlu0.b32.start [1/8] (short) %v677_v1, 128  ;;  %v681_v3 = vld [vmem:[%s15374_s28 + $0x20] sm:$0xff]  ;;  %v683_v4 = vld [vmem:[%s15374_s28 + $0x30] sm:$0xff]  ;;  %725 = vxpose.xlu1.b32.start [1/8] (short) %v678_v5, 128  ;;  %v680_v7 = vld [vmem:[%s15374_s28 + $0x18] sm:$0xff] }
  0x94   : > { %v685_v6 = vld [vmem:[%s15374_s28 + $0x40] sm:$0xff]  ;;  %v687_v8 = vld [vmem:[%s15374_s28 + $0x50] sm:$0xff]  ;;  %v682_v9 = vld [vmem:[%s15374_s28 + $0x28] sm:$0xff] }
  0x95   : > { %v13384_v10 = vld [vmem:[#allocation6 + $0x18] sm:$0xff]  ;;  %v689_v11 = vld [vmem:[%s15374_s28 + $0x60] sm:$0xff]  ;;  %v13383_v13 = vld [vmem:[#allocation6 + $0x10] sm:$0xff] }
  0x96   : > { %862 = vmatpush.bf16.msra.mxu0 %v13384_v10  ;;  %14285 = vmatpush.bf16.msra.mxu2 %v13384_v10  ;;  %v684_v12 = vld [vmem:[%s15374_s28 + $0x38] sm:$0xff]  ;;  %v691_v14 = vld [vmem:[%s15374_s28 + $0x70] sm:$0xff]  ;;  %v686_v15 = vld [vmem:[%s15374_s28 + $0x48] sm:$0xff] }
  0x97   : > { %v688_v16 = vld [vmem:[%s15374_s28 + $0x58] sm:$0xff]  ;;  %v690_v17 = vld [vmem:[%s15374_s28 + $0x68] sm:$0xff]  ;;  %v13381_v20 = vld [vmem:[#allocation6] sm:$0xff] }
  0x98   : > { %v692_v18 = vld [vmem:[%s15374_s28 + $0x78] sm:$0xff]  ;;  %v13382_v19 = vld [vmem:[#allocation6 + $0x8] sm:$0xff]  ;;  %v15437_v63 = vld [vmem:[#allocation8] ss:$0 sm:$0xff]  ;;  %p10048_p1 = scmp.ne.s32.totalorder %s16563_s10, 2 }
  0x99   : > { %v13388_v45 = vld [vmem:[#allocation9 + $0x18] sm:$0xff]  ;;  %v13387_v49 = vld [vmem:[#allocation9 + $0x10] sm:$0xff]  ;;  %v13386_v50 = vld [vmem:[#allocation9 + $0x8] sm:$0xff] }
  0x9a   : > { %863 = vmatpush.bf16.msra.mxu0 %v13383_v13  ;;  %14286 = vmatpush.bf16.msra.mxu2 %v13383_v13  ;;  %v13385_v53 = vld [vmem:[#allocation9] sm:$0xff] }
  0x9b   : > { %694 = vxpose.xlu0.b32.cont [2/8] (short) %v679_v2, 128  ;;  %726 = vxpose.xlu1.b32.cont [2/8] (short) %v680_v7, 128 }
  0x9c   : > { %1083 = vmatpush.bf16.msra.mxu1 %v13388_v45  ;;  %14289 = vmatpush.bf16.msra.mxu3 %v13388_v45 }
  0x9e   : > { %864 = vmatpush.bf16.msra.mxu0 %v13382_v19  ;;  %14287 = vmatpush.bf16.msra.mxu2 %v13382_v19 }
  0xa0   : > { %1084 = vmatpush.bf16.msra.mxu1 %v13387_v49  ;;  %14290 = vmatpush.bf16.msra.mxu3 %v13387_v49  ;;  %v9850_v49 = vld [vmem:[#allocation12 + $0x1c0] sm:$0xf] }
  0xa2   : > { %865 = vmatpush.bf16.msra.mxu0 %v13381_v20  ;;  %14288 = vmatpush.bf16.msra.mxu2 %v13381_v20 }
  0xa3   : > { %695 = vxpose.xlu0.b32.cont [3/8] (short) %v681_v3, 128  ;;  %727 = vxpose.xlu1.b32.cont [3/8] (short) %v682_v9, 128 }
  0xa4   : > { %1085 = vmatpush.bf16.msra.mxu1 %v13386_v50  ;;  %14291 = vmatpush.bf16.msra.mxu3 %v13386_v50  ;;  %v13404_v50 = vld [vmem:[#allocation12 + $0x1dc] sm:$0xf0] }
  0xa8   : > { %1086 = vmatpush.bf16.msra.mxu1 %v13385_v53  ;;  %14292 = vmatpush.bf16.msra.mxu3 %v13385_v53  ;;  %v13420_v53 = vld [vmem:[#allocation12 + $0x1e4] sm:$0xf0] }
  0xab   : > { %696 = vxpose.xlu0.b32.cont [4/8] (short) %v683_v4, 128  ;;  %728 = vxpose.xlu1.b32.cont [4/8] (short) %v684_v12, 128 }
  0xb3   : > { %697 = vxpose.xlu0.b32.cont [5/8] (short) %v685_v6, 128  ;;  %729 = vxpose.xlu1.b32.cont [5/8] (short) %v686_v15, 128 }
  0xbb   : > { %698 = vxpose.xlu0.b32.cont [6/8] (short) %v687_v8, 128  ;;  %730 = vxpose.xlu1.b32.cont [6/8] (short) %v688_v16, 128 }
  0xc3   : > { %699 = vxpose.xlu0.b32.cont [7/8] (short) %v689_v11, 128  ;;  %731 = vxpose.xlu1.b32.cont [7/8] (short) %v690_v17, 128 }
  0xcb   : > { %700 = vxpose.xlu0.b32.end [8/8] (short) %v691_v14, 128  ;;  %732 = vxpose.xlu1.b32.end [8/8] (short) %v692_v18, 128 }
 0x137   : > { %v709_v21 = vpop.trf.xlu0  ;;  %v741_v36 = vpop.trf.xlu1 }
 0x13f   : > { %v710_v22 = vpop.trf.xlu0  ;;  %v742_v38 = vpop.trf.xlu1 }
 0x140   : > { %v757_v23 = vpack.c.bf16 %v710_v22, %v709_v21  ;;  %v765_v61 = vpack.c.bf16 %v742_v38, %v741_v36 }
 0x142   : > { %9744 = vmatmul.msk.bf16.vlgmr.msra.gmra.mxu0 %vm809_vm0, %v757_v23 }
 0x147   : > { %v711_v24 = vpop.trf.xlu0  ;;  %v743_v41 = vpop.trf.xlu1 }
 0x14f   : > { %v712_v25 = vpop.trf.xlu0  ;;  %v744_v43 = vpop.trf.xlu1 }
 0x150   : > { %v758_v26 = vpack.c.bf16 %v712_v25, %v711_v24  ;;  %v766_v44 = vpack.c.bf16 %v744_v43, %v743_v41 }
 0x152   : > { %9745 = vmatmul.msk.bf16.gmra.mxu0 %vm809_vm0, %v758_v26  ;;  %9753 = vmatmul.msk.bf16.vlgmr.msra.gmra.mxu2 %vm809_vm0, %v766_v44 }
 0x157   : > { %v713_v27 = vpop.trf.xlu0  ;;  %v745_v48 = vpop.trf.xlu1 }
 0x15f   : > { %v714_v28 = vpop.trf.xlu0  ;;  %v746_v52 = vpop.trf.xlu1 }
 0x160   : > { %v759_v29 = vpack.c.bf16 %v714_v28, %v713_v27  ;;  %v767_v54 = vpack.c.bf16 %v746_v52, %v745_v48  ;;  %v9851_v52 = vor.u32 %v13404_v50, %v9850_v49  ;;  %v9852_v49 = vld [vmem:[#allocation12 + $0x1e0] sm:$0xf0] }
 0x162   : > { %9746 = vmatmul.msk.bf16.gmra.mxu0 %vm809_vm0, %v759_v29  ;;  %9754 = vmatmul.msk.bf16.gmra.mxu2 %vm809_vm0, %v767_v54  ;;  %v13419_v54 = vld [vmem:[#allocation12 + $0x1cc] sm:$0xf] }
 0x163   : > { %1318 = vmatpush.bf16.msrb.mxu2 %v9851_v52 }
 0x167   : > { %v715_v30 = vpop.trf.xlu0  ;;  %v747_v57 = vpop.trf.xlu1 }
 0x16f   : > { %v716_v31 = vpop.trf.xlu0  ;;  %v748_v58 = vpop.trf.xlu1 }
 0x170   : > { %v760_v32 = vpack.c.bf16 %v716_v31, %v715_v30  ;;  %v768_v59 = vpack.c.bf16 %v748_v58, %v747_v57 }
 0x172   : > { %9747 = vmatmul.msk.bf16.gmra.mxu0 %vm809_vm0, %v760_v32  ;;  %9755 = vmatmul.msk.bf16.gmra.mxu2 %vm809_vm0, %v768_v59 }
 0x177   : > { %v717_v33 = vpop.trf.xlu0  ;;  %v749_v62 = vpop.trf.xlu1 }
 0x17f   : > { %v718_v34 = vpop.trf.xlu0  ;;  %v750_v3 = vpop.trf.xlu1 }
 0x180   : > { %v761_v35 = vpack.c.bf16 %v718_v34, %v717_v33  ;;  %v769_v6 = vpack.c.bf16 %v750_v3, %v749_v62  ;;  %v13402_v62 = vld [vmem:[#allocation12 + $0x19c] sm:$0xf0]  ;;  %v13417_v3 = vld [vmem:[#allocation12 + $0x18c] sm:$0xf] }
 0x182   : > { %9748 = vmatmul.msk.bf16.gmra.mxu0 %vm809_vm0, %v761_v35  ;;  %9756 = vmatmul.msk.bf16.gmra.mxu2 %vm809_vm0, %v769_v6 }
 0x187   : > { %v719_v37 = vpop.trf.xlu0  ;;  %v751_v9 = vpop.trf.xlu1 }
 0x18f   : > { %v720_v39 = vpop.trf.xlu0  ;;  %v752_v13 = vpop.trf.xlu1 }
 0x190   : > { %v762_v40 = vpack.c.bf16 %v720_v39, %v719_v37  ;;  %v770_v16 = vpack.c.bf16 %v752_v13, %v751_v9  ;;  %v13400_v9 = vld [vmem:[#allocation12 + $0x15c] sm:$0xf0]  ;;  %v13415_v13 = vld [vmem:[#allocation12 + $0x14c] sm:$0xf] }
 0x192   : > { %9749 = vmatmul.msk.bf16.gmra.mxu0 %vm809_vm0, %v762_v40  ;;  %9757 = vmatmul.msk.bf16.gmra.mxu2 %vm809_vm0, %v770_v16 }
 0x197   : > { %v721_v42 = vpop.trf.xlu0  ;;  %v753_v19 = vpop.trf.xlu1 }
 0x19f   : > { %v722_v46 = vpop.trf.xlu0  ;;  %v754_v23 = vpop.trf.xlu1 }
 0x1a0   : > { %v763_v47 = vpack.c.bf16 %v722_v46, %v721_v42  ;;  %v771_v26 = vpack.c.bf16 %v754_v23, %v753_v19 }
 0x1a2   : > { %9750 = vmatmul.msk.bf16.gmra.mxu0 %vm809_vm0, %v763_v47  ;;  %9758 = vmatmul.msk.bf16.gmra.mxu2 %vm809_vm0, %v771_v26 }
 0x1a7   : > { %v723_v51 = vpop.trf.xlu0  ;;  %v755_v29 = vpop.trf.xlu1 }
 0x1af   : > { %v724_v55 = vpop.trf.xlu0  ;;  %v756_v33 = vpop.trf.xlu1 }
 0x1b0   : > { %v764_v56 = vpack.c.bf16 %v724_v55, %v723_v51  ;;  %v772_v36 = vpack.c.bf16 %v756_v33, %v755_v29  ;;  %v9914_v51 = vld [vmem:[#allocation12 + $0x1c8] sm:$0xf]  ;;  %v9916_v55 = vld [vmem:[#allocation12 + $0x1e8] sm:$0xf0]  ;;  %v9818_v29 = vld [vmem:[#allocation12 + $0xc0] sm:$0xf] }
 0x1b1   : > { %v9915_v58 = vor.u32 %v13420_v53, %v9914_v51  ;;  %v9919_v59 = vor.u32 %v13419_v54, %v9916_v55  ;;  %v13412_v33 = vld [vmem:[#allocation12 + $0xe4] sm:$0xf0]  ;;  %v9802_v55 = vld [vmem:[#allocation12 + $0x40] sm:$0xf] }
 0x1b2   : > { %9751 = vmatmul.msk.bf16.gmra.mxu0 %vm809_vm0, %v764_v56  ;;  %9759 = vmatmul.msk.bf16.gmra.mxu2 %vm809_vm0, %v772_v36 }
 0x1b3   : > { %1730 = vmatpush.bf16.msrb.mxu0 %v9915_v58  ;;  %1819 = vmatpush.bf16.msrb.mxu1 %v9919_v59  ;;  %v13408_v59 = vld [vmem:[#allocation12 + $0x64] sm:$0xf0] }
 0x1bf   : > { %v867_v60 = vpop.f32.mrf.mxu0 }
 0x1c0   : > { %v868_v0 = vadd.f32 %v15437_v63, %v867_v60 }
 0x1c2   : > { %9752 = vmatmul.msk.bf16.gmra.mxu0 %vm809_vm0, %v765_v61  ;;  %v947_v4 = vmax.f32 %v868_v0, 0.0  ;;  %v9842_v61 = vld [vmem:[#allocation12 + $0x180] sm:$0xf]  ;;  %v9906_v0 = vld [vmem:[#allocation12 + $0x188] sm:$0xf] }
 0x1c7   : > { %v869_v1 = vpop.f32.mrf.mxu0 }
 0x1c8   : > { %v870_v2 = vadd.f32 %v15437_v63, %v869_v1  ;;  %v9843_v1 = vor.u32 %v13402_v62, %v9842_v61  ;;  %v9868_v61 = vld [vmem:[#allocation12 + $0x68] sm:$0xf0] }
 0x1ca   : > { %v948_v5 = vmax.f32 %v870_v2, 0.0  ;;  %v13418_v2 = vld [vmem:[#allocation12 + $0x1a4] sm:$0xf0]  ;;  %1319 = vmatpush.bf16.msrb.mxu2 %v9843_v1  ;;  %v9794_v1 = vld [vmem:[#allocation12] sm:$0xf] }
 0x1cc   : > { %v979_v7 = vpack.c.bf16 %v948_v5, %v947_v4  ;;  %v9908_v4 = vld [vmem:[#allocation12 + $0x1a8] sm:$0xf0]  ;;  %v9907_v5 = vor.u32 %v13418_v2, %v9906_v0  ;;  %v13390_v2 = vld [vmem:[#allocation12 + $0x1c] sm:$0xf0] }
 0x1cd   : > { %v9911_v6 = vor.u32 %v13417_v3, %v9908_v4  ;;  %v9858_v3 = vld [vmem:[#allocation12 + $0x8] sm:$0xf]  ;;  %v9795_v4 = vor.u32 %v13390_v2, %v9794_v1  ;;  %v13395_v1 = vld [vmem:[#allocation12 + $0xc4] sm:$0xf] }
 0x1ce   : > { %9776 = vmatmul.msk.bf16.vlgmr.msra.gmra.mxu1 %vm809_vm0, %v979_v7  ;;  %1731 = vmatpush.bf16.msrb.mxu0 %v9907_v5  ;;  %v13406_v5 = vld [vmem:[#allocation12 + $0x24] sm:$0xf0]  ;;  %v9820_v2 = vld [vmem:[#allocation12 + $0xe0] sm:$0xf0] }
 0x1cf   : > { %v872_v8 = vpop.f32.mrf.mxu0  ;;  %1820 = vmatpush.bf16.msrb.mxu1 %v9911_v6  ;;  %v13405_v6 = vld [vmem:[#allocation12 + $0xc] sm:$0xf] }
 0x1d0   : > { %v873_v10 = vadd.f32 %v15437_v63, %v872_v8  ;;  %v9834_v8 = vld [vmem:[#allocation12 + $0x140] sm:$0xf] }
 0x1d2   : > { %v949_v14 = vmax.f32 %v873_v10, 0.0  ;;  %v9898_v10 = vld [vmem:[#allocation12 + $0x148] sm:$0xf] }
 0x1d5   : > { %v912_v53 = vpop.f32.mrf.mxu2 }
 0x1d7   : > { %v874_v11 = vpop.f32.mrf.mxu0 }
 0x1d8   : > { %v875_v12 = vadd.f32 %v15437_v63, %v874_v11  ;;  %v9835_v11 = vor.u32 %v13400_v9, %v9834_v8  ;;  %v9859_v9 = vor.u32 %v13406_v5, %v9858_v3  ;;  %v9823_v3 = vor.u32 %v13395_v1, %v9820_v2 }
 0x1da   : > { %v950_v15 = vmax.f32 %v875_v12, 0.0  ;;  %v13416_v12 = vld [vmem:[#allocation12 + $0x164] sm:$0xf0]  ;;  %1320 = vmatpush.bf16.msrb.mxu2 %v9835_v11 }
 0x1dc   : > { %v980_v17 = vpack.c.bf16 %v950_v15, %v949_v14  ;;  %v9900_v14 = vld [vmem:[#allocation12 + $0x168] sm:$0xf0]  ;;  %v9899_v15 = vor.u32 %v13416_v12, %v9898_v10 }
 0x1dd   : > { %v9903_v16 = vor.u32 %v13415_v13, %v9900_v14  ;;  %v914_v13 = vpop.f32.mrf.mxu2 }
 0x1de   : > { %9777 = vmatmul.msk.bf16.gmra.mxu1 %vm809_vm0, %v980_v17  ;;  %1732 = vmatpush.bf16.msrb.mxu0 %v9899_v15  ;;  %v9826_v17 = vld [vmem:[#allocation12 + $0x100] sm:$0xf] }
 0x1df   : > { %v877_v18 = vpop.f32.mrf.mxu0  ;;  %1821 = vmatpush.bf16.msrb.mxu1 %v9903_v16 }
 0x1e0   : > { %v878_v20 = vadd.f32 %v15437_v63, %v877_v18  ;;  %v13398_v18 = vld [vmem:[#allocation12 + $0x11c] sm:$0xf0] }
 0x1e1   : > { %v9827_v19 = vor.u32 %v13398_v18, %v9826_v17  ;;  %v13401_v17 = vld [vmem:[#allocation12 + $0x184] sm:$0xf] }
 0x1e2   : > { %v951_v24 = vmax.f32 %v878_v20, 0.0  ;;  %v9890_v20 = vld [vmem:[#allocation12 + $0x108] sm:$0xf]  ;;  %v9844_v18 = vld [vmem:[#allocation12 + $0x1a0] sm:$0xf0] }
 0x1e3   : > { %1321 = vmatpush.bf16.msrb.mxu2 %v9827_v19 }
 0x1e7   : > { %v879_v21 = vpop.f32.mrf.mxu0 }
 0x1e8   : > { %v880_v22 = vadd.f32 %v15437_v63, %v879_v21  ;;  %v13414_v21 = vld [vmem:[#allocation12 + $0x124] sm:$0xf0] }
 0x1ea   : > { %v952_v25 = vmax.f32 %v880_v22, 0.0  ;;  %v13413_v22 = vld [vmem:[#allocation12 + $0x10c] sm:$0xf] }
 0x1ec   : > { %v981_v27 = vpack.c.bf16 %v952_v25, %v951_v24  ;;  %v9891_v24 = vor.u32 %v13414_v21, %v9890_v20  ;;  %v9892_v25 = vld [vmem:[#allocation12 + $0x128] sm:$0xf0]  ;;  %v9847_v20 = vor.u32 %v13401_v17, %v9844_v18  ;;  %v917_v21 = vpop.f32.mrf.mxu2  ;;  %v13393_v17 = vld [vmem:[#allocation12 + $0x84] sm:$0xf] }
 0x1ed   : > { %v9812_v18 = vld [vmem:[#allocation12 + $0xa0] sm:$0xf0] }
 0x1ee   : > { %9778 = vmatmul.msk.bf16.gmra.mxu1 %vm809_vm0, %v981_v27  ;;  %v9895_v27 = vor.u32 %v13413_v22, %v9892_v25  ;;  %1733 = vmatpush.bf16.msrb.mxu0 %v9891_v24 }
 0x1ef   : > { %v882_v28 = vpop.f32.mrf.mxu0 }
 0x1f0   : > { %v883_v30 = vadd.f32 %v15437_v63, %v882_v28  ;;  %1822 = vmatpush.bf16.msrb.mxu1 %v9895_v27 }
 0x1f2   : > { %v953_v34 = vmax.f32 %v883_v30, 0.0  ;;  %v13396_v30 = vld [vmem:[#allocation12 + $0xdc] sm:$0xf0] }
 0x1f7   : > { %v884_v31 = vpop.f32.mrf.mxu0 }
 0x1f8   : > { %v885_v32 = vadd.f32 %v15437_v63, %v884_v31  ;;  %v9882_v31 = vld [vmem:[#allocation12 + $0xc8] sm:$0xf] }
 0x1fa   : > { %v954_v35 = vmax.f32 %v885_v32, 0.0  ;;  %v9819_v32 = vor.u32 %v13396_v30, %v9818_v29  ;;  %v919_v29 = vpop.f32.mrf.mxu2  ;;  %v15470_v30 = vld [vmem:[#allocation11] ss:$0 sm:$0xff] }
 0x1fc   : > { %v982_v37 = vpack.c.bf16 %v954_v35, %v953_v34  ;;  %v13411_v34 = vld [vmem:[#allocation12 + $0xcc] sm:$0xf]  ;;  %1322 = vmatpush.bf16.msrb.mxu2 %v9819_v32  ;;  %v9836_v32 = vld [vmem:[#allocation12 + $0x160] sm:$0xf0] }
 0x1fd   : > { %v9884_v35 = vld [vmem:[#allocation12 + $0xe8] sm:$0xf0] }
 0x1fe   : > { %9779 = vmatmul.msk.bf16.gmra.mxu1 %vm809_vm0, %v982_v37 }
 0x1ff   : > { %v887_v38 = vpop.f32.mrf.mxu0 }
 0x200   : > { %v888_v39 = vadd.f32 %v15437_v63, %v887_v38  ;;  %v9883_v38 = vor.u32 %v13412_v33, %v9882_v31  ;;  %v13399_v31 = vld [vmem:[#allocation12 + $0x144] sm:$0xf] }
 0x201   : > { %v9839_v33 = vor.u32 %v13399_v31, %v9836_v32 }
 0x202   : > { %v955_v42 = vmax.f32 %v888_v39, 0.0  ;;  %v9887_v39 = vor.u32 %v13411_v34, %v9884_v35  ;;  %1734 = vmatpush.bf16.msrb.mxu0 %v9883_v38 }
 0x204   : > { %1823 = vmatpush.bf16.msrb.mxu1 %v9887_v39 }
 0x207   : > { %v889_v40 = vpop.f32.mrf.mxu0 }
 0x208   : > { %v890_v41 = vadd.f32 %v15437_v63, %v889_v40 }
 0x20a   : > { %v956_v43 = vmax.f32 %v890_v41, 0.0  ;;  %v9810_v41 = vld [vmem:[#allocation12 + $0x80] sm:$0xf] }
 0x20c   : > { %v983_v44 = vpack.c.bf16 %v956_v43, %v955_v42  ;;  %v13394_v42 = vld [vmem:[#allocation12 + $0x9c] sm:$0xf0]  ;;  %v9874_v43 = vld [vmem:[#allocation12 + $0x88] sm:$0xf] }
 0x20e   : > { %9780 = vmatmul.msk.bf16.gmra.mxu1 %vm809_vm0, %v983_v44  ;;  %v9811_v44 = vor.u32 %v13394_v42, %v9810_v41  ;;  %v922_v41 = vpop.f32.mrf.mxu2 }
 0x20f   : > { %v892_v45 = vpop.f32.mrf.mxu0 }
 0x210   : > { %v893_v46 = vadd.f32 %v15437_v63, %v892_v45  ;;  %v13410_v45 = vld [vmem:[#allocation12 + $0xa4] sm:$0xf0]  ;;  %1323 = vmatpush.bf16.msrb.mxu2 %v9811_v44 }
 0x211   : > { %v9875_v50 = vor.u32 %v13410_v45, %v9874_v43 }
 0x212   : > { %v957_v56 = vmax.f32 %v893_v46, 0.0  ;;  %v13409_v46 = vld [vmem:[#allocation12 + $0x8c] sm:$0xf] }
 0x213   : > { %1735 = vmatpush.bf16.msrb.mxu0 %v9875_v50 }
 0x216   : > { %v924_v50 = vpop.f32.mrf.mxu2 }
 0x217   : > { %v894_v47 = vpop.f32.mrf.mxu0 }
 0x218   : > { %v895_v48 = vadd.f32 %v15437_v63, %v894_v47  ;;  %v9876_v47 = vld [vmem:[#allocation12 + $0xa8] sm:$0xf0] }
 0x219   : > { %v9879_v51 = vor.u32 %v13409_v46, %v9876_v47  ;;  %v13397_v47 = vld [vmem:[#allocation12 + $0x104] sm:$0xf] }
 0x21a   : > { %v958_v57 = vmax.f32 %v895_v48, 0.0  ;;  %v13403_v48 = vld [vmem:[#allocation12 + $0x1c4] sm:$0xf] }
 0x21b   : > { %v9855_v54 = vor.u32 %v13403_v48, %v9852_v49  ;;  %1824 = vmatpush.bf16.msrb.mxu1 %v9879_v51  ;;  %v9828_v48 = vld [vmem:[#allocation12 + $0x120] sm:$0xf0] }
 0x21c   : > { %v984_v60 = vpack.c.bf16 %v958_v57, %v957_v56  ;;  %v13392_v56 = vld [vmem:[#allocation12 + $0x5c] sm:$0xf0]  ;;  %v9866_v57 = vld [vmem:[#allocation12 + $0x48] sm:$0xf]  ;;  %v9831_v49 = vor.u32 %v13397_v47, %v9828_v48 }
 0x21d   : > { %1407 = vmatpush.bf16.msrb.mxu3 %v9855_v54  ;;  %v9803_v58 = vor.u32 %v13392_v56, %v9802_v55  ;;  %v9867_v62 = vor.u32 %v13408_v59, %v9866_v57  ;;  %v920_v54 = vadd.f32 %v15437_v63, %v919_v29 }
 0x21e   : > { %9781 = vmatmul.msk.bf16.gmra.mxu1 %vm809_vm0, %v984_v60  ;;  %v13407_v60 = vld [vmem:[#allocation12 + $0x4c] sm:$0xf] }
 0x21f   : > { %v897_v7 = vpop.f32.mrf.mxu0  ;;  %v9871_v0 = vor.u32 %v13407_v60, %v9868_v61  ;;  %1324 = vmatpush.bf16.msrb.mxu2 %v9803_v58  ;;  %1736 = vmatpush.bf16.msrb.mxu0 %v9867_v62  ;;  %v968_v59 = vmax.f32 %v920_v54, 0.0  ;;  %v927_v62 = vpop.f32.mrf.mxu2  ;;  %v9796_v54 = vld [vmem:[#allocation12 + $0x20] sm:$0xf0] }
 0x220   : > { %v898_v23 = vadd.f32 %v15437_v63, %v897_v7  ;;  %v9860_v7 = vld [vmem:[#allocation12 + $0x28] sm:$0xf0] }
 0x221   : > { %1825 = vmatpush.bf16.msrb.mxu1 %v9871_v0  ;;  %v9863_v10 = vor.u32 %v13405_v6, %v9860_v7  ;;  %1408 = vmatpush.bf16.msrb.mxu3 %v9847_v20  ;;  %v923_v6 = vadd.f32 %v15437_v63, %v922_v41  ;;  %v925_v7 = vadd.f32 %v15437_v63, %v924_v50 }
 0x222   : > { %v959_v36 = vmax.f32 %v898_v23, 0.0  ;;  %v9815_v20 = vor.u32 %v13393_v17, %v9812_v18 }
 0x223   : > { %1325 = vmatpush.bf16.msrb.mxu2 %v9795_v4  ;;  %1737 = vmatpush.bf16.msrb.mxu0 %v9859_v9 }
 0x225   : > { %1826 = vmatpush.bf16.msrb.mxu1 %v9863_v10  ;;  %1409 = vmatpush.bf16.msrb.mxu3 %v9839_v33 }
 0x227   : > { %v899_v26 = vpop.f32.mrf.mxu0  ;;  %v929_v9 = vpop.f32.mrf.mxu2 }
 0x228   : > { %v900_v28 = vadd.f32 %v15437_v63, %v899_v26 }
 0x229   : > { %1410 = vmatpush.bf16.msrb.mxu3 %v9831_v49 }
 0x22a   : > { %v960_v37 = vmax.f32 %v900_v28, 0.0 }
 0x22c   : > { %v985_v40 = vpack.c.bf16 %v960_v37, %v959_v36  ;;  %v913_v36 = vadd.f32 %v15437_v63, %v912_v53  ;;  %v915_v37 = vadd.f32 %v15437_v63, %v914_v13  ;;  %v918_v53 = vadd.f32 %v15437_v63, %v917_v21 }
 0x22d   : > { %1411 = vmatpush.bf16.msrb.mxu3 %v9823_v3  ;;  %v970_v13 = vmax.f32 %v925_v7, 0.0 }
 0x22e   : > { %9782 = vmatmul.msk.bf16.gmra.mxu1 %vm809_vm0, %v985_v40  ;;  %v965_v42 = vmax.f32 %v913_v36, 0.0  ;;  %v966_v43 = vmax.f32 %v915_v37, 0.0  ;;  %v967_v58 = vmax.f32 %v918_v53, 0.0  ;;  %v9804_v36 = vld [vmem:[#allocation12 + $0x60] sm:$0xf0] }
 0x22f   : > { %v902_v52 = vpop.f32.mrf.mxu0  ;;  %v13389_v53 = vld [vmem:[#allocation12 + $0x4] sm:$0xf] }
 0x230   : > { %v903_v8 = vadd.f32 %v15437_v63, %v902_v52  ;;  %v988_v46 = vpack.c.bf16 %v966_v43, %v965_v42  ;;  %v989_v0 = vpack.c.bf16 %v968_v59, %v967_v58 }
 0x231   : > { %1412 = vmatpush.bf16.msrb.mxu3 %v9815_v20  ;;  %v13451_v20 = vld [vmem:[#allocation12 + $0x1dc] sm:$0xf] }
 0x232   : > { %v961_v14 = vmax.f32 %v903_v8, 0.0 }
 0x237   : > { %v904_v11 = vpop.f32.mrf.mxu0 }
 0x238   : > { %v905_v12 = vadd.f32 %v15437_v63, %v904_v11 }
 0x23a   : > { %v962_v15 = vmax.f32 %v905_v12, 0.0  ;;  %v969_v12 = vmax.f32 %v923_v6, 0.0 }
 0x23c   : > { %v986_v16 = vpack.c.bf16 %v962_v15, %v961_v14 }
 0x23e   : > { %9783 = vmatmul.msk.bf16.gmra.mxu1 %vm809_vm0, %v986_v16  ;;  %v990_v16 = vpack.c.bf16 %v970_v13, %v969_v12 }
 0x23f   : > { %v907_v19 = vpop.f32.mrf.mxu0 }
 0x240   : > { %v908_v22 = vadd.f32 %v15437_v63, %v907_v19  ;;  %v932_v19 = vpop.f32.mrf.mxu2 }
 0x241   : > { %v933_v41 = vadd.f32 %v15437_v63, %v932_v19 }
 0x242   : > { %v963_v25 = vmax.f32 %v908_v22, 0.0 }
 0x243   : > { %v973_v47 = vmax.f32 %v933_v41, 0.0 }
 0x247   : > { %v909_v23 = vpop.f32.mrf.mxu0 }
 0x248   : > { %v910_v24 = vadd.f32 %v15437_v63, %v909_v23  ;;  %v928_v23 = vadd.f32 %v15437_v63, %v927_v62  ;;  %v934_v32 = vpop.f32.mrf.mxu2 }
 0x249   : > { %v935_v42 = vadd.f32 %v15437_v63, %v934_v32  ;;  %v13434_v32 = vld [vmem:[#allocation12 + $0x1ac] sm:$0xf0] }
 0x24a   : > { %v964_v26 = vmax.f32 %v910_v24, 0.0  ;;  %v930_v24 = vadd.f32 %v15437_v63, %v929_v9 }
 0x24b   : > { %v1088_v27 = vpop.f32.mrf.mxu1  ;;  %v974_v48 = vmax.f32 %v935_v42, 0.0 }
 0x24c   : > { %v987_v28 = vpack.c.bf16 %v964_v26, %v963_v25  ;;  %v1089_v34 = vadd.f32 %v15470_v30, %v1088_v27  ;;  %v972_v29 = vmax.f32 %v930_v24, 0.0 }
 0x24e   : > { %9784 = vmatmul.msk.bf16.vlgmr.msra.gmra.mxu3 %vm809_vm0, %v987_v28  ;;  %v1168_v39 = vmax.f32 %v1089_v34, 0.0  ;;  %v971_v28 = vmax.f32 %v928_v23, 0.0 }
 0x250   : > { %v991_v34 = vpack.c.bf16 %v972_v29, %v971_v28  ;;  %v9970_v29 = vld [vmem:[#allocation12 + $0x190] sm:$0xf] }
 0x253   : > { %v1090_v35 = vpop.f32.mrf.mxu1 }
 0x254   : > { %v1091_v38 = vadd.f32 %v15470_v30, %v1090_v35  ;;  %v13391_v35 = vld [vmem:[#allocation12 + $0x44] sm:$0xf] }
 0x255   : > { %v9807_v37 = vor.u32 %v13391_v35, %v9804_v36 }
 0x256   : > { %v1169_v40 = vmax.f32 %v1091_v38, 0.0 }
 0x257   : > { %1413 = vmatpush.bf16.msrb.mxu3 %v9807_v37  ;;  %v10042_v37 = vld [vmem:[#allocation12 + $0x1d8] sm:$0xf] }
 0x258   : > { %v15477_v44 = vpack.c.bf16 %v1169_v40, %v1168_v39  ;;  %v937_v39 = vpop.f32.mrf.mxu2 }
 0x259   : > { %v938_v62 = vadd.f32 %v15437_v63, %v937_v39 }
 0x25a   : > { %1326 = vmatmul.bf16.vlgmr.msrb.gmra.mxu2 %v15477_v44  ;;  %1738 = vmatmul.bf16.vlgmr.msrb.gmra.mxu0 %v15477_v44 }
 0x25b   : > { %1827 = vmatmul.bf16.vlgmr.msrb.gmra.mxu1 %v15477_v44  ;;  %v1093_v45 = vpop.f32.mrf.mxu1 }
 0x25c   : > { %v1094_v51 = vadd.f32 %v15470_v30, %v1093_v45 }
 0x25e   : > { %9785 = vmatmul.msk.bf16.gmra.mxu3 %vm809_vm0, %v988_v46  ;;  %v1170_v56 = vmax.f32 %v1094_v51, 0.0  ;;  %v992_v51 = vpack.c.bf16 %v974_v48, %v973_v47  ;;  %v13449_v48 = vld [vmem:[#allocation12 + $0x19c] sm:$0xf] }
 0x263   : > { %v1095_v52 = vpop.f32.mrf.mxu1 }
 0x264   : > { %v1096_v55 = vadd.f32 %v15470_v30, %v1095_v52  ;;  %v939_v52 = vpop.f32.mrf.mxu2 }
 0x266   : > { %v1171_v57 = vmax.f32 %v1096_v55, 0.0  ;;  %v9799_v55 = vor.u32 %v13389_v53, %v9796_v54 }
 0x268   : > { %v15487_v60 = vpack.c.bf16 %v1171_v57, %v1170_v56  ;;  %v9978_v56 = vld [vmem:[#allocation12 + $0x1d0] sm:$0xf]  ;;  %1414 = vmatpush.bf16.msrb.mxu3 %v9799_v55 }
 0x269   : > { %v13436_v57 = vld [vmem:[#allocation12 + $0x1ec] sm:$0xf0] }
 0x26a   : > { %1331 = vmatmul.bf16.gmra.mxu2 %v15487_v60  ;;  %1743 = vmatmul.bf16.gmra.mxu0 %v15487_v60  ;;  %v9979_v58 = vor.u32 %v13436_v57, %v9978_v56 }
 0x26b   : > { %1832 = vmatmul.bf16.gmra.mxu1 %v15487_v60  ;;  %v1098_v61 = vpop.f32.mrf.mxu1 }
 0x26c   : > { %v1099_v4 = vadd.f32 %v15470_v30, %v1098_v61  ;;  %2142 = vmatpush.bf16.msra.mxu2 %v9979_v58 }
 0x26e   : > { %9786 = vmatmul.msk.bf16.gmra.mxu3 %vm809_vm0, %v989_v0  ;;  %v1172_v10 = vmax.f32 %v1099_v4, 0.0  ;;  %v940_v0 = vadd.f32 %v15437_v63, %v939_v52  ;;  %v942_v4 = vpop.f32.mrf.mxu2 }
 0x26f   : > { %v943_v17 = vadd.f32 %v15437_v63, %v942_v4  ;;  %v9962_v4 = vld [vmem:[#allocation12 + $0x150] sm:$0xf] }
 0x270   : > { %v976_v6 = vmax.f32 %v940_v0, 0.0 }
 0x273   : > { %v1100_v5 = vpop.f32.mrf.mxu1 }
 0x274   : > { %v1101_v8 = vadd.f32 %v15470_v30, %v1100_v5  ;;  %v975_v5 = vmax.f32 %v938_v62, 0.0  ;;  %v1644_v62 = vld [vmem:[#allocation14 + $0x2] sm:$0x3] }
 0x276   : > { %v1173_v11 = vmax.f32 %v1101_v8, 0.0  ;;  %v993_v9 = vpack.c.bf16 %v976_v6, %v975_v5  ;;  %v944_v13 = vpop.f32.mrf.mxu2  ;;  %v13432_v5 = vld [vmem:[#allocation12 + $0x16c] sm:$0xf0]  ;;  %v15564_v6 = vperm.slane %v1644_v62, 1 }
 0x277   : > { %v945_v18 = vadd.f32 %v15437_v63, %v944_v13 }
 0x278   : > { %v15497_v14 = vpack.c.bf16 %v1173_v11, %v1172_v10  ;;  %v13435_v10 = vld [vmem:[#allocation12 + $0x1d4] sm:$0xf] }
 0x279   : > { %v9980_v11 = vld [vmem:[#allocation12 + $0x1f0] sm:$0xf0] }
 0x27a   : > { %1336 = vmatmul.bf16.gmra.mxu2 %v15497_v14  ;;  %1748 = vmatmul.bf16.gmra.mxu0 %v15497_v14  ;;  %v9983_v12 = vor.u32 %v13435_v10, %v9980_v11  ;;  %v10034_v11 = vld [vmem:[#allocation12 + $0x198] sm:$0xf] }
 0x27b   : > { %1837 = vmatmul.bf16.gmra.mxu1 %v15497_v14  ;;  %v1103_v15 = vpop.f32.mrf.mxu1 }
 0x27c   : > { %v1104_v21 = vadd.f32 %v15470_v30, %v1103_v15  ;;  %2231 = vmatpush.bf16.msra.mxu3 %v9983_v12  ;;  %v13450_v12 = vld [vmem:[#allocation12 + $0x1b4] sm:$0xf0] }
 0x27e   : > { %9787 = vmatmul.msk.bf16.gmra.mxu3 %vm809_vm0, %v990_v16  ;;  %v1174_v26 = vmax.f32 %v1104_v21, 0.0  ;;  %v10044_v21 = vld [vmem:[#allocation12 + $0x1f8] sm:$0xf0] }
 0x283   : > { %v1105_v22 = vpop.f32.mrf.mxu1 }
 0x284   : > { %v1106_v25 = vadd.f32 %v15470_v30, %v1105_v22  ;;  %v10047_v22 = vor.u32 %v13451_v20, %v10044_v21 }
 0x286   : > { %v1175_v27 = vmax.f32 %v1106_v25, 0.0  ;;  %2643 = vmatpush.bf16.msra.mxu1 %v10047_v22  ;;  %v977_v25 = vmax.f32 %v943_v17, 0.0 }
 0x288   : > { %v15507_v31 = vpack.c.bf16 %v1175_v27, %v1174_v26  ;;  %v978_v26 = vmax.f32 %v945_v18, 0.0 }
 0x28a   : > { %1341 = vmatmul.bf16.gmra.mxu2 %v15507_v31  ;;  %1753 = vmatmul.bf16.gmra.mxu0 %v15507_v31  ;;  %v994_v63 = vpack.c.bf16 %v978_v26, %v977_v25 }
 0x28b   : > { %1842 = vmatmul.bf16.gmra.mxu1 %v15507_v31  ;;  %v1108_v33 = vpop.f32.mrf.mxu1 }
 0x28c   : > { %v1109_v38 = vadd.f32 %v15470_v30, %v1108_v33  ;;  %v9971_v33 = vor.u32 %v13434_v32, %v9970_v29 }
 0x28e   : > { %9788 = vmatmul.msk.bf16.gmra.mxu3 %vm809_vm0, %v991_v34  ;;  %v1176_v45 = vmax.f32 %v1109_v38, 0.0  ;;  %2143 = vmatpush.bf16.msra.mxu2 %v9971_v33  ;;  %v13452_v38 = vld [vmem:[#allocation12 + $0x1f4] sm:$0xf0] }
 0x28f   : > { %v15545_v39 = vor.u32 %v13452_v38, %v10042_v37 }
 0x291   : > { %2554 = vmatpush.bf16.msra.mxu0 %v15545_v39 }
 0x293   : > { %v1110_v40 = vpop.f32.mrf.mxu1 }
 0x294   : > { %v1111_v43 = vadd.f32 %v15470_v30, %v1110_v40 }
 0x296   : > { %v1177_v46 = vmax.f32 %v1111_v43, 0.0 }
 0x298   : > { %v15517_v49 = vpack.c.bf16 %v1177_v46, %v1176_v45  ;;  %v13433_v45 = vld [vmem:[#allocation12 + $0x194] sm:$0xf] }
 0x299   : > { %v9972_v46 = vld [vmem:[#allocation12 + $0x1b0] sm:$0xf0] }
 0x29a   : > { %1346 = vmatmul.bf16.gmra.mxu2 %v15517_v49  ;;  %1758 = vmatmul.bf16.gmra.mxu0 %v15517_v49  ;;  %v9975_v47 = vor.u32 %v13433_v45, %v9972_v46 }
 0x29b   : > { %1847 = vmatmul.bf16.gmra.mxu1 %v15517_v49  ;;  %v1113_v50 = vpop.f32.mrf.mxu1 }
 0x29c   : > { %v1114_v59 = vadd.f32 %v15470_v30, %v1113_v50  ;;  %2232 = vmatpush.bf16.msra.mxu3 %v9975_v47  ;;  %v10036_v50 = vld [vmem:[#allocation12 + $0x1b8] sm:$0xf0] }
 0x29e   : > { %9789 = vmatmul.msk.bf16.gmra.mxu3 %vm809_vm0, %v992_v51  ;;  %v1178_v2 = vmax.f32 %v1114_v59, 0.0  ;;  %v10039_v51 = vor.u32 %v13449_v48, %v10036_v50 }
 0x2a0   : > { %2644 = vmatpush.bf16.msra.mxu1 %v10039_v51 }
 0x2a3   : > { %v1115_v61 = vpop.f32.mrf.mxu1 }
 0x2a4   : > { %v1116_v1 = vadd.f32 %v15470_v30, %v1115_v61 }
 0x2a6   : > { %v1179_v3 = vmax.f32 %v1116_v1, 0.0 }
 0x2a8   : > { %v15527_v7 = vpack.c.bf16 %v1179_v3, %v1178_v2  ;;  %v15562_v3 = vperm.slane %v1644_v62, 0 }
 0x2aa   : > { %1351 = vmatmul.bf16.gmra.mxu2 %v15527_v7  ;;  %1763 = vmatmul.bf16.gmra.mxu0 %v15527_v7 }
 0x2ab   : > { %1852 = vmatmul.bf16.gmra.mxu1 %v15527_v7  ;;  %v1118_v8 = vpop.f32.mrf.mxu1 }
 0x2ac   : > { %v1119_v15 = vadd.f32 %v15470_v30, %v1118_v8  ;;  %v9963_v8 = vor.u32 %v13432_v5, %v9962_v4  ;;  %v13447_v4 = vld [vmem:[#allocation12 + $0x15c] sm:$0xf] }
 0x2ad   : > { %v10028_v5 = vld [vmem:[#allocation12 + $0x178] sm:$0xf0] }
 0x2ae   : > { %9790 = vmatmul.msk.bf16.gmra.mxu3 %vm809_vm0, %v993_v9  ;;  %v1180_v23 = vmax.f32 %v1119_v15, 0.0  ;;  %v15566_v9 = vld [vmem:[#allocation14] sm:$0x3]  ;;  %2144 = vmatpush.bf16.msra.mxu2 %v9963_v8  ;;  %v15569_v15 = vor.u32 %v13450_v12, %v10034_v11  ;;  %v10031_v11 = vor.u32 %v13447_v4, %v10028_v5 }
 0x2af   : > { %v15573_v18 = vperm.slane %v15566_v9, 0 }
 0x2b0   : > { %2555 = vmatpush.bf16.msra.mxu0 %v15569_v15  ;;  %2645 = vmatpush.bf16.msra.mxu1 %v10031_v11 }
 0x2b3   : > { %v1120_v16 = vpop.f32.mrf.mxu1 }
 0x2b4   : > { %v1121_v19 = vadd.f32 %v15470_v30, %v1120_v16 }
 0x2b6   : > { %v1181_v24 = vmax.f32 %v1121_v19, 0.0 }
 0x2b8   : > { %v15537_v27 = vpack.c.bf16 %v1181_v24, %v1180_v23 }
 0x2ba   : > { %1356 = vmatmul.bf16.gmra.mxu2 %v15537_v27  ;;  %1768 = vmatmul.bf16.gmra.mxu0 %v15537_v27 }
 0x2bb   : > { %1857 = vmatmul.bf16.gmra.mxu1 %v15537_v27  ;;  %v1123_v28 = vpop.f32.mrf.mxu1 }
 0x2bc   : > { %v1124_v34 = vadd.f32 %v15470_v30, %v1123_v28 }
 0x2be   : > { %9791 = vmatmul.msk.bf16.gmra.mxu3 %vm809_vm0, %v994_v63  ;;  %v1182_v40 = vmax.f32 %v1124_v34, 0.0 }
 0x2c3   : > { %v1125_v35 = vpop.f32.mrf.mxu1 }
 0x2c4   : > { %v1126_v36 = vadd.f32 %v15470_v30, %v1125_v35 }
 0x2c6   : > { %v1183_v41 = vmax.f32 %v1126_v36, 0.0 }
 0x2c8   : > { %v15548_v42 = vpack.c.bf16 %v1183_v41, %v1182_v40 }
 0x2ca   : > { %1361 = vmatmul.bf16.gmra.mxu2 %v15548_v42  ;;  %1773 = vmatmul.bf16.gmra.mxu0 %v15548_v42 }
 0x2cb   : > { %1862 = vmatmul.bf16.gmra.mxu1 %v15548_v42 }
 0x2ce   : > { %1415 = vmatmul.bf16.vlgmr.msrb.gmra.mxu3 %v15477_v44 }
 0x2d1   : > { %v1128_v43 = vpop.f32.mrf.mxu3 }
 0x2d2   : > { %v1129_v53 = vadd.f32 %v15470_v30, %v1128_v43 }
 0x2d4   : > { %v1184_v57 = vmax.f32 %v1129_v53, 0.0 }
 0x2d7   : > { %v1739_v52 = vpop.f32.mrf.mxu0 }
 0x2d8   : > { %v1828_v54 = vpop.f32.mrf.mxu1  ;;  %v1740_v13 = vadd.f32 %v1739_v52, %v15562_v3 }
 0x2d9   : > { %v1130_v55 = vpop.f32.mrf.mxu3  ;;  %v1829_v16 = vadd.f32 %v1828_v54, %v15564_v6 }
 0x2da   : > { %v1131_v56 = vadd.f32 %v15470_v30, %v1130_v55  ;;  %v1908_v24 = vmax.f32 %v1740_v13, 0.0  ;;  %v13431_v55 = vld [vmem:[#allocation12 + $0x154] sm:$0xf] }
 0x2db   : > { %v1909_v28 = vmax.f32 %v1829_v16, 0.0 }
 0x2dc   : > { %v1185_v58 = vmax.f32 %v1131_v56, 0.0  ;;  %v9964_v56 = vld [vmem:[#allocation12 + $0x170] sm:$0xf0] }
 0x2dd   : > { %v1327_v59 = vpop.f32.mrf.mxu2 }
 0x2de   : > { %v15556_v61 = vpack.c.bf16 %v1185_v58, %v1184_v57  ;;  %1420 = vmatmul.bf16.gmra.mxu3 %v15487_v60  ;;  %v1328_v29 = vadd.f32 %v1327_v59, %v15573_v18  ;;  %v9967_v59 = vor.u32 %v13431_v55, %v9964_v56  ;;  %v10026_v56 = vld [vmem:[#allocation12 + $0x158] sm:$0xf] }
 0x2df   : > { %v1741_v0 = vpop.f32.mrf.mxu0 }
 0x2e0   : > { %v1830_v1 = vpop.f32.mrf.mxu1  ;;  %1366 = vmatmul.bf16.gmra.mxu2 %v15556_v61  ;;  %1778 = vmatmul.bf16.gmra.mxu0 %v15556_v61  ;;  %v1742_v37 = vadd.f32 %v1741_v0, %v15562_v3  ;;  %v1496_v45 = vmax.f32 %v1328_v29, 0.0 }
 0x2e1   : > { %1867 = vmatmul.bf16.gmra.mxu1 %v15556_v61  ;;  %v1133_v2 = vpop.f32.mrf.mxu3  ;;  %v1831_v41 = vadd.f32 %v1830_v1, %v15564_v6  ;;  %2233 = vmatpush.bf16.msra.mxu3 %v9967_v59 }
 0x2e2   : > { %v1134_v19 = vadd.f32 %v15470_v30, %v1133_v2  ;;  %v1910_v52 = vmax.f32 %v1742_v37, 0.0 }
 0x2e3   : > { %v1911_v57 = vmax.f32 %v1831_v41, 0.0 }
 0x2e4   : > { %v1186_v32 = vmax.f32 %v1134_v19, 0.0 }
 0x2e5   : > { %v1329_v10 = vpop.f32.mrf.mxu2 }
 0x2e6   : > { %v1330_v62 = vadd.f32 %v1329_v10, %v15573_v18 }
 0x2e7   : > { %v1744_v17 = vpop.f32.mrf.mxu0 }
 0x2e8   : > { %v1745_v20 = vadd.f32 %v1744_v17, %v15562_v3  ;;  %v1833_v21 = vpop.f32.mrf.mxu1  ;;  %v1498_v13 = vmax.f32 %v1330_v62, 0.0 }
 0x2e9   : > { %v1834_v22 = vadd.f32 %v1833_v21, %v15564_v6  ;;  %v1135_v23 = vpop.f32.mrf.mxu3 }
 0x2ea   : > { %v1912_v25 = vmax.f32 %v1745_v20, 0.0  ;;  %v1136_v26 = vadd.f32 %v15470_v30, %v1135_v23 }
 0x2eb   : > { %v1913_v63 = vmax.f32 %v1834_v22, 0.0 }
 0x2ec   : > { %v1972_v33 = vmax.f32 %v1908_v24, %v1912_v25  ;;  %v1187_v34 = vmax.f32 %v1136_v26, 0.0 }
 0x2ed   : > { %v2003_v35 = vmax.f32 %v1909_v28, %v1913_v63  ;;  %v1332_v36 = vpop.f32.mrf.mxu2 }
 0x2ee   : > { %v15582_v38 = vpack.c.bf16 %v1187_v34, %v1186_v32  ;;  %v1333_v40 = vadd.f32 %v1332_v36, %v15573_v18  ;;  %1425 = vmatmul.bf16.gmra.mxu3 %v15497_v14 }
 0x2ef   : > { %v1746_v43 = vpop.f32.mrf.mxu0 }
 0x2f0   : > { %v1500_v46 = vmax.f32 %v1333_v40, 0.0  ;;  %v1747_v47 = vadd.f32 %v1746_v43, %v15562_v3  ;;  %v1835_v48 = vpop.f32.mrf.mxu1  ;;  %1371 = vmatmul.bf16.gmra.mxu2 %v15582_v38  ;;  %1783 = vmatmul.bf16.gmra.mxu0 %v15582_v38 }
 0x2f1   : > { %v1836_v50 = vadd.f32 %v1835_v48, %v15564_v6  ;;  %1872 = vmatmul.bf16.gmra.mxu1 %v15582_v38  ;;  %v1138_v51 = vpop.f32.mrf.mxu3  ;;  %v13430_v48 = vld [vmem:[#allocation12 + $0x12c] sm:$0xf0] }
 0x2f2   : > { %v1560_v53 = vmax.f32 %v1496_v45, %v1500_v46  ;;  %v1914_v54 = vmax.f32 %v1747_v47, 0.0  ;;  %v1139_v16 = vadd.f32 %v15470_v30, %v1138_v51  ;;  %v9954_v47 = vld [vmem:[#allocation12 + $0x110] sm:$0xf] }
 0x2f3   : > { %v1915_v58 = vmax.f32 %v1836_v50, 0.0  ;;  %v9955_v51 = vor.u32 %v13430_v48, %v9954_v47  ;;  %v10020_v47 = vld [vmem:[#allocation12 + $0x138] sm:$0xf0] }
 0x2f4   : > { %v1973_v0 = vmax.f32 %v1910_v52, %v1914_v54  ;;  %v1188_v26 = vmax.f32 %v1139_v16, 0.0 }
 0x2f5   : > { %v2004_v1 = vmax.f32 %v1911_v57, %v1915_v58  ;;  %v1334_v2 = vpop.f32.mrf.mxu2  ;;  %2145 = vmatpush.bf16.msra.mxu2 %v9955_v51  ;;  %v13448_v57 = vld [vmem:[#allocation12 + $0x174] sm:$0xf0] }
 0x2f6   : > { %v1335_v8 = vadd.f32 %v1334_v2, %v15573_v18  ;;  %v15608_v59 = vor.u32 %v13448_v57, %v10026_v56 }
 0x2f7   : > { %v1749_v12 = vpop.f32.mrf.mxu0 }
 0x2f8   : > { %v1502_v17 = vmax.f32 %v1335_v8, 0.0  ;;  %v1750_v19 = vadd.f32 %v1749_v12, %v15562_v3  ;;  %v1838_v20 = vpop.f32.mrf.mxu1  ;;  %2556 = vmatpush.bf16.msra.mxu0 %v15608_v59 }
 0x2f9   : > { %v1839_v10 = vadd.f32 %v1838_v20, %v15564_v6  ;;  %v1140_v21 = vpop.f32.mrf.mxu3 }
 0x2fa   : > { %v1561_v22 = vmax.f32 %v1498_v13, %v1502_v17  ;;  %v1916_v23 = vmax.f32 %v1750_v19, 0.0  ;;  %v1141_v24 = vadd.f32 %v15470_v30, %v1140_v21 }
 0x2fb   : > { %v1917_v25 = vmax.f32 %v1839_v10, 0.0 }
 0x2fc   : > { %v1974_v28 = vmax.f32 %v1972_v33, %v1916_v23  ;;  %v1189_v63 = vmax.f32 %v1141_v24, 0.0 }
 0x2fd   : > { %v2005_v29 = vmax.f32 %v2003_v35, %v1917_v25  ;;  %v1337_v32 = vpop.f32.mrf.mxu2 }
 0x2fe   : > { %v15598_v34 = vpack.c.bf16 %v1189_v63, %v1188_v26  ;;  %v1338_v36 = vadd.f32 %v1337_v32, %v15573_v18  ;;  %1430 = vmatmul.bf16.gmra.mxu3 %v15507_v31 }
 0x2ff   : > { %v1751_v37 = vpop.f32.mrf.mxu0 }
 0x300   : > { %v1504_v40 = vmax.f32 %v1338_v36, 0.0  ;;  %v1752_v41 = vadd.f32 %v1751_v37, %v15562_v3  ;;  %v1840_v43 = vpop.f32.mrf.mxu1  ;;  %1376 = vmatmul.bf16.gmra.mxu2 %v15598_v34  ;;  %1788 = vmatmul.bf16.gmra.mxu0 %v15598_v34  ;;  %v13429_v36 = vld [vmem:[#allocation12 + $0x114] sm:$0xf] }
 0x301   : > { %v1841_v33 = vadd.f32 %v1840_v43, %v15564_v6  ;;  %1877 = vmatmul.bf16.gmra.mxu1 %v15598_v34  ;;  %v1143_v35 = vpop.f32.mrf.mxu3  ;;  %v9956_v37 = vld [vmem:[#allocation12 + $0x130] sm:$0xf0] }
 0x302   : > { %v1562_v45 = vmax.f32 %v1560_v53, %v1504_v40  ;;  %v1918_v46 = vmax.f32 %v1752_v41, 0.0  ;;  %v1144_v2 = vadd.f32 %v15470_v30, %v1143_v35  ;;  %v9959_v41 = vor.u32 %v13429_v36, %v9956_v37  ;;  %v10018_v37 = vld [vmem:[#allocation12 + $0x118] sm:$0xf] }
 0x303   : > { %v1919_v50 = vmax.f32 %v1841_v33, 0.0 }
 0x304   : > { %v1975_v52 = vmax.f32 %v1973_v0, %v1918_v46  ;;  %v1190_v16 = vmax.f32 %v1144_v2, 0.0  ;;  %2234 = vmatpush.bf16.msra.mxu3 %v9959_v41  ;;  %v13445_v46 = vld [vmem:[#allocation12 + $0x11c] sm:$0xf] }
 0x305   : > { %v2006_v54 = vmax.f32 %v2004_v1, %v1919_v50  ;;  %v1339_v55 = vpop.f32.mrf.mxu2  ;;  %v10023_v50 = vor.u32 %v13445_v46, %v10020_v47 }
 0x306   : > { %v1340_v58 = vadd.f32 %v1339_v55, %v15573_v18 }
 0x307   : > { %v1754_v62 = vpop.f32.mrf.mxu0  ;;  %2646 = vmatpush.bf16.msra.mxu1 %v10023_v50 }
 0x308   : > { %v1506_v4 = vmax.f32 %v1340_v58, 0.0  ;;  %v1755_v53 = vadd.f32 %v1754_v62, %v15562_v3  ;;  %v1843_v5 = vpop.f32.mrf.mxu1 }
 0x309   : > { %v1844_v0 = vadd.f32 %v1843_v5, %v15564_v6  ;;  %v1145_v1 = vpop.f32.mrf.mxu3 }
 0x30a   : > { %v1563_v8 = vmax.f32 %v1561_v22, %v1506_v4  ;;  %v1920_v11 = vmax.f32 %v1755_v53, 0.0  ;;  %v1146_v12 = vadd.f32 %v15470_v30, %v1145_v1 }
 0x30b   : > { %v1921_v13 = vmax.f32 %v1844_v0, 0.0 }
 0x30c   : > { %v1976_v17 = vmax.f32 %v1974_v28, %v1920_v11  ;;  %v1191_v19 = vmax.f32 %v1146_v12, 0.0 }
 0x30d   : > { %v2007_v20 = vmax.f32 %v2005_v29, %v1921_v13  ;;  %v1342_v10 = vpop.f32.mrf.mxu2 }
 0x30e   : > { %v15615_v21 = vpack.c.bf16 %v1191_v19, %v1190_v16  ;;  %v1343_v23 = vadd.f32 %v1342_v10, %v15573_v18  ;;  %1435 = vmatmul.bf16.gmra.mxu3 %v15517_v49 }
 0x30f   : > { %v1756_v24 = vpop.f32.mrf.mxu0 }
 0x310   : > { %v1508_v25 = vmax.f32 %v1343_v23, 0.0  ;;  %v1757_v26 = vadd.f32 %v1756_v24, %v15562_v3  ;;  %v1845_v22 = vpop.f32.mrf.mxu1  ;;  %1381 = vmatmul.bf16.gmra.mxu2 %v15615_v21  ;;  %1793 = vmatmul.bf16.gmra.mxu0 %v15615_v21 }
 0x311   : > { %v1846_v28 = vadd.f32 %v1845_v22, %v15564_v6  ;;  %1882 = vmatmul.bf16.gmra.mxu1 %v15615_v21  ;;  %v1148_v63 = vpop.f32.mrf.mxu3 }
 0x312   : > { %v1564_v29 = vmax.f32 %v1562_v45, %v1508_v25  ;;  %v1922_v32 = vmax.f32 %v1757_v26, 0.0  ;;  %v1149_v55 = vadd.f32 %v15470_v30, %v1148_v63  ;;  %v9946_v25 = vld [vmem:[#allocation12 + $0xd0] sm:$0xf] }
 0x313   : > { %v1923_v40 = vmax.f32 %v1846_v28, 0.0  ;;  %v13428_v26 = vld [vmem:[#allocation12 + $0xec] sm:$0xf0] }
 0x314   : > { %v1977_v43 = vmax.f32 %v1975_v52, %v1922_v32  ;;  %v1192_v53 = vmax.f32 %v1149_v55, 0.0  ;;  %v9947_v28 = vor.u32 %v13428_v26, %v9946_v25  ;;  %v13427_v26 = vld [vmem:[#allocation12 + $0xd4] sm:$0xf] }
 0x315   : > { %v2008_v33 = vmax.f32 %v2006_v54, %v1923_v40  ;;  %v1344_v35 = vpop.f32.mrf.mxu2  ;;  %v13446_v40 = vld [vmem:[#allocation12 + $0x134] sm:$0xf0] }
 0x316   : > { %v1345_v48 = vadd.f32 %v1344_v35, %v15573_v18  ;;  %2146 = vmatpush.bf16.msra.mxu2 %v9947_v28  ;;  %v15639_v35 = vor.u32 %v13446_v40, %v10018_v37  ;;  %v9938_v37 = vld [vmem:[#allocation12 + $0x90] sm:$0xf] }
 0x317   : > { %v1759_v51 = vpop.f32.mrf.mxu0  ;;  %v13426_v40 = vld [vmem:[#allocation12 + $0xac] sm:$0xf0] }
 0x318   : > { %v1510_v56 = vmax.f32 %v1345_v48, 0.0  ;;  %v1760_v45 = vadd.f32 %v1759_v51, %v15562_v3  ;;  %v1848_v57 = vpop.f32.mrf.mxu1  ;;  %2557 = vmatpush.bf16.msra.mxu0 %v15639_v35 }
 0x319   : > { %v1849_v58 = vadd.f32 %v1848_v57, %v15564_v6  ;;  %v1150_v62 = vpop.f32.mrf.mxu3 }
 0x31a   : > { %v1565_v52 = vmax.f32 %v1563_v8, %v1510_v56  ;;  %v1924_v54 = vmax.f32 %v1760_v45, 0.0  ;;  %v1151_v2 = vadd.f32 %v15470_v30, %v1150_v62 }
 0x31b   : > { %v1925_v4 = vmax.f32 %v1849_v58, 0.0 }
 0x31c   : > { %v1978_v5 = vmax.f32 %v1976_v17, %v1924_v54  ;;  %v1193_v0 = vmax.f32 %v1151_v2, 0.0 }
 0x31d   : > { %v2009_v1 = vmax.f32 %v2007_v20, %v1925_v4  ;;  %v1347_v11 = vpop.f32.mrf.mxu2 }
 0x31e   : > { %v15629_v12 = vpack.c.bf16 %v1193_v0, %v1192_v53  ;;  %v1348_v13 = vadd.f32 %v1347_v11, %v15573_v18  ;;  %1440 = vmatmul.bf16.gmra.mxu3 %v15527_v7  ;;  %v13444_v11 = vld [vmem:[#allocation12 + $0xf4] sm:$0xf0] }
 0x31f   : > { %v1761_v16 = vpop.f32.mrf.mxu0 }
 0x320   : > { %v1512_v19 = vmax.f32 %v1348_v13, 0.0  ;;  %v1762_v10 = vadd.f32 %v1761_v16, %v15562_v3  ;;  %v1850_v8 = vpop.f32.mrf.mxu1  ;;  %1386 = vmatmul.bf16.gmra.mxu2 %v15629_v12  ;;  %1798 = vmatmul.bf16.gmra.mxu0 %v15629_v12  ;;  %v13443_v13 = vld [vmem:[#allocation12 + $0xdc] sm:$0xf] }
 0x321   : > { %v1851_v17 = vadd.f32 %v1850_v8, %v15564_v6  ;;  %1887 = vmatmul.bf16.gmra.mxu1 %v15629_v12  ;;  %v1153_v20 = vpop.f32.mrf.mxu3 }
 0x322   : > { %v1566_v23 = vmax.f32 %v1564_v29, %v1512_v19  ;;  %v1926_v24 = vmax.f32 %v1762_v10, 0.0  ;;  %v1154_v47 = vadd.f32 %v15470_v30, %v1153_v20 }
 0x323   : > { %v1927_v22 = vmax.f32 %v1851_v17, 0.0 }
 0x324   : > { %v1979_v63 = vmax.f32 %v1977_v43, %v1926_v24  ;;  %v1194_v57 = vmax.f32 %v1154_v47, 0.0  ;;  %v10002_v47 = vld [vmem:[#allocation12 + $0x98] sm:$0xf] }
 0x325   : > { %v2010_v32 = vmax.f32 %v2008_v33, %v1927_v22  ;;  %v1349_v36 = vpop.f32.mrf.mxu2  ;;  %v9948_v22 = vld [vmem:[#allocation12 + $0xf0] sm:$0xf0] }
 0x326   : > { %v1350_v41 = vadd.f32 %v1349_v36, %v15573_v18  ;;  %v9951_v36 = vor.u32 %v13427_v26, %v9948_v22  ;;  %v9922_v22 = vld [vmem:[#allocation12 + $0x10] sm:$0xf] }
 0x327   : > { %v1764_v46 = vpop.f32.mrf.mxu0 }
 0x328   : > { %v1514_v48 = vmax.f32 %v1350_v41, 0.0  ;;  %v1765_v29 = vadd.f32 %v1764_v46, %v15562_v3  ;;  %v1853_v50 = vpop.f32.mrf.mxu1  ;;  %v9939_v46 = vor.u32 %v13426_v40, %v9938_v37  ;;  %2235 = vmatpush.bf16.msra.mxu3 %v9951_v36 }
 0x329   : > { %v1854_v43 = vadd.f32 %v1853_v50, %v15564_v6  ;;  %v1155_v33 = vpop.f32.mrf.mxu3 }
 0x32a   : > { %v15645_v51 = vmax.f32 %v1565_v52, %v1514_v48  ;;  %v1928_v55 = vmax.f32 %v1765_v29, 0.0  ;;  %v1156_v56 = vadd.f32 %v15470_v30, %v1155_v33  ;;  %v10010_v52 = vld [vmem:[#allocation12 + $0xd8] sm:$0xf]  ;;  %v10004_v33 = vld [vmem:[#allocation12 + $0xb8] sm:$0xf0]  ;;  %2147 = vmatpush.bf16.msra.mxu2 %v9939_v46 }
 0x32b   : > { %v1929_v45 = vmax.f32 %v1854_v43, 0.0  ;;  %v13442_v48 = vld [vmem:[#allocation12 + $0xb4] sm:$0xf0]  ;;  %v13441_v43 = vld [vmem:[#allocation12 + $0x9c] sm:$0xf] }
 0x32c   : > { %v15648_v58 = vmax.f32 %v1978_v5, %v1928_v55  ;;  %v1195_v62 = vmax.f32 %v1156_v56, 0.0  ;;  %v15659_v5 = vor.u32 %v13444_v11, %v10010_v52  ;;  %v10007_v56 = vor.u32 %v13441_v43, %v10004_v33  ;;  %v13440_v11 = vld [vmem:[#allocation12 + $0x74] sm:$0xf0]  ;;  %v9988_v33 = vld [vmem:[#allocation12 + $0x38] sm:$0xf0] }
 0x32d   : > { %v15650_v54 = vmax.f32 %v2009_v1, %v1929_v45  ;;  %v1352_v2 = vpop.f32.mrf.mxu2  ;;  %v10012_v1 = vld [vmem:[#allocation12 + $0xf8] sm:$0xf0] }
 0x32e   : > { %v15652_v4 = vpack.c.bf16 %v1195_v62, %v1194_v57  ;;  %v1353_v53 = vadd.f32 %v1352_v2, %v15573_v18  ;;  %1445 = vmatmul.bf16.gmra.mxu3 %v15537_v27  ;;  %v10015_v20 = vor.u32 %v13443_v13, %v10012_v1  ;;  %2558 = vmatpush.bf16.msra.mxu0 %v15659_v5  ;;  %v13424_v57 = vld [vmem:[#allocation12 + $0x6c] sm:$0xf0]  ;;  %v9994_v62 = vld [vmem:[#allocation12 + $0x58] sm:$0xf]  ;;  %v13439_v13 = vld [vmem:[#allocation12 + $0x5c] sm:$0xf] }
 0x32f   : > { %v1766_v0 = vpop.f32.mrf.mxu0  ;;  %v9996_v1 = vld [vmem:[#allocation12 + $0x78] sm:$0xf0] }
 0x330   : > { %v1516_v16 = vmax.f32 %v1353_v53, 0.0  ;;  %v1767_v19 = vadd.f32 %v1766_v0, %v15562_v3  ;;  %v1855_v10 = vpop.f32.mrf.mxu1  ;;  %1391 = vmatmul.bf16.gmra.mxu2 %v15652_v4  ;;  %1803 = vmatmul.bf16.gmra.mxu0 %v15652_v4 }
 0x331   : > { %v1856_v8 = vadd.f32 %v1855_v10, %v15564_v6  ;;  %1892 = vmatmul.bf16.gmra.mxu1 %v15652_v4  ;;  %v1158_v17 = vpop.f32.mrf.mxu3  ;;  %v15677_v10 = vor.u32 %v13440_v11, %v9994_v62 }
 0x332   : > { %v15663_v24 = vmax.f32 %v1566_v23, %v1516_v16  ;;  %v1930_v25 = vmax.f32 %v1767_v19, 0.0  ;;  %2647 = vmatpush.bf16.msra.mxu1 %v10015_v20  ;;  %v15670_v23 = vor.u32 %v13442_v48, %v10002_v47  ;;  %v1159_v2 = vadd.f32 %v15470_v30, %v1158_v17  ;;  %v9986_v47 = vld [vmem:[#allocation12 + $0x18] sm:$0xf] }
 0x333   : > { %v1931_v28 = vmax.f32 %v1856_v8, 0.0  ;;  %v9999_v17 = vor.u32 %v13439_v13, %v9996_v1  ;;  %v13438_v48 = vld [vmem:[#allocation12 + $0x34] sm:$0xf0] }
 0x334   : > { %v15666_v41 = vmax.f32 %v1979_v63, %v1930_v25  ;;  %2559 = vmatpush.bf16.msra.mxu0 %v15670_v23  ;;  %v9930_v63 = vld [vmem:[#allocation12 + $0x50] sm:$0xf]  ;;  %v1196_v36 = vmax.f32 %v1159_v2, 0.0  ;;  %v15684_v43 = vor.u32 %v13438_v48, %v9986_v47 }
 0x335   : > { %v15668_v29 = vmax.f32 %v2010_v32, %v1931_v28  ;;  %v1354_v50 = vpop.f32.mrf.mxu2  ;;  %v9931_v52 = vor.u32 %v13424_v57, %v9930_v63  ;;  %v13422_v28 = vld [vmem:[#allocation12 + $0x2c] sm:$0xf0] }
 0x336   : > { %v1355_v55 = vadd.f32 %v1354_v50, %v15573_v18  ;;  %2648 = vmatpush.bf16.msra.mxu1 %v10007_v56  ;;  %v9923_v46 = vor.u32 %v13422_v28, %v9922_v22 }
 0x337   : > { %v1769_v45 = vpop.f32.mrf.mxu0  ;;  %2148 = vmatpush.bf16.msra.mxu2 %v9931_v52 }
 0x338   : > { %v1518_v32 = vmax.f32 %v1355_v55, 0.0  ;;  %v1770_v53 = vadd.f32 %v1769_v45, %v15562_v3  ;;  %v1858_v0 = vpop.f32.mrf.mxu1  ;;  %2560 = vmatpush.bf16.msra.mxu0 %v15677_v10 }
 0x339   : > { %v1859_v16 = vadd.f32 %v1858_v0, %v15564_v6  ;;  %v1160_v19 = vpop.f32.mrf.mxu3 }
 0x33a   : > { %v1569_v8 = vmax.f32 %v15645_v51, %v1518_v32  ;;  %v1932_v20 = vmax.f32 %v1770_v53, 0.0  ;;  %v1161_v25 = vadd.f32 %v15470_v30, %v1160_v19  ;;  %2649 = vmatpush.bf16.msra.mxu1 %v9999_v17  ;;  %v13437_v30 = vld [vmem:[#allocation12 + $0x1c] sm:$0xf] }
 0x33b   : > { %v1933_v26 = vmax.f32 %v1859_v16, 0.0  ;;  %2149 = vmatpush.bf16.msra.mxu2 %v9923_v46  ;;  %v14539_v19 = vld [vmem:[#allocation11] ss:$0 sm:$0xff] }
 0x33c   : > { %v1982_v37 = vmax.f32 %v15648_v58, %v1932_v20  ;;  %v1197_v40 = vmax.f32 %v1161_v25, 0.0  ;;  %v9991_v58 = vor.u32 %v13437_v30, %v9988_v33  ;;  %2561 = vmatpush.bf16.msra.mxu0 %v15684_v43 }
 0x33d   : > { %v2013_v51 = vmax.f32 %v15650_v54, %v1933_v26  ;;  %v1357_v50 = vpop.f32.mrf.mxu2 }
 0x33e   : > { %v15686_v55 = vpack.c.bf16 %v1197_v40, %v1196_v36  ;;  %v1358_v56 = vadd.f32 %v1357_v50, %v15573_v18  ;;  %1450 = vmatmul.bf16.gmra.mxu3 %v15548_v42  ;;  %2650 = vmatpush.bf16.msra.mxu1 %v9991_v58 }
 0x33f   : > { %v1771_v45 = vpop.f32.mrf.mxu0  ;;  %14293 = vmatpush.bf16.msrb.mxu2 %v15545_v39 }
 0x340   : > { %v1520_v63 = vmax.f32 %v1358_v56, 0.0  ;;  %v1772_v54 = vadd.f32 %v1771_v45, %v15562_v3  ;;  %v1860_v57 = vpop.f32.mrf.mxu1  ;;  %1396 = vmatmul.bf16.gmra.mxu2 %v15686_v55  ;;  %1808 = vmatmul.bf16.gmra.mxu0 %v15686_v55  ;;  %v13425_v45 = vld [vmem:[#allocation12 + $0x94] sm:$0xf] }
 0x341   : > { %v1861_v62 = vadd.f32 %v1860_v57, %v15564_v6  ;;  %1897 = vmatmul.bf16.gmra.mxu1 %v15686_v55  ;;  %v1163_v2 = vpop.f32.mrf.mxu3 }
 0x342   : > { %v1570_v32 = vmax.f32 %v15663_v24, %v1520_v63  ;;  %v1934_v53 = vmax.f32 %v1772_v54, 0.0  ;;  %v1164_v1 = vadd.f32 %v14539_v19, %v1163_v2  ;;  %v9940_v63 = vld [vmem:[#allocation12 + $0xb0] sm:$0xf0] }
 0x343   : > { %v1935_v0 = vmax.f32 %v1861_v62, 0.0  ;;  %14294 = vmatpush.bf16.msrb.mxu2 %v15569_v15  ;;  %v9943_v54 = vor.u32 %v13425_v45, %v9940_v63 }
 0x344   : > { %v1983_v39 = vmax.f32 %v15666_v41, %v1934_v53 }
 0x345   : > { %v2014_v52 = vmax.f32 %v15668_v29, %v1935_v0  ;;  %v1359_v11 = vpop.f32.mrf.mxu2  ;;  %v1198_v29 = vmax.f32 %v1164_v1, 0.0  ;;  %2236 = vmatpush.bf16.msra.mxu3 %v9943_v54 }
 0x346   : > { %v1360_v13 = vadd.f32 %v1359_v11, %v15573_v18 }
 0x347   : > { %v1774_v16 = vpop.f32.mrf.mxu0  ;;  %14295 = vmatpush.bf16.msrb.mxu2 %v15608_v59 }
 0x348   : > { %v1522_v20 = vmax.f32 %v1360_v13, 0.0  ;;  %v1775_v24 = vadd.f32 %v1774_v16, %v15562_v3  ;;  %v1863_v25 = vpop.f32.mrf.mxu1 }
 0x349   : > { %v1864_v17 = vadd.f32 %v1863_v25, %v15564_v6  ;;  %v1165_v26 = vpop.f32.mrf.mxu3 }
 0x34a   : > { %v1571_v15 = vmax.f32 %v1569_v8, %v1522_v20  ;;  %v1936_v22 = vmax.f32 %v1775_v24, 0.0  ;;  %v1166_v41 = vadd.f32 %v14539_v19, %v1165_v26 }
 0x34b   : > { %v1937_v28 = vmax.f32 %v1864_v17, 0.0  ;;  %14296 = vmatpush.bf16.msrb.mxu2 %v15639_v35 }
 0x34c   : > { %v1984_v36 = vmax.f32 %v1982_v37, %v1936_v22  ;;  %v1199_v40 = vmax.f32 %v1166_v41, 0.0 }
 0x34d   : > { %v2015_v46 = vmax.f32 %v2013_v51, %v1937_v28  ;;  %v1362_v59 = vpop.f32.mrf.mxu2 }
 0x34e   : > { %v15706_v47 = vpack.c.bf16 %v1199_v40, %v1198_v29  ;;  %v1363_v48 = vadd.f32 %v1362_v59, %v15573_v18  ;;  %1455 = vmatmul.bf16.gmra.mxu3 %v15556_v61 }
 0x34f   : > { %v1776_v50 = vpop.f32.mrf.mxu0  ;;  %14297 = vmatpush.bf16.msrb.mxu2 %v15659_v5 }
 0x350   : > { %v1524_v8 = vmax.f32 %v1363_v48, 0.0  ;;  %v1777_v30 = vadd.f32 %v1776_v50, %v15562_v3  ;;  %v1865_v33 = vpop.f32.mrf.mxu1  ;;  %1401 = vmatmul.bf16.gmra.mxu2 %v15706_v47  ;;  %1813 = vmatmul.bf16.gmra.mxu0 %v15706_v47 }
 0x351   : > { %v1866_v35 = vadd.f32 %v1865_v33, %v15564_v6  ;;  %1902 = vmatmul.bf16.gmra.mxu1 %v15706_v47  ;;  %v1416_v37 = vpop.f32.mrf.mxu3 }
 0x352   : > { %v1572_v51 = vmax.f32 %v1570_v32, %v1524_v8  ;;  %v1938_v56 = vmax.f32 %v1777_v30, 0.0  ;;  %v15721_v32 = vperm.slane %v15566_v9, 1 }
 0x353   : > { %v1939_v58 = vmax.f32 %v1866_v35, 0.0  ;;  %14298 = vmatpush.bf16.msrb.mxu2 %v15670_v23 }
 0x354   : > { %v1985_v5 = vmax.f32 %v1983_v39, %v1938_v56  ;;  %v1417_v16 = vadd.f32 %v1416_v37, %v15721_v32 }
 0x355   : > { %v2016_v57 = vmax.f32 %v2014_v52, %v1939_v58  ;;  %v1364_v62 = vpop.f32.mrf.mxu2 }
 0x356   : > { %v1365_v2 = vadd.f32 %v1364_v62, %v15573_v18  ;;  %v1497_v25 = vmax.f32 %v1417_v16, 0.0  ;;  %v13423_v16 = vld [vmem:[#allocation12 + $0x54] sm:$0xf] }
 0x357   : > { %14299 = vmatpush.bf16.msrb.mxu2 %v15677_v10 }
 0x358   : > { %v1526_v53 = vmax.f32 %v1365_v2, 0.0 }
 0x359   : > { %v1418_v0 = vpop.f32.mrf.mxu3 }
 0x35a   : > { %v1573_v11 = vmax.f32 %v1571_v15, %v1526_v53  ;;  %v1419_v59 = vadd.f32 %v1418_v0, %v15721_v32 }
 0x35b   : > { %14300 = vmatpush.bf16.msrb.mxu2 %v15684_v43 }
 0x35c   : > { %v1499_v37 = vmax.f32 %v1419_v59, 0.0 }
 0x35d   : > { %v1779_v13 = vpop.f32.mrf.mxu0 }
 0x35e   : > { %v1780_v23 = vadd.f32 %v1779_v13, %v15562_v3  ;;  %v1868_v39 = vpop.f32.mrf.mxu1  ;;  %1460 = vmatmul.bf16.gmra.mxu3 %v15582_v38 }
 0x35f   : > { %v1869_v52 = vadd.f32 %v1868_v39, %v15564_v6 }
 0x360   : > { %v1940_v19 = vmax.f32 %v1780_v23, 0.0  ;;  %2150 = vmatmul.bf16.vlgmr.msra.gmra.mxu2 %v15477_v44  ;;  %2562 = vmatmul.bf16.vlgmr.msra.gmra.mxu0 %v15477_v44 }
 0x361   : > { %v1941_v10 = vmax.f32 %v1869_v52, 0.0  ;;  %2651 = vmatmul.bf16.vlgmr.msra.gmra.mxu1 %v15477_v44  ;;  %v1421_v9 = vpop.f32.mrf.mxu3 }
 0x362   : > { %v1986_v43 = vmax.f32 %v1984_v36, %v1940_v19  ;;  %v1422_v1 = vadd.f32 %v1421_v9, %v15721_v32  ;;  %v9932_v19 = vld [vmem:[#allocation12 + $0x70] sm:$0xf0] }
 0x363   : > { %v2017_v20 = vmax.f32 %v2015_v46, %v1941_v10  ;;  %v1367_v24 = vpop.f32.mrf.mxu2 }
 0x364   : > { %v1501_v17 = vmax.f32 %v1422_v1, 0.0  ;;  %v1368_v26 = vadd.f32 %v1367_v24, %v15573_v18 }
 0x365   : > { %v1781_v15 = vpop.f32.mrf.mxu0 }
 0x366   : > { %v1591_v22 = vmax.f32 %v1497_v25, %v1501_v17  ;;  %v1528_v41 = vmax.f32 %v1368_v26, 0.0  ;;  %v1782_v28 = vadd.f32 %v1781_v15, %v15562_v3  ;;  %v1870_v29 = vpop.f32.mrf.mxu1 }
 0x367   : > { %v1871_v40 = vadd.f32 %v1870_v29, %v15564_v6 }
 0x368   : > { %v1574_v48 = vmax.f32 %v1572_v51, %v1528_v41  ;;  %v1942_v36 = vmax.f32 %v1782_v28, 0.0 }
 0x369   : > { %v1943_v50 = vmax.f32 %v1871_v40, 0.0  ;;  %v1423_v8 = vpop.f32.mrf.mxu3 }
 0x36a   : > { %v1987_v46 = vmax.f32 %v1985_v5, %v1942_v36  ;;  %v1424_v30 = vadd.f32 %v1423_v8, %v15721_v32 }
 0x36b   : > { %v2018_v33 = vmax.f32 %v2016_v57, %v1943_v50  ;;  %v1369_v35 = vpop.f32.mrf.mxu2 }
 0x36c   : > { %v1503_v56 = vmax.f32 %v1424_v30, 0.0  ;;  %v1370_v58 = vadd.f32 %v1369_v35, %v15573_v18 }
 0x36d   : > { %v1784_v45 = vpop.f32.mrf.mxu0 }
 0x36e   : > { %v1592_v63 = vmax.f32 %v1499_v37, %v1503_v56  ;;  %v1530_v54 = vmax.f32 %v1370_v58, 0.0  ;;  %v1785_v62 = vadd.f32 %v1784_v45, %v15562_v3  ;;  %v1873_v2 = vpop.f32.mrf.mxu1  ;;  %1465 = vmatmul.bf16.gmra.mxu3 %v15598_v34 }
 0x36f   : > { %v1874_v51 = vadd.f32 %v1873_v2, %v15564_v6 }
 0x370   : > { %v1575_v53 = vmax.f32 %v1573_v11, %v1530_v54  ;;  %v1944_v5 = vmax.f32 %v1785_v62, 0.0  ;;  %2155 = vmatmul.bf16.gmra.mxu2 %v15487_v60  ;;  %2567 = vmatmul.bf16.gmra.mxu0 %v15487_v60  ;;  %v9935_v11 = vor.u32 %v13423_v16, %v9932_v19 }
 0x371   : > { %v1945_v57 = vmax.f32 %v1874_v51, 0.0  ;;  %2656 = vmatmul.bf16.gmra.mxu1 %v15487_v60  ;;  %v1426_v0 = vpop.f32.mrf.mxu3 }
 0x372   : > { %v1988_v13 = vmax.f32 %v1986_v43, %v1944_v5  ;;  %v1427_v23 = vadd.f32 %v1426_v0, %v15721_v32  ;;  %2237 = vmatpush.bf16.msra.mxu3 %v9935_v11 }
 0x373   : > { %v2019_v39 = vmax.f32 %v2017_v20, %v1945_v57  ;;  %v1372_v52 = vpop.f32.mrf.mxu2 }
 0x374   : > { %v1505_v10 = vmax.f32 %v1427_v23, 0.0  ;;  %v1373_v9 = vadd.f32 %v1372_v52, %v15573_v18 }
 0x375   : > { %v1786_v1 = vpop.f32.mrf.mxu0 }
 0x376   : > { %v1593_v24 = vmax.f32 %v1591_v22, %v1505_v10  ;;  %v1532_v25 = vmax.f32 %v1373_v9, 0.0  ;;  %v1787_v17 = vadd.f32 %v1786_v1, %v15562_v3  ;;  %v1875_v26 = vpop.f32.mrf.mxu1 }
 0x377   : > { %v1876_v15 = vadd.f32 %v1875_v26, %v15564_v6 }
 0x378   : > { %v1576_v43 = vmax.f32 %v1574_v48, %v1532_v25  ;;  %v1946_v41 = vmax.f32 %v1787_v17, 0.0 }
 0x379   : > { %v1947_v28 = vmax.f32 %v1876_v15, 0.0  ;;  %v1428_v20 = vpop.f32.mrf.mxu3 }
 0x37a   : > { %v1989_v29 = vmax.f32 %v1987_v46, %v1946_v41  ;;  %v1429_v40 = vadd.f32 %v1428_v20, %v15721_v32 }
 0x37b   : > { %v2020_v59 = vmax.f32 %v2018_v33, %v1947_v28  ;;  %v1374_v36 = vpop.f32.mrf.mxu2 }
 0x37c   : > { %v1507_v50 = vmax.f32 %v1429_v40, 0.0  ;;  %v1375_v8 = vadd.f32 %v1374_v36, %v15573_v18 }
 0x37d   : > { %v1789_v22 = vpop.f32.mrf.mxu0 }
 0x37e   : > { %v1594_v30 = vmax.f32 %v1592_v63, %v1507_v50  ;;  %v1534_v35 = vmax.f32 %v1375_v8, 0.0  ;;  %v1790_v37 = vadd.f32 %v1789_v22, %v15562_v3  ;;  %v1878_v56 = vpop.f32.mrf.mxu1  ;;  %1470 = vmatmul.bf16.gmra.mxu3 %v15615_v21 }
 0x37f   : > { %v1879_v48 = vadd.f32 %v1878_v56, %v15564_v6 }
 0x380   : > { %v1577_v58 = vmax.f32 %v1575_v53, %v1534_v35  ;;  %v1948_v45 = vmax.f32 %v1790_v37, 0.0  ;;  %2160 = vmatmul.bf16.gmra.mxu2 %v15497_v14  ;;  %2572 = vmatmul.bf16.gmra.mxu0 %v15497_v14  ;;  %v13421_v35 = vld [vmem:[#allocation12 + $0x14] sm:$0xf] }
 0x381   : > { %v1949_v46 = vmax.f32 %v1879_v48, 0.0  ;;  %2661 = vmatmul.bf16.gmra.mxu1 %v15497_v14  ;;  %v1431_v33 = vpop.f32.mrf.mxu3  ;;  %v9924_v37 = vld [vmem:[#allocation12 + $0x30] sm:$0xf0] }
 0x382   : > { %v1990_v54 = vmax.f32 %v1988_v13, %v1948_v45  ;;  %v1432_v63 = vadd.f32 %v1431_v33, %v15721_v32 }
 0x383   : > { %v2021_v62 = vmax.f32 %v2019_v39, %v1949_v46  ;;  %v1377_v2 = vpop.f32.mrf.mxu2 }
 0x384   : > { %v1509_v51 = vmax.f32 %v1432_v63, 0.0  ;;  %v1378_v5 = vadd.f32 %v1377_v2, %v15573_v18 }
 0x385   : > { %v1791_v57 = vpop.f32.mrf.mxu0 }
 0x386   : > { %v1595_v0 = vmax.f32 %v1593_v24, %v1509_v51  ;;  %v1536_v53 = vmax.f32 %v1378_v5, 0.0  ;;  %v1792_v23 = vadd.f32 %v1791_v57, %v15562_v3  ;;  %v1880_v52 = vpop.f32.mrf.mxu1 }
 0x387   : > { %v1881_v16 = vadd.f32 %v1880_v52, %v15564_v6 }
 0x388   : > { %v1578_v19 = vmax.f32 %v1576_v43, %v1536_v53  ;;  %v1950_v10 = vmax.f32 %v1792_v23, 0.0 }
 0x389   : > { %v1951_v9 = vmax.f32 %v1881_v16, 0.0  ;;  %v1433_v11 = vpop.f32.mrf.mxu3 }
 0x38a   : > { %v15759_v13 = vmax.f32 %v1989_v29, %v1950_v10  ;;  %v1434_v39 = vadd.f32 %v1433_v11, %v15721_v32 }
 0x38b   : > { %v15762_v1 = vmax.f32 %v2020_v59, %v1951_v9  ;;  %v1379_v25 = vpop.f32.mrf.mxu2 }
 0x38c   : > { %v1511_v17 = vmax.f32 %v1434_v39, 0.0  ;;  %v1380_v24 = vadd.f32 %v1379_v25, %v15573_v18 }
 0x38d   : > { %v1794_v26 = vpop.f32.mrf.mxu0 }
 0x38e   : > { %v1596_v15 = vmax.f32 %v1594_v30, %v1511_v17  ;;  %v1538_v41 = vmax.f32 %v1380_v24, 0.0  ;;  %v1795_v28 = vadd.f32 %v1794_v26, %v15562_v3  ;;  %v1883_v20 = vpop.f32.mrf.mxu1  ;;  %1475 = vmatmul.bf16.gmra.mxu3 %v15629_v12 }
 0x38f   : > { %v1884_v43 = vadd.f32 %v1883_v20, %v15564_v6 }
 0x390   : > { %v15768_v29 = vmax.f32 %v1577_v58, %v1538_v41  ;;  %v1952_v40 = vmax.f32 %v1795_v28, 0.0  ;;  %2165 = vmatmul.bf16.gmra.mxu2 %v15507_v31  ;;  %2577 = vmatmul.bf16.gmra.mxu0 %v15507_v31  ;;  %v9927_v58 = vor.u32 %v13421_v35, %v9924_v37 }
 0x391   : > { %v1953_v59 = vmax.f32 %v1884_v43, 0.0  ;;  %2666 = vmatmul.bf16.gmra.mxu1 %v15507_v31  ;;  %v1436_v36 = vpop.f32.mrf.mxu3 }
 0x392   : > { %v15773_v50 = vmax.f32 %v1990_v54, %v1952_v40  ;;  %v1437_v8 = vadd.f32 %v1436_v36, %v15721_v32  ;;  %2238 = vmatpush.bf16.msra.mxu3 %v9927_v58 }
 0x393   : > { %v15776_v22 = vmax.f32 %v2021_v62, %v1953_v59  ;;  %v1382_v30 = vpop.f32.mrf.mxu2 }
 0x394   : > { %v1513_v56 = vmax.f32 %v1437_v8, 0.0  ;;  %v1383_v48 = vadd.f32 %v1382_v30, %v15573_v18 }
 0x395   : > { %v1796_v45 = vpop.f32.mrf.mxu0 }
 0x396   : > { %v1597_v46 = vmax.f32 %v1595_v0, %v1513_v56  ;;  %v1540_v33 = vmax.f32 %v1383_v48, 0.0  ;;  %v1885_v63 = vpop.f32.mrf.mxu1 }
 0x398   : > { %v15779_v2 = vmax.f32 %v1578_v19, %v1540_v33 }
 0x399   : > { %v1438_v54 = vpop.f32.mrf.mxu3 }
 0x39a   : > { %v1439_v51 = vadd.f32 %v1438_v54, %v15721_v32 }
 0x39b   : > { %v1384_v5 = vpop.f32.mrf.mxu2 }
 0x39c   : > { %v1515_v62 = vmax.f32 %v1439_v51, 0.0 }
 0x39d   : > { %v1799_v57 = vpop.f32.mrf.mxu0 }
 0x39e   : > { %v1598_v53 = vmax.f32 %v1596_v15, %v1515_v62  ;;  %v1888_v23 = vpop.f32.mrf.mxu1  ;;  %1480 = vmatmul.bf16.gmra.mxu3 %v15652_v4  ;;  %v1797_v62 = vadd.f32 %v1796_v45, %v15562_v3 }
 0x3a0   : > { %2170 = vmatmul.bf16.gmra.mxu2 %v15517_v49  ;;  %2582 = vmatmul.bf16.gmra.mxu0 %v15517_v49 }
 0x3a1   : > { %2671 = vmatmul.bf16.gmra.mxu1 %v15517_v49  ;;  %v1441_v0 = vpop.f32.mrf.mxu3 }
 0x3a2   : > { %v1442_v52 = vadd.f32 %v1441_v0, %v15721_v32 }
 0x3a3   : > { %v1387_v16 = vpop.f32.mrf.mxu2 }
 0x3a4   : > { %v1517_v19 = vmax.f32 %v1442_v52, 0.0  ;;  %v1385_v52 = vadd.f32 %v1384_v5, %v15573_v18 }
 0x3a5   : > { %v1801_v10 = vpop.f32.mrf.mxu0 }
 0x3a6   : > { %v1599_v9 = vmax.f32 %v1597_v46, %v1517_v19  ;;  %v1890_v11 = vpop.f32.mrf.mxu1  ;;  %v1800_v19 = vadd.f32 %v1799_v57, %v15562_v3  ;;  %v1542_v45 = vmax.f32 %v1385_v52, 0.0 }
 0x3a9   : > { %v1443_v39 = vpop.f32.mrf.mxu3 }
 0x3aa   : > { %v1444_v25 = vadd.f32 %v1443_v39, %v15721_v32  ;;  %v1889_v39 = vadd.f32 %v1888_v23, %v15564_v6 }
 0x3ab   : > { %v1389_v17 = vpop.f32.mrf.mxu2 }
 0x3ac   : > { %v1519_v24 = vmax.f32 %v1444_v25, 0.0  ;;  %v1957_v5 = vmax.f32 %v1889_v39, 0.0  ;;  %v1390_v57 = vadd.f32 %v1389_v17, %v15573_v18 }
 0x3ad   : > { %v1804_v26 = vpop.f32.mrf.mxu0 }
 0x3ae   : > { %v1600_v15 = vmax.f32 %v1598_v53, %v1519_v24  ;;  %v1893_v41 = vpop.f32.mrf.mxu1  ;;  %1485 = vmatmul.bf16.gmra.mxu3 %v15686_v55  ;;  %v1886_v53 = vadd.f32 %v1885_v63, %v15564_v6  ;;  %v1891_v63 = vadd.f32 %v1890_v11, %v15564_v6  ;;  %v1581_v11 = vmax.f32 %v15768_v29, %v1542_v45 }
 0x3af   : > { %v1546_v39 = vmax.f32 %v1390_v57, 0.0 }
 0x3b0   : > { %2175 = vmatmul.bf16.gmra.mxu2 %v15527_v7  ;;  %2587 = vmatmul.bf16.gmra.mxu0 %v15527_v7  ;;  %v1959_v52 = vmax.f32 %v1891_v63, 0.0 }
 0x3b1   : > { %2676 = vmatmul.bf16.gmra.mxu1 %v15527_v7  ;;  %v1446_v28 = vpop.f32.mrf.mxu3 }
 0x3b2   : > { %v1447_v20 = vadd.f32 %v1446_v28, %v15721_v32  ;;  %v1802_v28 = vadd.f32 %v1801_v10, %v15562_v3 }
 0x3b3   : > { %v1392_v43 = vpop.f32.mrf.mxu2 }
 0x3b4   : > { %v1521_v40 = vmax.f32 %v1447_v20, 0.0  ;;  %v1954_v20 = vmax.f32 %v1797_v62, 0.0 }
 0x3b5   : > { %v1806_v59 = vpop.f32.mrf.mxu0 }
 0x3b6   : > { %v1601_v36 = vmax.f32 %v1599_v9, %v1521_v40  ;;  %v1895_v8 = vpop.f32.mrf.mxu1  ;;  %v1955_v40 = vmax.f32 %v1886_v53, 0.0  ;;  %v1993_v10 = vmax.f32 %v15759_v13, %v1954_v20  ;;  %v1807_v17 = vadd.f32 %v1806_v59, %v15562_v3 }
 0x3b7   : > { %v1896_v29 = vadd.f32 %v1895_v8, %v15564_v6  ;;  %v1583_v8 = vmax.f32 %v1581_v11, %v1546_v39 }
 0x3b8   : > { %v2024_v62 = vmax.f32 %v15762_v1, %v1955_v40 }
 0x3b9   : > { %v1448_v30 = vpop.f32.mrf.mxu3  ;;  %v1963_v63 = vmax.f32 %v1896_v29, 0.0 }
 0x3ba   : > { %v1449_v35 = vadd.f32 %v1448_v30, %v15721_v32  ;;  %v1956_v30 = vmax.f32 %v1800_v19, 0.0  ;;  %v2025_v19 = vmax.f32 %v15776_v22, %v1957_v5  ;;  %v2026_v22 = vmax.f32 %v2024_v62, %v1959_v52 }
 0x3bb   : > { %v15794_v37 = vpop.f32.mrf.mxu2 }
 0x3bc   : > { %v1523_v56 = vmax.f32 %v1449_v35, 0.0 }
 0x3bd   : > { %v1809_v48 = vpop.f32.mrf.mxu0 }
 0x3be   : > { %v1602_v58 = vmax.f32 %v1600_v15, %v1523_v56  ;;  %v1898_v46 = vpop.f32.mrf.mxu1  ;;  %1490 = vmatmul.bf16.gmra.mxu3 %v15706_v47  ;;  %v1388_v15 = vadd.f32 %v1387_v16, %v15573_v18  ;;  %v1805_v56 = vadd.f32 %v1804_v26, %v15562_v3  ;;  %v1894_v16 = vadd.f32 %v1893_v41, %v15564_v6 }
 0x3bf   : > { %v1810_v59 = vadd.f32 %v1809_v48, %v15562_v3 }
 0x3c0   : > { %2180 = vmatmul.bf16.gmra.mxu2 %v15537_v27  ;;  %2592 = vmatmul.bf16.gmra.mxu0 %v15537_v27  ;;  %v1961_v20 = vmax.f32 %v1894_v16, 0.0 }
 0x3c1   : > { %2681 = vmatmul.bf16.gmra.mxu1 %v15537_v27  ;;  %v1451_v33 = vpop.f32.mrf.mxu3 }
 0x3c2   : > { %v1452_v54 = vadd.f32 %v1451_v33, %v15721_v32  ;;  %v1958_v33 = vmax.f32 %v1802_v28, 0.0 }
 0x3c3   : > { %v15801_v51 = vpop.f32.mrf.mxu2 }
 0x3c4   : > { %v1525_v0 = vmax.f32 %v1452_v54, 0.0  ;;  %v1995_v1 = vmax.f32 %v1993_v10, %v1958_v33  ;;  %v1398_v16 = vadd.f32 %v15801_v51, %v15573_v18 }
 0x3c5   : > { %v1811_v9 = vpop.f32.mrf.mxu0 }
 0x3c6   : > { %v15808_v25 = vmax.f32 %v1601_v36, %v1525_v0  ;;  %v1900_v24 = vpop.f32.mrf.mxu1  ;;  %v1544_v36 = vmax.f32 %v1388_v15, 0.0  ;;  %v1994_v0 = vmax.f32 %v15773_v50, %v1956_v30  ;;  %v1960_v15 = vmax.f32 %v1805_v56, 0.0 }
 0x3c7   : > { %v1393_v50 = vadd.f32 %v1392_v43, %v15573_v18  ;;  %v1812_v40 = vadd.f32 %v1811_v9, %v15562_v3  ;;  %v2027_v9 = vmax.f32 %v2025_v19, %v1961_v20  ;;  %v1964_v56 = vmax.f32 %v1810_v59, 0.0 }
 0x3c8   : > { %v1582_v13 = vmax.f32 %v15779_v2, %v1544_v36  ;;  %v1901_v2 = vadd.f32 %v1900_v24, %v15564_v6  ;;  %v1996_v30 = vmax.f32 %v1994_v0, %v1960_v15  ;;  %v1552_v29 = vmax.f32 %v1398_v16, 0.0 }
 0x3c9   : > { %v1453_v35 = vpop.f32.mrf.mxu3  ;;  %v1966_v24 = vmax.f32 %v1812_v40, 0.0 }
 0x3ca   : > { %v1454_v23 = vadd.f32 %v1453_v35, %v15721_v32  ;;  %v1395_v35 = vadd.f32 %v15794_v37, %v15573_v18  ;;  %v1967_v10 = vmax.f32 %v1901_v2, 0.0  ;;  %v1998_v15 = vmax.f32 %v1996_v30, %v1964_v56 }
 0x3cb   : > { %v1399_v54 = vpop.f32.mrf.mxu2 }
 0x3cc   : > { %v1527_v53 = vmax.f32 %v1454_v23, 0.0 }
 0x3cd   : > { %v1814_v26 = vpop.f32.mrf.mxu0 }
 0x3ce   : > { %v15823_v28 = vmax.f32 %v1602_v58, %v1527_v53  ;;  %v1903_v41 = vpop.f32.mrf.mxu1  ;;  %2239 = vmatmul.bf16.vlgmr.msra.gmra.mxu3 %v15477_v44  ;;  %v1962_v58 = vmax.f32 %v1807_v17, 0.0  ;;  %v1899_v44 = vadd.f32 %v1898_v46, %v15564_v6  ;;  %v1815_v43 = vadd.f32 %v1814_v26, %v15562_v3 }
 0x3cf   : > { %v1904_v5 = vadd.f32 %v1903_v41, %v15564_v6  ;;  %v1548_v46 = vmax.f32 %v1393_v50, 0.0  ;;  %v1400_v53 = vadd.f32 %v1399_v54, %v15573_v18  ;;  %v2028_v17 = vmax.f32 %v2026_v22, %v1963_v63  ;;  %v2035_v63 = vld [vmem:[#allocation2 + $0x10] sm:$0xff] }
 0x3d0   : > { %2185 = vmatmul.bf16.gmra.mxu2 %v15548_v42  ;;  %2597 = vmatmul.bf16.gmra.mxu0 %v15548_v42  ;;  %v1997_v36 = vmax.f32 %v1995_v1, %v1962_v58  ;;  %v1965_v33 = vmax.f32 %v1899_v44, 0.0  ;;  %v1968_v11 = vmax.f32 %v1815_v43, 0.0  ;;  %v1550_v26 = vmax.f32 %v1395_v35, 0.0 }
 0x3d1   : > { %2686 = vmatmul.bf16.gmra.mxu1 %v15548_v42  ;;  %v1456_v45 = vpop.f32.mrf.mxu3  ;;  %v1969_v19 = vmax.f32 %v1904_v5, 0.0  ;;  %v2030_v50 = vmax.f32 %v2028_v17, %v1967_v10  ;;  %v1554_v40 = vmax.f32 %v1400_v53, 0.0  ;;  %v1584_v22 = vmax.f32 %v1582_v13, %v1548_v46 }
 0x3d2   : > { %v1457_v48 = vadd.f32 %v1456_v45, %v15721_v32  ;;  %v1999_v41 = vmax.f32 %v1997_v36, %v1966_v24  ;;  %v2029_v20 = vmax.f32 %v2027_v9, %v1965_v33  ;;  %v1585_v44 = vmax.f32 %v1583_v8, %v1550_v26  ;;  %v2034_v45 = vld [vmem:[#allocation2 + $0x18] sm:$0xff] }
 0x3d3   : > { %v1402_v57 = vpop.f32.mrf.mxu2  ;;  %v1586_v5 = vmax.f32 %v1584_v22, %v1552_v29 }
 0x3d4   : > { %v1529_v23 = vmax.f32 %v1457_v48, 0.0  ;;  %v1403_v1 = vadd.f32 %v1402_v57, %v15573_v18  ;;  %v2031_v2 = vmax.f32 %v2029_v20, %v1969_v19  ;;  %v1587_v24 = vmax.f32 %v1585_v44, %v1554_v40 }
 0x3d5   : > { %v1816_v62 = vpop.f32.mrf.mxu0 }
 0x3d6   : > { %v1605_v0 = vmax.f32 %v15808_v25, %v1529_v23  ;;  %v1817_v37 = vadd.f32 %v1816_v62, %v15562_v3  ;;  %v1905_v52 = vpop.f32.mrf.mxu1  ;;  %v2000_v25 = vmax.f32 %v1998_v15, %v1968_v11  ;;  %v1556_v43 = vmax.f32 %v1403_v1, 0.0  ;;  %v15861_v1 = vld [vmem:[#allocation14 + $0x4] sm:$0x3] }
 0x3d7   : > { %v1906_v39 = vadd.f32 %v1905_v52, %v15564_v6 }
 0x3d8   : > { %v1970_v51 = vmax.f32 %v1817_v37, 0.0  ;;  %v1588_v46 = vmax.f32 %v1586_v5, %v1556_v43 }
 0x3d9   : > { %v1971_v54 = vmax.f32 %v1906_v39, 0.0  ;;  %v1458_v59 = vpop.f32.mrf.mxu3 }
 0x3da   : > { %v2001_v58 = vmax.f32 %v1999_v41, %v1970_v51  ;;  %v1459_v3 = vadd.f32 %v1458_v59, %v15721_v32  ;;  %v15866_v59 = vperm.slane %v15861_v1, 0 }
 0x3db   : > { %v2032_v6 = vmax.f32 %v2030_v50, %v1971_v54  ;;  %v1404_v30 = vpop.f32.mrf.mxu2 }
 0x3dc   : > { %v2002_v48 = vmax.f32 %v2000_v25, %v2001_v58  ;;  %v1531_v35 = vmax.f32 %v1459_v3, 0.0  ;;  %v1405_v9 = vadd.f32 %v1404_v30, %v15573_v18  ;;  %v1622_v18 = vld [vmem:[#allocation2 + $0x30] sm:$0xff] }
 0x3dd   : > { %v2033_v57 = vmax.f32 %v2031_v2, %v2032_v6  ;;  %v2563_v56 = vpop.f32.mrf.mxu0 }
 0x3de   : > { %v2036_v23 = vmax.f32 %v2034_v45, %v2002_v48  ;;  %v1606_v36 = vmax.f32 %v15823_v28, %v1531_v35  ;;  %v1558_v33 = vmax.f32 %v1405_v9, 0.0  ;;  %v2652_v13 = vpop.f32.mrf.mxu1  ;;  %2244 = vmatmul.bf16.gmra.mxu3 %v15487_v60  ;;  %v2468_v60 = vld [vmem:[#allocation14 + $0x6] sm:$0x3] }
 0x3df   : > { %v2037_v8 = vmax.f32 %v2035_v63, %v2033_v57  ;;  %v15856_v19 = vperm.slane %v2468_v60, 0  ;;  %v15858_v39 = vperm.slane %v2468_v60, 1 }
 0x3e0   : > { %2038 = vst [vmem:[#allocation2 + $0x18] sm:$0xff] %v2036_v23  ;;  %v1589_v16 = vmax.f32 %v1587_v24, %v1558_v33  ;;  %2190 = vmatmul.bf16.gmra.mxu2 %v15556_v61  ;;  %2602 = vmatmul.bf16.gmra.mxu0 %v15556_v61 }
 0x3e1   : > { %2039 = vst [vmem:[#allocation2 + $0x10] sm:$0xff] %v2037_v8  ;;  %2691 = vmatmul.bf16.gmra.mxu1 %v15556_v61  ;;  %v1461_v10 = vpop.f32.mrf.mxu3  ;;  %v2564_v20 = vadd.f32 %v2563_v56, %v15856_v19  ;;  %v2653_v50 = vadd.f32 %v2652_v13, %v15858_v39 }
 0x3e2   : > { %v1590_v62 = vmax.f32 %v1588_v46, %v1589_v16  ;;  %v1462_v28 = vadd.f32 %v1461_v10, %v15721_v32 }
 0x3e3   : > { %v2151_v53 = vpop.f32.mrf.mxu2  ;;  %v2732_v3 = vmax.f32 %v2564_v20, 0.0  ;;  %v2733_v44 = vmax.f32 %v2653_v50, 0.0 }
 0x3e4   : > { %v1624_v11 = vmax.f32 %v1622_v18, %v1590_v62  ;;  %v1533_v37 = vmax.f32 %v1462_v28, 0.0  ;;  %v2152_v6 = vadd.f32 %v2151_v53, %v15866_v59 }
 0x3e5   : > { %v2565_v52 = vpop.f32.mrf.mxu0 }
 0x3e6   : > { %1626 = vst [vmem:[#allocation2 + $0x30] sm:$0xff] %v1624_v11  ;;  %v1607_v17 = vmax.f32 %v1605_v0, %v1533_v37  ;;  %v2654_v26 = vpop.f32.mrf.mxu1  ;;  %v2566_v63 = vadd.f32 %v2565_v52, %v15856_v19  ;;  %v2320_v56 = vmax.f32 %v2152_v6, 0.0 }
 0x3e7   : > { %v2655_v5 = vadd.f32 %v2654_v26, %v15858_v39 }
 0x3e8   : > { %v2734_v8 = vmax.f32 %v2566_v63, 0.0 }
 0x3e9   : > { %v1463_v15 = vpop.f32.mrf.mxu3  ;;  %v2735_v18 = vmax.f32 %v2655_v5, 0.0 }
 0x3ea   : > { %v1464_v41 = vadd.f32 %v1463_v15, %v15721_v32 }
 0x3eb   : > { %v2153_v51 = vpop.f32.mrf.mxu2 }
 0x3ec   : > { %v1535_v29 = vmax.f32 %v1464_v41, 0.0  ;;  %v2154_v28 = vadd.f32 %v2153_v51, %v15866_v59 }
 0x3ed   : > { %v2568_v54 = vpop.f32.mrf.mxu0 }
 0x3ee   : > { %v1608_v0 = vmax.f32 %v1606_v36, %v1535_v29  ;;  %v2569_v40 = vadd.f32 %v2568_v54, %v15856_v19  ;;  %v2657_v25 = vpop.f32.mrf.mxu1  ;;  %2249 = vmatmul.bf16.gmra.mxu3 %v15497_v14  ;;  %v2322_v15 = vmax.f32 %v2154_v28, 0.0 }
 0x3ef   : > { %v2658_v58 = vadd.f32 %v2657_v25, %v15858_v39 }
 0x3f0   : > { %v2736_v22 = vmax.f32 %v2569_v40, 0.0  ;;  %2195 = vmatmul.bf16.gmra.mxu2 %v15582_v38  ;;  %2607 = vmatmul.bf16.gmra.mxu0 %v15582_v38 }
 0x3f1   : > { %v2737_v2 = vmax.f32 %v2658_v58, 0.0  ;;  %2696 = vmatmul.bf16.gmra.mxu1 %v15582_v38  ;;  %v1466_v45 = vpop.f32.mrf.mxu3 }
 0x3f2   : > { %v2796_v30 = vmax.f32 %v2732_v3, %v2736_v22  ;;  %v1467_v43 = vadd.f32 %v1466_v45, %v15721_v32 }
 0x3f3   : > { %v2827_v48 = vmax.f32 %v2733_v44, %v2737_v2  ;;  %v2156_v14 = vpop.f32.mrf.mxu2 }
 0x3f4   : > { %v1537_v35 = vmax.f32 %v1467_v43, 0.0  ;;  %v2157_v9 = vadd.f32 %v2156_v14, %v15866_v59 }
 0x3f5   : > { %v2570_v57 = vpop.f32.mrf.mxu0 }
 0x3f6   : > { %v1609_v24 = vmax.f32 %v1607_v17, %v1537_v35  ;;  %v2324_v23 = vmax.f32 %v2157_v9, 0.0  ;;  %v2571_v36 = vadd.f32 %v2570_v57, %v15856_v19  ;;  %v2659_v33 = vpop.f32.mrf.mxu1 }
 0x3f7   : > { %v2660_v13 = vadd.f32 %v2659_v33, %v15858_v39 }
 0x3f8   : > { %v2384_v46 = vmax.f32 %v2320_v56, %v2324_v23  ;;  %v2738_v16 = vmax.f32 %v2571_v36, 0.0 }
 0x3f9   : > { %v2739_v10 = vmax.f32 %v2660_v13, 0.0  ;;  %v1468_v62 = vpop.f32.mrf.mxu3 }
 0x3fa   : > { %v2797_v53 = vmax.f32 %v2734_v8, %v2738_v16  ;;  %v1469_v11 = vadd.f32 %v1468_v62, %v15721_v32 }
 0x3fb   : > { %v2828_v37 = vmax.f32 %v2735_v18, %v2739_v10  ;;  %v2158_v60 = vpop.f32.mrf.mxu2 }
 0x3fc   : > { %v1539_v52 = vmax.f32 %v1469_v11, 0.0  ;;  %v2159_v17 = vadd.f32 %v2158_v60, %v15866_v59 }
 0x3fd   : > { %v2573_v26 = vpop.f32.mrf.mxu0 }
 0x3fe   : > { %v15884_v41 = vmax.f32 %v1608_v0, %v1539_v52  ;;  %v2326_v20 = vmax.f32 %v2159_v17, 0.0  ;;  %v2574_v29 = vadd.f32 %v2573_v26, %v15856_v19  ;;  %v2662_v50 = vpop.f32.mrf.mxu1  ;;  %2254 = vmatmul.bf16.gmra.mxu3 %v15507_v31 }
 0x3ff   : > { %v2663_v51 = vadd.f32 %v2662_v50, %v15858_v39 }
 0x400   : > { %v2385_v54 = vmax.f32 %v2322_v15, %v2326_v20  ;;  %v2740_v40 = vmax.f32 %v2574_v29, 0.0  ;;  %2200 = vmatmul.bf16.gmra.mxu2 %v15598_v34  ;;  %2612 = vmatmul.bf16.gmra.mxu0 %v15598_v34 }
 0x401   : > { %v2741_v25 = vmax.f32 %v2663_v51, 0.0  ;;  %2701 = vmatmul.bf16.gmra.mxu1 %v15598_v34  ;;  %v1471_v58 = vpop.f32.mrf.mxu3 }
 0x402   : > { %v2798_v0 = vmax.f32 %v2796_v30, %v2740_v40  ;;  %v1472_v3 = vadd.f32 %v1471_v58, %v15721_v32 }
 0x403   : > { %v2829_v22 = vmax.f32 %v2827_v48, %v2741_v25  ;;  %v2161_v44 = vpop.f32.mrf.mxu2 }
 0x404   : > { %v1541_v2 = vmax.f32 %v1472_v3, 0.0  ;;  %v2162_v31 = vadd.f32 %v2161_v44, %v15866_v59 }
 0x405   : > { %v2575_v45 = vpop.f32.mrf.mxu0 }
 0x406   : > { %v15894_v6 = vmax.f32 %v1609_v24, %v1541_v2  ;;  %v2328_v43 = vmax.f32 %v2162_v31, 0.0  ;;  %v2576_v14 = vadd.f32 %v2575_v45, %v15856_v19  ;;  %v2664_v63 = vpop.f32.mrf.mxu1 }
 0x407   : > { %v2665_v35 = vadd.f32 %v2664_v63, %v15858_v39 }
 0x408   : > { %v2386_v9 = vmax.f32 %v2384_v46, %v2328_v43  ;;  %v2742_v5 = vmax.f32 %v2576_v14, 0.0 }
 0x409   : > { %v2743_v57 = vmax.f32 %v2665_v35, 0.0  ;;  %v15898_v30 = vpop.f32.mrf.mxu3 }
 0x40a   : > { %v2799_v56 = vmax.f32 %v2797_v53, %v2742_v5 }
 0x40b   : > { %v2830_v48 = vmax.f32 %v2828_v37, %v2743_v57  ;;  %v2163_v23 = vpop.f32.mrf.mxu2 }
 0x40c   : > { %v2164_v36 = vadd.f32 %v2163_v23, %v15866_v59 }
 0x40d   : > { %v2578_v33 = vpop.f32.mrf.mxu0 }
 0x40e   : > { %v2330_v13 = vmax.f32 %v2164_v36, 0.0  ;;  %v2579_v24 = vadd.f32 %v2578_v33, %v15856_v19  ;;  %v2667_v8 = vpop.f32.mrf.mxu1  ;;  %2259 = vmatmul.bf16.gmra.mxu3 %v15517_v49 }
 0x40f   : > { %v2668_v16 = vadd.f32 %v2667_v8, %v15858_v39 }
 0x410   : > { %v2387_v18 = vmax.f32 %v2385_v54, %v2330_v13  ;;  %v2744_v46 = vmax.f32 %v2579_v24, 0.0  ;;  %2205 = vmatmul.bf16.gmra.mxu2 %v15615_v21  ;;  %2617 = vmatmul.bf16.gmra.mxu0 %v15615_v21 }
 0x411   : > { %v2745_v10 = vmax.f32 %v2668_v16, 0.0  ;;  %2706 = vmatmul.bf16.gmra.mxu1 %v15615_v21  ;;  %v15907_v62 = vpop.f32.mrf.mxu3 }
 0x412   : > { %v2800_v28 = vmax.f32 %v2798_v0, %v2744_v46 }
 0x413   : > { %v2831_v53 = vmax.f32 %v2829_v22, %v2745_v10  ;;  %v2166_v11 = vpop.f32.mrf.mxu2 }
 0x414   : > { %v2167_v37 = vadd.f32 %v2166_v11, %v15866_v59 }
 0x415   : > { %v2580_v60 = vpop.f32.mrf.mxu0 }
 0x416   : > { %v2332_v49 = vmax.f32 %v2167_v37, 0.0  ;;  %v2581_v52 = vadd.f32 %v2580_v60, %v15856_v19  ;;  %v2669_v17 = vpop.f32.mrf.mxu1 }
 0x417   : > { %v2670_v26 = vadd.f32 %v2669_v17, %v15858_v39 }
 0x418   : > { %v2388_v15 = vmax.f32 %v2386_v9, %v2332_v49  ;;  %v2746_v20 = vmax.f32 %v2581_v52, 0.0 }
 0x419   : > { %v2747_v29 = vmax.f32 %v2670_v26, 0.0  ;;  %v15912_v50 = vpop.f32.mrf.mxu3 }
 0x41a   : > { %v2801_v51 = vmax.f32 %v2799_v56, %v2746_v20 }
 0x41b   : > { %v2832_v54 = vmax.f32 %v2830_v48, %v2747_v29  ;;  %v2168_v40 = vpop.f32.mrf.mxu2 }
 0x41c   : > { %v2169_v25 = vadd.f32 %v2168_v40, %v15866_v59 }
 0x41d   : > { %v2583_v58 = vpop.f32.mrf.mxu0 }
 0x41e   : > { %v2334_v0 = vmax.f32 %v2169_v25, 0.0  ;;  %v2584_v3 = vadd.f32 %v2583_v58, %v15856_v19  ;;  %v2672_v22 = vpop.f32.mrf.mxu1  ;;  %2264 = vmatmul.bf16.gmra.mxu3 %v15527_v7 }
 0x41f   : > { %v2673_v44 = vadd.f32 %v2672_v22, %v15858_v39 }
 0x420   : > { %v2389_v2 = vmax.f32 %v2387_v18, %v2334_v0  ;;  %v2748_v31 = vmax.f32 %v2584_v3, 0.0  ;;  %2210 = vmatmul.bf16.gmra.mxu2 %v15629_v12  ;;  %2622 = vmatmul.bf16.gmra.mxu0 %v15629_v12 }
 0x421   : > { %v2749_v45 = vmax.f32 %v2673_v44, 0.0  ;;  %2711 = vmatmul.bf16.gmra.mxu1 %v15629_v12  ;;  %v1481_v43 = vpop.f32.mrf.mxu3 }
 0x422   : > { %v2802_v14 = vmax.f32 %v2800_v28, %v2748_v31 }
 0x423   : > { %v2833_v63 = vmax.f32 %v2831_v53, %v2749_v45  ;;  %v2171_v35 = vpop.f32.mrf.mxu2  ;;  %v1474_v45 = vadd.f32 %v15898_v30, %v15721_v32 }
 0x424   : > { %v2172_v9 = vadd.f32 %v2171_v35, %v15866_v59 }
 0x425   : > { %v2585_v5 = vpop.f32.mrf.mxu0  ;;  %v1543_v30 = vmax.f32 %v1474_v45, 0.0 }
 0x426   : > { %v2336_v57 = vmax.f32 %v2172_v9, 0.0  ;;  %v2586_v7 = vadd.f32 %v2585_v5, %v15856_v19  ;;  %v2674_v56 = vpop.f32.mrf.mxu1  ;;  %v1477_v5 = vadd.f32 %v15907_v62, %v15721_v32 }
 0x427   : > { %v2675_v48 = vadd.f32 %v2674_v56, %v15858_v39 }
 0x428   : > { %v2390_v23 = vmax.f32 %v2388_v15, %v2336_v57  ;;  %v2750_v36 = vmax.f32 %v2586_v7, 0.0  ;;  %v1479_v57 = vadd.f32 %v15912_v50, %v15721_v32 }
 0x429   : > { %v2751_v33 = vmax.f32 %v2675_v48, 0.0  ;;  %v1483_v13 = vpop.f32.mrf.mxu3 }
 0x42a   : > { %v2803_v24 = vmax.f32 %v2801_v51, %v2750_v36  ;;  %v1484_v62 = vadd.f32 %v1483_v13, %v15721_v32  ;;  %v1547_v50 = vmax.f32 %v1479_v57, 0.0 }
 0x42b   : > { %v2834_v8 = vmax.f32 %v2832_v54, %v2751_v33  ;;  %v2173_v16 = vpop.f32.mrf.mxu2 }
 0x42c   : > { %v2174_v18 = vadd.f32 %v2173_v16, %v15866_v59 }
 0x42d   : > { %v2588_v46 = vpop.f32.mrf.mxu0 }
 0x42e   : > { %v2338_v10 = vmax.f32 %v2174_v18, 0.0  ;;  %v2589_v28 = vadd.f32 %v2588_v46, %v15856_v19  ;;  %v2677_v53 = vpop.f32.mrf.mxu1  ;;  %2269 = vmatmul.bf16.gmra.mxu3 %v15537_v27 }
 0x42f   : > { %v2678_v11 = vadd.f32 %v2677_v53, %v15858_v39 }
 0x430   : > { %v2391_v37 = vmax.f32 %v2389_v2, %v2338_v10  ;;  %v2752_v60 = vmax.f32 %v2589_v28, 0.0  ;;  %2215 = vmatmul.bf16.gmra.mxu2 %v15652_v4  ;;  %2627 = vmatmul.bf16.gmra.mxu0 %v15652_v4  ;;  %v1612_v28 = vmax.f32 %v15884_v41, %v1543_v30 }
 0x431   : > { %v2753_v49 = vmax.f32 %v2678_v11, 0.0  ;;  %2716 = vmatmul.bf16.gmra.mxu1 %v15652_v4  ;;  %v1486_v52 = vpop.f32.mrf.mxu3  ;;  %v1551_v11 = vmax.f32 %v1484_v62, 0.0 }
 0x432   : > { %v2804_v17 = vmax.f32 %v2802_v14, %v2752_v60  ;;  %v1487_v18 = vadd.f32 %v1486_v52, %v15721_v32 }
 0x433   : > { %v2835_v26 = vmax.f32 %v2833_v63, %v2753_v49  ;;  %v2176_v15 = vpop.f32.mrf.mxu2 }
 0x434   : > { %v2177_v20 = vadd.f32 %v2176_v15, %v15866_v59  ;;  %v1553_v15 = vmax.f32 %v1487_v18, 0.0 }
 0x435   : > { %v2590_v29 = vpop.f32.mrf.mxu0 }
 0x436   : > { %v2340_v51 = vmax.f32 %v2177_v20, 0.0  ;;  %v2591_v27 = vadd.f32 %v2590_v29, %v15856_v19  ;;  %v2679_v54 = vpop.f32.mrf.mxu1 }
 0x437   : > { %v2680_v40 = vadd.f32 %v2679_v54, %v15858_v39 }
 0x438   : > { %v2392_v25 = vmax.f32 %v2390_v23, %v2340_v51  ;;  %v2754_v58 = vmax.f32 %v2591_v27, 0.0  ;;  %v1482_v23 = vadd.f32 %v1481_v43, %v15721_v32 }
 0x439   : > { %v2755_v0 = vmax.f32 %v2680_v40, 0.0  ;;  %v1488_v3 = vpop.f32.mrf.mxu3 }
 0x43a   : > { %v2805_v22 = vmax.f32 %v2803_v24, %v2754_v58  ;;  %v1545_v24 = vmax.f32 %v1477_v5, 0.0  ;;  %v1489_v46 = vadd.f32 %v1488_v3, %v15721_v32  ;;  %v1549_v43 = vmax.f32 %v1482_v23, 0.0 }
 0x43b   : > { %v2836_v44 = vmax.f32 %v2834_v8, %v2755_v0  ;;  %v2178_v2 = vpop.f32.mrf.mxu2 }
 0x43c   : > { %v2179_v31 = vadd.f32 %v2178_v2, %v15866_v59  ;;  %v1555_v20 = vmax.f32 %v1489_v46, 0.0 }
 0x43d   : > { %v2593_v14 = vpop.f32.mrf.mxu0 }
 0x43e   : > { %v2342_v63 = vmax.f32 %v2179_v31, 0.0  ;;  %v2594_v35 = vadd.f32 %v2593_v14, %v15856_v19  ;;  %v2682_v9 = vpop.f32.mrf.mxu1  ;;  %2274 = vmatmul.bf16.gmra.mxu3 %v15548_v42 }
 0x43f   : > { %v2683_v7 = vadd.f32 %v2682_v9, %v15858_v39 }
 0x440   : > { %v2393_v56 = vmax.f32 %v2391_v37, %v2342_v63  ;;  %v2756_v48 = vmax.f32 %v2594_v35, 0.0  ;;  %2220 = vmatmul.bf16.gmra.mxu2 %v15686_v55  ;;  %2632 = vmatmul.bf16.gmra.mxu0 %v15686_v55 }
 0x441   : > { %v2757_v36 = vmax.f32 %v2683_v7, 0.0  ;;  %2721 = vmatmul.bf16.gmra.mxu1 %v15686_v55  ;;  %v1491_v42 = vpop.f32.mrf.mxu3 }
 0x442   : > { %v2806_v33 = vmax.f32 %v2804_v17, %v2756_v48  ;;  %v1492_v37 = vadd.f32 %v1491_v42, %v15721_v32  ;;  %v1613_v17 = vmax.f32 %v15894_v6, %v1545_v24  ;;  %v1623_v48 = vld [vmem:[#allocation2] sm:$0xff] }
 0x443   : > { %v2837_v8 = vmax.f32 %v2835_v26, %v2757_v36  ;;  %v2181_v16 = vpop.f32.mrf.mxu2  ;;  %v1614_v26 = vmax.f32 %v1612_v28, %v1547_v50 }
 0x444   : > { %v2182_v10 = vadd.f32 %v2181_v16, %v15866_v59  ;;  %v1615_v27 = vmax.f32 %v1613_v17, %v1549_v43  ;;  %v1557_v58 = vmax.f32 %v1492_v37, 0.0 }
 0x445   : > { %v2595_v53 = vpop.f32.mrf.mxu0  ;;  %v1616_v40 = vmax.f32 %v1614_v26, %v1551_v11 }
 0x446   : > { %v2344_v60 = vmax.f32 %v2182_v10, 0.0  ;;  %v2596_v13 = vadd.f32 %v2595_v53, %v15856_v19  ;;  %v2684_v49 = vpop.f32.mrf.mxu1  ;;  %v1617_v45 = vmax.f32 %v1615_v27, %v1553_v15 }
 0x447   : > { %v2685_v52 = vadd.f32 %v2684_v49, %v15858_v39  ;;  %v1618_v14 = vmax.f32 %v1616_v40, %v1555_v20 }
 0x448   : > { %v2394_v29 = vmax.f32 %v2392_v25, %v2344_v60  ;;  %v2758_v51 = vmax.f32 %v2596_v13, 0.0  ;;  %v1619_v9 = vmax.f32 %v1617_v45, %v1557_v58 }
 0x449   : > { %v2759_v41 = vmax.f32 %v2685_v52, 0.0  ;;  %v1493_v54 = vpop.f32.mrf.mxu3 }
 0x44a   : > { %v2807_v0 = vmax.f32 %v2805_v22, %v2758_v51  ;;  %v1494_v3 = vadd.f32 %v1493_v54, %v15721_v32 }
 0x44b   : > { %v2838_v2 = vmax.f32 %v2836_v44, %v2759_v41  ;;  %v2183_v31 = vpop.f32.mrf.mxu2 }
 0x44c   : > { %v1559_v6 = vmax.f32 %v1494_v3, 0.0  ;;  %v2184_v63 = vadd.f32 %v2183_v31, %v15866_v59 }
 0x44d   : > { %v2598_v35 = vpop.f32.mrf.mxu0 }
 0x44e   : > { %v1620_v5 = vmax.f32 %v1618_v14, %v1559_v6  ;;  %v2346_v25 = vmax.f32 %v2184_v63, 0.0  ;;  %v2599_v57 = vadd.f32 %v2598_v35, %v15856_v19  ;;  %v2687_v7 = vpop.f32.mrf.mxu1  ;;  %2279 = vmatmul.bf16.gmra.mxu3 %v15556_v61 }
 0x44f   : > { %v2688_v22 = vadd.f32 %v2687_v7, %v15858_v39 }
 0x450   : > { %v1621_v32 = vmax.f32 %v1619_v9, %v1620_v5  ;;  %v2395_v44 = vmax.f32 %v2393_v56, %v2346_v25  ;;  %v2760_v30 = vmax.f32 %v2599_v57, 0.0  ;;  %2225 = vmatmul.bf16.gmra.mxu2 %v15706_v47 }
 0x451   : > { %v2761_v23 = vmax.f32 %v2688_v22, 0.0  ;;  %2726 = vmatmul.bf16.gmra.mxu1 %v15706_v47  ;;  %v2240_v36 = vpop.f32.mrf.mxu3 }
 0x452   : > { %v1625_v42 = vmax.f32 %v1623_v48, %v1621_v32  ;;  %v2808_v62 = vmax.f32 %v2806_v33, %v2760_v30  ;;  %v15968_v33 = vperm.slane %v15861_v1, 1 }
 0x453   : > { %v2839_v24 = vmax.f32 %v2837_v8, %v2761_v23  ;;  %v2186_v50 = vpop.f32.mrf.mxu2 }
 0x454   : > { %1627 = vst [vmem:[#allocation2] sm:$0xff] %v1625_v42  ;;  %v2187_v16 = vadd.f32 %v2186_v50, %v15866_v59  ;;  %v2241_v20 = vadd.f32 %v2240_v36, %v15968_v33 }
 0x455   : > { %v2600_v61 = vpop.f32.mrf.mxu0 }
 0x456   : > { %v2348_v18 = vmax.f32 %v2187_v16, 0.0  ;;  %v2601_v46 = vadd.f32 %v2600_v61, %v15856_v19  ;;  %v2689_v10 = vpop.f32.mrf.mxu1 }
 0x457   : > { %v2690_v56 = vadd.f32 %v2689_v10, %v15858_v39 }
 0x458   : > { %v2396_v28 = vmax.f32 %v2394_v29, %v2348_v18  ;;  %v2762_v43 = vmax.f32 %v2601_v46, 0.0 }
 0x459   : > { %v2763_v53 = vmax.f32 %v2690_v56, 0.0  ;;  %v2242_v11 = vpop.f32.mrf.mxu3 }
 0x45a   : > { %v2809_v37 = vmax.f32 %v2807_v0, %v2762_v43  ;;  %v2321_v0 = vmax.f32 %v2241_v20, 0.0  ;;  %v2243_v35 = vadd.f32 %v2242_v11, %v15968_v33 }
 0x45b   : > { %v2840_v60 = vmax.f32 %v2838_v2, %v2763_v53  ;;  %v2188_v13 = vpop.f32.mrf.mxu2 }
 0x45c   : > { %v2189_v8 = vadd.f32 %v2188_v13, %v15866_v59 }
 0x45d   : > { %v2603_v49 = vpop.f32.mrf.mxu0 }
 0x45e   : > { %v2350_v17 = vmax.f32 %v2189_v8, 0.0  ;;  %v2604_v26 = vadd.f32 %v2603_v49, %v15856_v19  ;;  %v2692_v52 = vpop.f32.mrf.mxu1  ;;  %2284 = vmatmul.bf16.gmra.mxu3 %v15582_v38 }
 0x45f   : > { %v2693_v15 = vadd.f32 %v2692_v52, %v15858_v39 }
 0x460   : > { %v2397_v29 = vmax.f32 %v2395_v44, %v2350_v17  ;;  %v2764_v51 = vmax.f32 %v2604_v26, 0.0  ;;  %2637 = vmatmul.bf16.vlgmr.msrb.gmra.mxu2 %v15706_v47  ;;  %v2323_v44 = vmax.f32 %v2243_v35, 0.0 }
 0x461   : > { %v2765_v27 = vmax.f32 %v2693_v15, 0.0  ;;  %v2245_v1 = vpop.f32.mrf.mxu3 }
 0x462   : > { %v2810_v41 = vmax.f32 %v2808_v62, %v2764_v51  ;;  %v2246_v54 = vadd.f32 %v2245_v1, %v15968_v33 }
 0x463   : > { %v2841_v40 = vmax.f32 %v2839_v24, %v2765_v27  ;;  %v2191_v58 = vpop.f32.mrf.mxu2 }
 0x464   : > { %v2325_v3 = vmax.f32 %v2246_v54, 0.0  ;;  %v2192_v2 = vadd.f32 %v2191_v58, %v15866_v59 }
 0x465   : > { %v2605_v38 = vpop.f32.mrf.mxu0 }
 0x466   : > { %v2415_v31 = vmax.f32 %v2321_v0, %v2325_v3  ;;  %v2352_v45 = vmax.f32 %v2192_v2, 0.0  ;;  %v2606_v14 = vadd.f32 %v2605_v38, %v15856_v19  ;;  %v2694_v6 = vpop.f32.mrf.mxu1 }
 0x467   : > { %v2695_v63 = vadd.f32 %v2694_v6, %v15858_v39 }
 0x468   : > { %v2398_v9 = vmax.f32 %v2396_v28, %v2352_v45  ;;  %v2766_v5 = vmax.f32 %v2606_v14, 0.0 }
 0x469   : > { %v2767_v25 = vmax.f32 %v2695_v63, 0.0  ;;  %v2247_v57 = vpop.f32.mrf.mxu3 }
 0x46a   : > { %v2811_v7 = vmax.f32 %v2809_v37, %v2766_v5  ;;  %v2248_v48 = vadd.f32 %v2247_v57, %v15968_v33 }
 0x46b   : > { %v2842_v22 = vmax.f32 %v2840_v60, %v2767_v25  ;;  %v2193_v32 = vpop.f32.mrf.mxu2 }
 0x46c   : > { %v2327_v30 = vmax.f32 %v2248_v48, 0.0  ;;  %v2194_v23 = vadd.f32 %v2193_v32, %v15866_v59 }
 0x46d   : > { %v2608_v36 = vpop.f32.mrf.mxu0 }
 0x46e   : > { %v2416_v42 = vmax.f32 %v2323_v44, %v2327_v30  ;;  %v2354_v62 = vmax.f32 %v2194_v23, 0.0  ;;  %v2609_v24 = vadd.f32 %v2608_v36, %v15856_v19  ;;  %v2697_v50 = vpop.f32.mrf.mxu1  ;;  %2289 = vmatmul.bf16.gmra.mxu3 %v15598_v34 }
 0x46f   : > { %v2698_v16 = vadd.f32 %v2697_v50, %v15858_v39 }
 0x470   : > { %v2399_v61 = vmax.f32 %v2397_v29, %v2354_v62  ;;  %v2768_v18 = vmax.f32 %v2609_v24, 0.0 }
 0x471   : > { %v2769_v46 = vmax.f32 %v2698_v16, 0.0  ;;  %v2250_v10 = vpop.f32.mrf.mxu3 }
 0x472   : > { %v2812_v56 = vmax.f32 %v2810_v41, %v2768_v18  ;;  %v2251_v28 = vadd.f32 %v2250_v10, %v15968_v33 }
 0x473   : > { %v2843_v43 = vmax.f32 %v2841_v40, %v2769_v46  ;;  %v2196_v53 = vpop.f32.mrf.mxu2 }
 0x474   : > { %v2329_v11 = vmax.f32 %v2251_v28, 0.0  ;;  %v2197_v37 = vadd.f32 %v2196_v53, %v15866_v59 }
 0x475   : > { %v2610_v60 = vpop.f32.mrf.mxu0 }
 0x476   : > { %v2417_v13 = vmax.f32 %v2415_v31, %v2329_v11  ;;  %v2356_v8 = vmax.f32 %v2197_v37, 0.0  ;;  %v2611_v49 = vadd.f32 %v2610_v60, %v15856_v19  ;;  %v2699_v34 = vpop.f32.mrf.mxu1 }
 0x477   : > { %v2700_v17 = vadd.f32 %v2699_v34, %v15858_v39 }
 0x478   : > { %v2400_v26 = vmax.f32 %v2398_v9, %v2356_v8  ;;  %v2770_v52 = vmax.f32 %v2611_v49, 0.0 }
 0x479   : > { %v2771_v15 = vmax.f32 %v2700_v17, 0.0  ;;  %v2252_v20 = vpop.f32.mrf.mxu3 }
 0x47a   : > { %v15990_v29 = vmax.f32 %v2811_v7, %v2770_v52  ;;  %v2253_v51 = vadd.f32 %v2252_v20, %v15968_v33 }
 0x47b   : > { %v2844_v27 = vmax.f32 %v2842_v22, %v2771_v15  ;;  %v2198_v1 = vpop.f32.mrf.mxu2 }
 0x47c   : > { %v2331_v41 = vmax.f32 %v2253_v51, 0.0  ;;  %v2199_v54 = vadd.f32 %v2198_v1, %v15866_v59 }
 0x47d   : > { %v2613_v40 = vpop.f32.mrf.mxu0 }
 0x47e   : > { %v2418_v58 = vmax.f32 %v2416_v42, %v2331_v41  ;;  %v2358_v0 = vmax.f32 %v2199_v54, 0.0  ;;  %v2614_v3 = vadd.f32 %v2613_v40, %v15856_v19  ;;  %v2702_v2 = vpop.f32.mrf.mxu1  ;;  %2294 = vmatmul.bf16.gmra.mxu3 %v15615_v21 }
 0x47f   : > { %v2703_v38 = vadd.f32 %v2702_v2, %v15858_v39 }
 0x480   : > { %v2401_v31 = vmax.f32 %v2399_v61, %v2358_v0  ;;  %v2772_v45 = vmax.f32 %v2614_v3, 0.0 }
 0x481   : > { %v2773_v14 = vmax.f32 %v2703_v38, 0.0  ;;  %v2255_v6 = vpop.f32.mrf.mxu3 }
 0x482   : > { %v15997_v63 = vmax.f32 %v2812_v56, %v2772_v45  ;;  %v2256_v35 = vadd.f32 %v2255_v6, %v15968_v33 }
 0x483   : > { %v2845_v9 = vmax.f32 %v2843_v43, %v2773_v14  ;;  %v2201_v5 = vpop.f32.mrf.mxu2 }
 0x484   : > { %v2333_v25 = vmax.f32 %v2256_v35, 0.0  ;;  %v2202_v57 = vadd.f32 %v2201_v5, %v15866_v59 }
 0x485   : > { %v16011_v43 = vpop.f32.mrf.mxu0 }
 0x486   : > { %v2419_v7 = vmax.f32 %v2417_v13, %v2333_v25  ;;  %v2360_v48 = vmax.f32 %v2202_v57, 0.0  ;;  %v2704_v22 = vpop.f32.mrf.mxu1 }
 0x487   : > { %v2705_v21 = vadd.f32 %v2704_v22, %v15858_v39 }
 0x488   : > { %v2402_v32 = vmax.f32 %v2400_v26, %v2360_v48 }
 0x489   : > { %v2775_v44 = vmax.f32 %v2705_v21, 0.0  ;;  %v2257_v30 = vpop.f32.mrf.mxu3 }
 0x48a   : > { %v2258_v23 = vadd.f32 %v2257_v30, %v15968_v33 }
 0x48b   : > { %v16003_v36 = vmax.f32 %v2844_v27, %v2775_v44  ;;  %v2203_v42 = vpop.f32.mrf.mxu2 }
 0x48c   : > { %v2335_v62 = vmax.f32 %v2258_v23, 0.0  ;;  %v2204_v24 = vadd.f32 %v2203_v42, %v15866_v59 }
 0x48d   : > { %v16019_v15 = vpop.f32.mrf.mxu0 }
 0x48e   : > { %v2420_v50 = vmax.f32 %v2418_v58, %v2335_v62  ;;  %v2362_v16 = vmax.f32 %v2204_v24, 0.0  ;;  %v2707_v61 = vpop.f32.mrf.mxu1  ;;  %2299 = vmatmul.bf16.gmra.mxu3 %v15629_v12 }
 0x48f   : > { %v2708_v18 = vadd.f32 %v2707_v61, %v15858_v39 }
 0x490   : > { %v16008_v46 = vmax.f32 %v2401_v31, %v2362_v16 }
 0x491   : > { %v2777_v10 = vmax.f32 %v2708_v18, 0.0  ;;  %v2260_v56 = vpop.f32.mrf.mxu3 }
 0x492   : > { %v2261_v28 = vadd.f32 %v2260_v56, %v15968_v33 }
 0x493   : > { %v16013_v53 = vmax.f32 %v2845_v9, %v2777_v10  ;;  %v2206_v11 = vpop.f32.mrf.mxu2 }
 0x494   : > { %v2337_v37 = vmax.f32 %v2261_v28, 0.0  ;;  %v2207_v60 = vadd.f32 %v2206_v11, %v15866_v59 }
 0x495   : > { %v16023_v0 = vpop.f32.mrf.mxu0 }
 0x496   : > { %v2421_v13 = vmax.f32 %v2419_v7, %v2337_v37  ;;  %v2364_v8 = vmax.f32 %v2207_v60, 0.0  ;;  %v2709_v49 = vpop.f32.mrf.mxu1 }
 0x497   : > { %v2710_v18 = vadd.f32 %v2709_v49, %v15858_v39 }
 0x498   : > { %v16016_v12 = vmax.f32 %v2402_v32, %v2364_v8 }
 0x499   : > { %v2262_v34 = vpop.f32.mrf.mxu3  ;;  %v2779_v37 = vmax.f32 %v2710_v18, 0.0 }
 0x49a   : > { %v2263_v17 = vadd.f32 %v2262_v34, %v15968_v33 }
 0x49b   : > { %v2208_v26 = vpop.f32.mrf.mxu2 }
 0x49c   : > { %v2339_v52 = vmax.f32 %v2263_v17, 0.0  ;;  %v2209_v34 = vadd.f32 %v2208_v26, %v15866_v59 }
 0x49d   : > { %v16027_v6 = vpop.f32.mrf.mxu0 }
 0x49e   : > { %v2422_v20 = vmax.f32 %v2420_v50, %v2339_v52  ;;  %v2712_v51 = vpop.f32.mrf.mxu1  ;;  %2304 = vmatmul.bf16.gmra.mxu3 %v15652_v4 }
 0x49f   : > { %v2713_v28 = vadd.f32 %v2712_v51, %v15858_v39 }
 0x4a1   : > { %v2265_v27 = vpop.f32.mrf.mxu3  ;;  %v2781_v52 = vmax.f32 %v2713_v28, 0.0 }
 0x4a2   : > { %v2266_v1 = vadd.f32 %v2265_v27, %v15968_v33 }
 0x4a3   : > { %v2211_v41 = vpop.f32.mrf.mxu2 }
 0x4a4   : > { %v2341_v54 = vmax.f32 %v2266_v1, 0.0 }
 0x4a5   : > { %v16031_v22 = vpop.f32.mrf.mxu0 }
 0x4a6   : > { %v2423_v40 = vmax.f32 %v2421_v13, %v2341_v54  ;;  %v2714_v58 = vpop.f32.mrf.mxu1 }
 0x4a9   : > { %v2267_v3 = vpop.f32.mrf.mxu3 }
 0x4aa   : > { %v2268_v2 = vadd.f32 %v2267_v3, %v15968_v33 }
 0x4ab   : > { %v2213_v38 = vpop.f32.mrf.mxu2 }
 0x4ac   : > { %v2343_v31 = vmax.f32 %v2268_v2, 0.0  ;;  %v2214_v51 = vadd.f32 %v2213_v38, %v15866_v59  ;;  %v2366_v2 = vmax.f32 %v2209_v34, 0.0 }
 0x4ad   : > { %v16035_v24 = vpop.f32.mrf.mxu0 }
 0x4ae   : > { %v2424_v45 = vmax.f32 %v2422_v20, %v2343_v31  ;;  %v2717_v14 = vpop.f32.mrf.mxu1  ;;  %2309 = vmatmul.bf16.gmra.mxu3 %v15686_v55  ;;  %v2212_v20 = vadd.f32 %v2211_v41, %v15866_v59 }
 0x4af   : > { %v2718_v60 = vadd.f32 %v2717_v14, %v15858_v39 }
 0x4b0   : > { %v2368_v38 = vmax.f32 %v2212_v20, 0.0  ;;  %v2859_v20 = vld [vmem:[#allocation2 + $0x38] sm:$0xff] }
 0x4b1   : > { %v2270_v4 = vpop.f32.mrf.mxu3  ;;  %v2785_v3 = vmax.f32 %v2718_v60, 0.0 }
 0x4b2   : > { %v2271_v35 = vadd.f32 %v2270_v4, %v15968_v33  ;;  %v2849_v4 = vmax.f32 %v16013_v53, %v2781_v52  ;;  %v2406_v18 = vmax.f32 %v16016_v12, %v2368_v38 }
 0x4b3   : > { %v2216_v9 = vpop.f32.mrf.mxu2 }
 0x4b4   : > { %v2345_v5 = vmax.f32 %v2271_v35, 0.0  ;;  %v2217_v31 = vadd.f32 %v2216_v9, %v15866_v59 }
 0x4b5   : > { %v16045_v17 = vpop.f32.mrf.mxu0 }
 0x4b6   : > { %v2425_v25 = vmax.f32 %v2423_v40, %v2345_v5  ;;  %v2719_v57 = vpop.f32.mrf.mxu1 }
 0x4b7   : > { %v2720_v49 = vadd.f32 %v2719_v57, %v15858_v39  ;;  %v2370_v57 = vmax.f32 %v2214_v51, 0.0  ;;  %v2616_v51 = vadd.f32 %v16011_v43, %v15856_v19  ;;  %v2446_v43 = vld [vmem:[#allocation2 + $0x8] sm:$0xff] }
 0x4b9   : > { %v2272_v7 = vpop.f32.mrf.mxu3 }
 0x4ba   : > { %v2273_v48 = vadd.f32 %v2272_v7, %v15968_v33 }
 0x4bb   : > { %v2218_v21 = vpop.f32.mrf.mxu2 }
 0x4bc   : > { %v2347_v32 = vmax.f32 %v2273_v48, 0.0  ;;  %v2219_v35 = vadd.f32 %v2218_v21, %v15866_v59  ;;  %v2851_v48 = vmax.f32 %v2849_v4, %v2785_v3 }
 0x4be   : > { %v2426_v44 = vmax.f32 %v2424_v45, %v2347_v32  ;;  %v2722_v30 = vpop.f32.mrf.mxu1  ;;  %2314 = vmatmul.bf16.gmra.mxu3 %v15706_v47  ;;  %v2715_v47 = vadd.f32 %v2714_v58, %v15858_v39  ;;  %v2848_v58 = vmax.f32 %v16003_v36, %v2779_v37  ;;  %v2787_v45 = vmax.f32 %v2720_v49, 0.0 }
 0x4bf   : > { %v2723_v1 = vadd.f32 %v2722_v30, %v15858_v39  ;;  %v2374_v21 = vmax.f32 %v2219_v35, 0.0 }
 0x4c0   : > { %v2783_v27 = vmax.f32 %v2715_v47, 0.0 }
 0x4c1   : > { %v2275_v55 = vpop.f32.mrf.mxu3  ;;  %v2789_v7 = vmax.f32 %v2723_v1, 0.0 }
 0x4c2   : > { %v2276_v23 = vadd.f32 %v2275_v55, %v15968_v33  ;;  %v2372_v55 = vmax.f32 %v2217_v31, 0.0  ;;  %v2621_v31 = vadd.f32 %v16023_v0, %v15856_v19 }
 0x4c3   : > { %v2221_v42 = vpop.f32.mrf.mxu2  ;;  %v2853_v28 = vmax.f32 %v2851_v48, %v2789_v7  ;;  %v2631_v7 = vadd.f32 %v16045_v17, %v15856_v19 }
 0x4c4   : > { %v2349_v62 = vmax.f32 %v2276_v23, 0.0  ;;  %v2222_v32 = vadd.f32 %v2221_v42, %v15866_v59 }
 0x4c6   : > { %v2427_v50 = vmax.f32 %v2425_v25, %v2349_v62  ;;  %v2724_v16 = vpop.f32.mrf.mxu1  ;;  %v2850_v25 = vmax.f32 %v2848_v58, %v2783_v27 }
 0x4c7   : > { %v2725_v54 = vadd.f32 %v2724_v16, %v15858_v39  ;;  %v2405_v16 = vmax.f32 %v16008_v46, %v2366_v2 }
 0x4c8   : > { %v2852_v23 = vmax.f32 %v2850_v25, %v2787_v45 }
 0x4c9   : > { %v2277_v61 = vpop.f32.mrf.mxu3  ;;  %v2791_v36 = vmax.f32 %v2725_v54, 0.0 }
 0x4ca   : > { %v2278_v10 = vadd.f32 %v2277_v61, %v15968_v33 }
 0x4cb   : > { %v2223_v56 = vpop.f32.mrf.mxu2 }
 0x4cc   : > { %v2351_v11 = vmax.f32 %v2278_v10, 0.0  ;;  %v2633_v10 = vpop.f32.mrf.mxu0 }
 0x4ce   : > { %v16042_v13 = vmax.f32 %v2426_v44, %v2351_v11  ;;  %v2727_v8 = vpop.f32.mrf.mxu1  ;;  %v2224_v44 = vadd.f32 %v2223_v56, %v15866_v59  ;;  %v2854_v11 = vmax.f32 %v2852_v23, %v2791_v36  ;;  %v2407_v56 = vmax.f32 %v2405_v16, %v2370_v57 }
 0x4cf   : > { %v2728_v14 = vadd.f32 %v2727_v8, %v15858_v39  ;;  %v2408_v8 = vmax.f32 %v2406_v18, %v2372_v55  ;;  %v2778_v57 = vmax.f32 %v2621_v31, 0.0 }
 0x4d0   : > { %v2378_v37 = vmax.f32 %v2224_v44, 0.0  ;;  %v2409_v46 = vmax.f32 %v2407_v56, %v2374_v21 }
 0x4d1   : > { %v2280_v40 = vpop.f32.mrf.mxu3  ;;  %v2793_v62 = vmax.f32 %v2728_v14, 0.0 }
 0x4d2   : > { %v2281_v26 = vadd.f32 %v2280_v40, %v15968_v33  ;;  %v2411_v40 = vmax.f32 %v2409_v46, %v2378_v37 }
 0x4d3   : > { %v2226_v41 = vpop.f32.mrf.mxu2  ;;  %v2855_v34 = vmax.f32 %v2853_v28, %v2793_v62 }
 0x4d4   : > { %v2353_v5 = vmax.f32 %v2281_v26, 0.0  ;;  %v2227_v61 = vadd.f32 %v2226_v41, %v15866_v59  ;;  %v2619_v26 = vadd.f32 %v16019_v15, %v15856_v19  ;;  %v2774_v41 = vmax.f32 %v2616_v51, 0.0  ;;  %v2635_v0 = vpop.f32.mrf.mxu0 }
 0x4d6   : > { %v2429_v9 = vmax.f32 %v2427_v50, %v2353_v5  ;;  %v2729_v30 = vpop.f32.mrf.mxu1  ;;  %v2376_v50 = vmax.f32 %v2222_v32, 0.0  ;;  %v2380_v52 = vmax.f32 %v2227_v61, 0.0  ;;  %v2776_v15 = vmax.f32 %v2619_v26, 0.0 }
 0x4d7   : > { %v2730_v53 = vadd.f32 %v2729_v30, %v15858_v39  ;;  %v2629_v5 = vadd.f32 %v16035_v24, %v15856_v19  ;;  %v2815_v48 = vmax.f32 %v15990_v29, %v2774_v41  ;;  %v2636_v30 = vadd.f32 %v2635_v0, %v15856_v19 }
 0x4d8   : > { %v2410_v54 = vmax.f32 %v2408_v8, %v2376_v50  ;;  %v2816_v24 = vmax.f32 %v15997_v63, %v2776_v15 }
 0x4d9   : > { %v2795_v42 = vmax.f32 %v2730_v53, 0.0  ;;  %v2282_v47 = vpop.f32.mrf.mxu3  ;;  %v2784_v23 = vmax.f32 %v2629_v5, 0.0  ;;  %v2817_v62 = vmax.f32 %v2815_v48, %v2778_v57  ;;  %v2786_v53 = vmax.f32 %v2631_v7, 0.0 }
 0x4da   : > { %v2283_v60 = vadd.f32 %v2282_v47, %v15968_v33  ;;  %v2412_v45 = vmax.f32 %v2410_v54, %v2380_v52  ;;  %v2790_v29 = vmax.f32 %v2636_v30, 0.0 }
 0x4db   : > { %v2856_v39 = vmax.f32 %v2854_v11, %v2795_v42  ;;  %v2228_v49 = vpop.f32.mrf.mxu2 }
 0x4dc   : > { %v2355_v27 = vmax.f32 %v2283_v60, 0.0  ;;  %v2229_v12 = vadd.f32 %v2228_v49, %v15866_v59  ;;  %v2624_v59 = vadd.f32 %v16027_v6, %v15856_v19 }
 0x4dd   : > { %v2857_v1 = vmax.f32 %v2855_v34, %v2856_v39  ;;  %v2858_v39 = vld [vmem:[#allocation2 + $0x28] sm:$0xff] }
 0x4de   : > { %v2430_v58 = vmax.f32 %v16042_v13, %v2355_v27  ;;  %v2382_v3 = vmax.f32 %v2229_v12, 0.0  ;;  %v2626_v13 = vadd.f32 %v16031_v22, %v15856_v19  ;;  %v2780_v32 = vmax.f32 %v2624_v59, 0.0 }
 0x4df   : > { %v2861_v2 = vmax.f32 %v2859_v20, %v2857_v1  ;;  %v2634_v22 = vadd.f32 %v2633_v10, %v15856_v19 }
 0x4e0   : > { %v2413_v14 = vmax.f32 %v2411_v40, %v2382_v3  ;;  %v2782_v44 = vmax.f32 %v2626_v13, 0.0  ;;  %v2818_v17 = vmax.f32 %v2816_v24, %v2780_v32 }
 0x4e1   : > { %2863 = vst [vmem:[#allocation2 + $0x38] sm:$0xff] %v2861_v2  ;;  %v2285_v4 = vpop.f32.mrf.mxu3  ;;  %v2788_v18 = vmax.f32 %v2634_v22, 0.0 }
 0x4e2   : > { %v2414_v38 = vmax.f32 %v2412_v45, %v2413_v14  ;;  %v2286_v35 = vadd.f32 %v2285_v4, %v15968_v33  ;;  %v2819_v61 = vmax.f32 %v2817_v62, %v2782_v44  ;;  %v2820_v11 = vmax.f32 %v2818_v17, %v2784_v23 }
 0x4e3   : > { %v2638_v25 = vpop.f32.mrf.mxu2 }
 0x4e4   : > { %v2448_v6 = vmax.f32 %v2446_v43, %v2414_v38  ;;  %v2357_v36 = vmax.f32 %v2286_v35, 0.0  ;;  %v2639_v16 = vadd.f32 %v2638_v25, %v15856_v19  ;;  %v2821_v42 = vmax.f32 %v2819_v61, %v2786_v53 }
 0x4e5   : > { %v2822_v63 = vmax.f32 %v2820_v11, %v2788_v18  ;;  %v2447_v11 = vld [vmem:[#allocation2 + $0x20] sm:$0xff] }
 0x4e6   : > { %2450 = vst [vmem:[#allocation2 + $0x8] sm:$0xff] %v2448_v6  ;;  %v2431_v55 = vmax.f32 %v2429_v9, %v2357_v36  ;;  %v2792_v47 = vmax.f32 %v2639_v16, 0.0  ;;  %v2823_v50 = vmax.f32 %v2821_v42, %v2790_v29 }
 0x4e8   : > { %v2824_v8 = vmax.f32 %v2822_v63, %v2792_v47 }
 0x4e9   : > { %v2287_v21 = vpop.f32.mrf.mxu3 }
 0x4ea   : > { %v2288_v28 = vadd.f32 %v2287_v21, %v15968_v33 }
 0x4eb   : > { %v2640_v10 = vpop.f32.mrf.mxu2 }
 0x4ec   : > { %v2359_v56 = vmax.f32 %v2288_v28, 0.0  ;;  %v2641_v9 = vadd.f32 %v2640_v10, %v15856_v19 }
 0x4ee   : > { %v2432_v37 = vmax.f32 %v2430_v58, %v2359_v56  ;;  %v2794_v60 = vmax.f32 %v2641_v9, 0.0 }
 0x4f0   : > { %v2825_v34 = vmax.f32 %v2823_v50, %v2794_v60 }
 0x4f1   : > { %v2290_v49 = vpop.f32.mrf.mxu3 }
 0x4f2   : > { %v2826_v46 = vmax.f32 %v2824_v8, %v2825_v34  ;;  %v2291_v52 = vadd.f32 %v2290_v49, %v15968_v33 }
 0x4f4   : > { %v2860_v20 = vmax.f32 %v2858_v39, %v2826_v46  ;;  %v2361_v27 = vmax.f32 %v2291_v52, 0.0 }
 0x4f6   : > { %2862 = vst [vmem:[#allocation2 + $0x28] sm:$0xff] %v2860_v20  ;;  %v2433_v12 = vmax.f32 %v2431_v55, %v2361_v27 }
 0x4f9   : > { %v2292_v51 = vpop.f32.mrf.mxu3 }
 0x4fa   : > { %v2293_v1 = vadd.f32 %v2292_v51, %v15968_v33 }
 0x4fc   : > { %v2363_v54 = vmax.f32 %v2293_v1, 0.0 }
 0x4fe   : > { %v2434_v19 = vmax.f32 %v2432_v37, %v2363_v54 }
 0x501   : > { %v2295_v40 = vpop.f32.mrf.mxu3 }
 0x502   : > { %v2296_v58 = vadd.f32 %v2295_v40, %v15968_v33 }
 0x504   : > { %v2365_v3 = vmax.f32 %v2296_v58, 0.0 }
 0x506   : > { %v2435_v26 = vmax.f32 %v2433_v12, %v2365_v3 }
 0x509   : > { %v2297_v2 = vpop.f32.mrf.mxu3 }
 0x50a   : > { %v2298_v4 = vadd.f32 %v2297_v2, %v15968_v33 }
 0x50c   : > { %v2367_v15 = vmax.f32 %v2298_v4, 0.0 }
 0x50e   : > { %v2436_v36 = vmax.f32 %v2434_v19, %v2367_v15 }
 0x511   : > { %v2300_v31 = vpop.f32.mrf.mxu3 }
 0x512   : > { %v2301_v13 = vadd.f32 %v2300_v31, %v15968_v33 }
 0x514   : > { %v2369_v25 = vmax.f32 %v2301_v13, 0.0 }
 0x516   : > { %v2437_v22 = vmax.f32 %v2435_v26, %v2369_v25 }
 0x519   : > { %v2302_v45 = vpop.f32.mrf.mxu3 }
 0x51a   : > { %v2303_v38 = vadd.f32 %v2302_v45, %v15968_v33 }
 0x51c   : > { %v2371_v57 = vmax.f32 %v2303_v38, 0.0 }
 0x51e   : > { %v2438_v30 = vmax.f32 %v2436_v36, %v2371_v57 }
 0x521   : > { %v2305_v14 = vpop.f32.mrf.mxu3 }
 0x522   : > { %v2306_v5 = vadd.f32 %v2305_v14, %v15968_v33 }
 0x524   : > { %v2373_v48 = vmax.f32 %v2306_v5, 0.0 }
 0x526   : > { %v2439_v62 = vmax.f32 %v2437_v22, %v2373_v48 }
 0x529   : > { %v2307_v41 = vpop.f32.mrf.mxu3 }
 0x52a   : > { %v2308_v0 = vadd.f32 %v2307_v41, %v15968_v33 }
 0x52c   : > { %v2375_v32 = vmax.f32 %v2308_v0, 0.0 }
 0x52e   : > { %v2440_v53 = vmax.f32 %v2438_v30, %v2375_v32 }
 0x531   : > { %v2310_v59 = vpop.f32.mrf.mxu3 }
 0x532   : > { %v2311_v7 = vadd.f32 %v2310_v59, %v15968_v33 }
 0x534   : > { %v2377_v55 = vmax.f32 %v2311_v7, 0.0 }
 0x536   : > { %v2441_v21 = vmax.f32 %v2439_v62, %v2377_v55 }
 0x539   : > { %v2312_v43 = vpop.f32.mrf.mxu3 }
 0x53a   : > { %v2313_v6 = vadd.f32 %v2312_v43, %v15968_v33 }
 0x53c   : > { %v2379_v24 = vmax.f32 %v2313_v6, 0.0 }
 0x53e   : > { %v2442_v61 = vmax.f32 %v2440_v53, %v2379_v24 }
 0x541   : > { %v2315_v35 = vpop.f32.mrf.mxu3 }
 0x542   : > { %v2316_v44 = vadd.f32 %v2315_v35, %v15968_v33 }
 0x544   : > { %v2381_v16 = vmax.f32 %v2316_v44, 0.0 }
 0x546   : > { %v2443_v29 = vmax.f32 %v2441_v21, %v2381_v16 }
 0x549   : > { %v2317_v23 = vpop.f32.mrf.mxu3 }
 0x54a   : > { %v2318_v17 = vadd.f32 %v2317_v23, %v15968_v33 }
 0x54c   : > { %v2383_v18 = vmax.f32 %v2318_v17, 0.0 }
 0x54e   : > { %v2444_v28 = vmax.f32 %v2442_v61, %v2383_v18 }
 0x550   : > { %v2445_v10 = vmax.f32 %v2443_v29, %v2444_v28  ;;  %2867 = sbr.rel (%p10048_p1) target bundleno = 2513 (0x9d1), region = 132 }
 0x552   : > { %v2449_v42 = vmax.f32 %v2447_v11, %v2445_v10 }
 0x554   : > { %2451 = vst [vmem:[#allocation2 + $0x20] sm:$0xff] %v2449_v42 }
 0x555   : > { %v10163_v47 = vld [vmem:[#allocation15 + $0xe0] sm:$0xf]  ;;  %v13483_v56 = vld [vmem:[#allocation15 + $0xec] sm:$0xf0]  ;;  %vm9436_vm1 = vcmask 1040384   ;;  %vm9438_vm2 = vcmask 1042434  }
 0x556   : > { %v10291_v9 = vld [vmem:[#allocation15 + $0x1e0] sm:$0xf]  ;;  %v10164_v63 = vor.u32 %v13483_v56, %v10163_v47  ;;  %v13515_v50 = vld [vmem:[#allocation15 + $0x1ec] sm:$0xf0]  ;;  %vm9440_vm3 = vcmask 1041408   ;;  %vm9442_vm4 = vcmask 1044484  }
 0x557   : > { %v10419_v37 = vld [vmem:[#allocation15 + $0x2e0] sm:$0xf]  ;;  %v13547_v60 = vld [vmem:[#allocation15 + $0x2ec] sm:$0xf0]  ;;  %v10292_v33 = vor.u32 %v13515_v50, %v10291_v9  ;;  %vm9444_vm5 = vcmask 1046534   ;;  %vm9446_vm6 = vcmask 1045508  }
 0x558   : > { %v10420_v8 = vor.u32 %v13547_v60, %v10419_v37  ;;  %v10547_v34 = vld [vmem:[#allocation15 + $0x3e0] sm:$0xf]  ;;  %v13579_v39 = vld [vmem:[#allocation15 + $0x3ec] sm:$0xf0]  ;;  %4478 = vmatpush.bf16.msra.mxu0 %v10164_v63  ;;  %vm9448_vm7 = vcmask 1043456  }
 0x559   : > { %v10147_v49 = vld [vmem:[#allocation15 + $0xc0] sm:$0xf]  ;;  %v10548_v46 = vor.u32 %v13579_v39, %v10547_v34  ;;  %v13479_v52 = vld [vmem:[#allocation15 + $0xcc] sm:$0xf0]  ;;  %4491 = vmatpush.bf16.msra.mxu1 %v10292_v33 }
 0x55a   : > { %v10275_v20 = vld [vmem:[#allocation15 + $0x1c0] sm:$0xf]  ;;  %v13511_v27 = vld [vmem:[#allocation15 + $0x1cc] sm:$0xf0]  ;;  %4504 = vmatpush.bf16.msra.mxu2 %v10420_v8  ;;  %v10148_v12 = vor.u32 %v13479_v52, %v10147_v49 }
 0x55b   : > { %v10276_v51 = vor.u32 %v13511_v27, %v10275_v20  ;;  %v10403_v1 = vld [vmem:[#allocation15 + $0x2c0] sm:$0xf]  ;;  %v13543_v54 = vld [vmem:[#allocation15 + $0x2cc] sm:$0xf0]  ;;  %4517 = vmatpush.bf16.msra.mxu3 %v10548_v46 }
 0x55c   : > { %v10531_v19 = vld [vmem:[#allocation15 + $0x3c0] sm:$0xf]  ;;  %v10404_v40 = vor.u32 %v13543_v54, %v10403_v1  ;;  %v13575_v58 = vld [vmem:[#allocation15 + $0x3cc] sm:$0xf0]  ;;  %4479 = vmatpush.bf16.msra.mxu0 %v10148_v12 }
 0x55d   : > { %v10131_v3 = vld [vmem:[#allocation15 + $0xa0] sm:$0xf]  ;;  %v13475_v26 = vld [vmem:[#allocation15 + $0xac] sm:$0xf0]  ;;  %v10532_v2 = vor.u32 %v13575_v58, %v10531_v19  ;;  %4492 = vmatpush.bf16.msra.mxu1 %v10276_v51 }
 0x55e   : > { %v10259_v31 = vld [vmem:[#allocation15 + $0x1a0] sm:$0xf]  ;;  %v13507_v45 = vld [vmem:[#allocation15 + $0x1ac] sm:$0xf0]  ;;  %v10132_v41 = vor.u32 %v13475_v26, %v10131_v3  ;;  %4505 = vmatpush.bf16.msra.mxu2 %v10404_v40 }
 0x55f   : > { %v10387_v14 = vld [vmem:[#allocation15 + $0x2a0] sm:$0xf]  ;;  %v13539_v59 = vld [vmem:[#allocation15 + $0x2ac] sm:$0xf0]  ;;  %v10260_v13 = vor.u32 %v13507_v45, %v10259_v31  ;;  %4518 = vmatpush.bf16.msra.mxu3 %v10532_v2 }
 0x560   : > { %v10515_v43 = vld [vmem:[#allocation15 + $0x3a0] sm:$0xf]  ;;  %v13571_v4 = vld [vmem:[#allocation15 + $0x3ac] sm:$0xf0]  ;;  %v10388_v38 = vor.u32 %v13539_v59, %v10387_v14  ;;  %4480 = vmatpush.bf16.msra.mxu0 %v10132_v41 }
 0x561   : > { %v10115_v35 = vld [vmem:[#allocation15 + $0x80] sm:$0xf]  ;;  %v13471_v15 = vld [vmem:[#allocation15 + $0x8c] sm:$0xf0]  ;;  %v10516_v0 = vor.u32 %v13571_v4, %v10515_v43  ;;  %4493 = vmatpush.bf16.msra.mxu1 %v10260_v13 }
 0x562   : > { %v10243_v5 = vld [vmem:[#allocation15 + $0x180] sm:$0xf]  ;;  %v13503_v25 = vld [vmem:[#allocation15 + $0x18c] sm:$0xf0]  ;;  %v10116_v48 = vor.u32 %v13471_v15, %v10115_v35  ;;  %4506 = vmatpush.bf16.msra.mxu2 %v10388_v38 }
 0x563   : > { %v10371_v57 = vld [vmem:[#allocation15 + $0x280] sm:$0xf]  ;;  %v13535_v7 = vld [vmem:[#allocation15 + $0x28c] sm:$0xf0]  ;;  %v10244_v32 = vor.u32 %v13503_v25, %v10243_v5  ;;  %4519 = vmatpush.bf16.msra.mxu3 %v10516_v0 }
 0x564   : > { %v10499_v6 = vld [vmem:[#allocation15 + $0x380] sm:$0xf]  ;;  %v13567_v36 = vld [vmem:[#allocation15 + $0x38c] sm:$0xf0]  ;;  %v10372_v44 = vor.u32 %v13535_v7, %v10371_v57  ;;  %4481 = vmatpush.bf16.msra.mxu0 %v10116_v48 }
 0x565   : > { %v10099_v22 = vld [vmem:[#allocation15 + $0x60] sm:$0xf]  ;;  %v13467_v30 = vld [vmem:[#allocation15 + $0x6c] sm:$0xf0]  ;;  %v10500_v24 = vor.u32 %v13567_v36, %v10499_v6  ;;  %4494 = vmatpush.bf16.msra.mxu1 %v10244_v32 }
 0x566   : > { %v10227_v55 = vld [vmem:[#allocation15 + $0x160] sm:$0xf]  ;;  %v13499_v23 = vld [vmem:[#allocation15 + $0x16c] sm:$0xf0]  ;;  %v10100_v21 = vor.u32 %v13467_v30, %v10099_v22  ;;  %4507 = vmatpush.bf16.msra.mxu2 %v10372_v44 }
 0x567   : > { %v10355_v62 = vld [vmem:[#allocation15 + $0x260] sm:$0xf]  ;;  %v13531_v53 = vld [vmem:[#allocation15 + $0x26c] sm:$0xf0]  ;;  %v10228_v61 = vor.u32 %v13499_v23, %v10227_v55  ;;  %4520 = vmatpush.bf16.msra.mxu3 %v10500_v24 }
 0x568   : > { %v10483_v16 = vld [vmem:[#allocation15 + $0x360] sm:$0xf]  ;;  %v13563_v17 = vld [vmem:[#allocation15 + $0x36c] sm:$0xf0]  ;;  %v10356_v18 = vor.u32 %v13531_v53, %v10355_v62  ;;  %4482 = vmatpush.bf16.msra.mxu0 %v10100_v21 }
 0x569   : > { %v10083_v29 = vld [vmem:[#allocation15 + $0x40] sm:$0xf]  ;;  %v13463_v28 = vld [vmem:[#allocation15 + $0x4c] sm:$0xf0]  ;;  %v10484_v10 = vor.u32 %v13563_v17, %v10483_v16  ;;  %4495 = vmatpush.bf16.msra.mxu1 %v10228_v61 }
 0x56a   : > { %v10211_v11 = vld [vmem:[#allocation15 + $0x140] sm:$0xf]  ;;  %v13495_v42 = vld [vmem:[#allocation15 + $0x14c] sm:$0xf0]  ;;  %v10084_v50 = vor.u32 %v13463_v28, %v10083_v29  ;;  %4508 = vmatpush.bf16.msra.mxu2 %v10356_v18 }
 0x56b   : > { %v10339_v47 = vld [vmem:[#allocation15 + $0x240] sm:$0xf]  ;;  %v13527_v56 = vld [vmem:[#allocation15 + $0x24c] sm:$0xf0]  ;;  %v10212_v37 = vor.u32 %v13495_v42, %v10211_v11  ;;  %4521 = vmatpush.bf16.msra.mxu3 %v10484_v10 }
 0x56c   : > { %v10467_v9 = vld [vmem:[#allocation15 + $0x340] sm:$0xf]  ;;  %v13559_v63 = vld [vmem:[#allocation15 + $0x34c] sm:$0xf0]  ;;  %v10340_v60 = vor.u32 %v13527_v56, %v10339_v47  ;;  %4483 = vmatpush.bf16.msra.mxu0 %v10084_v50 }
 0x56d   : > { %v10067_v33 = vld [vmem:[#allocation15 + $0x20] sm:$0xf]  ;;  %v13459_v8 = vld [vmem:[#allocation15 + $0x2c] sm:$0xf0]  ;;  %v10468_v39 = vor.u32 %v13559_v63, %v10467_v9  ;;  %4496 = vmatpush.bf16.msra.mxu1 %v10212_v37  ;;  %v2868_v37 = vld [vmem:[#allocation2 + $0x30] sm:$0xff] }
 0x56e   : > { %v10195_v34 = vld [vmem:[#allocation15 + $0x120] sm:$0xf]  ;;  %v13491_v49 = vld [vmem:[#allocation15 + $0x12c] sm:$0xf0]  ;;  %v10068_v12 = vor.u32 %v13459_v8, %v10067_v33  ;;  %4509 = vmatpush.bf16.msra.mxu2 %v10340_v60 }
 0x56f   : > { %v10323_v46 = vld [vmem:[#allocation15 + $0x220] sm:$0xf]  ;;  %v13523_v52 = vld [vmem:[#allocation15 + $0x22c] sm:$0xf0]  ;;  %v10196_v54 = vor.u32 %v13491_v49, %v10195_v34  ;;  %4522 = vmatpush.bf16.msra.mxu3 %v10468_v39  ;;  %v2876_v39 = vrot.slane %v2868_v37, 4  ;;  %v2871_v49 = vld [vmem:[#allocation2 + $0x10] sm:$0xff] }
 0x570   : > { %v10451_v20 = vld [vmem:[#allocation15 + $0x320] sm:$0xf]  ;;  %v13555_v27 = vld [vmem:[#allocation15 + $0x32c] sm:$0xf0]  ;;  %v10324_v19 = vor.u32 %v13523_v52, %v10323_v46  ;;  %4484 = vmatpush.bf16.msra.mxu0 %v10068_v12  ;;  %v2869_v46 = vld [vmem:[#allocation2] sm:$0xff]  ;;  %v2894_v12 = vrot.slane %v2871_v49, 4 }
 0x571   : > { %v10051_v51 = vld [vmem:[#allocation15] sm:$0xf]  ;;  %v13455_v1 = vld [vmem:[#allocation15 + $0xc] sm:$0xf0]  ;;  %v10452_v26 = vor.u32 %v13555_v27, %v10451_v20  ;;  %4497 = vmatpush.bf16.msra.mxu1 %v10196_v54 }
 0x572   : > { %v10179_v40 = vld [vmem:[#allocation15 + $0x100] sm:$0xf]  ;;  %v13487_v58 = vld [vmem:[#allocation15 + $0x10c] sm:$0xf0]  ;;  %v10052_v43 = vor.u32 %v13455_v1, %v10051_v51  ;;  %4510 = vmatpush.bf16.msra.mxu2 %v10324_v19  ;;  %v2882_v51 = vrot.slane %v2869_v46, 4 }
 0x573   : > { %v10307_v3 = vld [vmem:[#allocation15 + $0x200] sm:$0xf]  ;;  %v13519_v2 = vld [vmem:[#allocation15 + $0x20c] sm:$0xf0]  ;;  %v10180_v35 = vor.u32 %v13487_v58, %v10179_v40  ;;  %4523 = vmatpush.bf16.msra.mxu3 %v10452_v26  ;;  %v2877_v40 = vmax.f32 %v2868_v37, %v2876_v39 }
 0x574   : > { %v10435_v31 = vld [vmem:[#allocation15 + $0x300] sm:$0xf]  ;;  %v13551_v45 = vld [vmem:[#allocation15 + $0x30c] sm:$0xf0]  ;;  %v10308_v15 = vor.u32 %v13519_v2, %v10307_v3  ;;  %4485 = vmatpush.bf16.msra.mxu0 %v10052_v43  ;;  %v2895_v2 = vmax.f32 %v2871_v49, %v2894_v12 }
 0x575   : > { %v10675_v14 = vld [vmem:[#allocation15 + $0x4e0] sm:$0xf]  ;;  %v13611_v41 = vld [vmem:[#allocation15 + $0x4ec] sm:$0xf0]  ;;  %v10436_v25 = vor.u32 %v13551_v45, %v10435_v31  ;;  %4498 = vmatpush.bf16.msra.mxu1 %v10180_v35  ;;  %v2883_v31 = vmax.f32 %v2869_v46, %v2882_v51 }
 0x576   : > { %v10803_v59 = vld [vmem:[#allocation15 + $0x5e0] sm:$0xf]  ;;  %v13643_v4 = vld [vmem:[#allocation15 + $0x5ec] sm:$0xf0]  ;;  %v10676_v57 = vor.u32 %v13611_v41, %v10675_v14  ;;  %4511 = vmatpush.bf16.msra.mxu2 %v10308_v15  ;;  %v2896_v15 = vrot.slane %v2895_v2, 2 }
 0x577   : > { %v10931_v13 = vld [vmem:[#allocation15 + $0x6e0] sm:$0xf]  ;;  %v13675_v38 = vld [vmem:[#allocation15 + $0x6ec] sm:$0xf0]  ;;  %v10804_v7 = vor.u32 %v13643_v4, %v10803_v59  ;;  %4524 = vmatpush.bf16.msra.mxu3 %v10436_v25  ;;  %v2878_v4 = vrot.slane %v2877_v40, 2 }
 0x578   : > { %v11059_v5 = vld [vmem:[#allocation15 + $0x7e0] sm:$0xf]  ;;  %v13707_v0 = vld [vmem:[#allocation15 + $0x7ec] sm:$0xf0]  ;;  %v10932_v6 = vor.u32 %v13675_v38, %v10931_v13  ;;  %4530 = vmatpush.bf16.msrb.mxu0 %v10676_v57 }
 0x579   : > { %v10659_v36 = vld [vmem:[#allocation15 + $0x4c0] sm:$0xf]  ;;  %v13607_v48 = vld [vmem:[#allocation15 + $0x4cc] sm:$0xf0]  ;;  %v11060_v44 = vor.u32 %v13707_v0, %v11059_v5  ;;  %4543 = vmatpush.bf16.msrb.mxu1 %v10804_v7  ;;  %v2884_v5 = vrot.slane %v2883_v31, 2  ;;  %v2879_v7 = vmax.f32 %v2877_v40, %v2878_v4  ;;  %v2873_v4 = vld [vmem:[#allocation2 + $0x20] sm:$0xff] }
 0x57a   : > { %v10787_v32 = vld [vmem:[#allocation15 + $0x5c0] sm:$0xf]  ;;  %v13639_v22 = vld [vmem:[#allocation15 + $0x5cc] sm:$0xf0]  ;;  %v10660_v62 = vor.u32 %v13607_v48, %v10659_v36  ;;  %4556 = vmatpush.bf16.msrb.mxu2 %v10932_v6 }
 0x57b   : > { %v10915_v30 = vld [vmem:[#allocation15 + $0x6c0] sm:$0xf]  ;;  %v13671_v55 = vld [vmem:[#allocation15 + $0x6cc] sm:$0xf0]  ;;  %v10788_v16 = vor.u32 %v13639_v22, %v10787_v32  ;;  %4569 = vmatpush.bf16.msrb.mxu3 %v11060_v44  ;;  %v2897_v32 = vmax.f32 %v2895_v2, %v2896_v15  ;;  %v2885_v44 = vmax.f32 %v2883_v31, %v2884_v5  ;;  %v2906_v5 = vrot.slane %v2873_v4, 4 }
 0x57c   : > { %v11043_v24 = vld [vmem:[#allocation15 + $0x7c0] sm:$0xf]  ;;  %v13703_v23 = vld [vmem:[#allocation15 + $0x7cc] sm:$0xf0]  ;;  %v10916_v17 = vor.u32 %v13671_v55, %v10915_v30  ;;  %4531 = vmatpush.bf16.msrb.mxu0 %v10660_v62  ;;  %v2880_v62 = vrot.slane %v2879_v7, 1 }
 0x57d   : > { %v10643_v53 = vld [vmem:[#allocation15 + $0x4a0] sm:$0xf]  ;;  %v13603_v21 = vld [vmem:[#allocation15 + $0x4ac] sm:$0xf0]  ;;  %v11044_v29 = vor.u32 %v13703_v23, %v11043_v24  ;;  %4544 = vmatpush.bf16.msrb.mxu1 %v10788_v16 }
 0x57e   : > { %v10771_v61 = vld [vmem:[#allocation15 + $0x5a0] sm:$0xf]  ;;  %v13635_v18 = vld [vmem:[#allocation15 + $0x5ac] sm:$0xf0]  ;;  %v10644_v9 = vor.u32 %v13603_v21, %v10643_v53  ;;  %4557 = vmatpush.bf16.msrb.mxu2 %v10916_v17  ;;  %v2898_v21 = vrot.slane %v2897_v32, 1 }
 0x57f   : > { %v10899_v28 = vld [vmem:[#allocation15 + $0x6a0] sm:$0xf]  ;;  %v13667_v11 = vld [vmem:[#allocation15 + $0x6ac] sm:$0xf0]  ;;  %v10772_v60 = vor.u32 %v13635_v18, %v10771_v61  ;;  %4570 = vmatpush.bf16.msrb.mxu3 %v11044_v29  ;;  %v2886_v61 = vrot.slane %v2885_v44, 1 }
 0x580   : > { %v11027_v10 = vld [vmem:[#allocation15 + $0x7a0] sm:$0xf]  ;;  %v13699_v42 = vld [vmem:[#allocation15 + $0x7ac] sm:$0xf0]  ;;  %v10900_v33 = vor.u32 %v13667_v11, %v10899_v28  ;;  %4532 = vmatpush.bf16.msrb.mxu0 %v10644_v9  ;;  %v2881_v11 = vmax.f32 %v2879_v7, %v2880_v62 }
 0x581   : > { %v10627_v47 = vld [vmem:[#allocation15 + $0x480] sm:$0xf]  ;;  %v13599_v56 = vld [vmem:[#allocation15 + $0x48c] sm:$0xf0]  ;;  %v11028_v52 = vor.u32 %v13699_v42, %v11027_v10  ;;  %4545 = vmatpush.bf16.msrb.mxu1 %v10772_v60 }
 0x582   : > { %v10755_v63 = vld [vmem:[#allocation15 + $0x580] sm:$0xf]  ;;  %v2870_v50 = vld [vmem:[#allocation2 + $0x18] sm:$0xff]  ;;  %v10628_v58 = vor.u32 %v13599_v56, %v10627_v47  ;;  %4558 = vmatpush.bf16.msrb.mxu2 %v10900_v33  ;;  %v2899_v47 = vmax.f32 %v2897_v32, %v2898_v21  ;;  %v16104_v33 = vpack.c.bf16 %v2881_v11, %v2881_v11  ;;  %v10421_v32 = vld [vmem:[#allocation15 + $0x2f0] sm:$0xf0] }
 0x583   : > { %v13631_v8 = vld [vmem:[#allocation15 + $0x58c] sm:$0xf0]  ;;  %v2888_v34 = vrot.slane %v2870_v50, 4  ;;  %v10883_v20 = vld [vmem:[#allocation15 + $0x680] sm:$0xf]  ;;  %4571 = vmatpush.bf16.msrb.mxu3 %v11028_v52 }
 0x584   : > { %v13663_v27 = vld [vmem:[#allocation15 + $0x68c] sm:$0xf0]  ;;  %v11011_v1 = vld [vmem:[#allocation15 + $0x780] sm:$0xf]  ;;  %v10756_v45 = vor.u32 %v13631_v8, %v10755_v63  ;;  %4533 = vmatpush.bf16.msrb.mxu0 %v10628_v58  ;;  %v16106_v46 = vpack.c.bf16 %v2899_v47, %v2899_v47  ;;  %v13477_v21 = vld [vmem:[#allocation15 + $0xc4] sm:$0xf] }
 0x585   : > { %v13695_v54 = vld [vmem:[#allocation15 + $0x78c] sm:$0xf0]  ;;  %v2889_v19 = vmax.f32 %v2870_v50, %v2888_v34  ;;  %v10611_v3 = vld [vmem:[#allocation15 + $0x460] sm:$0xf]  ;;  %v10884_v14 = vor.u32 %v13663_v27, %v10883_v20  ;;  %v2887_v50 = vmax.f32 %v2885_v44, %v2886_v61  ;;  %4486 = vmatmul.bf16.vlgmr.msra.gmra.mxu0 %v16104_v33  ;;  %v10149_v11 = vld [vmem:[#allocation15 + $0xd0] sm:$0xf0] }
 0x586   : > { %v13595_v26 = vld [vmem:[#allocation15 + $0x46c] sm:$0xf0]  ;;  %v10739_v41 = vld [vmem:[#allocation15 + $0x560] sm:$0xf]  ;;  %v11012_v13 = vor.u32 %v13695_v54, %v11011_v1  ;;  %4546 = vmatpush.bf16.msrb.mxu1 %v10756_v45  ;;  %4525 = vmatmul.bf16.vlgmr.msra.gmra.mxu3 %v16106_v46 }
 0x587   : > { %v13627_v59 = vld [vmem:[#allocation15 + $0x56c] sm:$0xf0]  ;;  %v2890_v43 = vrot.slane %v2889_v19, 2  ;;  %v10867_v38 = vld [vmem:[#allocation15 + $0x660] sm:$0xf]  ;;  %v10612_v6 = vor.u32 %v13595_v26, %v10611_v3  ;;  %4559 = vmatpush.bf16.msrb.mxu2 %v10884_v14  ;;  %v16108_v27 = vpack.c.bf16 %v2887_v50, %v2887_v50 }
 0x588   : > { %v13659_v35 = vld [vmem:[#allocation15 + $0x66c] sm:$0xf0]  ;;  %v10995_v0 = vld [vmem:[#allocation15 + $0x760] sm:$0xf]  ;;  %v10740_v22 = vor.u32 %v13627_v59, %v10739_v41  ;;  %4572 = vmatpush.bf16.msrb.mxu3 %v11012_v13  ;;  %v10405_v50 = vld [vmem:[#allocation15 + $0x2d0] sm:$0xf0] }
 0x589   : > { %v13691_v25 = vld [vmem:[#allocation15 + $0x76c] sm:$0xf0]  ;;  %v2891_v57 = vmax.f32 %v2889_v19, %v2890_v43  ;;  %v10595_v36 = vld [vmem:[#allocation15 + $0x440] sm:$0xf]  ;;  %v10868_v30 = vor.u32 %v13659_v35, %v10867_v38  ;;  %4534 = vmatpush.bf16.msrb.mxu0 %v10612_v6  ;;  %4499 = vmatmul.bf16.vlgmr.msra.gmra.mxu1 %v16108_v27  ;;  %v13481_v35 = vld [vmem:[#allocation15 + $0xe4] sm:$0xf] }
 0x58a   : > { %v13591_v48 = vld [vmem:[#allocation15 + $0x44c] sm:$0xf0]  ;;  %v10723_v55 = vld [vmem:[#allocation15 + $0x540] sm:$0xf]  ;;  %v10996_v53 = vor.u32 %v13691_v25, %v10995_v0  ;;  %4547 = vmatpush.bf16.msrb.mxu1 %v10740_v22  ;;  %v10165_v0 = vld [vmem:[#allocation15 + $0xf0] sm:$0xf0]  ;;  %v2907_v22 = vmax.f32 %v2873_v4, %v2906_v5 }
 0x58b   : > { %v13623_v24 = vld [vmem:[#allocation15 + $0x54c] sm:$0xf0]  ;;  %v2892_v23 = vrot.slane %v2891_v57, 1  ;;  %v10851_v16 = vld [vmem:[#allocation15 + $0x640] sm:$0xf]  ;;  %v10596_v10 = vor.u32 %v13591_v48, %v10595_v36  ;;  %4560 = vmatpush.bf16.msrb.mxu2 %v10868_v30 }
 0x58c   : > { %v13655_v17 = vld [vmem:[#allocation15 + $0x64c] sm:$0xf0]  ;;  %v10979_v18 = vld [vmem:[#allocation15 + $0x740] sm:$0xf]  ;;  %v10724_v42 = vor.u32 %v13623_v24, %v10723_v55  ;;  %4573 = vmatpush.bf16.msrb.mxu3 %v10996_v53  ;;  %v13513_v25 = vld [vmem:[#allocation15 + $0x1e4] sm:$0xf] }
 0x58d   : > { %v13687_v29 = vld [vmem:[#allocation15 + $0x74c] sm:$0xf0]  ;;  %v2893_v28 = vmax.f32 %v2891_v57, %v2892_v23  ;;  %v10579_v56 = vld [vmem:[#allocation15 + $0x420] sm:$0xf]  ;;  %v10852_v37 = vor.u32 %v13655_v17, %v10851_v16  ;;  %4535 = vmatpush.bf16.msrb.mxu0 %v10596_v10  ;;  %v10293_v36 = vld [vmem:[#allocation15 + $0x1f0] sm:$0xf0]  ;;  %v10168_v17 = vor.u32 %v13481_v35, %v10165_v0 }
 0x58e   : > { %v13587_v9 = vld [vmem:[#allocation15 + $0x42c] sm:$0xf0]  ;;  %v10707_v63 = vld [vmem:[#allocation15 + $0x520] sm:$0xf]  ;;  %v10980_v49 = vor.u32 %v13687_v29, %v10979_v18  ;;  %4548 = vmatpush.bf16.msrb.mxu1 %v10724_v42  ;;  %v13545_v48 = vld [vmem:[#allocation15 + $0x2e4] sm:$0xf]  ;;  %v10296_v29 = vor.u32 %v13513_v25, %v10293_v36 }
 0x58f   : > { %v16102_v60 = vpack.c.bf16 %v2893_v28, %v2893_v28  ;;  %v13619_v8 = vld [vmem:[#allocation15 + $0x52c] sm:$0xf0]  ;;  %v10835_v34 = vld [vmem:[#allocation15 + $0x620] sm:$0xf]  ;;  %v10580_v40 = vor.u32 %v13587_v9, %v10579_v56  ;;  %4561 = vmatpush.bf16.msrb.mxu2 %v10852_v37  ;;  %v13577_v24 = vld [vmem:[#allocation15 + $0x3e4] sm:$0xf]  ;;  %v10424_v28 = vor.u32 %v13545_v48, %v10421_v32 }
 0x590   : > { %v13651_v39 = vld [vmem:[#allocation15 + $0x62c] sm:$0xf0]  ;;  %v10963_v52 = vld [vmem:[#allocation15 + $0x720] sm:$0xf]  ;;  %v10708_v31 = vor.u32 %v13619_v8, %v10707_v63  ;;  %4574 = vmatpush.bf16.msrb.mxu3 %v10980_v49  ;;  %v10549_v23 = vld [vmem:[#allocation15 + $0x3f0] sm:$0xf0] }
 0x591   : > { %v13683_v20 = vld [vmem:[#allocation15 + $0x72c] sm:$0xf0]  ;;  %v2874_v12 = vld [vmem:[#allocation2 + $0x28] sm:$0xff]  ;;  %4512 = vmatmul.bf16.vlgmr.msra.gmra.mxu2 %v16102_v60  ;;  %v10836_v45 = vor.u32 %v13651_v39, %v10835_v34  ;;  %4536 = vmatpush.bf16.msrb.mxu0 %v10580_v40  ;;  %v2908_v18 = vrot.slane %v2907_v22, 2  ;;  %v13509_v10 = vld [vmem:[#allocation15 + $0x1c4] sm:$0xf]  ;;  %v10552_v56 = vor.u32 %v13577_v24, %v10549_v23 }
 0x592   : > { %v10563_v51 = vld [vmem:[#allocation15 + $0x400] sm:$0xf]  ;;  %v13583_v1 = vld [vmem:[#allocation15 + $0x40c] sm:$0xf0]  ;;  %v2912_v54 = vrot.slane %v2874_v12, 4  ;;  %v10964_v13 = vor.u32 %v13683_v20, %v10963_v52  ;;  %4549 = vmatpush.bf16.msrb.mxu1 %v10708_v31  ;;  %v10152_v20 = vor.u32 %v13477_v21, %v10149_v11 }
 0x593   : > { %v2872_v19 = vld [vmem:[#allocation2 + $0x8] sm:$0xff]  ;;  %v13615_v3 = vld [vmem:[#allocation15 + $0x50c] sm:$0xf0]  ;;  %v10564_v6 = vor.u32 %v13583_v1, %v10563_v51  ;;  %4562 = vmatpush.bf16.msrb.mxu2 %v10836_v45  ;;  %v10277_v9 = vld [vmem:[#allocation15 + $0x1d0] sm:$0xf0]  ;;  %v2909_v8 = vmax.f32 %v2907_v22, %v2908_v18 }
 0x594   : > { %v10691_v58 = vld [vmem:[#allocation15 + $0x500] sm:$0xf]  ;;  %v13647_v2 = vld [vmem:[#allocation15 + $0x60c] sm:$0xf0]  ;;  %v2913_v41 = vmax.f32 %v2874_v12, %v2912_v54  ;;  %v2900_v59 = vrot.slane %v2872_v19, 4  ;;  %4575 = vmatpush.bf16.msrb.mxu3 %v10964_v13  ;;  %v10280_v1 = vor.u32 %v13509_v10, %v10277_v9 }
 0x595   : > { %v10819_v26 = vld [vmem:[#allocation15 + $0x600] sm:$0xf]  ;;  %v2875_v43 = vld [vmem:[#allocation2 + $0x38] sm:$0xff]  ;;  %v10692_v30 = vor.u32 %v13615_v3, %v10691_v58  ;;  %4537 = vmatpush.bf16.msrb.mxu0 %v10564_v6  ;;  %v13541_v63 = vld [vmem:[#allocation15 + $0x2c4] sm:$0xf]  ;;  %v2910_v51 = vrot.slane %v2909_v8, 1 }
 0x596   : > { %v10947_v14 = vld [vmem:[#allocation15 + $0x700] sm:$0xf]  ;;  %v13679_v38 = vld [vmem:[#allocation15 + $0x70c] sm:$0xf0]  ;;  %v2918_v15 = vrot.slane %v2875_v43, 4  ;;  %v2914_v57 = vrot.slane %v2913_v41, 2  ;;  %v2901_v7 = vmax.f32 %v2872_v19, %v2900_v59  ;;  %v10820_v55 = vor.u32 %v13647_v2, %v10819_v26 }
 0x597   : > { %v10948_v16 = vor.u32 %v13679_v38, %v10947_v14  ;;  %4550 = vmatpush.bf16.msrb.mxu1 %v10692_v30  ;;  %v13573_v34 = vld [vmem:[#allocation15 + $0x3c4] sm:$0xf]  ;;  %v10533_v39 = vld [vmem:[#allocation15 + $0x3d0] sm:$0xf0]  ;;  %v10408_v54 = vor.u32 %v13541_v63, %v10405_v50  ;;  %v2911_v59 = vmax.f32 %v2909_v8, %v2910_v51 }
 0x598   : > { %v2919_v44 = vmax.f32 %v2875_v43, %v2918_v15  ;;  %v2915_v62 = vmax.f32 %v2913_v41, %v2914_v57  ;;  %v2902_v53 = vrot.slane %v2901_v7, 2  ;;  %4563 = vmatpush.bf16.msrb.mxu2 %v10820_v55  ;;  %v13473_v19 = vld [vmem:[#allocation15 + $0xa4] sm:$0xf]  ;;  %v10133_v40 = vld [vmem:[#allocation15 + $0xb0] sm:$0xf0]  ;;  %v10536_v26 = vor.u32 %v13573_v34, %v10533_v39 }
 0x599   : > { %4576 = vmatpush.bf16.msrb.mxu3 %v10948_v16  ;;  %4582 = vmatpush.bf16.msra.mxu0 %v10168_v17  ;;  %v13505_v58 = vld [vmem:[#allocation15 + $0x1a4] sm:$0xf]  ;;  %v10261_v31 = vld [vmem:[#allocation15 + $0x1b0] sm:$0xf0]  ;;  %v10136_v38 = vor.u32 %v13473_v19, %v10133_v40  ;;  %v16120_v15 = vpack.c.bf16 %v2911_v59, %v2911_v59 }
 0x59a   : > { %v2920_v61 = vrot.slane %v2919_v44, 2  ;;  %v2916_v42 = vrot.slane %v2915_v62, 1  ;;  %v2903_v47 = vmax.f32 %v2901_v7, %v2902_v53  ;;  %v13537_v45 = vld [vmem:[#allocation15 + $0x2a4] sm:$0xf]  ;;  %v10389_v14 = vld [vmem:[#allocation15 + $0x2b0] sm:$0xf0]  ;;  %v10264_v5 = vor.u32 %v13505_v58, %v10261_v31 }
 0x59b   : > { %4595 = vmatpush.bf16.msra.mxu1 %v10296_v29  ;;  %v13569_v43 = vld [vmem:[#allocation15 + $0x3a4] sm:$0xf]  ;;  %v10517_v4 = vld [vmem:[#allocation15 + $0x3b0] sm:$0xf0]  ;;  %v10392_v0 = vor.u32 %v13537_v45, %v10389_v14 }
 0x59c   : > { %v2921_v37 = vmax.f32 %v2919_v44, %v2920_v61  ;;  %v2917_v49 = vmax.f32 %v2915_v62, %v2916_v42  ;;  %v2904_v52 = vrot.slane %v2903_v47, 1  ;;  %4608 = vmatpush.bf16.msra.mxu2 %v10424_v28  ;;  %v13469_v25 = vld [vmem:[#allocation15 + $0x84] sm:$0xf]  ;;  %v10117_v57 = vld [vmem:[#allocation15 + $0x90] sm:$0xf0]  ;;  %v10520_v6 = vor.u32 %v13569_v43, %v10517_v4  ;;  %4551 = vmatmul.bf16.vlgmr.msrb.gmra.mxu1 %v16120_v15 }
 0x59d   : > { %4621 = vmatpush.bf16.msra.mxu3 %v10552_v56  ;;  %4583 = vmatpush.bf16.msra.mxu0 %v10152_v20  ;;  %v13501_v7 = vld [vmem:[#allocation15 + $0x184] sm:$0xf]  ;;  %v10245_v36 = vld [vmem:[#allocation15 + $0x190] sm:$0xf0]  ;;  %v10120_v30 = vor.u32 %v13469_v25, %v10117_v57 }
 0x59e   : > { %v2922_v12 = vrot.slane %v2921_v37, 1  ;;  %v2905_v3 = vmax.f32 %v2903_v47, %v2904_v52  ;;  %v16114_v2 = vpack.c.bf16 %v2917_v49, %v2917_v49  ;;  %v13533_v48 = vld [vmem:[#allocation15 + $0x284] sm:$0xf]  ;;  %v10373_v32 = vld [vmem:[#allocation15 + $0x290] sm:$0xf0]  ;;  %v10248_v55 = vor.u32 %v13501_v7, %v10245_v36 }
 0x59f   : > { %4596 = vmatpush.bf16.msra.mxu1 %v10280_v1  ;;  %v13565_v44 = vld [vmem:[#allocation15 + $0x384] sm:$0xf]  ;;  %v10501_v22 = vld [vmem:[#allocation15 + $0x390] sm:$0xf0]  ;;  %v10376_v24 = vor.u32 %v13533_v48, %v10373_v32 }
 0x5a0   : > { %v2923_v41 = vmax.f32 %v2921_v37, %v2922_v12  ;;  %v16116_v13 = vpack.c.bf16 %v2905_v3, %v2905_v3  ;;  %4609 = vmatpush.bf16.msra.mxu2 %v10408_v54  ;;  %v13465_v23 = vld [vmem:[#allocation15 + $0x64] sm:$0xf]  ;;  %v10101_v62 = vld [vmem:[#allocation15 + $0x70] sm:$0xf0]  ;;  %v10504_v16 = vor.u32 %v13565_v44, %v10501_v22 }
 0x5a1   : > { %4622 = vmatpush.bf16.msra.mxu3 %v10536_v26  ;;  %4564 = vmatmul.bf16.vlgmr.msrb.gmra.mxu2 %v16114_v2  ;;  %v13497_v53 = vld [vmem:[#allocation15 + $0x164] sm:$0xf]  ;;  %v10229_v17 = vld [vmem:[#allocation15 + $0x170] sm:$0xf0]  ;;  %v10104_v28 = vor.u32 %v13465_v23, %v10101_v62 }
 0x5a2   : > { %v16118_v35 = vpack.c.bf16 %v2923_v41, %v2923_v41  ;;  %4538 = vmatmul.bf16.vlgmr.msrb.gmra.mxu0 %v16116_v13  ;;  %v13529_v21 = vld [vmem:[#allocation15 + $0x264] sm:$0xf]  ;;  %v10357_v61 = vld [vmem:[#allocation15 + $0x270] sm:$0xf0]  ;;  %v10232_v11 = vor.u32 %v13497_v53, %v10229_v17 }
 0x5a3   : > { %4584 = vmatpush.bf16.msra.mxu0 %v10136_v38  ;;  %4597 = vmatpush.bf16.msra.mxu1 %v10264_v5  ;;  %v13561_v18 = vld [vmem:[#allocation15 + $0x364] sm:$0xf]  ;;  %v10485_v29 = vld [vmem:[#allocation15 + $0x370] sm:$0xf0]  ;;  %v10360_v10 = vor.u32 %v13529_v21, %v10357_v61 }
 0x5a4   : > { %4577 = vmatmul.bf16.vlgmr.msrb.gmra.mxu3 %v16118_v35  ;;  %4610 = vmatpush.bf16.msra.mxu2 %v10392_v0  ;;  %v13461_v42 = vld [vmem:[#allocation15 + $0x44] sm:$0xf]  ;;  %v10085_v47 = vld [vmem:[#allocation15 + $0x50] sm:$0xf0]  ;;  %v10488_v9 = vor.u32 %v13561_v18, %v10485_v29 }
 0x5a5   : > { %4623 = vmatpush.bf16.msra.mxu3 %v10520_v6  ;;  %v13493_v56 = vld [vmem:[#allocation15 + $0x144] sm:$0xf]  ;;  %v10213_v63 = vld [vmem:[#allocation15 + $0x150] sm:$0xf0]  ;;  %v10088_v39 = vor.u32 %v13461_v42, %v10085_v47 }
 0x5a6   : > { %v13525_v50 = vld [vmem:[#allocation15 + $0x244] sm:$0xf]  ;;  %v10341_v37 = vld [vmem:[#allocation15 + $0x250] sm:$0xf0]  ;;  %v10216_v49 = vor.u32 %v13493_v56, %v10213_v63 }
 0x5a7   : > { %4585 = vmatpush.bf16.msra.mxu0 %v10120_v30  ;;  %4598 = vmatpush.bf16.msra.mxu1 %v10248_v55  ;;  %v13557_v8 = vld [vmem:[#allocation15 + $0x344] sm:$0xf]  ;;  %v10469_v34 = vld [vmem:[#allocation15 + $0x350] sm:$0xf0]  ;;  %v10344_v52 = vor.u32 %v13525_v50, %v10341_v37 }
 0x5a8   : > { %4611 = vmatpush.bf16.msra.mxu2 %v10376_v24  ;;  %v13457_v20 = vld [vmem:[#allocation15 + $0x24] sm:$0xf]  ;;  %v10069_v12 = vld [vmem:[#allocation15 + $0x30] sm:$0xf0]  ;;  %v10472_v1 = vor.u32 %v13557_v8, %v10469_v34 }
 0x5a9   : > { %4624 = vmatpush.bf16.msra.mxu3 %v10504_v16  ;;  %v13489_v51 = vld [vmem:[#allocation15 + $0x124] sm:$0xf]  ;;  %v10197_v54 = vld [vmem:[#allocation15 + $0x130] sm:$0xf0]  ;;  %v10072_v26 = vor.u32 %v13457_v20, %v10069_v12 }
 0x5aa   : > { %v13521_v19 = vld [vmem:[#allocation15 + $0x224] sm:$0xf]  ;;  %v10325_v40 = vld [vmem:[#allocation15 + $0x230] sm:$0xf0]  ;;  %v10200_v14 = vor.u32 %v13489_v51, %v10197_v54 }
 0x5ab   : > { %4586 = vmatpush.bf16.msra.mxu0 %v10104_v28  ;;  %4599 = vmatpush.bf16.msra.mxu1 %v10232_v11  ;;  %v13553_v58 = vld [vmem:[#allocation15 + $0x324] sm:$0xf]  ;;  %v10453_v3 = vld [vmem:[#allocation15 + $0x330] sm:$0xf0]  ;;  %v10328_v41 = vor.u32 %v13521_v19, %v10325_v40 }
 0x5ac   : > { %4612 = vmatpush.bf16.msra.mxu2 %v10360_v10  ;;  %v13453_v31 = vld [vmem:[#allocation15 + $0x4] sm:$0xf]  ;;  %v10053_v45 = vld [vmem:[#allocation15 + $0x10] sm:$0xf0]  ;;  %v10456_v38 = vor.u32 %v13553_v58, %v10453_v3 }
 0x5ad   : > { %4625 = vmatpush.bf16.msra.mxu3 %v10488_v9  ;;  %v13485_v59 = vld [vmem:[#allocation15 + $0x104] sm:$0xf]  ;;  %v10181_v43 = vld [vmem:[#allocation15 + $0x110] sm:$0xf0]  ;;  %v10056_v36 = vor.u32 %v13453_v31, %v10053_v45 }
 0x5ae   : > { %v13517_v4 = vld [vmem:[#allocation15 + $0x204] sm:$0xf]  ;;  %v10309_v5 = vld [vmem:[#allocation15 + $0x210] sm:$0xf0]  ;;  %v10184_v22 = vor.u32 %v13485_v59, %v10181_v43 }
 0x5af   : > { %4587 = vmatpush.bf16.msra.mxu0 %v10088_v39  ;;  %4600 = vmatpush.bf16.msra.mxu1 %v10216_v49  ;;  %v13549_v0 = vld [vmem:[#allocation15 + $0x304] sm:$0xf]  ;;  %v10437_v25 = vld [vmem:[#allocation15 + $0x310] sm:$0xf0]  ;;  %v10312_v30 = vor.u32 %v13517_v4, %v10309_v5 }
 0x5b0   : > { %4613 = vmatpush.bf16.msra.mxu2 %v10344_v52  ;;  %v13609_v57 = vld [vmem:[#allocation15 + $0x4e4] sm:$0xf]  ;;  %v10677_v7 = vld [vmem:[#allocation15 + $0x4f0] sm:$0xf0]  ;;  %v10440_v23 = vor.u32 %v13549_v0, %v10437_v25 }
 0x5b1   : > { %4626 = vmatpush.bf16.msra.mxu3 %v10472_v1  ;;  %v13641_v6 = vld [vmem:[#allocation15 + $0x5e4] sm:$0xf]  ;;  %v10805_v48 = vld [vmem:[#allocation15 + $0x5f0] sm:$0xf0]  ;;  %v10680_v62 = vor.u32 %v13609_v57, %v10677_v7 }
 0x5b2   : > { %v13673_v32 = vld [vmem:[#allocation15 + $0x6e4] sm:$0xf]  ;;  %v10933_v44 = vld [vmem:[#allocation15 + $0x6f0] sm:$0xf0]  ;;  %v10808_v53 = vor.u32 %v13641_v6, %v10805_v48 }
 0x5b3   : > { %4588 = vmatpush.bf16.msra.mxu0 %v10072_v26  ;;  %4601 = vmatpush.bf16.msra.mxu1 %v10200_v14  ;;  %v13705_v55 = vld [vmem:[#allocation15 + $0x7e4] sm:$0xf]  ;;  %v11061_v24 = vld [vmem:[#allocation15 + $0x7f0] sm:$0xf0]  ;;  %v10936_v16 = vor.u32 %v13673_v32, %v10933_v44 }
 0x5b4   : > { %4614 = vmatpush.bf16.msra.mxu2 %v10328_v41  ;;  %v13605_v17 = vld [vmem:[#allocation15 + $0x4c4] sm:$0xf]  ;;  %v10661_v21 = vld [vmem:[#allocation15 + $0x4d0] sm:$0xf0]  ;;  %v11064_v18 = vor.u32 %v13705_v55, %v11061_v24 }
 0x5b5   : > { %4627 = vmatpush.bf16.msra.mxu3 %v10456_v38  ;;  %v13637_v61 = vld [vmem:[#allocation15 + $0x5c4] sm:$0xf]  ;;  %v10789_v29 = vld [vmem:[#allocation15 + $0x5d0] sm:$0xf0]  ;;  %v10664_v47 = vor.u32 %v13605_v17, %v10661_v21 }
 0x5b6   : > { %v13669_v28 = vld [vmem:[#allocation15 + $0x6c4] sm:$0xf]  ;;  %v10917_v11 = vld [vmem:[#allocation15 + $0x6d0] sm:$0xf0]  ;;  %v10792_v56 = vor.u32 %v13637_v61, %v10789_v29 }
 0x5b7   : > { %4589 = vmatpush.bf16.msra.mxu0 %v10056_v36  ;;  %4602 = vmatpush.bf16.msra.mxu1 %v10184_v22  ;;  %v13701_v10 = vld [vmem:[#allocation15 + $0x7c4] sm:$0xf]  ;;  %v11045_v42 = vld [vmem:[#allocation15 + $0x7d0] sm:$0xf0]  ;;  %v10920_v9 = vor.u32 %v13669_v28, %v10917_v11 }
 0x5b8   : > { %4615 = vmatpush.bf16.msra.mxu2 %v10312_v30  ;;  %v13601_v63 = vld [vmem:[#allocation15 + $0x4a4] sm:$0xf]  ;;  %v10645_v50 = vld [vmem:[#allocation15 + $0x4b0] sm:$0xf0]  ;;  %v11048_v8 = vor.u32 %v13701_v10, %v11045_v42 }
 0x5b9   : > { %4628 = vmatpush.bf16.msra.mxu3 %v10440_v23  ;;  %v13633_v37 = vld [vmem:[#allocation15 + $0x5a4] sm:$0xf]  ;;  %v10773_v34 = vld [vmem:[#allocation15 + $0x5b0] sm:$0xf0]  ;;  %v10648_v12 = vor.u32 %v13601_v63, %v10645_v50 }
 0x5ba   : > { %v13665_v39 = vld [vmem:[#allocation15 + $0x6a4] sm:$0xf]  ;;  %v10901_v49 = vld [vmem:[#allocation15 + $0x6b0] sm:$0xf0]  ;;  %4590 = vmatmul.bf16.vlgmr.msra.gmra.mxu0 %v16104_v33  ;;  %4603 = vmatmul.bf16.vlgmr.msra.gmra.mxu1 %v16108_v27  ;;  %v10776_v51 = vor.u32 %v13633_v37, %v10773_v34 }
 0x5bb   : > { %4634 = vmatpush.bf16.msrb.mxu0 %v10680_v62  ;;  %4647 = vmatpush.bf16.msrb.mxu1 %v10808_v53  ;;  %v13697_v52 = vld [vmem:[#allocation15 + $0x7a4] sm:$0xf]  ;;  %v11029_v20 = vld [vmem:[#allocation15 + $0x7b0] sm:$0xf0]  ;;  %v10904_v1 = vor.u32 %v13665_v39, %v10901_v49 }
 0x5bc   : > { %4660 = vmatpush.bf16.msrb.mxu2 %v10936_v16  ;;  %4629 = vmatmul.bf16.vlgmr.msra.gmra.mxu3 %v16106_v46  ;;  %v13597_v54 = vld [vmem:[#allocation15 + $0x484] sm:$0xf]  ;;  %v10629_v19 = vld [vmem:[#allocation15 + $0x490] sm:$0xf0]  ;;  %v11032_v58 = vor.u32 %v13697_v52, %v11029_v20 }
 0x5bd   : > { %4673 = vmatpush.bf16.msrb.mxu3 %v11064_v18  ;;  %4616 = vmatmul.bf16.vlgmr.msra.gmra.mxu2 %v16102_v60  ;;  %v13629_v40 = vld [vmem:[#allocation15 + $0x584] sm:$0xf]  ;;  %v10757_v3 = vld [vmem:[#allocation15 + $0x590] sm:$0xf0]  ;;  %v10632_v41 = vor.u32 %v13597_v54, %v10629_v19  ;;  %v10171_v19 = vld [vmem:[#allocation15 + $0xe8] sm:$0xf] }
 0x5be   : > { %v13661_v26 = vld [vmem:[#allocation15 + $0x684] sm:$0xf]  ;;  %v10885_v31 = vld [vmem:[#allocation15 + $0x690] sm:$0xf0]  ;;  %v10760_v59 = vor.u32 %v13629_v40, %v10757_v3  ;;  %v13484_v40 = vld [vmem:[#allocation15 + $0xf4] sm:$0xf0] }
 0x5bf   : > { %4635 = vmatpush.bf16.msrb.mxu0 %v10664_v47  ;;  %4648 = vmatpush.bf16.msrb.mxu1 %v10792_v56  ;;  %v13693_v45 = vld [vmem:[#allocation15 + $0x784] sm:$0xf]  ;;  %v11013_v14 = vld [vmem:[#allocation15 + $0x790] sm:$0xf0]  ;;  %v10888_v43 = vor.u32 %v13661_v26, %v10885_v31  ;;  %v13516_v26 = vld [vmem:[#allocation15 + $0x1f4] sm:$0xf0] }
 0x5c0   : > { %4661 = vmatpush.bf16.msrb.mxu2 %v10920_v9  ;;  %v13593_v4 = vld [vmem:[#allocation15 + $0x464] sm:$0xf]  ;;  %v10613_v38 = vld [vmem:[#allocation15 + $0x470] sm:$0xf0]  ;;  %v11016_v0 = vor.u32 %v13693_v45, %v11013_v14  ;;  %v10427_v31 = vld [vmem:[#allocation15 + $0x2e8] sm:$0xf] }
 0x5c1   : > { %4674 = vmatpush.bf16.msrb.mxu3 %v11048_v8  ;;  %v13625_v5 = vld [vmem:[#allocation15 + $0x564] sm:$0xf]  ;;  %v10741_v25 = vld [vmem:[#allocation15 + $0x570] sm:$0xf0]  ;;  %v10616_v48 = vor.u32 %v13593_v4, %v10613_v38  ;;  %v13548_v45 = vld [vmem:[#allocation15 + $0x2f4] sm:$0xf0]  ;;  %v10172_v38 = vor.u32 %v13484_v40, %v10171_v19 }
 0x5c2   : > { %v13657_v57 = vld [vmem:[#allocation15 + $0x664] sm:$0xf]  ;;  %v10869_v7 = vld [vmem:[#allocation15 + $0x670] sm:$0xf0]  ;;  %v10744_v32 = vor.u32 %v13625_v5, %v10741_v25  ;;  %v10155_v25 = vld [vmem:[#allocation15 + $0xc8] sm:$0xf] }
 0x5c3   : > { %4636 = vmatpush.bf16.msrb.mxu0 %v10648_v12  ;;  %4649 = vmatpush.bf16.msrb.mxu1 %v10776_v51  ;;  %v13689_v6 = vld [vmem:[#allocation15 + $0x764] sm:$0xf]  ;;  %v10997_v36 = vld [vmem:[#allocation15 + $0x770] sm:$0xf0]  ;;  %v10872_v44 = vor.u32 %v13657_v57, %v10869_v7  ;;  %v13480_v57 = vld [vmem:[#allocation15 + $0xd4] sm:$0xf0] }
 0x5c4   : > { %4662 = vmatpush.bf16.msrb.mxu2 %v10904_v1  ;;  %v13589_v22 = vld [vmem:[#allocation15 + $0x444] sm:$0xf]  ;;  %v10597_v30 = vld [vmem:[#allocation15 + $0x450] sm:$0xf0]  ;;  %v11000_v24 = vor.u32 %v13689_v6, %v10997_v36  ;;  %v10283_v7 = vld [vmem:[#allocation15 + $0x1c8] sm:$0xf] }
 0x5c5   : > { %4675 = vmatpush.bf16.msrb.mxu3 %v11032_v58  ;;  %v13621_v55 = vld [vmem:[#allocation15 + $0x544] sm:$0xf]  ;;  %v10725_v23 = vld [vmem:[#allocation15 + $0x550] sm:$0xf0]  ;;  %v10600_v21 = vor.u32 %v13589_v22, %v10597_v30  ;;  %v10299_v58 = vld [vmem:[#allocation15 + $0x1e8] sm:$0xf]  ;;  %v10156_v30 = vor.u32 %v13480_v57, %v10155_v25 }
 0x5c6   : > { %v13653_v62 = vld [vmem:[#allocation15 + $0x644] sm:$0xf]  ;;  %v10853_v53 = vld [vmem:[#allocation15 + $0x650] sm:$0xf0]  ;;  %v10728_v61 = vor.u32 %v13621_v55, %v10725_v23  ;;  %v10300_v5 = vor.u32 %v13516_v26, %v10299_v58  ;;  %v13512_v36 = vld [vmem:[#allocation15 + $0x1d4] sm:$0xf0] }
 0x5c7   : > { %4637 = vmatpush.bf16.msrb.mxu0 %v10632_v41  ;;  %4650 = vmatpush.bf16.msrb.mxu1 %v10760_v59  ;;  %v13685_v16 = vld [vmem:[#allocation15 + $0x744] sm:$0xf]  ;;  %v10981_v17 = vld [vmem:[#allocation15 + $0x750] sm:$0xf0]  ;;  %v10856_v18 = vor.u32 %v13653_v62, %v10853_v53  ;;  %v10555_v59 = vld [vmem:[#allocation15 + $0x3e8] sm:$0xf]  ;;  %v10284_v55 = vor.u32 %v13512_v36, %v10283_v7 }
 0x5c8   : > { %4663 = vmatpush.bf16.msrb.mxu2 %v10888_v43  ;;  %v13585_v29 = vld [vmem:[#allocation15 + $0x424] sm:$0xf]  ;;  %v10581_v28 = vld [vmem:[#allocation15 + $0x430] sm:$0xf0]  ;;  %v10984_v10 = vor.u32 %v13685_v16, %v10981_v17  ;;  %v13580_v43 = vld [vmem:[#allocation15 + $0x3f4] sm:$0xf0] }
 0x5c9   : > { %4676 = vmatpush.bf16.msrb.mxu3 %v11016_v0  ;;  %v13617_v11 = vld [vmem:[#allocation15 + $0x524] sm:$0xf]  ;;  %v10709_v42 = vld [vmem:[#allocation15 + $0x530] sm:$0xf0]  ;;  %v10584_v50 = vor.u32 %v13585_v29, %v10581_v28  ;;  %v10428_v0 = vor.u32 %v13548_v45, %v10427_v31  ;;  %v10556_v6 = vor.u32 %v13580_v43, %v10555_v59  ;;  %v13576_v22 = vld [vmem:[#allocation15 + $0x3d4] sm:$0xf0] }
 0x5ca   : > { %v13649_v47 = vld [vmem:[#allocation15 + $0x624] sm:$0xf]  ;;  %v10837_v56 = vld [vmem:[#allocation15 + $0x630] sm:$0xf0]  ;;  %v10712_v34 = vor.u32 %v13617_v11, %v10709_v42  ;;  %v10139_v23 = vld [vmem:[#allocation15 + $0xa8] sm:$0xf] }
 0x5cb   : > { %4638 = vmatpush.bf16.msrb.mxu0 %v10616_v48  ;;  %4651 = vmatpush.bf16.msrb.mxu1 %v10744_v32  ;;  %v13681_v9 = vld [vmem:[#allocation15 + $0x724] sm:$0xf]  ;;  %v10965_v63 = vld [vmem:[#allocation15 + $0x730] sm:$0xf0]  ;;  %v10840_v39 = vor.u32 %v13649_v47, %v10837_v56  ;;  %v10411_v48 = vld [vmem:[#allocation15 + $0x2c8] sm:$0xf] }
 0x5cc   : > { %4664 = vmatpush.bf16.msrb.mxu2 %v10872_v44  ;;  %v13581_v37 = vld [vmem:[#allocation15 + $0x404] sm:$0xf]  ;;  %v10565_v8 = vld [vmem:[#allocation15 + $0x410] sm:$0xf0]  ;;  %v10968_v12 = vor.u32 %v13681_v9, %v10965_v63  ;;  %v13544_v32 = vld [vmem:[#allocation15 + $0x2d4] sm:$0xf0] }
 0x5cd   : > { %4677 = vmatpush.bf16.msrb.mxu3 %v11000_v24  ;;  %v13613_v49 = vld [vmem:[#allocation15 + $0x504] sm:$0xf]  ;;  %v10693_v52 = vld [vmem:[#allocation15 + $0x510] sm:$0xf0]  ;;  %v10568_v3 = vor.u32 %v13581_v37, %v10565_v8  ;;  %v10539_v44 = vld [vmem:[#allocation15 + $0x3c8] sm:$0xf]  ;;  %v10412_v24 = vor.u32 %v13544_v32, %v10411_v48 }
 0x5ce   : > { %v13645_v20 = vld [vmem:[#allocation15 + $0x604] sm:$0xf]  ;;  %v10821_v51 = vld [vmem:[#allocation15 + $0x610] sm:$0xf0]  ;;  %v10696_v14 = vor.u32 %v13613_v49, %v10693_v52  ;;  %v13476_v62 = vld [vmem:[#allocation15 + $0xb4] sm:$0xf0]  ;;  %v10540_v16 = vor.u32 %v13576_v22, %v10539_v44 }
 0x5cf   : > { %4639 = vmatpush.bf16.msrb.mxu0 %v10600_v21  ;;  %4652 = vmatpush.bf16.msrb.mxu1 %v10728_v61  ;;  %v13677_v1 = vld [vmem:[#allocation15 + $0x704] sm:$0xf]  ;;  %v10949_v54 = vld [vmem:[#allocation15 + $0x710] sm:$0xf0]  ;;  %v10824_v41 = vor.u32 %v13645_v20, %v10821_v51  ;;  %v10267_v53 = vld [vmem:[#allocation15 + $0x1a8] sm:$0xf]  ;;  %v10140_v28 = vor.u32 %v13476_v62, %v10139_v23 }
 0x5d0   : > { %4665 = vmatpush.bf16.msrb.mxu2 %v10856_v18  ;;  %v10952_v4 = vor.u32 %v13677_v1, %v10949_v54  ;;  %v13508_v17 = vld [vmem:[#allocation15 + $0x1b4] sm:$0xf0]  ;;  %v10395_v21 = vld [vmem:[#allocation15 + $0x2a8] sm:$0xf] }
 0x5d1   : > { %4678 = vmatpush.bf16.msrb.mxu3 %v10984_v10  ;;  %v13540_v61 = vld [vmem:[#allocation15 + $0x2b4] sm:$0xf0]  ;;  %v10523_v18 = vld [vmem:[#allocation15 + $0x3a8] sm:$0xf]  ;;  %v10268_v11 = vor.u32 %v13508_v17, %v10267_v53 }
 0x5d2   : > { %v13572_v29 = vld [vmem:[#allocation15 + $0x3b4] sm:$0xf0]  ;;  %v10396_v10 = vor.u32 %v13540_v61, %v10395_v21  ;;  %v10123_v42 = vld [vmem:[#allocation15 + $0x88] sm:$0xf] }
 0x5d3   : > { %4640 = vmatpush.bf16.msrb.mxu0 %v10584_v50  ;;  %4653 = vmatpush.bf16.msrb.mxu1 %v10712_v34  ;;  %v13472_v47 = vld [vmem:[#allocation15 + $0x94] sm:$0xf0]  ;;  %v10251_v56 = vld [vmem:[#allocation15 + $0x188] sm:$0xf]  ;;  %v10524_v9 = vor.u32 %v13572_v29, %v10523_v18 }
 0x5d4   : > { %4666 = vmatpush.bf16.msrb.mxu2 %v10840_v39  ;;  %v13504_v63 = vld [vmem:[#allocation15 + $0x194] sm:$0xf0]  ;;  %v10379_v50 = vld [vmem:[#allocation15 + $0x288] sm:$0xf]  ;;  %v10124_v39 = vor.u32 %v13472_v47, %v10123_v42 }
 0x5d5   : > { %4679 = vmatpush.bf16.msrb.mxu3 %v10968_v12  ;;  %v13536_v37 = vld [vmem:[#allocation15 + $0x294] sm:$0xf0]  ;;  %v10507_v8 = vld [vmem:[#allocation15 + $0x388] sm:$0xf]  ;;  %v10252_v49 = vor.u32 %v13504_v63, %v10251_v56 }
 0x5d6   : > { %v13568_v34 = vld [vmem:[#allocation15 + $0x394] sm:$0xf0]  ;;  %v10380_v52 = vor.u32 %v13536_v37, %v10379_v50  ;;  %v10107_v20 = vld [vmem:[#allocation15 + $0x68] sm:$0xf] }
 0x5d7   : > { %4641 = vmatpush.bf16.msrb.mxu0 %v10568_v3  ;;  %4654 = vmatpush.bf16.msrb.mxu1 %v10696_v14  ;;  %v13468_v12 = vld [vmem:[#allocation15 + $0x74] sm:$0xf0]  ;;  %v10235_v51 = vld [vmem:[#allocation15 + $0x168] sm:$0xf]  ;;  %v10508_v1 = vor.u32 %v13568_v34, %v10507_v8 }
 0x5d8   : > { %4667 = vmatpush.bf16.msrb.mxu2 %v10824_v41  ;;  %v13500_v54 = vld [vmem:[#allocation15 + $0x174] sm:$0xf0]  ;;  %v10363_v19 = vld [vmem:[#allocation15 + $0x268] sm:$0xf]  ;;  %v10108_v26 = vor.u32 %v13468_v12, %v10107_v20 }
 0x5d9   : > { %4680 = vmatpush.bf16.msrb.mxu3 %v10952_v4  ;;  %v13532_v40 = vld [vmem:[#allocation15 + $0x274] sm:$0xf0]  ;;  %v10491_v58 = vld [vmem:[#allocation15 + $0x368] sm:$0xf]  ;;  %v10236_v31 = vor.u32 %v13500_v54, %v10235_v51 }
 0x5da   : > { %4642 = vmatmul.bf16.vlgmr.msrb.gmra.mxu0 %v16116_v13  ;;  %4655 = vmatmul.bf16.vlgmr.msrb.gmra.mxu1 %v16120_v15  ;;  %v13564_v3 = vld [vmem:[#allocation15 + $0x374] sm:$0xf0]  ;;  %v10364_v45 = vor.u32 %v13532_v40, %v10363_v19  ;;  %v10091_v14 = vld [vmem:[#allocation15 + $0x48] sm:$0xf] }
 0x5db   : > { %4686 = vmatpush.bf16.msra.mxu0 %v10172_v38  ;;  %4699 = vmatpush.bf16.msra.mxu1 %v10300_v5  ;;  %v13464_v41 = vld [vmem:[#allocation15 + $0x54] sm:$0xf0]  ;;  %v10219_v59 = vld [vmem:[#allocation15 + $0x148] sm:$0xf]  ;;  %v10492_v43 = vor.u32 %v13564_v3, %v10491_v58 }
 0x5dc   : > { %4712 = vmatpush.bf16.msra.mxu2 %v10428_v0  ;;  %4681 = vmatmul.bf16.vlgmr.msrb.gmra.mxu3 %v16118_v35  ;;  %v13496_v4 = vld [vmem:[#allocation15 + $0x154] sm:$0xf0]  ;;  %v10347_v38 = vld [vmem:[#allocation15 + $0x248] sm:$0xf]  ;;  %v10092_v57 = vor.u32 %v13464_v41, %v10091_v14 }
 0x5dd   : > { %4725 = vmatpush.bf16.msra.mxu3 %v10556_v6  ;;  %4668 = vmatmul.bf16.vlgmr.msrb.gmra.mxu2 %v16114_v2  ;;  %v13528_v5 = vld [vmem:[#allocation15 + $0x254] sm:$0xf0]  ;;  %v10475_v0 = vld [vmem:[#allocation15 + $0x348] sm:$0xf]  ;;  %v10220_v7 = vor.u32 %v13496_v4, %v10219_v59 }
 0x5de   : > { %v13560_v25 = vld [vmem:[#allocation15 + $0x354] sm:$0xf0]  ;;  %v10348_v6 = vor.u32 %v13528_v5, %v10347_v38  ;;  %v10075_v36 = vld [vmem:[#allocation15 + $0x28] sm:$0xf] }
 0x5df   : > { %4687 = vmatpush.bf16.msra.mxu0 %v10156_v30  ;;  %4700 = vmatpush.bf16.msra.mxu1 %v10284_v55  ;;  %v13460_v48 = vld [vmem:[#allocation15 + $0x34] sm:$0xf0]  ;;  %v10203_v32 = vld [vmem:[#allocation15 + $0x128] sm:$0xf]  ;;  %v10476_v44 = vor.u32 %v13560_v25, %v10475_v0 }
 0x5e0   : > { %4713 = vmatpush.bf16.msra.mxu2 %v10412_v24  ;;  %v13492_v22 = vld [vmem:[#allocation15 + $0x134] sm:$0xf0]  ;;  %v10331_v30 = vld [vmem:[#allocation15 + $0x228] sm:$0xf]  ;;  %v10076_v62 = vor.u32 %v13460_v48, %v10075_v36 }
 0x5e1   : > { %4726 = vmatpush.bf16.msra.mxu3 %v10540_v16  ;;  %v13524_v55 = vld [vmem:[#allocation15 + $0x234] sm:$0xf0]  ;;  %v10459_v24 = vld [vmem:[#allocation15 + $0x328] sm:$0xf]  ;;  %v10204_v17 = vor.u32 %v13492_v22, %v10203_v32 }
 0x5e2   : > { %v13556_v23 = vld [vmem:[#allocation15 + $0x334] sm:$0xf0]  ;;  %v10059_v53 = vld [vmem:[#allocation15 + $0x8] sm:$0xf]  ;;  %v10332_v21 = vor.u32 %v13524_v55, %v10331_v30 }
 0x5e3   : > { %4688 = vmatpush.bf16.msra.mxu0 %v10140_v28  ;;  %4701 = vmatpush.bf16.msra.mxu1 %v10268_v11  ;;  %v13456_v16 = vld [vmem:[#allocation15 + $0x14] sm:$0xf0]  ;;  %v10187_v61 = vld [vmem:[#allocation15 + $0x108] sm:$0xf]  ;;  %v10460_v28 = vor.u32 %v13556_v23, %v10459_v24 }
 0x5e4   : > { %4714 = vmatpush.bf16.msra.mxu2 %v10396_v10  ;;  %v13488_v18 = vld [vmem:[#allocation15 + $0x114] sm:$0xf0]  ;;  %v10315_v29 = vld [vmem:[#allocation15 + $0x208] sm:$0xf]  ;;  %v10060_v63 = vor.u32 %v13456_v16, %v10059_v53 }
 0x5e5   : > { %4727 = vmatpush.bf16.msra.mxu3 %v10524_v9  ;;  %v13520_v11 = vld [vmem:[#allocation15 + $0x214] sm:$0xf0]  ;;  %v10443_v10 = vld [vmem:[#allocation15 + $0x308] sm:$0xf]  ;;  %v10188_v34 = vor.u32 %v13488_v18, %v10187_v61 }
 0x5e6   : > { %v13552_v42 = vld [vmem:[#allocation15 + $0x314] sm:$0xf0]  ;;  %v10683_v47 = vld [vmem:[#allocation15 + $0x4e8] sm:$0xf] }
 0x5e7   : > { %4689 = vmatpush.bf16.msra.mxu0 %v10124_v39  ;;  %4702 = vmatpush.bf16.msra.mxu1 %v10252_v49  ;;  %v13612_v56 = vld [vmem:[#allocation15 + $0x4f4] sm:$0xf0]  ;;  %v10811_v9 = vld [vmem:[#allocation15 + $0x5e8] sm:$0xf]  ;;  %v10316_v39 = vor.u32 %v13520_v11, %v10315_v29  ;;  %v10444_v20 = vor.u32 %v13552_v42, %v10443_v10 }
 0x5e8   : > { %4715 = vmatpush.bf16.msra.mxu2 %v10380_v52  ;;  %v13644_v50 = vld [vmem:[#allocation15 + $0x5f4] sm:$0xf0]  ;;  %v10939_v37 = vld [vmem:[#allocation15 + $0x6e8] sm:$0xf]  ;;  %v10684_v12 = vor.u32 %v13612_v56, %v10683_v47 }
 0x5e9   : > { %4728 = vmatpush.bf16.msra.mxu3 %v10508_v1  ;;  %v13676_v8 = vld [vmem:[#allocation15 + $0x6f4] sm:$0xf0]  ;;  %v11067_v49 = vld [vmem:[#allocation15 + $0x7e8] sm:$0xf]  ;;  %v10812_v51 = vor.u32 %v13644_v50, %v10811_v9 }
 0x5ea   : > { %v13708_v52 = vld [vmem:[#allocation15 + $0x7f4] sm:$0xf0]  ;;  %v10940_v1 = vor.u32 %v13676_v8, %v10939_v37  ;;  %v10667_v54 = vld [vmem:[#allocation15 + $0x4c8] sm:$0xf] }
 0x5eb   : > { %4690 = vmatpush.bf16.msra.mxu0 %v10108_v26  ;;  %4703 = vmatpush.bf16.msra.mxu1 %v10236_v31  ;;  %v13608_v19 = vld [vmem:[#allocation15 + $0x4d4] sm:$0xf0]  ;;  %v10795_v40 = vld [vmem:[#allocation15 + $0x5c8] sm:$0xf]  ;;  %v11068_v58 = vor.u32 %v13708_v52, %v11067_v49 }
 0x5ec   : > { %4716 = vmatpush.bf16.msra.mxu2 %v10364_v45  ;;  %v13640_v3 = vld [vmem:[#allocation15 + $0x5d4] sm:$0xf0]  ;;  %v10923_v26 = vld [vmem:[#allocation15 + $0x6c8] sm:$0xf]  ;;  %v10668_v41 = vor.u32 %v13608_v19, %v10667_v54 }
 0x5ed   : > { %4729 = vmatpush.bf16.msra.mxu3 %v10492_v43  ;;  %v13672_v31 = vld [vmem:[#allocation15 + $0x6d4] sm:$0xf0]  ;;  %v11051_v45 = vld [vmem:[#allocation15 + $0x7c8] sm:$0xf]  ;;  %v10796_v59 = vor.u32 %v13640_v3, %v10795_v40 }
 0x5ee   : > { %v13704_v14 = vld [vmem:[#allocation15 + $0x7d4] sm:$0xf0]  ;;  %v10924_v43 = vor.u32 %v13672_v31, %v10923_v26  ;;  %v10651_v4 = vld [vmem:[#allocation15 + $0x4a8] sm:$0xf] }
 0x5ef   : > { %4691 = vmatpush.bf16.msra.mxu0 %v10092_v57  ;;  %4704 = vmatpush.bf16.msra.mxu1 %v10220_v7  ;;  %v13604_v38 = vld [vmem:[#allocation15 + $0x4b4] sm:$0xf0]  ;;  %v10779_v5 = vld [vmem:[#allocation15 + $0x5a8] sm:$0xf]  ;;  %v11052_v0 = vor.u32 %v13704_v14, %v11051_v45 }
 0x5f0   : > { %4717 = vmatpush.bf16.msra.mxu2 %v10348_v6  ;;  %v13636_v25 = vld [vmem:[#allocation15 + $0x5b4] sm:$0xf0]  ;;  %v10907_v57 = vld [vmem:[#allocation15 + $0x6a8] sm:$0xf]  ;;  %v10652_v48 = vor.u32 %v13604_v38, %v10651_v4 }
 0x5f1   : > { %4730 = vmatpush.bf16.msra.mxu3 %v10476_v44  ;;  %v13668_v7 = vld [vmem:[#allocation15 + $0x6b4] sm:$0xf0]  ;;  %v11035_v6 = vld [vmem:[#allocation15 + $0x7a8] sm:$0xf]  ;;  %v10780_v32 = vor.u32 %v13636_v25, %v10779_v5 }
 0x5f2   : > { %v13700_v36 = vld [vmem:[#allocation15 + $0x7b4] sm:$0xf0]  ;;  %v10908_v44 = vor.u32 %v13668_v7, %v10907_v57  ;;  %v10635_v22 = vld [vmem:[#allocation15 + $0x488] sm:$0xf] }
 0x5f3   : > { %4692 = vmatpush.bf16.msra.mxu0 %v10076_v62  ;;  %4705 = vmatpush.bf16.msra.mxu1 %v10204_v17  ;;  %v13600_v30 = vld [vmem:[#allocation15 + $0x494] sm:$0xf0]  ;;  %v10763_v55 = vld [vmem:[#allocation15 + $0x588] sm:$0xf]  ;;  %v11036_v24 = vor.u32 %v13700_v36, %v11035_v6 }
 0x5f4   : > { %4718 = vmatpush.bf16.msra.mxu2 %v10332_v21  ;;  %v13632_v23 = vld [vmem:[#allocation15 + $0x594] sm:$0xf0]  ;;  %v10891_v62 = vld [vmem:[#allocation15 + $0x688] sm:$0xf]  ;;  %v10636_v21 = vor.u32 %v13600_v30, %v10635_v22 }
 0x5f5   : > { %4731 = vmatpush.bf16.msra.mxu3 %v10460_v28  ;;  %v13664_v53 = vld [vmem:[#allocation15 + $0x694] sm:$0xf0]  ;;  %v11019_v16 = vld [vmem:[#allocation15 + $0x788] sm:$0xf]  ;;  %v10764_v61 = vor.u32 %v13632_v23, %v10763_v55  ;;  %v10173_v23 = vld [vmem:[#allocation15 + $0xf8] sm:$0xf0] }
 0x5f6   : > { %v13696_v17 = vld [vmem:[#allocation15 + $0x794] sm:$0xf0]  ;;  %v10892_v18 = vor.u32 %v13664_v53, %v10891_v62  ;;  %v10619_v29 = vld [vmem:[#allocation15 + $0x468] sm:$0xf]  ;;  %v13514_v62 = vld [vmem:[#allocation15 + $0x1ec] sm:$0xf] }
 0x5f7   : > { %4693 = vmatpush.bf16.msra.mxu0 %v10060_v63  ;;  %4706 = vmatpush.bf16.msra.mxu1 %v10188_v34  ;;  %v13596_v28 = vld [vmem:[#allocation15 + $0x474] sm:$0xf0]  ;;  %v10747_v11 = vld [vmem:[#allocation15 + $0x568] sm:$0xf]  ;;  %v11020_v10 = vor.u32 %v13696_v17, %v11019_v16  ;;  %v10301_v16 = vld [vmem:[#allocation15 + $0x1f8] sm:$0xf0] }
 0x5f8   : > { %4719 = vmatpush.bf16.msra.mxu2 %v10316_v39  ;;  %v13628_v42 = vld [vmem:[#allocation15 + $0x574] sm:$0xf0]  ;;  %v10875_v47 = vld [vmem:[#allocation15 + $0x668] sm:$0xf]  ;;  %v10620_v50 = vor.u32 %v13596_v28, %v10619_v29  ;;  %v13546_v17 = vld [vmem:[#allocation15 + $0x2ec] sm:$0xf] }
 0x5f9   : > { %4732 = vmatpush.bf16.msra.mxu3 %v10444_v20  ;;  %v13660_v56 = vld [vmem:[#allocation15 + $0x674] sm:$0xf0]  ;;  %v11003_v9 = vld [vmem:[#allocation15 + $0x768] sm:$0xf]  ;;  %v10748_v37 = vor.u32 %v13628_v42, %v10747_v11  ;;  %v13578_v28 = vld [vmem:[#allocation15 + $0x3ec] sm:$0xf] }
 0x5fa   : > { %4694 = vmatmul.bf16.vlgmr.msra.gmra.mxu0 %v16104_v33  ;;  %4707 = vmatmul.bf16.vlgmr.msra.gmra.mxu1 %v16108_v27  ;;  %v13692_v63 = vld [vmem:[#allocation15 + $0x774] sm:$0xf0]  ;;  %v10876_v8 = vor.u32 %v13660_v56, %v10875_v47  ;;  %v10603_v34 = vld [vmem:[#allocation15 + $0x448] sm:$0xf]  ;;  %v10557_v11 = vld [vmem:[#allocation15 + $0x3f8] sm:$0xf0]  ;;  %v10304_v56 = vor.u32 %v13514_v62, %v10301_v16 }
 0x5fb   : > { %4738 = vmatpush.bf16.msrb.mxu0 %v10684_v12  ;;  %4751 = vmatpush.bf16.msrb.mxu1 %v10812_v51  ;;  %v13592_v39 = vld [vmem:[#allocation15 + $0x454] sm:$0xf0]  ;;  %v10731_v49 = vld [vmem:[#allocation15 + $0x548] sm:$0xf]  ;;  %v11004_v52 = vor.u32 %v13692_v63, %v11003_v9  ;;  %v13478_v63 = vld [vmem:[#allocation15 + $0xcc] sm:$0xf] }
 0x5fc   : > { %4764 = vmatpush.bf16.msrb.mxu2 %v10940_v1  ;;  %4733 = vmatmul.bf16.vlgmr.msra.gmra.mxu3 %v16106_v46  ;;  %v13624_v20 = vld [vmem:[#allocation15 + $0x554] sm:$0xf0]  ;;  %v10859_v12 = vld [vmem:[#allocation15 + $0x648] sm:$0xf]  ;;  %v10604_v19 = vor.u32 %v13592_v39, %v10603_v34  ;;  %v10560_v34 = vor.u32 %v13578_v28, %v10557_v11  ;;  %v10285_v39 = vld [vmem:[#allocation15 + $0x1d8] sm:$0xf0] }
 0x5fd   : > { %4777 = vmatpush.bf16.msrb.mxu3 %v11068_v58  ;;  %4720 = vmatmul.bf16.vlgmr.msra.gmra.mxu2 %v16102_v60  ;;  %v13656_v51 = vld [vmem:[#allocation15 + $0x654] sm:$0xf0]  ;;  %v10987_v1 = vld [vmem:[#allocation15 + $0x748] sm:$0xf]  ;;  %v10732_v58 = vor.u32 %v13624_v20, %v10731_v49  ;;  %v13542_v49 = vld [vmem:[#allocation15 + $0x2cc] sm:$0xf] }
 0x5fe   : > { %v13688_v54 = vld [vmem:[#allocation15 + $0x754] sm:$0xf0]  ;;  %v10587_v40 = vld [vmem:[#allocation15 + $0x428] sm:$0xf]  ;;  %v10860_v3 = vor.u32 %v13656_v51, %v10859_v12  ;;  %v13574_v12 = vld [vmem:[#allocation15 + $0x3cc] sm:$0xf] }
 0x5ff   : > { %4739 = vmatpush.bf16.msrb.mxu0 %v10668_v41  ;;  %4752 = vmatpush.bf16.msrb.mxu1 %v10796_v59  ;;  %v13588_v26 = vld [vmem:[#allocation15 + $0x434] sm:$0xf0]  ;;  %v10715_v31 = vld [vmem:[#allocation15 + $0x528] sm:$0xf]  ;;  %v10988_v14 = vor.u32 %v13688_v54, %v10987_v1  ;;  %v10541_v51 = vld [vmem:[#allocation15 + $0x3d8] sm:$0xf0] }
 0x600   : > { %4765 = vmatpush.bf16.msrb.mxu2 %v10924_v43  ;;  %v13620_v45 = vld [vmem:[#allocation15 + $0x534] sm:$0xf0]  ;;  %v10843_v41 = vld [vmem:[#allocation15 + $0x628] sm:$0xf]  ;;  %v16138_v43 = vld [vmem:[#allocation17] sm:$0xf]  ;;  %v10588_v5 = vor.u32 %v13588_v26, %v10587_v40 }
 0x601   : > { %4778 = vmatpush.bf16.msrb.mxu3 %v11052_v0  ;;  %v13652_v59 = vld [vmem:[#allocation15 + $0x634] sm:$0xf0]  ;;  %v10971_v4 = vld [vmem:[#allocation15 + $0x728] sm:$0xf]  ;;  %v10716_v7 = vor.u32 %v13620_v45, %v10715_v31  ;;  %v10141_v26 = vld [vmem:[#allocation15 + $0xb8] sm:$0xf0] }
 0x602   : > { %v13684_v38 = vld [vmem:[#allocation15 + $0x734] sm:$0xf0]  ;;  %v10571_v0 = vld [vmem:[#allocation15 + $0x408] sm:$0xf]  ;;  %v10844_v6 = vor.u32 %v13652_v59, %v10843_v41  ;;  %v13506_v31 = vld [vmem:[#allocation15 + $0x1ac] sm:$0xf] }
 0x603   : > { %4740 = vmatpush.bf16.msrb.mxu0 %v10652_v48  ;;  %4753 = vmatpush.bf16.msrb.mxu1 %v10780_v32  ;;  %v13584_v25 = vld [vmem:[#allocation15 + $0x414] sm:$0xf0]  ;;  %v10699_v57 = vld [vmem:[#allocation15 + $0x508] sm:$0xf]  ;;  %v4470_v32 = vperm.slane %v16138_v43, 0 }
 0x604   : > { %4766 = vmatpush.bf16.msrb.mxu2 %v10908_v44  ;;  %v13616_v36 = vld [vmem:[#allocation15 + $0x514] sm:$0xf0]  ;;  %v10827_v48 = vld [vmem:[#allocation15 + $0x608] sm:$0xf]  ;;  %v10972_v44 = vor.u32 %v13684_v38, %v10971_v4  ;;  %v10572_v53 = vor.u32 %v13584_v25, %v10571_v0  ;;  %v10269_v41 = vld [vmem:[#allocation15 + $0x1b8] sm:$0xf0] }
 0x605   : > { %4779 = vmatpush.bf16.msrb.mxu3 %v11036_v24  ;;  %v13648_v22 = vld [vmem:[#allocation15 + $0x614] sm:$0xf0]  ;;  %v10955_v30 = vld [vmem:[#allocation15 + $0x708] sm:$0xf]  ;;  %v13482_v24 = vld [vmem:[#allocation15 + $0xec] sm:$0xf] }
 0x606   : > { %v13680_v55 = vld [vmem:[#allocation15 + $0x714] sm:$0xf0]  ;;  %v10828_v29 = vor.u32 %v13648_v22, %v10827_v48  ;;  %v10176_v47 = vor.u32 %v13482_v24, %v10173_v23  ;;  %v13538_v59 = vld [vmem:[#allocation15 + $0x2ac] sm:$0xf]  ;;  %v10397_v4 = vld [vmem:[#allocation15 + $0x2b8] sm:$0xf0] }
 0x607   : > { %4741 = vmatpush.bf16.msrb.mxu0 %v10636_v21  ;;  %4754 = vmatpush.bf16.msrb.mxu1 %v10764_v61  ;;  %v10429_v21 = vld [vmem:[#allocation15 + $0x2f8] sm:$0xf0]  ;;  %v4487_v61 = vpop.f32.mrf.mxu0  ;;  %v10956_v42 = vor.u32 %v13680_v55, %v10955_v30  ;;  %v13534_v55 = vld [vmem:[#allocation15 + $0x28c] sm:$0xf] }
 0x608   : > { %4767 = vmatpush.bf16.msrb.mxu2 %v10892_v18  ;;  %v10700_v18 = vor.u32 %v13616_v36, %v10699_v57  ;;  %v10432_v9 = vor.u32 %v13546_v17, %v10429_v21  ;;  %v10525_v0 = vld [vmem:[#allocation15 + $0x3b8] sm:$0xf0]  ;;  %v13470_v36 = vld [vmem:[#allocation15 + $0x8c] sm:$0xf] }
 0x609   : > { %4780 = vmatpush.bf16.msrb.mxu3 %v11020_v10  ;;  %v4488_v10 = vadd.f32 %v4487_v61, %v4470_v32  ;;  %v4526_v45 = vpop.f32.mrf.mxu3  ;;  %v10125_v48 = vld [vmem:[#allocation15 + $0x98] sm:$0xf0]  ;;  %v13502_v32 = vld [vmem:[#allocation15 + $0x18c] sm:$0xf] }
 0x60a   : > { %v10253_v30 = vld [vmem:[#allocation15 + $0x198] sm:$0xf0]  ;;  %v13566_v23 = vld [vmem:[#allocation15 + $0x38c] sm:$0xf] }
 0x60b   : > { %4742 = vmatpush.bf16.msrb.mxu0 %v10620_v50  ;;  %4755 = vmatpush.bf16.msrb.mxu1 %v10748_v37  ;;  %v10157_v50 = vld [vmem:[#allocation15 + $0xd8] sm:$0xf0]  ;;  %v13510_v37 = vld [vmem:[#allocation15 + $0x1cc] sm:$0xf]  ;;  %v10256_v17 = vor.u32 %v13502_v32, %v10253_v30 }
 0x60c   : > { %4768 = vmatpush.bf16.msrb.mxu2 %v10876_v8  ;;  %v4500_v8 = vpop.f32.mrf.mxu1  ;;  %v10160_v1 = vor.u32 %v13478_v63, %v10157_v50  ;;  %v10381_v24 = vld [vmem:[#allocation15 + $0x298] sm:$0xf0]  ;;  %v13466_v61 = vld [vmem:[#allocation15 + $0x6c] sm:$0xf] }
 0x60d   : > { %4781 = vmatpush.bf16.msrb.mxu3 %v11004_v52  ;;  %v10413_v52 = vld [vmem:[#allocation15 + $0x2d8] sm:$0xf0]  ;;  %v4501_v20 = vadd.f32 %v4500_v8, %v4488_v10  ;;  %v10384_v21 = vor.u32 %v13534_v55, %v10381_v24  ;;  %v13454_v32 = vld [vmem:[#allocation15 + $0xc] sm:$0xf] }
 0x60e   : > { %v10416_v40 = vor.u32 %v13542_v49, %v10413_v52  ;;  %v10509_v62 = vld [vmem:[#allocation15 + $0x398] sm:$0xf0]  ;;  %v13494_v52 = vld [vmem:[#allocation15 + $0x14c] sm:$0xf] }
 0x60f   : > { %4743 = vmatpush.bf16.msrb.mxu0 %v10604_v19  ;;  %4756 = vmatpush.bf16.msrb.mxu1 %v10732_v58  ;;  %v10288_v19 = vor.u32 %v13510_v37, %v10285_v39  ;;  %v4489_v38 = vpop.f32.mrf.mxu0  ;;  %v10512_v11 = vor.u32 %v13566_v23, %v10509_v62  ;;  %v10237_v10 = vld [vmem:[#allocation15 + $0x178] sm:$0xf0]  ;;  %v13462_v39 = vld [vmem:[#allocation15 + $0x4c] sm:$0xf] }
 0x610   : > { %4769 = vmatpush.bf16.msrb.mxu2 %v10860_v3  ;;  %v13474_v3 = vld [vmem:[#allocation15 + $0xac] sm:$0xf]  ;;  %v10093_v49 = vld [vmem:[#allocation15 + $0x58] sm:$0xf0] }
 0x611   : > { %4782 = vmatpush.bf16.msrb.mxu3 %v10988_v14  ;;  %v10544_v14 = vor.u32 %v13574_v12, %v10541_v51  ;;  %v10144_v57 = vor.u32 %v13474_v3, %v10141_v26  ;;  %v4528_v28 = vpop.f32.mrf.mxu3  ;;  %v10221_v51 = vld [vmem:[#allocation15 + $0x158] sm:$0xf0]  ;;  %v10096_v3 = vor.u32 %v13462_v39, %v10093_v49  ;;  %v13486_v24 = vld [vmem:[#allocation15 + $0x10c] sm:$0xf] }
 0x612   : > { %v10224_v26 = vor.u32 %v13494_v52, %v10221_v51  ;;  %v10189_v23 = vld [vmem:[#allocation15 + $0x118] sm:$0xf0]  ;;  %v13518_v62 = vld [vmem:[#allocation15 + $0x20c] sm:$0xf] }
 0x613   : > { %4744 = vmatpush.bf16.msrb.mxu0 %v10588_v5  ;;  %4757 = vmatpush.bf16.msrb.mxu1 %v10716_v7  ;;  %v13570_v5 = vld [vmem:[#allocation15 + $0x3ac] sm:$0xf]  ;;  %v10272_v7 = vor.u32 %v13506_v31, %v10269_v41  ;;  %v10077_v41 = vld [vmem:[#allocation15 + $0x38] sm:$0xf0] }
 0x614   : > { %4770 = vmatpush.bf16.msrb.mxu2 %v10844_v6  ;;  %v4513_v54 = vpop.f32.mrf.mxu2  ;;  %v10400_v6 = vor.u32 %v13538_v59, %v10397_v4  ;;  %v10528_v22 = vor.u32 %v13570_v5, %v10525_v0  ;;  %v13490_v59 = vld [vmem:[#allocation15 + $0x12c] sm:$0xf]  ;;  %v10205_v5 = vld [vmem:[#allocation15 + $0x138] sm:$0xf0] }
 0x615   : > { %4783 = vmatpush.bf16.msrb.mxu3 %v10972_v44  ;;  %v4514_v58 = vadd.f32 %v4513_v54, %v4501_v20  ;;  %v4502_v44 = vpop.f32.mrf.mxu1  ;;  %v10349_v54 = vld [vmem:[#allocation15 + $0x258] sm:$0xf0]  ;;  %v13522_v0 = vld [vmem:[#allocation15 + $0x22c] sm:$0xf]  ;;  %v10208_v30 = vor.u32 %v13490_v59, %v10205_v5 }
 0x616   : > { %v10061_v44 = vld [vmem:[#allocation15 + $0x18] sm:$0xf0]  ;;  %v13642_v28 = vld [vmem:[#allocation15 + $0x5ec] sm:$0xf] }
 0x617   : > { %4745 = vmatpush.bf16.msrb.mxu0 %v10572_v53  ;;  %4758 = vmatpush.bf16.msrb.mxu1 %v10700_v18  ;;  %v4527_v25 = vadd.f32 %v4526_v45, %v4514_v58  ;;  %v10128_v53 = vor.u32 %v13470_v36, %v10125_v48  ;;  %v10109_v18 = vld [vmem:[#allocation15 + $0x78] sm:$0xf0]  ;;  %v13638_v51 = vld [vmem:[#allocation15 + $0x5cc] sm:$0xf] }
 0x618   : > { %4771 = vmatpush.bf16.msrb.mxu2 %v10828_v29  ;;  %v13498_v29 = vld [vmem:[#allocation15 + $0x16c] sm:$0xf]  ;;  %v10112_v63 = vor.u32 %v13466_v61, %v10109_v18  ;;  %v10445_v61 = vld [vmem:[#allocation15 + $0x318] sm:$0xf0] }
 0x619   : > { %4784 = vmatpush.bf16.msrb.mxu3 %v10956_v42  ;;  %v13530_v42 = vld [vmem:[#allocation15 + $0x26c] sm:$0xf]  ;;  %v10240_v37 = vor.u32 %v13498_v29, %v10237_v10  ;;  %v10685_v29 = vld [vmem:[#allocation15 + $0x4f8] sm:$0xf0] }
 0x61a   : > { %4746 = vmatmul.bf16.vlgmr.msrb.gmra.mxu0 %v16116_v13  ;;  %4759 = vmatmul.bf16.vlgmr.msrb.gmra.mxu1 %v16120_v15  ;;  %v13610_v18 = vld [vmem:[#allocation15 + $0x4ec] sm:$0xf]  ;;  %v10813_v10 = vld [vmem:[#allocation15 + $0x5f8] sm:$0xf0] }
 0x61b   : > { %4790 = vmatpush.bf16.msra.mxu0 %v10176_v47  ;;  %4803 = vmatpush.bf16.msra.mxu1 %v10304_v56  ;;  %v10365_v47 = vld [vmem:[#allocation15 + $0x278] sm:$0xf0]  ;;  %v13562_v56 = vld [vmem:[#allocation15 + $0x36c] sm:$0xf]  ;;  %v10816_v49 = vor.u32 %v13642_v28, %v10813_v10 }
 0x61c   : > { %4816 = vmatpush.bf16.msra.mxu2 %v10432_v9  ;;  %4785 = vmatmul.bf16.vlgmr.msrb.gmra.mxu3 %v16118_v35  ;;  %v4515_v16 = vpop.f32.mrf.mxu2  ;;  %v10493_v9 = vld [vmem:[#allocation15 + $0x378] sm:$0xf0]  ;;  %v10368_v8 = vor.u32 %v13530_v42, %v10365_v47  ;;  %v13674_v42 = vld [vmem:[#allocation15 + $0x6ec] sm:$0xf] }
 0x61d   : > { %4829 = vmatpush.bf16.msra.mxu3 %v10560_v34  ;;  %4772 = vmatmul.bf16.vlgmr.msrb.gmra.mxu2 %v16114_v2  ;;  %v4552_v20 = vpop.f32.mrf.mxu1  ;;  %v10496_v12 = vor.u32 %v13562_v56, %v10493_v9  ;;  %v10941_v47 = vld [vmem:[#allocation15 + $0x6f8] sm:$0xf0]  ;;  %v10192_v56 = vor.u32 %v13486_v24, %v10189_v23  ;;  %v13634_v59 = vld [vmem:[#allocation15 + $0x5ac] sm:$0xf] }
 0x61e   : > { %v10944_v52 = vor.u32 %v13674_v42, %v10941_v47  ;;  %v13666_v5 = vld [vmem:[#allocation15 + $0x6ac] sm:$0xf]  ;;  %v10893_v24 = vld [vmem:[#allocation15 + $0x698] sm:$0xf0] }
 0x61f   : > { %4791 = vmatpush.bf16.msra.mxu0 %v10160_v1  ;;  %4804 = vmatpush.bf16.msra.mxu1 %v10288_v19  ;;  %v4539_v50 = vpop.f32.mrf.mxu0  ;;  %v13526_v1 = vld [vmem:[#allocation15 + $0x24c] sm:$0xf]  ;;  %v11005_v42 = vld [vmem:[#allocation15 + $0x778] sm:$0xf0] }
 0x620   : > { %4817 = vmatpush.bf16.msra.mxu2 %v10416_v40  ;;  %v4540_v34 = vadd.f32 %v4539_v50, %v4527_v25  ;;  %v13558_v19 = vld [vmem:[#allocation15 + $0x34c] sm:$0xf]  ;;  %v10477_v40 = vld [vmem:[#allocation15 + $0x358] sm:$0xf0]  ;;  %v10352_v31 = vor.u32 %v13526_v1, %v10349_v54 }
 0x621   : > { %4830 = vmatpush.bf16.msra.mxu3 %v10544_v14  ;;  %v13458_v14 = vld [vmem:[#allocation15 + $0x2c] sm:$0xf]  ;;  %v10480_v4 = vor.u32 %v13558_v19, %v10477_v40  ;;  %v10333_v25 = vld [vmem:[#allocation15 + $0x238] sm:$0xf0] }
 0x622   : > { %v4553_v58 = vadd.f32 %v4552_v20, %v4540_v34  ;;  %v10080_v36 = vor.u32 %v13458_v14, %v10077_v41  ;;  %v10336_v55 = vor.u32 %v13522_v0, %v10333_v25  ;;  %v11069_v50 = vld [vmem:[#allocation15 + $0x7f8] sm:$0xf0]  ;;  %v10688_v34 = vor.u32 %v13610_v18, %v10685_v29  ;;  %v13606_v20 = vld [vmem:[#allocation15 + $0x4cc] sm:$0xf] }
 0x623   : > { %4792 = vmatpush.bf16.msra.mxu0 %v10144_v57  ;;  %4805 = vmatpush.bf16.msra.mxu1 %v10272_v7  ;;  %v13554_v7 = vld [vmem:[#allocation15 + $0x32c] sm:$0xf]  ;;  %v10797_v54 = vld [vmem:[#allocation15 + $0x5d8] sm:$0xf0] }
 0x624   : > { %4818 = vmatpush.bf16.msra.mxu2 %v10400_v6  ;;  %v4565_v45 = vpop.f32.mrf.mxu2  ;;  %v10461_v6 = vld [vmem:[#allocation15 + $0x338] sm:$0xf0]  ;;  %v13670_v19 = vld [vmem:[#allocation15 + $0x6cc] sm:$0xf] }
 0x625   : > { %4831 = vmatpush.bf16.msra.mxu3 %v10528_v22  ;;  %v4566_v38 = vadd.f32 %v4565_v45, %v4553_v58  ;;  %v10464_v16 = vor.u32 %v13554_v7, %v10461_v6  ;;  %v10925_v40 = vld [vmem:[#allocation15 + $0x6d8] sm:$0xf0]  ;;  %v13702_v58 = vld [vmem:[#allocation15 + $0x7cc] sm:$0xf] }
 0x626   : > { %v10928_v45 = vor.u32 %v13670_v19, %v10925_v40  ;;  %v13602_v14 = vld [vmem:[#allocation15 + $0x4ac] sm:$0xf]  ;;  %v10653_v41 = vld [vmem:[#allocation15 + $0x4b8] sm:$0xf0] }
 0x627   : > { %4793 = vmatpush.bf16.msra.mxu0 %v10128_v53  ;;  %4806 = vmatpush.bf16.msra.mxu1 %v10256_v17  ;;  %v4578_v57 = vpop.f32.mrf.mxu3  ;;  %v4541_v22 = vpop.f32.mrf.mxu0  ;;  %v10317_v17 = vld [vmem:[#allocation15 + $0x218] sm:$0xf0]  ;;  %v13698_v25 = vld [vmem:[#allocation15 + $0x7ac] sm:$0xf]  ;;  %v10656_v7 = vor.u32 %v13602_v14, %v10653_v41 }
 0x628   : > { %4819 = vmatpush.bf16.msra.mxu2 %v10384_v21  ;;  %v16145_v48 = vadd.f32 %v4578_v57, %v4566_v38  ;;  %v4554_v53 = vpop.f32.mrf.mxu1  ;;  %v13550_v21 = vld [vmem:[#allocation15 + $0x30c] sm:$0xf]  ;;  %v10320_v9 = vor.u32 %v13518_v62, %v10317_v17  ;;  %v10781_v38 = vld [vmem:[#allocation15 + $0x5b8] sm:$0xf0] }
 0x629   : > { %4832 = vmatpush.bf16.msra.mxu3 %v10512_v11  ;;  %v10064_v11 = vor.u32 %v13454_v32, %v10061_v44  ;;  %v10909_v0 = vld [vmem:[#allocation15 + $0x6b8] sm:$0xf0]  ;;  %v10784_v6 = vor.u32 %v13634_v59, %v10781_v38  ;;  %v13598_v32 = vld [vmem:[#allocation15 + $0x48c] sm:$0xf] }
 0x62a   : > { %v11037_v57 = vld [vmem:[#allocation15 + $0x7b8] sm:$0xf0]  ;;  %v13694_v23 = vld [vmem:[#allocation15 + $0x78c] sm:$0xf] }
 0x62b   : > { %4794 = vmatpush.bf16.msra.mxu0 %v10112_v63  ;;  %4807 = vmatpush.bf16.msra.mxu1 %v10240_v37  ;;  %v13706_v63 = vld [vmem:[#allocation15 + $0x7ec] sm:$0xf]  ;;  %v10637_v44 = vld [vmem:[#allocation15 + $0x498] sm:$0xf0]  ;;  %v11040_v22 = vor.u32 %v13698_v25, %v11037_v57 }
 0x62c   : > { %4820 = vmatpush.bf16.msra.mxu2 %v10368_v8  ;;  %v4567_v37 = vpop.f32.mrf.mxu2  ;;  %v10448_v8 = vor.u32 %v13550_v21, %v10445_v61  ;;  %v11072_v1 = vor.u32 %v13706_v63, %v11069_v50  ;;  %v10621_v17 = vld [vmem:[#allocation15 + $0x478] sm:$0xf0]  ;;  %v13626_v21 = vld [vmem:[#allocation15 + $0x56c] sm:$0xf] }
 0x62d   : > { %4833 = vmatpush.bf16.msra.mxu3 %v10496_v12  ;;  %v10669_v12 = vld [vmem:[#allocation15 + $0x4d8] sm:$0xf0]  ;;  %v13658_v28 = vld [vmem:[#allocation15 + $0x66c] sm:$0xf] }
 0x62e   : > { %v10749_v29 = vld [vmem:[#allocation15 + $0x578] sm:$0xf0]  ;;  %v13690_v10 = vld [vmem:[#allocation15 + $0x76c] sm:$0xf] }
 0x62f   : > { %4795 = vmatpush.bf16.msra.mxu0 %v10096_v3  ;;  %4808 = vmatpush.bf16.msra.mxu1 %v10224_v26  ;;  %v4580_v39 = vpop.f32.mrf.mxu3  ;;  %v11053_v3 = vld [vmem:[#allocation15 + $0x7d8] sm:$0xf0]  ;;  %v10672_v26 = vor.u32 %v13606_v20, %v10669_v12  ;;  %v13590_v63 = vld [vmem:[#allocation15 + $0x44c] sm:$0xf] }
 0x630   : > { %4821 = vmatpush.bf16.msra.mxu2 %v10352_v31  ;;  %v10800_v31 = vor.u32 %v13638_v51, %v10797_v54  ;;  %v10605_v50 = vld [vmem:[#allocation15 + $0x458] sm:$0xf0]  ;;  %v13622_v37 = vld [vmem:[#allocation15 + $0x54c] sm:$0xf] }
 0x631   : > { %4834 = vmatpush.bf16.msra.mxu3 %v10480_v4  ;;  %v11056_v4 = vor.u32 %v13702_v58, %v11053_v3  ;;  %v10733_v39 = vld [vmem:[#allocation15 + $0x558] sm:$0xf0]  ;;  %v13686_v12 = vld [vmem:[#allocation15 + $0x74c] sm:$0xf] }
 0x632   : > { %v10989_v51 = vld [vmem:[#allocation15 + $0x758] sm:$0xf0]  ;;  %v10736_v19 = vor.u32 %v13622_v37, %v10733_v39  ;;  %v13586_v58 = vld [vmem:[#allocation15 + $0x42c] sm:$0xf] }
 0x633   : > { %4796 = vmatpush.bf16.msra.mxu0 %v10080_v36  ;;  %4809 = vmatpush.bf16.msra.mxu1 %v10208_v30  ;;  %v10912_v36 = vor.u32 %v13666_v5, %v10909_v0  ;;  %v10765_v30 = vld [vmem:[#allocation15 + $0x598] sm:$0xf0]  ;;  %v13650_v41 = vld [vmem:[#allocation15 + $0x62c] sm:$0xf]  ;;  %v4471_v5 = vperm.slane %v16138_v43, 1 }
 0x634   : > { %4822 = vmatpush.bf16.msra.mxu2 %v10336_v55  ;;  %v13662_v55 = vld [vmem:[#allocation15 + $0x68c] sm:$0xf]  ;;  %v10589_v3 = vld [vmem:[#allocation15 + $0x438] sm:$0xf0] }
 0x635   : > { %4835 = vmatpush.bf16.msra.mxu3 %v10464_v16  ;;  %v10896_v53 = vor.u32 %v13662_v55, %v10893_v24  ;;  %v13594_v16 = vld [vmem:[#allocation15 + $0x46c] sm:$0xf]  ;;  %v10717_v14 = vld [vmem:[#allocation15 + $0x538] sm:$0xf0]  ;;  %v10592_v0 = vor.u32 %v13586_v58, %v10589_v3  ;;  %v11099_v58 = vld [vmem:[#allocation18 + $0x30] sm:$0xf] }
 0x636   : > { %v10624_v47 = vor.u32 %v13594_v16, %v10621_v17  ;;  %v10845_v59 = vld [vmem:[#allocation15 + $0x638] sm:$0xf0]  ;;  %v13582_v25 = vld [vmem:[#allocation15 + $0x40c] sm:$0xf]  ;;  %v11163_v3 = vld [vmem:[#allocation18 + $0xb0] sm:$0xf] }
 0x637   : > { %4797 = vmatpush.bf16.msra.mxu0 %v10064_v11  ;;  %4810 = vmatpush.bf16.msra.mxu1 %v10192_v56  ;;  %v16151_v62 = vpop.f32.mrf.mxu0  ;;  %v16153_v61 = vpop.f32.mrf.mxu1  ;;  %v10877_v11 = vld [vmem:[#allocation15 + $0x678] sm:$0xf0]  ;;  %v10752_v56 = vor.u32 %v13626_v21, %v10749_v29  ;;  %v13678_v55 = vld [vmem:[#allocation15 + $0x70c] sm:$0xf] }
 0x638   : > { %4823 = vmatpush.bf16.msra.mxu2 %v10320_v9  ;;  %v10880_v9 = vor.u32 %v13658_v28, %v10877_v11  ;;  %v10973_v38 = vld [vmem:[#allocation15 + $0x738] sm:$0xf0] }
 0x639   : > { %4836 = vmatpush.bf16.msra.mxu3 %v10448_v8  ;;  %v13724_v43 = vld [vmem:[#allocation18 + $0x74] sm:$0xf0] }
 0x63a   : > { %4798 = vmatmul.bf16.vlgmr.msra.gmra.mxu0 %v16104_v33  ;;  %4811 = vmatmul.bf16.vlgmr.msra.gmra.mxu1 %v16108_v27  ;;  %v11021_v33 = vld [vmem:[#allocation15 + $0x798] sm:$0xf0] }
 0x63b   : > { %4842 = vmatpush.bf16.msrb.mxu0 %v10688_v34  ;;  %4855 = vmatpush.bf16.msrb.mxu1 %v10816_v49  ;;  %v11024_v18 = vor.u32 %v13694_v23, %v11021_v33  ;;  %v11008_v34 = vor.u32 %v13690_v10, %v11005_v42  ;;  %v13654_v49 = vld [vmem:[#allocation15 + $0x64c] sm:$0xf]  ;;  %v10957_v23 = vld [vmem:[#allocation15 + $0x718] sm:$0xf0]  ;;  %v11131_v33 = vld [vmem:[#allocation18 + $0x70] sm:$0xf] }
 0x63c   : > { %4868 = vmatpush.bf16.msrb.mxu2 %v10944_v52  ;;  %4837 = vmatmul.bf16.vlgmr.msra.gmra.mxu3 %v16106_v46  ;;  %v10640_v46 = vor.u32 %v13598_v32, %v10637_v44  ;;  %v10861_v52 = vld [vmem:[#allocation15 + $0x658] sm:$0xf0]  ;;  %v11132_v29 = vor.u32 %v13724_v43, %v11131_v33  ;;  %v11123_v10 = vld [vmem:[#allocation18 + $0x60] sm:$0xf]  ;;  %v13722_v42 = vld [vmem:[#allocation18 + $0x64] sm:$0xf0] }
 0x63d   : > { %4881 = vmatpush.bf16.msrb.mxu3 %v11072_v1  ;;  %4824 = vmatmul.bf16.vlgmr.msra.gmra.mxu2 %v16102_v60  ;;  %v13630_v60 = vld [vmem:[#allocation15 + $0x58c] sm:$0xf]  ;;  %v10608_v1 = vor.u32 %v13590_v63, %v10605_v50  ;;  %v10864_v40 = vor.u32 %v13654_v49, %v10861_v52  ;;  %v10701_v32 = vld [vmem:[#allocation15 + $0x518] sm:$0xf0]  ;;  %v11115_v50 = vld [vmem:[#allocation18 + $0x50] sm:$0xf] }
 0x63e   : > { %v10768_v27 = vor.u32 %v13630_v60, %v10765_v30  ;;  %v10829_v30 = vld [vmem:[#allocation15 + $0x618] sm:$0xf0]  ;;  %v11147_v33 = vld [vmem:[#allocation18 + $0x90] sm:$0xf] }
 0x63f   : > { %4843 = vmatpush.bf16.msrb.mxu0 %v10672_v26  ;;  %4856 = vmatpush.bf16.msrb.mxu1 %v10800_v31  ;;  %v16157_v20 = vpop.f32.mrf.mxu3  ;;  %v4593_v54 = vpop.f32.mrf.mxu0  ;;  %v13618_v26 = vld [vmem:[#allocation15 + $0x52c] sm:$0xf]  ;;  %v13740_v16 = vld [vmem:[#allocation18 + $0xf4] sm:$0xf0] }
 0x640   : > { %4869 = vmatpush.bf16.msrb.mxu2 %v10928_v45  ;;  %v16155_v8 = vpop.f32.mrf.mxu2  ;;  %v4606_v31 = vpop.f32.mrf.mxu1  ;;  %v10992_v45 = vor.u32 %v13686_v12, %v10989_v51  ;;  %v10720_v57 = vor.u32 %v13618_v26, %v10717_v14  ;;  %v13720_v37 = vld [vmem:[#allocation18 + $0x54] sm:$0xf0]  ;;  %v13718_v12 = vld [vmem:[#allocation18 + $0x44] sm:$0xf0]  ;;  %v11171_v51 = vld [vmem:[#allocation18 + $0xc0] sm:$0xf] }
 0x641   : > { %4882 = vmatpush.bf16.msrb.mxu3 %v11056_v4  ;;  %v13682_v4 = vld [vmem:[#allocation15 + $0x72c] sm:$0xf]  ;;  %v11116_v39 = vor.u32 %v13720_v37, %v11115_v50  ;;  %v13756_v54 = vld [vmem:[#allocation18 + $0x174] sm:$0xf0]  ;;  %v13739_v50 = vld [vmem:[#allocation18 + $0xf4] sm:$0xf] }
 0x642   : > { %v10976_v60 = vor.u32 %v13682_v4, %v10973_v38  ;;  %v13754_v14 = vld [vmem:[#allocation18 + $0x164] sm:$0xf0]  ;;  %v11197_v37 = vld [vmem:[#allocation18 + $0xf8] sm:$0xf0] }
 0x643   : > { %4844 = vmatpush.bf16.msrb.mxu0 %v10656_v7  ;;  %4857 = vmatpush.bf16.msrb.mxu1 %v10784_v6  ;;  %v10848_v7 = vor.u32 %v13650_v41, %v10845_v59  ;;  %v10573_v6 = vld [vmem:[#allocation15 + $0x418] sm:$0xf0] }
 0x644   : > { %4870 = vmatpush.bf16.msrb.mxu2 %v10912_v36  ;;  %v13614_v36 = vld [vmem:[#allocation15 + $0x50c] sm:$0xf] }
 0x645   : > { %4883 = vmatpush.bf16.msrb.mxu3 %v11040_v22  ;;  %v13646_v22 = vld [vmem:[#allocation15 + $0x60c] sm:$0xf]  ;;  %v10704_v17 = vor.u32 %v13614_v36, %v10701_v32  ;;  %v11243_v36 = vld [vmem:[#allocation18 + $0x150] sm:$0xf]  ;;  %v13752_v32 = vld [vmem:[#allocation18 + $0x154] sm:$0xf0] }
 0x646   : > { %v10832_v21 = vor.u32 %v13646_v22, %v10829_v30 }
 0x647   : > { %4845 = vmatpush.bf16.msrb.mxu0 %v10640_v46  ;;  %4858 = vmatpush.bf16.msrb.mxu1 %v10768_v27  ;;  %v4632_v24 = vpop.f32.mrf.mxu3  ;;  %v4592_v46 = vadd.f32 %v16151_v62, %v4471_v5  ;;  %v10576_v27 = vor.u32 %v13582_v25, %v10573_v6  ;;  %v11124_v62 = vor.u32 %v13722_v42, %v11123_v10  ;;  %v11091_v5 = vld [vmem:[#allocation18 + $0x20] sm:$0xf]  ;;  %v13726_v10 = vld [vmem:[#allocation18 + $0x84] sm:$0xf0]  ;;  %v13723_v42 = vld [vmem:[#allocation18 + $0x74] sm:$0xf] }
 0x648   : > { %4871 = vmatpush.bf16.msrb.mxu2 %v10896_v53  ;;  %v4619_v44 = vpop.f32.mrf.mxu2  ;;  %v11195_v53 = vld [vmem:[#allocation18 + $0xf0] sm:$0xf]  ;;  %v11155_v25 = vld [vmem:[#allocation18 + $0xa0] sm:$0xf] }
 0x649   : > { %4884 = vmatpush.bf16.msrb.mxu3 %v11024_v18  ;;  %v10960_v18 = vor.u32 %v13678_v55, %v10957_v23  ;;  %v11196_v28 = vor.u32 %v13740_v16, %v11195_v53  ;;  %v4605_v11 = vadd.f32 %v16153_v61, %v4592_v46  ;;  %v11179_v61 = vld [vmem:[#allocation18 + $0xd0] sm:$0xf]  ;;  %v11244_v44 = vor.u32 %v13752_v32, %v11243_v36  ;;  %v13712_v23 = vld [vmem:[#allocation18 + $0x14] sm:$0xf0]  ;;  %v13750_v53 = vld [vmem:[#allocation18 + $0x144] sm:$0xf0] }
 0x64a   : > { %v11083_v24 = vld [vmem:[#allocation18 + $0x10] sm:$0xf]  ;;  %v13728_v46 = vld [vmem:[#allocation18 + $0x94] sm:$0xf0]  ;;  %v13733_v36 = vld [vmem:[#allocation18 + $0xc4] sm:$0xf] }
 0x64b   : > { %4846 = vmatpush.bf16.msrb.mxu0 %v10624_v47  ;;  %4859 = vmatpush.bf16.msrb.mxu1 %v10752_v56  ;;  %v11187_v47 = vld [vmem:[#allocation18 + $0xe0] sm:$0xf]  ;;  %v13738_v56 = vld [vmem:[#allocation18 + $0xe4] sm:$0xf0]  ;;  %v4618_v63 = vadd.f32 %v16155_v8, %v4605_v11  ;;  %v11173_v32 = vld [vmem:[#allocation18 + $0xc8] sm:$0xf0] }
 0x64c   : > { %4872 = vmatpush.bf16.msrb.mxu2 %v10880_v9  ;;  %v11188_v9 = vor.u32 %v13738_v56, %v11187_v47  ;;  %v13734_v8 = vld [vmem:[#allocation18 + $0xc4] sm:$0xf0]  ;;  %v11139_v11 = vld [vmem:[#allocation18 + $0x80] sm:$0xf]  ;;  %v11133_v56 = vld [vmem:[#allocation18 + $0x78] sm:$0xf0] }
 0x64d   : > { %4885 = vmatpush.bf16.msrb.mxu3 %v11008_v34  ;;  %v13736_v34 = vld [vmem:[#allocation18 + $0xd4] sm:$0xf0]  ;;  %v4631_v49 = vadd.f32 %v16157_v20, %v4618_v63 }
 0x64e   : > { %v11180_v52 = vor.u32 %v13736_v34, %v11179_v61  ;;  %v13732_v20 = vld [vmem:[#allocation18 + $0xb4] sm:$0xf0] }
 0x64f   : > { %4847 = vmatpush.bf16.msrb.mxu0 %v10608_v1  ;;  %4860 = vmatpush.bf16.msrb.mxu1 %v10736_v19  ;;  %v11259_v1 = vld [vmem:[#allocation18 + $0x170] sm:$0xf]  ;;  %v11164_v38 = vor.u32 %v13732_v20, %v11163_v3  ;;  %v13748_v63 = vld [vmem:[#allocation18 + $0x134] sm:$0xf0]  ;;  %v11117_v20 = vld [vmem:[#allocation18 + $0x58] sm:$0xf0] }
 0x650   : > { %4873 = vmatpush.bf16.msrb.mxu2 %v10864_v40  ;;  %v11260_v19 = vor.u32 %v13756_v54, %v11259_v1  ;;  %v11172_v40 = vor.u32 %v13734_v8, %v11171_v51  ;;  %v11200_v51 = vor.u32 %v13739_v50, %v11197_v37  ;;  %v11125_v8 = vld [vmem:[#allocation18 + $0x68] sm:$0xf0]  ;;  %v11219_v1 = vld [vmem:[#allocation18 + $0x120] sm:$0xf]  ;;  %v13746_v54 = vld [vmem:[#allocation18 + $0x124] sm:$0xf0] }
 0x651   : > { %4886 = vmatpush.bf16.msrb.mxu3 %v10992_v45  ;;  %v11251_v45 = vld [vmem:[#allocation18 + $0x160] sm:$0xf]  ;;  %v13744_v3 = vld [vmem:[#allocation18 + $0x114] sm:$0xf0]  ;;  %v11085_v50 = vld [vmem:[#allocation18 + $0x18] sm:$0xf0] }
 0x652   : > { %v11252_v41 = vor.u32 %v13754_v14, %v11251_v45  ;;  %v13735_v45 = vld [vmem:[#allocation18 + $0xd4] sm:$0xf] }
 0x653   : > { %4848 = vmatpush.bf16.msrb.mxu0 %v10592_v0  ;;  %4861 = vmatpush.bf16.msrb.mxu1 %v10720_v57  ;;  %v13714_v0 = vld [vmem:[#allocation18 + $0x24] sm:$0xf0]  ;;  %v13727_v37 = vld [vmem:[#allocation18 + $0x94] sm:$0xf] }
 0x654   : > { %4874 = vmatpush.bf16.msrb.mxu2 %v10848_v7  ;;  %v13730_v7 = vld [vmem:[#allocation18 + $0xa4] sm:$0xf0] }
 0x655   : > { %4887 = vmatpush.bf16.msrb.mxu3 %v10976_v60  ;;  %v11092_v60 = vor.u32 %v13714_v0, %v11091_v5  ;;  %v11156_v55 = vor.u32 %v13730_v7, %v11155_v25  ;;  %v11261_v5 = vld [vmem:[#allocation18 + $0x178] sm:$0xf0]  ;;  %v11109_v7 = vld [vmem:[#allocation18 + $0x48] sm:$0xf0] }
 0x657   : > { %4849 = vmatpush.bf16.msrb.mxu0 %v10576_v27  ;;  %4862 = vmatpush.bf16.msrb.mxu1 %v10704_v17  ;;  %v4656_v31 = vpop.f32.mrf.mxu1  ;;  %v11235_v27 = vld [vmem:[#allocation18 + $0x140] sm:$0xf] }
 0x658   : > { %4875 = vmatpush.bf16.msrb.mxu2 %v10832_v21  ;;  %v11236_v16 = vor.u32 %v13750_v53, %v11235_v27  ;;  %v11084_v21 = vor.u32 %v13712_v23, %v11083_v24  ;;  %v13731_v24 = vld [vmem:[#allocation18 + $0xb4] sm:$0xf]  ;;  %v11253_v27 = vld [vmem:[#allocation18 + $0x168] sm:$0xf0] }
 0x659   : > { %4888 = vmatpush.bf16.msrb.mxu3 %v10960_v18  ;;  %v11075_v18 = vld [vmem:[#allocation18] sm:$0xf] }
 0x65a   : > { %4850 = vmatmul.bf16.vlgmr.msrb.gmra.mxu0 %v16116_v13  ;;  %4863 = vmatmul.bf16.vlgmr.msrb.gmra.mxu1 %v16120_v15  ;;  %v11107_v13 = vld [vmem:[#allocation18 + $0x40] sm:$0xf] }
 0x65b   : > { %5292 = vmatpush.bf16.msra.mxu0 %v11132_v29  ;;  %5305 = vmatpush.bf16.msra.mxu1 %v11196_v28  ;;  %v11108_v15 = vor.u32 %v13718_v12, %v11107_v13  ;;  %v13710_v29 = vld [vmem:[#allocation18 + $0x4] sm:$0xf0]  ;;  %v11148_v28 = vor.u32 %v13728_v46, %v11147_v33  ;;  %v11136_v13 = vor.u32 %v13723_v42, %v11133_v56  ;;  %v13721_v12 = vld [vmem:[#allocation18 + $0x64] sm:$0xf]  ;;  %v11165_v33 = vld [vmem:[#allocation18 + $0xb8] sm:$0xf0] }
 0x65c   : > { %4876 = vmatmul.bf16.vlgmr.msrb.gmra.mxu2 %v16114_v2  ;;  %4889 = vmatmul.bf16.vlgmr.msrb.gmra.mxu3 %v16118_v35  ;;  %v4643_v2 = vpop.f32.mrf.mxu0  ;;  %v13716_v35 = vld [vmem:[#allocation18 + $0x34] sm:$0xf0]  ;;  %v13753_v46 = vld [vmem:[#allocation18 + $0x164] sm:$0xf]  ;;  %v11245_v42 = vld [vmem:[#allocation18 + $0x158] sm:$0xf0] }
 0x65d   : > { %v4644_v26 = vadd.f32 %v4643_v2, %v4631_v49  ;;  %5318 = vmatpush.bf16.msra.mxu2 %v11260_v19  ;;  %v11100_v59 = vor.u32 %v13716_v35, %v11099_v58  ;;  %v4894_v49 = vmax.f32 %v16145_v48, 0.0  ;;  %v13737_v19 = vld [vmem:[#allocation18 + $0xe4] sm:$0xf]  ;;  %v11220_v2 = vor.u32 %v13746_v54, %v11219_v1  ;;  %v11211_v35 = vld [vmem:[#allocation18 + $0x110] sm:$0xf] }
 0x65e   : > { %v11128_v48 = vor.u32 %v13721_v12, %v11125_v8  ;;  %v11212_v14 = vor.u32 %v13744_v3, %v11211_v35  ;;  %v11256_v53 = vor.u32 %v13753_v46, %v11253_v27  ;;  %v13709_v1 = vld [vmem:[#allocation18 + $0x4] sm:$0xf]  ;;  %v11141_v35 = vld [vmem:[#allocation18 + $0x88] sm:$0xf0] }
 0x65f   : > { %5293 = vmatpush.bf16.msra.mxu0 %v11124_v62  ;;  %5306 = vmatpush.bf16.msra.mxu1 %v11188_v9  ;;  %v4657_v4 = vadd.f32 %v4656_v31, %v4644_v26  ;;  %v4682_v6 = vpop.f32.mrf.mxu3  ;;  %v4658_v43 = vpop.f32.mrf.mxu1  ;;  %v11227_v9 = vld [vmem:[#allocation18 + $0x130] sm:$0xf]  ;;  %v16171_v58 = vpack.c.bf16 %v4894_v49, %v4894_v49  ;;  %v13719_v31 = vld [vmem:[#allocation18 + $0x54] sm:$0xf]  ;;  %v13749_v49 = vld [vmem:[#allocation18 + $0x144] sm:$0xf] }
 0x660   : > { %v4669_v57 = vpop.f32.mrf.mxu2  ;;  %v11228_v61 = vor.u32 %v13748_v63, %v11227_v9  ;;  %v11120_v0 = vor.u32 %v13719_v31, %v11117_v20  ;;  %v13711_v63 = vld [vmem:[#allocation18 + $0x14] sm:$0xf]  ;;  %v13745_v20 = vld [vmem:[#allocation18 + $0x124] sm:$0xf] }
 0x661   : > { %5319 = vmatpush.bf16.msra.mxu2 %v11252_v41  ;;  %v4670_v22 = vadd.f32 %v4669_v57, %v4657_v4  ;;  %v11181_v41 = vld [vmem:[#allocation18 + $0xd8] sm:$0xf0]  ;;  %v13742_v4 = vld [vmem:[#allocation18 + $0x104] sm:$0xf0]  ;;  %v13717_v57 = vld [vmem:[#allocation18 + $0x44] sm:$0xf]  ;;  %v11088_v12 = vor.u32 %v13711_v63, %v11085_v50 }
 0x662   : > { %v11184_v25 = vor.u32 %v13735_v45, %v11181_v41  ;;  %v11221_v45 = vld [vmem:[#allocation18 + $0x128] sm:$0xf0]  ;;  %v13762_v63 = vld [vmem:[#allocation18 + $0x1a4] sm:$0xf0] }
 0x663   : > { %5294 = vmatpush.bf16.msra.mxu0 %v11116_v39  ;;  %5307 = vmatpush.bf16.msra.mxu1 %v11180_v52  ;;  %v4683_v17 = vadd.f32 %v4682_v6, %v4670_v22  ;;  %v11076_v39 = vor.u32 %v13710_v29, %v11075_v18  ;;  %v11140_v52 = vor.u32 %v13726_v10, %v11139_v11  ;;  %v11093_v18 = vld [vmem:[#allocation18 + $0x28] sm:$0xf0]  ;;  %v13729_v29 = vld [vmem:[#allocation18 + $0xa4] sm:$0xf]  ;;  %v13751_v10 = vld [vmem:[#allocation18 + $0x154] sm:$0xf] }
 0x664   : > { %v4645_v30 = vpop.f32.mrf.mxu0  ;;  %v11176_v22 = vor.u32 %v13733_v36, %v11173_v32  ;;  %v11248_v56 = vor.u32 %v13751_v10, %v11245_v42  ;;  %v13741_v36 = vld [vmem:[#allocation18 + $0x104] sm:$0xf]  ;;  %v11205_v32 = vld [vmem:[#allocation18 + $0x108] sm:$0xf0] }
 0x665   : > { %5320 = vmatpush.bf16.msra.mxu2 %v11244_v44  ;;  %v4895_v34 = vmax.f32 %v4683_v17, 0.0  ;;  %v13715_v30 = vld [vmem:[#allocation18 + $0x34] sm:$0xf]  ;;  %v11168_v17 = vor.u32 %v13731_v24, %v11165_v33  ;;  %v13768_v33 = vld [vmem:[#allocation18 + $0x1d4] sm:$0xf0] }
 0x667   : > { %5295 = vmatpush.bf16.msra.mxu0 %v11108_v15  ;;  %5308 = vmatpush.bf16.msra.mxu1 %v11172_v40  ;;  %v4684_v62 = vpop.f32.mrf.mxu3  ;;  %v11189_v15 = vld [vmem:[#allocation18 + $0xe8] sm:$0xf0]  ;;  %v16169_v40 = vpack.c.bf16 %v4895_v34, %v4895_v34  ;;  %v11149_v34 = vld [vmem:[#allocation18 + $0x98] sm:$0xf0] }
 0x668   : > { %v4671_v47 = vpop.f32.mrf.mxu2  ;;  %v11192_v26 = vor.u32 %v13737_v19, %v11189_v15  ;;  %v11152_v54 = vor.u32 %v13727_v37, %v11149_v34  ;;  %v11077_v19 = vld [vmem:[#allocation18 + $0x8] sm:$0xf0]  ;;  %v13747_v15 = vld [vmem:[#allocation18 + $0x134] sm:$0xf] }
 0x669   : > { %5321 = vmatpush.bf16.msra.mxu2 %v11236_v16 }
 0x66b   : > { %5296 = vmatpush.bf16.msra.mxu0 %v11100_v59  ;;  %5309 = vmatpush.bf16.msra.mxu1 %v11164_v38  ;;  %v11203_v59 = vld [vmem:[#allocation18 + $0x100] sm:$0xf]  ;;  %v13755_v38 = vld [vmem:[#allocation18 + $0x174] sm:$0xf] }
 0x66c   : > { %v11204_v6 = vor.u32 %v13742_v4, %v11203_v59  ;;  %v11264_v44 = vor.u32 %v13755_v38, %v11261_v5  ;;  %v11080_v59 = vor.u32 %v13709_v1, %v11077_v19  ;;  %v13772_v4 = vld [vmem:[#allocation18 + $0x1f4] sm:$0xf0]  ;;  %v13771_v1 = vld [vmem:[#allocation18 + $0x1f4] sm:$0xf] }
 0x66d   : > { %5322 = vmatpush.bf16.msra.mxu2 %v11228_v61 }
 0x66f   : > { %5297 = vmatpush.bf16.msra.mxu0 %v11092_v60  ;;  %5310 = vmatpush.bf16.msra.mxu1 %v11156_v55  ;;  %v11112_v60 = vor.u32 %v13717_v57, %v11109_v7  ;;  %v11101_v55 = vld [vmem:[#allocation18 + $0x38] sm:$0xf0] }
 0x670   : > { %v11104_v16 = vor.u32 %v13715_v30, %v11101_v55  ;;  %v11213_v57 = vld [vmem:[#allocation18 + $0x118] sm:$0xf0]  ;;  %v11315_v30 = vld [vmem:[#allocation18 + $0x1e0] sm:$0xf]  ;;  %v13770_v55 = vld [vmem:[#allocation18 + $0x1e4] sm:$0xf0] }
 0x671   : > { %5323 = vmatpush.bf16.msra.mxu2 %v11220_v2  ;;  %v11229_v2 = vld [vmem:[#allocation18 + $0x138] sm:$0xf0]  ;;  %v11316_v24 = vor.u32 %v13770_v55, %v11315_v30 }
 0x672   : > { %v11277_v30 = vld [vmem:[#allocation18 + $0x198] sm:$0xf0] }
 0x673   : > { %5298 = vmatpush.bf16.msra.mxu0 %v11084_v21  ;;  %5311 = vmatpush.bf16.msra.mxu1 %v11148_v28  ;;  %v13713_v21 = vld [vmem:[#allocation18 + $0x24] sm:$0xf]  ;;  %v11157_v28 = vld [vmem:[#allocation18 + $0xa8] sm:$0xf0] }
 0x674   : > { %v11096_v62 = vor.u32 %v13713_v21, %v11093_v18  ;;  %v11160_v9 = vor.u32 %v13729_v29, %v11157_v28  ;;  %v11291_v28 = vld [vmem:[#allocation18 + $0x1b0] sm:$0xf] }
 0x675   : > { %5324 = vmatpush.bf16.msra.mxu2 %v11212_v14  ;;  %v11323_v14 = vld [vmem:[#allocation18 + $0x1f0] sm:$0xf] }
 0x676   : > { %v11324_v5 = vor.u32 %v13772_v4, %v11323_v14 }
 0x677   : > { %5299 = vmatpush.bf16.msra.mxu0 %v11076_v39  ;;  %5312 = vmatpush.bf16.msra.mxu1 %v11140_v52  ;;  %v4695_v23 = vpop.f32.mrf.mxu0  ;;  %v16175_v43 = vpop.f32.mrf.mxu1  ;;  %v11237_v52 = vld [vmem:[#allocation18 + $0x148] sm:$0xf0] }
 0x678   : > { %5331 = vmatpush.bf16.msra.mxu3 %v11324_v5 }
 0x679   : > { %5325 = vmatpush.bf16.msra.mxu2 %v11204_v6 }
 0x67a   : > { %5300 = vmatmul.bf16.vlgmr.msra.gmra.mxu0 %v16171_v58  ;;  %5313 = vmatmul.bf16.vlgmr.msra.gmra.mxu1 %v16169_v40 }
 0x67b   : > { %5344 = vmatpush.bf16.msrb.mxu0 %v11136_v13  ;;  %5357 = vmatpush.bf16.msrb.mxu1 %v11200_v51  ;;  %v11240_v13 = vor.u32 %v13749_v49, %v11237_v52  ;;  %v16177_v51 = vld [vmem:[#allocation17] sm:$0xf]  ;;  %v13760_v49 = vld [vmem:[#allocation18 + $0x194] sm:$0xf0] }
 0x67c   : > { %v4472_v8 = vperm.slane %v16177_v51, 2  ;;  %5332 = vmatpush.bf16.msra.mxu3 %v11316_v24 }
 0x67d   : > { %5370 = vmatpush.bf16.msrb.mxu2 %v11264_v44 }
 0x67e   : > { %v4696_v41 = vadd.f32 %v4695_v23, %v4472_v8  ;;  %v11307_v23 = vld [vmem:[#allocation18 + $0x1d0] sm:$0xf] }
 0x67f   : > { %5345 = vmatpush.bf16.msrb.mxu0 %v11128_v48  ;;  %5358 = vmatpush.bf16.msrb.mxu1 %v11192_v26  ;;  %v4734_v47 = vpop.f32.mrf.mxu3  ;;  %v4697_v61 = vpop.f32.mrf.mxu0  ;;  %v13725_v48 = vld [vmem:[#allocation18 + $0x84] sm:$0xf]  ;;  %v11232_v26 = vor.u32 %v13747_v15, %v11229_v2  ;;  %v11317_v2 = vld [vmem:[#allocation18 + $0x1e8] sm:$0xf0] }
 0x680   : > { %v4721_v11 = vpop.f32.mrf.mxu2  ;;  %v4710_v39 = vpop.f32.mrf.mxu1  ;;  %v11144_v38 = vor.u32 %v13725_v48, %v11141_v35  ;;  %v4709_v7 = vadd.f32 %v16175_v43, %v4696_v41  ;;  %v13769_v15 = vld [vmem:[#allocation18 + $0x1e4] sm:$0xf] }
 0x681   : > { %5371 = vmatpush.bf16.msrb.mxu2 %v11256_v53  ;;  %v11308_v53 = vor.u32 %v13768_v33, %v11307_v23  ;;  %v11275_v39 = vld [vmem:[#allocation18 + $0x190] sm:$0xf]  ;;  %v11320_v35 = vor.u32 %v13769_v15, %v11317_v2  ;;  %v13765_v41 = vld [vmem:[#allocation18 + $0x1c4] sm:$0xf]  ;;  %v11269_v33 = vld [vmem:[#allocation18 + $0x188] sm:$0xf0] }
 0x682   : > { %v4722_v44 = vadd.f32 %v4721_v11, %v4709_v7  ;;  %v13764_v11 = vld [vmem:[#allocation18 + $0x1b4] sm:$0xf0]  ;;  %v11276_v52 = vor.u32 %v13760_v49, %v11275_v39  ;;  %v13757_v23 = vld [vmem:[#allocation18 + $0x184] sm:$0xf] }
 0x683   : > { %5346 = vmatpush.bf16.msrb.mxu0 %v11120_v0  ;;  %5359 = vmatpush.bf16.msrb.mxu1 %v11184_v25  ;;  %v11224_v0 = vor.u32 %v13745_v20, %v11221_v45  ;;  %v13743_v25 = vld [vmem:[#allocation18 + $0x114] sm:$0xf] }
 0x684   : > { %v11216_v6 = vor.u32 %v13743_v25, %v11213_v57  ;;  %5333 = vmatpush.bf16.msra.mxu3 %v11308_v53  ;;  %v11293_v25 = vld [vmem:[#allocation18 + $0x1b8] sm:$0xf0]  ;;  %v4473_v57 = vperm.slane %v16177_v51, 3 }
 0x685   : > { %5372 = vmatpush.bf16.msrb.mxu2 %v11248_v56  ;;  %v11292_v56 = vor.u32 %v13764_v11, %v11291_v28 }
 0x687   : > { %5347 = vmatpush.bf16.msrb.mxu0 %v11112_v60  ;;  %5360 = vmatpush.bf16.msrb.mxu1 %v11176_v22  ;;  %v4736_v31 = vpop.f32.mrf.mxu3  ;;  %v11208_v60 = vor.u32 %v13741_v36, %v11205_v32  ;;  %v4735_v22 = vadd.f32 %v4734_v47, %v4722_v44  ;;  %v11285_v36 = vld [vmem:[#allocation18 + $0x1a8] sm:$0xf0] }
 0x688   : > { %v4723_v3 = vpop.f32.mrf.mxu2  ;;  %v11309_v31 = vld [vmem:[#allocation18 + $0x1d8] sm:$0xf0] }
 0x689   : > { %5373 = vmatpush.bf16.msrb.mxu2 %v11240_v13  ;;  %v11267_v13 = vld [vmem:[#allocation18 + $0x180] sm:$0xf] }
 0x68b   : > { %5348 = vmatpush.bf16.msrb.mxu0 %v11104_v16  ;;  %5361 = vmatpush.bf16.msrb.mxu1 %v11168_v17  ;;  %v11299_v16 = vld [vmem:[#allocation18 + $0x1c0] sm:$0xf]  ;;  %v13766_v17 = vld [vmem:[#allocation18 + $0x1c4] sm:$0xf0] }
 0x68d   : > { %5374 = vmatpush.bf16.msrb.mxu2 %v11232_v26  ;;  %v13767_v26 = vld [vmem:[#allocation18 + $0x1d4] sm:$0xf] }
 0x68e   : > { %v11312_v20 = vor.u32 %v13767_v26, %v11309_v31  ;;  %v13965_v26 = vld [vmem:[#allocation21 + $0x604] sm:$0xf] }
 0x68f   : > { %5349 = vmatpush.bf16.msrb.mxu0 %v11096_v62  ;;  %5362 = vmatpush.bf16.msrb.mxu1 %v11160_v9  ;;  %v11283_v9 = vld [vmem:[#allocation18 + $0x1a0] sm:$0xf] }
 0x690   : > { %v11284_v61 = vor.u32 %v13762_v63, %v11283_v9 }
 0x691   : > { %5375 = vmatpush.bf16.msrb.mxu2 %v11224_v0  ;;  %v13763_v0 = vld [vmem:[#allocation18 + $0x1b4] sm:$0xf] }
 0x692   : > { %v11296_v7 = vor.u32 %v13763_v0, %v11293_v25 }
 0x693   : > { %5350 = vmatpush.bf16.msrb.mxu0 %v11088_v12  ;;  %5363 = vmatpush.bf16.msrb.mxu1 %v11152_v54  ;;  %v13758_v12 = vld [vmem:[#allocation18 + $0x184] sm:$0xf0]  ;;  %v11325_v54 = vld [vmem:[#allocation18 + $0x1f8] sm:$0xf0] }
 0x694   : > { %v11268_v8 = vor.u32 %v13758_v12, %v11267_v13  ;;  %v11328_v19 = vor.u32 %v13771_v1, %v11325_v54  ;;  %v14013_v13 = vld [vmem:[#allocation21 + $0x77c] sm:$0xf0]  ;;  %v13997_v12 = vld [vmem:[#allocation21 + $0x704] sm:$0xf] }
 0x695   : > { %5376 = vmatpush.bf16.msrb.mxu2 %v11216_v6  ;;  %v13761_v6 = vld [vmem:[#allocation18 + $0x1a4] sm:$0xf] }
 0x696   : > { %v12229_v1 = vld [vmem:[#allocation21 + $0x780] sm:$0xf0] }
 0x697   : > { %5351 = vmatpush.bf16.msrb.mxu0 %v11080_v59  ;;  %5364 = vmatpush.bf16.msrb.mxu1 %v11144_v38  ;;  %v4747_v43 = vpop.f32.mrf.mxu0  ;;  %v4760_v27 = vpop.f32.mrf.mxu1  ;;  %v11301_v59 = vld [vmem:[#allocation18 + $0x1c8] sm:$0xf0]  ;;  %v12232_v54 = vor.u32 %v13997_v12, %v12229_v1  ;;  %v11331_v12 = vld [vmem:[#allocation21] sm:$0xf] }
 0x698   : > { %v4748_v46 = vadd.f32 %v4747_v43, %v4735_v22  ;;  %v11304_v38 = vor.u32 %v13765_v41, %v11301_v59  ;;  %v13759_v22 = vld [vmem:[#allocation18 + $0x194] sm:$0xf]  ;;  %v13933_v59 = vld [vmem:[#allocation21 + $0x504] sm:$0xf] }
 0x699   : > { %5377 = vmatpush.bf16.msrb.mxu2 %v11208_v60  ;;  %v11288_v60 = vor.u32 %v13761_v6, %v11285_v36  ;;  %v11280_v24 = vor.u32 %v13759_v22, %v11277_v30  ;;  %v13901_v6 = vld [vmem:[#allocation21 + $0x404] sm:$0xf]  ;;  %v13251_v30 = vld [vmem:[#allocation21 + $0xf00] sm:$0xf] }
 0x69a   : > { %5352 = vmatmul.bf16.vlgmr.msrb.gmra.mxu0 %v16171_v58  ;;  %5365 = vmatmul.bf16.vlgmr.msrb.gmra.mxu1 %v16169_v40  ;;  %v4761_v58 = vadd.f32 %v4760_v27, %v4748_v46  ;;  %v11300_v40 = vor.u32 %v13766_v17, %v11299_v16  ;;  %v11272_v46 = vor.u32 %v13757_v23, %v11269_v33 }
 0x69c   : > { %5334 = vmatpush.bf16.msra.mxu3 %v11300_v40 }
 0x69f   : > { %v4786_v29 = vpop.f32.mrf.mxu3  ;;  %v4749_v42 = vpop.f32.mrf.mxu0 }
 0x6a0   : > { %v4773_v21 = vpop.f32.mrf.mxu2  ;;  %v4762_v47 = vpop.f32.mrf.mxu1  ;;  %5335 = vmatpush.bf16.msra.mxu3 %v11292_v56 }
 0x6a1   : > { %v4774_v18 = vadd.f32 %v4773_v21, %v4761_v58 }
 0x6a3   : > { %v4787_v10 = vadd.f32 %v4786_v29, %v4774_v18 }
 0x6a4   : > { %5336 = vmatpush.bf16.msra.mxu3 %v11284_v61 }
 0x6a5   : > { %v4896_v62 = vmax.f32 %v4787_v10, 0.0 }
 0x6a7   : > { %v4900_v50 = vpack.c.bf16 %v4896_v62, %v4896_v62  ;;  %v4788_v34 = vpop.f32.mrf.mxu3  ;;  %v4966_v62 = vld [vmem:[#allocation20] sm:$0x3] }
 0x6a8   : > { %v4775_v37 = vpop.f32.mrf.mxu2  ;;  %5337 = vmatpush.bf16.msra.mxu3 %v11276_v52  ;;  %v5288_v9 = vperm.slane %v4966_v62, 0  ;;  %v5289_v49 = vperm.slane %v4966_v62, 1  ;;  %v12227_v52 = vld [vmem:[#allocation21 + $0x700] sm:$0xf] }
 0x6a9   : > { %5326 = vmatmul.bf16.vlgmr.msra.gmra.mxu2 %v4900_v50  ;;  %v13821_v62 = vld [vmem:[#allocation21 + $0x17c] sm:$0xf0] }
 0x6aa   : > { %8570 = vmatpush.bf16.msra.mxu2 %v12232_v54  ;;  %v12867_v54 = vld [vmem:[#allocation21 + $0xc00] sm:$0xf] }
 0x6ac   : > { %5338 = vmatpush.bf16.msra.mxu3 %v11268_v8  ;;  %v12228_v8 = vor.u32 %v14013_v13, %v12227_v52  ;;  %v12997_v13 = vld [vmem:[#allocation21 + $0xd80] sm:$0xf0] }
 0x6ae   : > { %8544 = vmatpush.bf16.msra.mxu0 %v12228_v8  ;;  %v13789_v8 = vld [vmem:[#allocation21 + $0x7c] sm:$0xf0] }
 0x6b0   : > { %5383 = vmatpush.bf16.msrb.mxu3 %v11328_v19 }
 0x6b4   : > { %5384 = vmatpush.bf16.msrb.mxu3 %v11320_v35  ;;  %v12099_v35 = vld [vmem:[#allocation21 + $0x600] sm:$0xf] }
 0x6b7   : > { %v4799_v48 = vpop.f32.mrf.mxu0  ;;  %v4812_v3 = vpop.f32.mrf.mxu1 }
 0x6b8   : > { %5385 = vmatpush.bf16.msrb.mxu3 %v11312_v20  ;;  %v4800_v55 = vadd.f32 %v4799_v48, %v4473_v57  ;;  %v12101_v20 = vld [vmem:[#allocation21 + $0x680] sm:$0xf0]  ;;  %v11843_v57 = vld [vmem:[#allocation21 + $0x400] sm:$0xf] }
 0x6b9   : > { %5378 = vmatmul.bf16.vlgmr.msrb.gmra.mxu2 %v4900_v50  ;;  %v12104_v41 = vor.u32 %v13965_v26, %v12101_v20 }
 0x6ba   : > { %v4813_v43 = vadd.f32 %v4812_v3, %v4800_v55  ;;  %v13981_v3 = vld [vmem:[#allocation21 + $0x67c] sm:$0xf0] }
 0x6bb   : > { %v12100_v31 = vor.u32 %v13981_v3, %v12099_v35  ;;  %8571 = vmatpush.bf16.msra.mxu2 %v12104_v41  ;;  %v14269_v55 = vld [vmem:[#allocation21 + $0xf7c] sm:$0xf0]  ;;  %v14157_v35 = vld [vmem:[#allocation21 + $0xc04] sm:$0xf]  ;;  %v13998_v41 = vld [vmem:[#allocation21 + $0x70c] sm:$0xf] }
 0x6bc   : > { %5386 = vmatpush.bf16.msrb.mxu3 %v11304_v38  ;;  %v13252_v33 = vor.u32 %v14269_v55, %v13251_v30  ;;  %v12869_v3 = vld [vmem:[#allocation21 + $0xc80] sm:$0xf0]  ;;  %v12611_v55 = vld [vmem:[#allocation21 + $0xa00] sm:$0xf] }
 0x6bd   : > { %8545 = vmatpush.bf16.msra.mxu0 %v12100_v31  ;;  %v11332_v31 = vor.u32 %v13789_v8, %v11331_v12  ;;  %v13259_v12 = vld [vmem:[#allocation21 + $0xf08] sm:$0xf] }
 0x6be   : > { %8557 = vmatpush.bf16.msra.mxu1 %v13252_v33  ;;  %v14270_v8 = vld [vmem:[#allocation21 + $0xf84] sm:$0xf0] }
 0x6bf   : > { %v4838_v14 = vpop.f32.mrf.mxu3  ;;  %v4801_v4 = vpop.f32.mrf.mxu0 }
 0x6c0   : > { %v4825_v45 = vpop.f32.mrf.mxu2  ;;  %v4814_v5 = vpop.f32.mrf.mxu1  ;;  %5387 = vmatpush.bf16.msrb.mxu3 %v11296_v7  ;;  %v11973_v4 = vld [vmem:[#allocation21 + $0x580] sm:$0xf0]  ;;  %v13917_v7 = vld [vmem:[#allocation21 + $0x47c] sm:$0xf0] }
 0x6c1   : > { %v4826_v27 = vadd.f32 %v4825_v45, %v4813_v43  ;;  %v11971_v45 = vld [vmem:[#allocation21 + $0x500] sm:$0xf]  ;;  %v11976_v0 = vor.u32 %v13933_v59, %v11973_v4  ;;  %v11844_v36 = vor.u32 %v13917_v7, %v11843_v57  ;;  %v11717_v43 = vld [vmem:[#allocation21 + $0x380] sm:$0xf0]  ;;  %v12872_v4 = vor.u32 %v14157_v35, %v12869_v3  ;;  %v14254_v35 = vld [vmem:[#allocation21 + $0xf0c] sm:$0xf] }
 0x6c2   : > { %v14125_v7 = vld [vmem:[#allocation21 + $0xb04] sm:$0xf]  ;;  %v13261_v3 = vld [vmem:[#allocation21 + $0xf88] sm:$0xf0] }
 0x6c3   : > { %v4839_v51 = vadd.f32 %v4838_v14, %v4826_v27  ;;  %v13949_v14 = vld [vmem:[#allocation21 + $0x57c] sm:$0xf0]  ;;  %8572 = vmatpush.bf16.msra.mxu2 %v11976_v0  ;;  %v13253_v27 = vld [vmem:[#allocation21 + $0xf80] sm:$0xf0] }
 0x6c4   : > { %5388 = vmatpush.bf16.msrb.mxu3 %v11288_v60  ;;  %v11972_v38 = vor.u32 %v13949_v14, %v11971_v45  ;;  %v13885_v60 = vld [vmem:[#allocation21 + $0x37c] sm:$0xf0]  ;;  %v12235_v45 = vld [vmem:[#allocation21 + $0x708] sm:$0xf] }
 0x6c5   : > { %v14014_v14 = vld [vmem:[#allocation21 + $0x784] sm:$0xf0]  ;;  %v14141_v0 = vld [vmem:[#allocation21 + $0xb7c] sm:$0xf0] }
 0x6c6   : > { %8546 = vmatpush.bf16.msra.mxu0 %v11972_v38  ;;  %v12237_v38 = vld [vmem:[#allocation21 + $0x788] sm:$0xf0] }
 0x6c7   : > { %v4840_v44 = vpop.f32.mrf.mxu3  ;;  %v12240_v57 = vor.u32 %v13998_v41, %v12237_v38  ;;  %v11595_v41 = vld [vmem:[#allocation21 + $0x208] sm:$0xf]  ;;  %v13264_v38 = vor.u32 %v14254_v35, %v13261_v3  ;;  %v12493_v35 = vld [vmem:[#allocation21 + $0x988] sm:$0xf0] }
 0x6c8   : > { %v4827_v32 = vpop.f32.mrf.mxu2  ;;  %5389 = vmatpush.bf16.msrb.mxu3 %v11280_v24  ;;  %v11715_v44 = vld [vmem:[#allocation21 + $0x300] sm:$0xf]  ;;  %v13869_v24 = vld [vmem:[#allocation21 + $0x304] sm:$0xf] }
 0x6c9   : > { %v11845_v32 = vld [vmem:[#allocation21 + $0x480] sm:$0xf0]  ;;  %v11716_v23 = vor.u32 %v13885_v60, %v11715_v44  ;;  %v13966_v44 = vld [vmem:[#allocation21 + $0x60c] sm:$0xf] }
 0x6ca   : > { %v11848_v22 = vor.u32 %v13901_v6, %v11845_v32  ;;  %8547 = vmatpush.bf16.msra.mxu0 %v11844_v36  ;;  %v12741_v6 = vld [vmem:[#allocation21 + $0xb80] sm:$0xf0]  ;;  %v12107_v36 = vld [vmem:[#allocation21 + $0x608] sm:$0xf]  ;;  %v12109_v60 = vld [vmem:[#allocation21 + $0x688] sm:$0xf0] }
 0x6cb   : > { %v13982_v32 = vld [vmem:[#allocation21 + $0x684] sm:$0xf0]  ;;  %v12744_v30 = vor.u32 %v14125_v7, %v12741_v6  ;;  %v12112_v33 = vor.u32 %v13966_v44, %v12109_v60  ;;  %v13133_v7 = vld [vmem:[#allocation21 + $0xe88] sm:$0xf0] }
 0x6cc   : > { %5390 = vmatpush.bf16.msrb.mxu3 %v11272_v46  ;;  %v14253_v46 = vld [vmem:[#allocation21 + $0xf04] sm:$0xf]  ;;  %8573 = vmatpush.bf16.msra.mxu2 %v11848_v22 }
 0x6ce   : > { %8548 = vmatpush.bf16.msra.mxu0 %v11716_v23  ;;  %v12108_v23 = vor.u32 %v13982_v32, %v12107_v36 }
 0x6d7   : > { %v4851_v53 = vpop.f32.mrf.mxu0  ;;  %v4864_v58 = vpop.f32.mrf.mxu1 }
 0x6d8   : > { %v4852_v16 = vadd.f32 %v4851_v53, %v4839_v51  ;;  %v11720_v51 = vor.u32 %v13869_v24, %v11717_v43  ;;  %v13256_v53 = vor.u32 %v14253_v46, %v13253_v27  ;;  %v14109_v24 = vld [vmem:[#allocation21 + $0xa7c] sm:$0xf0]  ;;  %v14093_v43 = vld [vmem:[#allocation21 + $0xa04] sm:$0xf]  ;;  %v11979_v27 = vld [vmem:[#allocation21 + $0x508] sm:$0xf] }
 0x6d9   : > { %v12613_v46 = vld [vmem:[#allocation21 + $0xa80] sm:$0xf0] }
 0x6da   : > { %v4865_v17 = vadd.f32 %v4864_v58, %v4852_v16  ;;  %v11587_v58 = vld [vmem:[#allocation21 + $0x200] sm:$0xf]  ;;  %8574 = vmatpush.bf16.msra.mxu2 %v11720_v51  ;;  %v13950_v51 = vld [vmem:[#allocation21 + $0x584] sm:$0xf0] }
 0x6db   : > { %v13853_v16 = vld [vmem:[#allocation21 + $0x27c] sm:$0xf0] }
 0x6df   : > { %v4877_v21 = vpop.f32.mrf.mxu2  ;;  %v4890_v18 = vpop.f32.mrf.mxu3 }
 0x6e0   : > { %v4878_v40 = vadd.f32 %v4877_v21, %v4865_v17  ;;  %v4853_v29 = vpop.f32.mrf.mxu0  ;;  %v4866_v28 = vpop.f32.mrf.mxu1  ;;  %v13123_v17 = vld [vmem:[#allocation21 + $0xe00] sm:$0xf]  ;;  %v11588_v21 = vor.u32 %v13853_v16, %v11587_v58  ;;  %v11981_v58 = vld [vmem:[#allocation21 + $0x588] sm:$0xf0] }
 0x6e1   : > { %v11589_v29 = vld [vmem:[#allocation21 + $0x280] sm:$0xf0] }
 0x6e2   : > { %v4891_v11 = vadd.f32 %v4890_v18, %v4878_v40  ;;  %v14237_v40 = vld [vmem:[#allocation21 + $0xe7c] sm:$0xf0]  ;;  %v13837_v18 = vld [vmem:[#allocation21 + $0x204] sm:$0xf]  ;;  %8549 = vmatpush.bf16.msra.mxu0 %v11588_v21  ;;  %v12616_v21 = vor.u32 %v14093_v43, %v12613_v46  ;;  %v11469_v43 = vld [vmem:[#allocation21 + $0x188] sm:$0xf0] }
 0x6e3   : > { %v13124_v28 = vor.u32 %v14237_v40, %v13123_v17  ;;  %v12612_v17 = vor.u32 %v14109_v24, %v12611_v55  ;;  %v12483_v40 = vld [vmem:[#allocation21 + $0x900] sm:$0xf]  ;;  %v13003_v55 = vld [vmem:[#allocation21 + $0xd08] sm:$0xf] }
 0x6e4   : > { %v4897_v10 = vmax.f32 %v4891_v11, 0.0  ;;  %v11592_v11 = vor.u32 %v13837_v18, %v11589_v29  ;;  %v14077_v18 = vld [vmem:[#allocation21 + $0x97c] sm:$0xf0]  ;;  %v11980_v29 = vor.u32 %v13950_v51, %v11979_v27  ;;  %v14190_v51 = vld [vmem:[#allocation21 + $0xd0c] sm:$0xf] }
 0x6e5   : > { %8558 = vmatpush.bf16.msra.mxu1 %v13124_v28 }
 0x6e6   : > { %v4901_v42 = vpack.c.bf16 %v4897_v10, %v4897_v10  ;;  %v14221_v10 = vld [vmem:[#allocation21 + $0xe04] sm:$0xf]  ;;  %8575 = vmatpush.bf16.msra.mxu2 %v11592_v11 }
 0x6e7   : > { %v4879_v47 = vpop.f32.mrf.mxu2  ;;  %v4892_v56 = vpop.f32.mrf.mxu3  ;;  %v14061_v11 = vld [vmem:[#allocation21 + $0x904] sm:$0xf] }
 0x6e8   : > { %5339 = vmatmul.bf16.vlgmr.msra.gmra.mxu3 %v4901_v42  ;;  %v11459_v47 = vld [vmem:[#allocation21 + $0x100] sm:$0xf] }
 0x6e9   : > { %8583 = vmatpush.bf16.msra.mxu3 %v13256_v53  ;;  %v13934_v53 = vld [vmem:[#allocation21 + $0x50c] sm:$0xf] }
 0x6ea   : > { %v11984_v28 = vor.u32 %v13934_v53, %v11981_v58  ;;  %v13005_v53 = vld [vmem:[#allocation21 + $0xd88] sm:$0xf0] }
 0x6eb   : > { %v13008_v58 = vor.u32 %v14190_v51, %v13005_v53  ;;  %v11859_v53 = vld [vmem:[#allocation21 + $0x410] sm:$0xf] }
 0x6f7   : > { %v5301_v63 = vpop.f32.mrf.mxu0  ;;  %v5314_v37 = vpop.f32.mrf.mxu1 }
 0x6f8   : > { %v5302_v50 = vadd.f32 %v5301_v63, %v5288_v9  ;;  %5391 = vmatmul.bf16.vlgmr.msrb.gmra.mxu3 %v4901_v42  ;;  %v13125_v42 = vld [vmem:[#allocation21 + $0xe80] sm:$0xf0]  ;;  %v12995_v9 = vld [vmem:[#allocation21 + $0xd00] sm:$0xf] }
 0x6f9   : > { %v13128_v56 = vor.u32 %v14221_v10, %v13125_v42  ;;  %v14205_v63 = vld [vmem:[#allocation21 + $0xd7c] sm:$0xf0]  ;;  %v12485_v10 = vld [vmem:[#allocation21 + $0x980] sm:$0xf0]  ;;  %v11851_v42 = vld [vmem:[#allocation21 + $0x408] sm:$0xf] }
 0x6fa   : > { %v16184_v61 = vadd.f32 %v5314_v37, %v5302_v50  ;;  %v11460_v50 = vor.u32 %v13821_v62, %v11459_v47  ;;  %v12996_v37 = vor.u32 %v14205_v63, %v12995_v9  ;;  %v13918_v47 = vld [vmem:[#allocation21 + $0x484] sm:$0xf0]  ;;  %v11853_v62 = vld [vmem:[#allocation21 + $0x488] sm:$0xf0]  ;;  %v12484_v9 = vor.u32 %v14077_v18, %v12483_v40  ;;  %v12355_v63 = vld [vmem:[#allocation21 + $0x800] sm:$0xf] }
 0x6fb   : > { %8584 = vmatpush.bf16.msra.mxu3 %v13128_v56  ;;  %v13902_v56 = vld [vmem:[#allocation21 + $0x40c] sm:$0xf]  ;;  %v14174_v18 = vld [vmem:[#allocation21 + $0xc84] sm:$0xf0] }
 0x6fc   : > { %8550 = vmatpush.bf16.msra.mxu0 %v11460_v50  ;;  %8559 = vmatpush.bf16.msra.mxu1 %v12996_v37  ;;  %v12488_v50 = vor.u32 %v14061_v11, %v12485_v10  ;;  %v14045_v37 = vld [vmem:[#allocation21 + $0x87c] sm:$0xf0] }
 0x6ff   : > { %v5303_v34 = vpop.f32.mrf.mxu0  ;;  %v5316_v39 = vpop.f32.mrf.mxu1 }
 0x700   : > { %v13805_v34 = vld [vmem:[#allocation21 + $0x104] sm:$0xf]  ;;  %8551 = vmatpush.bf16.msra.mxu0 %v11332_v31 }
 0x701   : > { %v11461_v39 = vld [vmem:[#allocation21 + $0x180] sm:$0xf0] }
 0x702   : > { %v11464_v52 = vor.u32 %v13805_v34, %v11461_v39  ;;  %v14029_v34 = vld [vmem:[#allocation21 + $0x804] sm:$0xf] }
 0x703   : > { %v12357_v39 = vld [vmem:[#allocation21 + $0x880] sm:$0xf0] }
 0x704   : > { %8576 = vmatpush.bf16.msra.mxu2 %v11464_v52  ;;  %v11856_v52 = vor.u32 %v13902_v56, %v11853_v62  ;;  %v12360_v31 = vor.u32 %v14029_v34, %v12357_v39  ;;  %v12747_v62 = vld [vmem:[#allocation21 + $0xb08] sm:$0xf] }
 0x705   : > { %v12619_v39 = vld [vmem:[#allocation21 + $0xa08] sm:$0xf] }
 0x717   : > { %v5353_v19 = vpop.f32.mrf.mxu0  ;;  %v5366_v2 = vpop.f32.mrf.mxu1 }
 0x718   : > { %v5354_v15 = vadd.f32 %v5353_v19, %v5289_v49  ;;  %v14189_v49 = vld [vmem:[#allocation21 + $0xd04] sm:$0xf]  ;;  %v14173_v19 = vld [vmem:[#allocation21 + $0xc7c] sm:$0xf0] }
 0x719   : > { %v13000_v1 = vor.u32 %v14189_v49, %v12997_v13  ;;  %v12868_v20 = vor.u32 %v14173_v19, %v12867_v54  ;;  %v11852_v49 = vor.u32 %v13918_v47, %v11851_v42  ;;  %v11723_v13 = vld [vmem:[#allocation21 + $0x308] sm:$0xf]  ;;  %v13870_v54 = vld [vmem:[#allocation21 + $0x30c] sm:$0xf] }
 0x71a   : > { %v16186_v48 = vadd.f32 %v5366_v2, %v5354_v15  ;;  %v13773_v15 = vld [vmem:[#allocation21 + $0x4] sm:$0xf]  ;;  %v11725_v19 = vld [vmem:[#allocation21 + $0x388] sm:$0xf0] }
 0x71b   : > { %v11333_v2 = vld [vmem:[#allocation21 + $0x80] sm:$0xf0]  ;;  %8585 = vmatpush.bf16.msra.mxu3 %v13000_v1  ;;  %8560 = vmatpush.bf16.msra.mxu1 %v12868_v20  ;;  %v13886_v1 = vld [vmem:[#allocation21 + $0x384] sm:$0xf0]  ;;  %v13260_v20 = vor.u32 %v14270_v8, %v13259_v12  ;;  %v14158_v42 = vld [vmem:[#allocation21 + $0xc0c] sm:$0xf] }
 0x71c   : > { %v11336_v59 = vor.u32 %v13773_v15, %v11333_v2  ;;  %v12356_v2 = vor.u32 %v14045_v37, %v12355_v63  ;;  %v12877_v47 = vld [vmem:[#allocation21 + $0xc88] sm:$0xf0] }
 0x71d   : > { %v12880_v56 = vor.u32 %v14158_v42, %v12877_v47  ;;  %v14126_v63 = vld [vmem:[#allocation21 + $0xb0c] sm:$0xf]  ;;  %v13267_v42 = vld [vmem:[#allocation21 + $0xf10] sm:$0xf] }
 0x71e   : > { %8577 = vmatpush.bf16.msra.mxu2 %v11336_v59  ;;  %v13131_v59 = vld [vmem:[#allocation21 + $0xe08] sm:$0xf]  ;;  %v12749_v37 = vld [vmem:[#allocation21 + $0xb88] sm:$0xf0]  ;;  %v14271_v47 = vld [vmem:[#allocation21 + $0xf8c] sm:$0xf0] }
 0x71f   : > { %v5355_v5 = vpop.f32.mrf.mxu0  ;;  %v5368_v25 = vpop.f32.mrf.mxu1  ;;  %8586 = vmatpush.bf16.msra.mxu3 %v12872_v4  ;;  %v14238_v4 = vld [vmem:[#allocation21 + $0xe84] sm:$0xf0]  ;;  %v12752_v34 = vor.u32 %v14126_v63, %v12749_v37  ;;  %v12621_v12 = vld [vmem:[#allocation21 + $0xa88] sm:$0xf0]  ;;  %v14255_v63 = vld [vmem:[#allocation21 + $0xf14] sm:$0xf] }
 0x720   : > { %v12739_v5 = vld [vmem:[#allocation21 + $0xb00] sm:$0xf]  ;;  %v12236_v25 = vor.u32 %v14014_v14, %v12235_v45  ;;  %v11724_v45 = vor.u32 %v13886_v1, %v11723_v13  ;;  %v11728_v14 = vor.u32 %v13870_v54, %v11725_v19  ;;  %v13132_v6 = vor.u32 %v14238_v4, %v13131_v59  ;;  %v12491_v1 = vld [vmem:[#allocation21 + $0x908] sm:$0xf]  ;;  %v14062_v19 = vld [vmem:[#allocation21 + $0x90c] sm:$0xf] }
 0x721   : > { %v12740_v22 = vor.u32 %v14141_v0, %v12739_v5  ;;  %v13854_v5 = vld [vmem:[#allocation21 + $0x284] sm:$0xf0]  ;;  %v13838_v0 = vld [vmem:[#allocation21 + $0x20c] sm:$0xf]  ;;  %v12496_v3 = vor.u32 %v14062_v19, %v12493_v35  ;;  %v13141_v19 = vld [vmem:[#allocation21 + $0xe90] sm:$0xf0] }
 0x722   : > { %8596 = vmatpush.bf16.msrb.mxu0 %v12236_v25  ;;  %8622 = vmatpush.bf16.msrb.mxu2 %v12240_v57  ;;  %v11597_v25 = vld [vmem:[#allocation21 + $0x288] sm:$0xf0]  ;;  %v11596_v36 = vor.u32 %v13854_v5, %v11595_v41  ;;  %v14078_v54 = vld [vmem:[#allocation21 + $0x984] sm:$0xf0]  ;;  %v12243_v5 = vld [vmem:[#allocation21 + $0x710] sm:$0xf] }
 0x723   : > { %8561 = vmatpush.bf16.msra.mxu1 %v12740_v22  ;;  %8587 = vmatpush.bf16.msra.mxu3 %v12744_v30  ;;  %v14222_v57 = vld [vmem:[#allocation21 + $0xe0c] sm:$0xf]  ;;  %v11600_v32 = vor.u32 %v13838_v0, %v11597_v25  ;;  %v11467_v22 = vld [vmem:[#allocation21 + $0x108] sm:$0xf]  ;;  %v14015_v25 = vld [vmem:[#allocation21 + $0x78c] sm:$0xf0] }
 0x724   : > { %v13136_v44 = vor.u32 %v14222_v57, %v13133_v7  ;;  %v13822_v30 = vld [vmem:[#allocation21 + $0x184] sm:$0xf0]  ;;  %v12365_v41 = vld [vmem:[#allocation21 + $0x888] sm:$0xf0]  ;;  %v13999_v57 = vld [vmem:[#allocation21 + $0x714] sm:$0xf] }
 0x725   : > { %v11468_v24 = vor.u32 %v13822_v30, %v11467_v22  ;;  %v12245_v7 = vld [vmem:[#allocation21 + $0x790] sm:$0xf0]  ;;  %v13983_v22 = vld [vmem:[#allocation21 + $0x68c] sm:$0xf0] }
 0x726   : > { %8597 = vmatpush.bf16.msrb.mxu0 %v12108_v23  ;;  %8623 = vmatpush.bf16.msrb.mxu2 %v12112_v33  ;;  %v14206_v23 = vld [vmem:[#allocation21 + $0xd84] sm:$0xf0]  ;;  %v13806_v33 = vld [vmem:[#allocation21 + $0x10c] sm:$0xf]  ;;  %v13967_v30 = vld [vmem:[#allocation21 + $0x614] sm:$0xf] }
 0x727   : > { %8562 = vmatpush.bf16.msra.mxu1 %v12612_v17  ;;  %8588 = vmatpush.bf16.msra.mxu3 %v12616_v21  ;;  %v13004_v46 = vor.u32 %v14206_v23, %v13003_v55  ;;  %v11472_v27 = vor.u32 %v13806_v33, %v11469_v43  ;;  %v13790_v17 = vld [vmem:[#allocation21 + $0x84] sm:$0xf0]  ;;  %v12117_v55 = vld [vmem:[#allocation21 + $0x690] sm:$0xf0]  ;;  %v11987_v23 = vld [vmem:[#allocation21 + $0x510] sm:$0xf] }
 0x728   : > { %v12875_v21 = vld [vmem:[#allocation21 + $0xc08] sm:$0xf]  ;;  %v13951_v33 = vld [vmem:[#allocation21 + $0x58c] sm:$0xf0]  ;;  %v13935_v43 = vld [vmem:[#allocation21 + $0x514] sm:$0xf] }
 0x729   : > { %v12876_v11 = vor.u32 %v14174_v18, %v12875_v21 }
 0x72a   : > { %8598 = vmatpush.bf16.msrb.mxu0 %v11980_v29  ;;  %8624 = vmatpush.bf16.msrb.mxu2 %v11984_v28  ;;  %v13774_v29 = vld [vmem:[#allocation21 + $0xc] sm:$0xf] }
 0x72b   : > { %8563 = vmatpush.bf16.msra.mxu1 %v12484_v9  ;;  %8589 = vmatpush.bf16.msra.mxu3 %v12488_v50  ;;  %v11341_v28 = vld [vmem:[#allocation21 + $0x88] sm:$0xf0]  ;;  %v14142_v9 = vld [vmem:[#allocation21 + $0xb84] sm:$0xf0] }
 0x72c   : > { %v16188_v26 = vpop.f32.mrf.mxu2  ;;  %v11344_v10 = vor.u32 %v13774_v29, %v11341_v28  ;;  %v12748_v50 = vor.u32 %v14142_v9, %v12747_v62  ;;  %v11733_v62 = vld [vmem:[#allocation21 + $0x390] sm:$0xf0] }
 0x72d   : > { %v5328_v4 = vadd.f32 %v16188_v26, %v16184_v61 }
 0x72e   : > { %8599 = vmatpush.bf16.msrb.mxu0 %v11852_v49  ;;  %8625 = vmatpush.bf16.msrb.mxu2 %v11856_v52  ;;  %v14110_v49 = vld [vmem:[#allocation21 + $0xa84] sm:$0xf0]  ;;  %v14094_v52 = vld [vmem:[#allocation21 + $0xa0c] sm:$0xf] }
 0x72f   : > { %8564 = vmatpush.bf16.msra.mxu1 %v12356_v2  ;;  %8590 = vmatpush.bf16.msra.mxu3 %v12360_v31  ;;  %v12620_v13 = vor.u32 %v14110_v49, %v12619_v39  ;;  %v12624_v8 = vor.u32 %v14094_v52, %v12621_v12  ;;  %v12492_v2 = vor.u32 %v14078_v54, %v12491_v1  ;;  %v12363_v31 = vld [vmem:[#allocation21 + $0x808] sm:$0xf]  ;;  %v13855_v39 = vld [vmem:[#allocation21 + $0x28c] sm:$0xf0]  ;;  %v11605_v1 = vld [vmem:[#allocation21 + $0x290] sm:$0xf0] }
 0x730   : > { %v14239_v12 = vld [vmem:[#allocation21 + $0xe8c] sm:$0xf0]  ;;  %v14223_v54 = vld [vmem:[#allocation21 + $0xe14] sm:$0xf] }
 0x732   : > { %8600 = vmatpush.bf16.msrb.mxu0 %v11724_v45  ;;  %8626 = vmatpush.bf16.msrb.mxu2 %v11728_v14  ;;  %v14030_v45 = vld [vmem:[#allocation21 + $0x80c] sm:$0xf] }
 0x733   : > { %8609 = vmatpush.bf16.msrb.mxu1 %v13260_v20  ;;  %8635 = vmatpush.bf16.msrb.mxu3 %v13264_v38  ;;  %v14046_v20 = vld [vmem:[#allocation21 + $0x884] sm:$0xf0]  ;;  %v12368_v59 = vor.u32 %v14030_v45, %v12365_v41  ;;  %v13011_v41 = vld [vmem:[#allocation21 + $0xd10] sm:$0xf] }
 0x734   : > { %v5329_v16 = vpop.f32.mrf.mxu2  ;;  %v12364_v14 = vor.u32 %v14046_v20, %v12363_v31  ;;  %v11475_v31 = vld [vmem:[#allocation21 + $0x110] sm:$0xf] }
 0x735   : > { %v11339_v16 = vld [vmem:[#allocation21 + $0x8] sm:$0xf]  ;;  %v13823_v20 = vld [vmem:[#allocation21 + $0x18c] sm:$0xf0] }
 0x736   : > { %8601 = vmatpush.bf16.msrb.mxu0 %v11596_v36  ;;  %8627 = vmatpush.bf16.msrb.mxu2 %v11600_v32  ;;  %v11340_v40 = vor.u32 %v13790_v17, %v11339_v16  ;;  %v12244_v36 = vor.u32 %v14015_v25, %v12243_v5  ;;  %v12248_v32 = vor.u32 %v13999_v57, %v12245_v7  ;;  %v13903_v16 = vld [vmem:[#allocation21 + $0x414] sm:$0xf]  ;;  %v11347_v7 = vld [vmem:[#allocation21 + $0x10] sm:$0xf] }
 0x737   : > { %8610 = vmatpush.bf16.msrb.mxu1 %v13132_v6  ;;  %8636 = vmatpush.bf16.msrb.mxu3 %v13136_v44  ;;  %v12115_v44 = vld [vmem:[#allocation21 + $0x610] sm:$0xf]  ;;  %v11861_v17 = vld [vmem:[#allocation21 + $0x490] sm:$0xf0]  ;;  %v11476_v25 = vor.u32 %v13823_v20, %v11475_v31  ;;  %v13904_v31 = vld [vmem:[#allocation21 + $0x41c] sm:$0xf] }
 0x738   : > { %v12116_v26 = vor.u32 %v13983_v22, %v12115_v44  ;;  %v11864_v29 = vor.u32 %v13903_v16, %v11861_v17  ;;  %v14191_v5 = vld [vmem:[#allocation21 + $0xd14] sm:$0xf]  ;;  %v14175_v22 = vld [vmem:[#allocation21 + $0xc8c] sm:$0xf0]  ;;  %v11869_v20 = vld [vmem:[#allocation21 + $0x498] sm:$0xf0] }
 0x739   : > { %v14143_v16 = vld [vmem:[#allocation21 + $0xb8c] sm:$0xf0] }
 0x73a   : > { %8602 = vmatpush.bf16.msrb.mxu0 %v11468_v24  ;;  %8628 = vmatpush.bf16.msrb.mxu2 %v11472_v27  ;;  %v12120_v24 = vor.u32 %v13967_v30, %v12117_v55  ;;  %v11988_v27 = vor.u32 %v13951_v33, %v11987_v23  ;;  %v13775_v30 = vld [vmem:[#allocation21 + $0x14] sm:$0xf]  ;;  %v14016_v23 = vld [vmem:[#allocation21 + $0x794] sm:$0xf0]  ;;  %v14000_v33 = vld [vmem:[#allocation21 + $0x71c] sm:$0xf] }
 0x73b   : > { %8611 = vmatpush.bf16.msrb.mxu1 %v13004_v46  ;;  %8637 = vmatpush.bf16.msrb.mxu3 %v13008_v58  ;;  %v11989_v46 = vld [vmem:[#allocation21 + $0x590] sm:$0xf0]  ;;  %v13919_v58 = vld [vmem:[#allocation21 + $0x48c] sm:$0xf0] }
 0x73c   : > { %v16190_v15 = vpop.f32.mrf.mxu2  ;;  %v11992_v51 = vor.u32 %v13935_v43, %v11989_v46  ;;  %v11860_v18 = vor.u32 %v13919_v58, %v11859_v53  ;;  %v11349_v55 = vld [vmem:[#allocation21 + $0x90] sm:$0xf0]  ;;  %v12253_v43 = vld [vmem:[#allocation21 + $0x798] sm:$0xf0]  ;;  %v12755_v58 = vld [vmem:[#allocation21 + $0xb10] sm:$0xf] }
 0x73d   : > { %v5380_v21 = vadd.f32 %v16190_v15, %v16186_v48  ;;  %v13268_v15 = vor.u32 %v14271_v47, %v13267_v42  ;;  %v12756_v42 = vor.u32 %v14143_v16, %v12755_v58  ;;  %v14224_v58 = vld [vmem:[#allocation21 + $0xe1c] sm:$0xf] }
 0x73e   : > { %8603 = vmatpush.bf16.msrb.mxu0 %v11340_v40  ;;  %8629 = vmatpush.bf16.msrb.mxu2 %v11344_v10  ;;  %v13887_v10 = vld [vmem:[#allocation21 + $0x38c] sm:$0xf0]  ;;  %v13149_v16 = vld [vmem:[#allocation21 + $0xe98] sm:$0xf0] }
 0x73f   : > { %8612 = vmatpush.bf16.msrb.mxu1 %v12876_v11  ;;  %8638 = vmatpush.bf16.msrb.mxu3 %v12880_v56  ;;  %v11731_v11 = vld [vmem:[#allocation21 + $0x310] sm:$0xf]  ;;  %v13871_v56 = vld [vmem:[#allocation21 + $0x314] sm:$0xf] }
 0x740   : > { %v11732_v48 = vor.u32 %v13887_v10, %v11731_v11  ;;  %v11736_v49 = vor.u32 %v13871_v56, %v11733_v62  ;;  %v13968_v11 = vld [vmem:[#allocation21 + $0x61c] sm:$0xf]  ;;  %v12627_v56 = vld [vmem:[#allocation21 + $0xa10] sm:$0xf] }
 0x741   : > { %v12125_v10 = vld [vmem:[#allocation21 + $0x698] sm:$0xf0]  ;;  %v14111_v62 = vld [vmem:[#allocation21 + $0xa8c] sm:$0xf0] }
 0x743   : > { %8613 = vmatpush.bf16.msrb.mxu1 %v12748_v50  ;;  %8639 = vmatpush.bf16.msrb.mxu3 %v12752_v34  ;;  %v13269_v50 = vld [vmem:[#allocation21 + $0xf90] sm:$0xf0]  ;;  %v11603_v34 = vld [vmem:[#allocation21 + $0x210] sm:$0xf] }
 0x744   : > { %v5381_v60 = vpop.f32.mrf.mxu2  ;;  %v13272_v52 = vor.u32 %v14255_v63, %v13269_v50  ;;  %v11604_v35 = vor.u32 %v13855_v39, %v11603_v34  ;;  %v12128_v63 = vor.u32 %v13968_v11, %v12125_v10  ;;  %v14095_v50 = vld [vmem:[#allocation21 + $0xa14] sm:$0xf]  ;;  %v13952_v34 = vld [vmem:[#allocation21 + $0x594] sm:$0xf0]  ;;  %v13936_v39 = vld [vmem:[#allocation21 + $0x51c] sm:$0xf]  ;;  %v13152_v11 = vor.u32 %v14224_v58, %v13149_v16 }
 0x745   : > { %v13824_v10 = vld [vmem:[#allocation21 + $0x194] sm:$0xf0]  ;;  %v12509_v16 = vld [vmem:[#allocation21 + $0x998] sm:$0xf0] }
 0x747   : > { %8614 = vmatpush.bf16.msrb.mxu1 %v12620_v13  ;;  %8640 = vmatpush.bf16.msrb.mxu3 %v12624_v8  ;;  %v13139_v13 = vld [vmem:[#allocation21 + $0xe10] sm:$0xf]  ;;  %v13839_v8 = vld [vmem:[#allocation21 + $0x214] sm:$0xf] }
 0x748   : > { %v11608_v45 = vor.u32 %v13839_v8, %v11605_v1  ;;  %v14079_v8 = vld [vmem:[#allocation21 + $0x98c] sm:$0xf0] }
 0x74b   : > { %8615 = vmatpush.bf16.msrb.mxu1 %v12492_v2  ;;  %8641 = vmatpush.bf16.msrb.mxu3 %v12496_v3  ;;  %v13140_v3 = vor.u32 %v14239_v12, %v13139_v13  ;;  %v12499_v12 = vld [vmem:[#allocation21 + $0x910] sm:$0xf] }
 0x74f   : > { %8616 = vmatpush.bf16.msrb.mxu1 %v12364_v14  ;;  %8642 = vmatpush.bf16.msrb.mxu3 %v12368_v59  ;;  %v13144_v14 = vor.u32 %v14223_v54, %v13141_v19  ;;  %v14207_v59 = vld [vmem:[#allocation21 + $0xd8c] sm:$0xf0]  ;;  %v14063_v19 = vld [vmem:[#allocation21 + $0x914] sm:$0xf] }
 0x750   : > { %v13012_v57 = vor.u32 %v14207_v59, %v13011_v41  ;;  %v14047_v59 = vld [vmem:[#allocation21 + $0x88c] sm:$0xf0] }
 0x76b   : > { %v5340_v38 = vpop.f32.mrf.mxu3 }
 0x76c   : > { %v5341_v0 = vadd.f32 %v5340_v38, %v5328_v4  ;;  %v13807_v4 = vld [vmem:[#allocation21 + $0x114] sm:$0xf] }
 0x76d   : > { %v11477_v38 = vld [vmem:[#allocation21 + $0x190] sm:$0xf0] }
 0x76e   : > { %v5396_v6 = vmax.f32 %v5341_v0, 0.0  ;;  %v13013_v0 = vld [vmem:[#allocation21 + $0xd90] sm:$0xf0] }
 0x76f   : > { %v13016_v44 = vor.u32 %v14191_v5, %v13013_v0  ;;  %v11872_v0 = vor.u32 %v13904_v31, %v11869_v20 }
 0x770   : > { %v16194_v60 = vpack.c.bf16 %v5396_v6, %v5396_v6  ;;  %v13791_v6 = vld [vmem:[#allocation21 + $0x8c] sm:$0xf0] }
 0x771   : > { %v11348_v46 = vor.u32 %v13791_v6, %v11347_v7  ;;  %v14272_v7 = vld [vmem:[#allocation21 + $0xf94] sm:$0xf0] }
 0x772   : > { %8552 = vmatmul.bf16.vlgmr.msra.gmra.mxu0 %v16194_v60  ;;  %8578 = vmatmul.bf16.vlgmr.msra.gmra.mxu2 %v16194_v60  ;;  %v13888_v6 = vld [vmem:[#allocation21 + $0x394] sm:$0xf0] }
 0x773   : > { %8648 = vmatpush.bf16.msra.mxu0 %v12244_v36  ;;  %8674 = vmatpush.bf16.msra.mxu2 %v12248_v32  ;;  %v5342_v61 = vpop.f32.mrf.mxu3  ;;  %v12883_v36 = vld [vmem:[#allocation21 + $0xc10] sm:$0xf]  ;;  %v11480_v32 = vor.u32 %v13807_v4, %v11477_v38  ;;  %v14031_v4 = vld [vmem:[#allocation21 + $0x814] sm:$0xf] }
 0x774   : > { %v14159_v61 = vld [vmem:[#allocation21 + $0xc14] sm:$0xf] }
 0x775   : > { %v12373_v38 = vld [vmem:[#allocation21 + $0x890] sm:$0xf0] }
 0x777   : > { %8649 = vmatpush.bf16.msra.mxu0 %v12116_v26  ;;  %8675 = vmatpush.bf16.msra.mxu2 %v12120_v24  ;;  %v12885_v26 = vld [vmem:[#allocation21 + $0xc90] sm:$0xf0]  ;;  %v12251_v24 = vld [vmem:[#allocation21 + $0x718] sm:$0xf] }
 0x778   : > { %v12888_v53 = vor.u32 %v14159_v61, %v12885_v26  ;;  %v12252_v17 = vor.u32 %v14016_v23, %v12251_v24  ;;  %v11611_v23 = vld [vmem:[#allocation21 + $0x218] sm:$0xf] }
 0x77b   : > { %8650 = vmatpush.bf16.msra.mxu0 %v11988_v27  ;;  %8676 = vmatpush.bf16.msra.mxu2 %v11992_v51  ;;  %v5392_v40 = vpop.f32.mrf.mxu3  ;;  %v12884_v27 = vor.u32 %v14175_v22, %v12883_v36  ;;  %v11352_v51 = vor.u32 %v13775_v30, %v11349_v55  ;;  %v13872_v36 = vld [vmem:[#allocation21 + $0x31c] sm:$0xf]  ;;  %v12376_v55 = vor.u32 %v14031_v4, %v12373_v38 }
 0x77c   : > { %v5393_v28 = vadd.f32 %v5392_v40, %v5380_v21  ;;  %v12256_v21 = vor.u32 %v14000_v33, %v12253_v43  ;;  %v14127_v40 = vld [vmem:[#allocation21 + $0xb14] sm:$0xf]  ;;  %v14256_v22 = vld [vmem:[#allocation21 + $0xf1c] sm:$0xf]  ;;  %v13147_v33 = vld [vmem:[#allocation21 + $0xe18] sm:$0xf] }
 0x77d   : > { %v13277_v30 = vld [vmem:[#allocation21 + $0xf98] sm:$0xf0]  ;;  %v14240_v43 = vld [vmem:[#allocation21 + $0xe94] sm:$0xf0] }
 0x77e   : > { %v5397_v9 = vmax.f32 %v5393_v28, 0.0  ;;  %v13984_v28 = vld [vmem:[#allocation21 + $0x694] sm:$0xf0]  ;;  %v12765_v38 = vld [vmem:[#allocation21 + $0xb98] sm:$0xf0] }
 0x77f   : > { %8651 = vmatpush.bf16.msra.mxu0 %v11860_v18  ;;  %8677 = vmatpush.bf16.msra.mxu2 %v11864_v29  ;;  %v12757_v18 = vld [vmem:[#allocation21 + $0xb90] sm:$0xf0]  ;;  %v12123_v29 = vld [vmem:[#allocation21 + $0x618] sm:$0xf] }
 0x780   : > { %v16200_v37 = vpack.c.bf16 %v5397_v9, %v5397_v9  ;;  %v12760_v47 = vor.u32 %v14127_v40, %v12757_v18  ;;  %v12124_v9 = vor.u32 %v13984_v28, %v12123_v29  ;;  %v11483_v18 = vld [vmem:[#allocation21 + $0x118] sm:$0xf] }
 0x781   : > { %v13019_v29 = vld [vmem:[#allocation21 + $0xd18] sm:$0xf] }
 0x782   : > { %8565 = vmatmul.bf16.vlgmr.msra.gmra.mxu1 %v16200_v37  ;;  %8591 = vmatmul.bf16.vlgmr.msra.gmra.mxu3 %v16200_v37  ;;  %v14208_v28 = vld [vmem:[#allocation21 + $0xd94] sm:$0xf0] }
 0x783   : > { %8604 = vmatmul.bf16.vlgmr.msrb.gmra.mxu0 %v16194_v60  ;;  %8630 = vmatmul.bf16.vlgmr.msrb.gmra.mxu2 %v16194_v60  ;;  %v5394_v2 = vpop.f32.mrf.mxu3 }
 0x784   : > { %8652 = vmatpush.bf16.msra.mxu0 %v11732_v48  ;;  %8661 = vmatpush.bf16.msra.mxu1 %v13268_v15  ;;  %v12629_v48 = vld [vmem:[#allocation21 + $0xa90] sm:$0xf0]  ;;  %v11995_v15 = vld [vmem:[#allocation21 + $0x518] sm:$0xf] }
 0x785   : > { %8678 = vmatpush.bf16.msra.mxu2 %v11736_v49  ;;  %8687 = vmatpush.bf16.msra.mxu3 %v13272_v52  ;;  %v11997_v49 = vld [vmem:[#allocation21 + $0x598] sm:$0xf0]  ;;  %v12628_v52 = vor.u32 %v14111_v62, %v12627_v56  ;;  %v12632_v13 = vor.u32 %v14095_v50, %v12629_v48  ;;  %v11996_v1 = vor.u32 %v13952_v34, %v11995_v15  ;;  %v12501_v2 = vld [vmem:[#allocation21 + $0x990] sm:$0xf0]  ;;  %v13792_v15 = vld [vmem:[#allocation21 + $0x94] sm:$0xf0] }
 0x786   : > { %v12000_v54 = vor.u32 %v13936_v39, %v11997_v49  ;;  %v12504_v41 = vor.u32 %v14063_v19, %v12501_v2  ;;  %v14192_v56 = vld [vmem:[#allocation21 + $0xd1c] sm:$0xf]  ;;  %v11484_v50 = vor.u32 %v13824_v10, %v11483_v18  ;;  %v12891_v34 = vld [vmem:[#allocation21 + $0xc18] sm:$0xf]  ;;  %v14001_v2 = vld [vmem:[#allocation21 + $0x724] sm:$0xf] }
 0x787   : > { %v13021_v62 = vld [vmem:[#allocation21 + $0xd98] sm:$0xf0]  ;;  %v14176_v39 = vld [vmem:[#allocation21 + $0xc94] sm:$0xf0]  ;;  %v11877_v18 = vld [vmem:[#allocation21 + $0x4a0] sm:$0xf0] }
 0x788   : > { %8653 = vmatpush.bf16.msra.mxu0 %v11604_v35  ;;  %8662 = vmatpush.bf16.msra.mxu1 %v13140_v3  ;;  %v11867_v35 = vld [vmem:[#allocation21 + $0x418] sm:$0xf]  ;;  %v13024_v49 = vor.u32 %v14192_v56, %v13021_v62  ;;  %v12892_v19 = vor.u32 %v14176_v39, %v12891_v34  ;;  %v12381_v56 = vld [vmem:[#allocation21 + $0x898] sm:$0xf0]  ;;  %v11749_v34 = vld [vmem:[#allocation21 + $0x3a0] sm:$0xf0] }
 0x789   : > { %8679 = vmatpush.bf16.msra.mxu2 %v11608_v45  ;;  %8688 = vmatpush.bf16.msra.mxu3 %v13144_v14  ;;  %v13920_v3 = vld [vmem:[#allocation21 + $0x494] sm:$0xf0]  ;;  %v12500_v45 = vor.u32 %v14079_v8, %v12499_v12  ;;  %v12371_v14 = vld [vmem:[#allocation21 + $0x810] sm:$0xf]  ;;  %v14160_v12 = vld [vmem:[#allocation21 + $0xc1c] sm:$0xf] }
 0x78a   : > { %v11868_v5 = vor.u32 %v13920_v3, %v11867_v35  ;;  %v12893_v8 = vld [vmem:[#allocation21 + $0xc98] sm:$0xf0]  ;;  %v12261_v35 = vld [vmem:[#allocation21 + $0x7a0] sm:$0xf0] }
 0x78b   : > { %v12896_v20 = vor.u32 %v14160_v12, %v12893_v8  ;;  %v12264_v4 = vor.u32 %v14001_v2, %v12261_v35  ;;  %v13155_v2 = vld [vmem:[#allocation21 + $0xe20] sm:$0xf] }
 0x78c   : > { %8654 = vmatpush.bf16.msra.mxu0 %v11476_v25  ;;  %8663 = vmatpush.bf16.msra.mxu1 %v13012_v57  ;;  %v11739_v25 = vld [vmem:[#allocation21 + $0x318] sm:$0xf] }
 0x78d   : > { %8680 = vmatpush.bf16.msra.mxu2 %v11480_v32  ;;  %8689 = vmatpush.bf16.msra.mxu3 %v13016_v44  ;;  %v13275_v57 = vld [vmem:[#allocation21 + $0xf18] sm:$0xf]  ;;  %v11741_v32 = vld [vmem:[#allocation21 + $0x398] sm:$0xf0]  ;;  %v12372_v44 = vor.u32 %v14047_v59, %v12371_v14  ;;  %v11740_v26 = vor.u32 %v13888_v6, %v11739_v25  ;;  %v13969_v25 = vld [vmem:[#allocation21 + $0x624] sm:$0xf] }
 0x78e   : > { %v13276_v61 = vor.u32 %v14272_v7, %v13275_v57  ;;  %v11744_v24 = vor.u32 %v13872_v36, %v11741_v32  ;;  %v12763_v14 = vld [vmem:[#allocation21 + $0xb18] sm:$0xf]  ;;  %v14128_v59 = vld [vmem:[#allocation21 + $0xb1c] sm:$0xf]  ;;  %v12133_v57 = vld [vmem:[#allocation21 + $0x6a0] sm:$0xf0] }
 0x78f   : > { %v12768_v6 = vor.u32 %v14128_v59, %v12765_v38  ;;  %v12635_v32 = vld [vmem:[#allocation21 + $0xa18] sm:$0xf]  ;;  %v11491_v38 = vld [vmem:[#allocation21 + $0x120] sm:$0xf] }
 0x790   : > { %8655 = vmatpush.bf16.msra.mxu0 %v11348_v46  ;;  %8664 = vmatpush.bf16.msra.mxu1 %v12884_v27  ;;  %v13280_v46 = vor.u32 %v14256_v22, %v13277_v30  ;;  %v13856_v27 = vld [vmem:[#allocation21 + $0x294] sm:$0xf0]  ;;  %v14096_v22 = vld [vmem:[#allocation21 + $0xa1c] sm:$0xf]  ;;  %v12136_v30 = vor.u32 %v13969_v25, %v12133_v57  ;;  %v14209_v57 = vld [vmem:[#allocation21 + $0xd9c] sm:$0xf0] }
 0x791   : > { %8681 = vmatpush.bf16.msra.mxu2 %v11352_v51  ;;  %8690 = vmatpush.bf16.msra.mxu3 %v12888_v53  ;;  %v13840_v51 = vld [vmem:[#allocation21 + $0x21c] sm:$0xf] }
 0x792   : > { %8617 = vmatmul.bf16.vlgmr.msrb.gmra.mxu1 %v16200_v37  ;;  %8643 = vmatmul.bf16.vlgmr.msrb.gmra.mxu3 %v16200_v37  ;;  %v11613_v53 = vld [vmem:[#allocation21 + $0x298] sm:$0xf0] }
 0x793   : > { %8656 = vmatmul.bf16.vlgmr.msra.gmra.mxu0 %v16194_v60  ;;  %v11616_v40 = vor.u32 %v13840_v51, %v11613_v53  ;;  %v14080_v51 = vld [vmem:[#allocation21 + $0x994] sm:$0xf0]  ;;  %v14064_v53 = vld [vmem:[#allocation21 + $0x91c] sm:$0xf] }
 0x794   : > { %8700 = vmatpush.bf16.msrb.mxu0 %v12252_v17  ;;  %8665 = vmatpush.bf16.msra.mxu1 %v12756_v42  ;;  %v13148_v17 = vor.u32 %v14240_v43, %v13147_v33  ;;  %v13808_v42 = vld [vmem:[#allocation21 + $0x11c] sm:$0xf] }
 0x795   : > { %8726 = vmatpush.bf16.msrb.mxu2 %v12256_v21  ;;  %8691 = vmatpush.bf16.msra.mxu3 %v12760_v47  ;;  %v11612_v21 = vor.u32 %v13856_v27, %v11611_v23  ;;  %v11485_v47 = vld [vmem:[#allocation21 + $0x198] sm:$0xf0]  ;;  %v12005_v23 = vld [vmem:[#allocation21 + $0x5a0] sm:$0xf0]  ;;  %v12507_v27 = vld [vmem:[#allocation21 + $0x918] sm:$0xf] }
 0x796   : > { %8682 = vmatmul.bf16.vlgmr.msra.gmra.mxu2 %v16194_v60  ;;  %v11488_v48 = vor.u32 %v13808_v42, %v11485_v47  ;;  %v14048_v42 = vld [vmem:[#allocation21 + $0x894] sm:$0xf0]  ;;  %v14032_v47 = vld [vmem:[#allocation21 + $0x81c] sm:$0xf] }
 0x798   : > { %8701 = vmatpush.bf16.msrb.mxu0 %v12124_v9  ;;  %8666 = vmatpush.bf16.msra.mxu1 %v12628_v52  ;;  %v13020_v9 = vor.u32 %v14208_v28, %v13019_v29  ;;  %v13776_v52 = vld [vmem:[#allocation21 + $0x1c] sm:$0xf]  ;;  %v12508_v29 = vor.u32 %v14080_v51, %v12507_v27  ;;  %v12379_v28 = vld [vmem:[#allocation21 + $0x818] sm:$0xf]  ;;  %v12901_v27 = vld [vmem:[#allocation21 + $0xca0] sm:$0xf0] }
 0x799   : > { %8727 = vmatpush.bf16.msrb.mxu2 %v12128_v63  ;;  %8692 = vmatpush.bf16.msra.mxu3 %v12632_v13  ;;  %v11355_v63 = vld [vmem:[#allocation21 + $0x18] sm:$0xf]  ;;  %v11357_v13 = vld [vmem:[#allocation21 + $0x98] sm:$0xf0]  ;;  %v12380_v39 = vor.u32 %v14048_v42, %v12379_v28  ;;  %v12267_v51 = vld [vmem:[#allocation21 + $0x728] sm:$0xf] }
 0x79a   : > { %v11356_v3 = vor.u32 %v13792_v15, %v11355_v63  ;;  %v11360_v31 = vor.u32 %v13776_v52, %v11357_v13  ;;  %v13889_v63 = vld [vmem:[#allocation21 + $0x39c] sm:$0xf0]  ;;  %v13873_v15 = vld [vmem:[#allocation21 + $0x324] sm:$0xf]  ;;  %v12384_v13 = vor.u32 %v14032_v47, %v12381_v56  ;;  %v12139_v56 = vld [vmem:[#allocation21 + $0x628] sm:$0xf] }
 0x79b   : > { %v13285_v52 = vld [vmem:[#allocation21 + $0xfa0] sm:$0xf0]  ;;  %v12771_v28 = vld [vmem:[#allocation21 + $0xb20] sm:$0xf] }
 0x79c   : > { %8702 = vmatpush.bf16.msrb.mxu0 %v11996_v1  ;;  %8667 = vmatpush.bf16.msra.mxu1 %v12500_v45  ;;  %v12259_v1 = vld [vmem:[#allocation21 + $0x720] sm:$0xf]  ;;  %v12773_v47 = vld [vmem:[#allocation21 + $0xba0] sm:$0xf0] }
 0x79d   : > { %8728 = vmatpush.bf16.msrb.mxu2 %v12000_v54  ;;  %8693 = vmatpush.bf16.msra.mxu3 %v12504_v41  ;;  %v14017_v54 = vld [vmem:[#allocation21 + $0x79c] sm:$0xf0]  ;;  %v14144_v41 = vld [vmem:[#allocation21 + $0xb94] sm:$0xf0] }
 0x79e   : > { %v12260_v45 = vor.u32 %v14017_v54, %v12259_v1  ;;  %v12764_v7 = vor.u32 %v14144_v41, %v12763_v14  ;;  %v11752_v1 = vor.u32 %v13873_v15, %v11749_v34  ;;  %v11619_v54 = vld [vmem:[#allocation21 + $0x220] sm:$0xf]  ;;  %v13157_v14 = vld [vmem:[#allocation21 + $0xea0] sm:$0xf0] }
 0x79f   : > { %v12643_v34 = vld [vmem:[#allocation21 + $0xa20] sm:$0xf] }
 0x7a0   : > { %8703 = vmatpush.bf16.msrb.mxu0 %v11868_v5  ;;  %8668 = vmatpush.bf16.msra.mxu1 %v12372_v44  ;;  %v12131_v5 = vld [vmem:[#allocation21 + $0x620] sm:$0xf]  ;;  %v14112_v44 = vld [vmem:[#allocation21 + $0xa94] sm:$0xf0] }
 0x7a1   : > { %8729 = vmatpush.bf16.msrb.mxu2 %v11872_v0  ;;  %8694 = vmatpush.bf16.msra.mxu3 %v12376_v55  ;;  %v13985_v0 = vld [vmem:[#allocation21 + $0x69c] sm:$0xf0]  ;;  %v12637_v55 = vld [vmem:[#allocation21 + $0xa98] sm:$0xf0]  ;;  %v12636_v33 = vor.u32 %v14112_v44, %v12635_v32  ;;  %v13029_v32 = vld [vmem:[#allocation21 + $0xda0] sm:$0xf0] }
 0x7a2   : > { %v12132_v36 = vor.u32 %v13985_v0, %v12131_v5  ;;  %v12640_v43 = vor.u32 %v14096_v22, %v12637_v55  ;;  %v13825_v5 = vld [vmem:[#allocation21 + $0x19c] sm:$0xf0] }
 0x7a3   : > { %8669 = vmatmul.bf16.vlgmr.msra.gmra.mxu1 %v16200_v37  ;;  %v13027_v0 = vld [vmem:[#allocation21 + $0xd20] sm:$0xf]  ;;  %v11492_v44 = vor.u32 %v13825_v5, %v11491_v38  ;;  %v11885_v38 = vld [vmem:[#allocation21 + $0x4a8] sm:$0xf0] }
 0x7a4   : > { %8713 = vmatpush.bf16.msrb.mxu1 %v13276_v61  ;;  %8704 = vmatpush.bf16.msrb.mxu0 %v11740_v26  ;;  %v12003_v61 = vld [vmem:[#allocation21 + $0x520] sm:$0xf] }
 0x7a5   : > { %8730 = vmatpush.bf16.msrb.mxu2 %v11744_v24  ;;  %8739 = vmatpush.bf16.msrb.mxu3 %v13280_v46  ;;  %v13953_v26 = vld [vmem:[#allocation21 + $0x59c] sm:$0xf0]  ;;  %v13937_v24 = vld [vmem:[#allocation21 + $0x524] sm:$0xf] }
 0x7a6   : > { %8695 = vmatmul.bf16.vlgmr.msra.gmra.mxu3 %v16200_v37  ;;  %v12004_v46 = vor.u32 %v13953_v26, %v12003_v61  ;;  %v12008_v58 = vor.u32 %v13937_v24, %v12005_v23  ;;  %v11363_v22 = vld [vmem:[#allocation21 + $0x20] sm:$0xf] }
 0x7a7   : > { %v13793_v61 = vld [vmem:[#allocation21 + $0x9c] sm:$0xf0] }
 0x7a8   : > { %8714 = vmatpush.bf16.msrb.mxu1 %v13148_v17  ;;  %8705 = vmatpush.bf16.msrb.mxu0 %v11612_v21  ;;  %v11875_v17 = vld [vmem:[#allocation21 + $0x420] sm:$0xf] }
 0x7a9   : > { %8731 = vmatpush.bf16.msrb.mxu2 %v11616_v40  ;;  %8740 = vmatpush.bf16.msrb.mxu3 %v13152_v11  ;;  %v13921_v21 = vld [vmem:[#allocation21 + $0x49c] sm:$0xf0]  ;;  %v13905_v40 = vld [vmem:[#allocation21 + $0x424] sm:$0xf]  ;;  %v12512_v11 = vor.u32 %v14064_v53, %v12509_v16  ;;  %v14018_v53 = vld [vmem:[#allocation21 + $0x7a4] sm:$0xf0] }
 0x7aa   : > { %v11876_v10 = vor.u32 %v13921_v21, %v11875_v17  ;;  %v11880_v62 = vor.u32 %v13905_v40, %v11877_v18  ;;  %v12899_v26 = vld [vmem:[#allocation21 + $0xc20] sm:$0xf]  ;;  %v14002_v16 = vld [vmem:[#allocation21 + $0x72c] sm:$0xf] }
 0x7ab   : > { %v14177_v24 = vld [vmem:[#allocation21 + $0xc9c] sm:$0xf0]  ;;  %v12269_v17 = vld [vmem:[#allocation21 + $0x7a8] sm:$0xf0] }
 0x7ac   : > { %8715 = vmatpush.bf16.msrb.mxu1 %v13020_v9  ;;  %8706 = vmatpush.bf16.msrb.mxu0 %v11484_v50  ;;  %v11747_v9 = vld [vmem:[#allocation21 + $0x320] sm:$0xf]  ;;  %v12900_v21 = vor.u32 %v14177_v24, %v12899_v26  ;;  %v12272_v42 = vor.u32 %v14002_v16, %v12269_v17  ;;  %v11757_v26 = vld [vmem:[#allocation21 + $0x3a8] sm:$0xf0]  ;;  %v13163_v16 = vld [vmem:[#allocation21 + $0xe28] sm:$0xf] }
 0x7ad   : > { %8732 = vmatpush.bf16.msrb.mxu2 %v11488_v48  ;;  %8741 = vmatpush.bf16.msrb.mxu3 %v13024_v49  ;;  %v13283_v50 = vld [vmem:[#allocation21 + $0xf20] sm:$0xf]  ;;  %v14257_v49 = vld [vmem:[#allocation21 + $0xf24] sm:$0xf]  ;;  %v11748_v12 = vor.u32 %v13889_v63, %v11747_v9  ;;  %v13970_v9 = vld [vmem:[#allocation21 + $0x62c] sm:$0xf] }
 0x7ae   : > { %v14273_v48 = vld [vmem:[#allocation21 + $0xf9c] sm:$0xf0]  ;;  %v13288_v35 = vor.u32 %v14257_v49, %v13285_v52  ;;  %v12141_v63 = vld [vmem:[#allocation21 + $0x6a8] sm:$0xf0]  ;;  %v14097_v49 = vld [vmem:[#allocation21 + $0xa24] sm:$0xf] }
 0x7af   : > { %v13284_v8 = vor.u32 %v14273_v48, %v13283_v50  ;;  %v12144_v52 = vor.u32 %v13970_v9, %v12141_v63  ;;  %v14210_v63 = vld [vmem:[#allocation21 + $0xda4] sm:$0xf0] }
 0x7b0   : > { %8716 = vmatpush.bf16.msrb.mxu1 %v12892_v19  ;;  %8707 = vmatpush.bf16.msrb.mxu0 %v11356_v3  ;;  %v13857_v19 = vld [vmem:[#allocation21 + $0x29c] sm:$0xf0] }
 0x7b1   : > { %8733 = vmatpush.bf16.msrb.mxu2 %v11360_v31  ;;  %8742 = vmatpush.bf16.msrb.mxu3 %v12896_v20  ;;  %v14241_v3 = vld [vmem:[#allocation21 + $0xe9c] sm:$0xf0]  ;;  %v13841_v31 = vld [vmem:[#allocation21 + $0x224] sm:$0xf]  ;;  %v11620_v41 = vor.u32 %v13857_v19, %v11619_v54  ;;  %v12013_v54 = vld [vmem:[#allocation21 + $0x5a8] sm:$0xf0] }
 0x7b2   : > { %v11621_v20 = vld [vmem:[#allocation21 + $0x2a0] sm:$0xf0]  ;;  %v13156_v59 = vor.u32 %v14241_v3, %v13155_v2  ;;  %v12515_v3 = vld [vmem:[#allocation21 + $0x920] sm:$0xf] }
 0x7b3   : > { %8708 = vmatmul.bf16.vlgmr.msrb.gmra.mxu0 %v16194_v60 }
 0x7b4   : > { %8752 = vmatpush.bf16.msra.mxu0 %v12260_v45  ;;  %8734 = vmatmul.bf16.vlgmr.msrb.gmra.mxu2 %v16194_v60  ;;  %v14225_v45 = vld [vmem:[#allocation21 + $0xe24] sm:$0xf] }
 0x7b5   : > { %8778 = vmatpush.bf16.msra.mxu2 %v12264_v4  ;;  %8717 = vmatpush.bf16.msrb.mxu1 %v12764_v7  ;;  %v11624_v4 = vor.u32 %v13841_v31, %v11621_v20  ;;  %v13160_v25 = vor.u32 %v14225_v45, %v13157_v14  ;;  %v13809_v7 = vld [vmem:[#allocation21 + $0x124] sm:$0xf]  ;;  %v14081_v31 = vld [vmem:[#allocation21 + $0x99c] sm:$0xf0] }
 0x7b6   : > { %8743 = vmatpush.bf16.msrb.mxu3 %v12768_v6  ;;  %v11493_v6 = vld [vmem:[#allocation21 + $0x1a0] sm:$0xf0]  ;;  %v12516_v5 = vor.u32 %v14081_v31, %v12515_v3  ;;  %v12909_v3 = vld [vmem:[#allocation21 + $0xca8] sm:$0xf0]  ;;  %v12275_v31 = vld [vmem:[#allocation21 + $0x730] sm:$0xf] }
 0x7b7   : > { %v11496_v55 = vor.u32 %v13809_v7, %v11493_v6  ;;  %v14065_v20 = vld [vmem:[#allocation21 + $0x924] sm:$0xf]  ;;  %v14049_v7 = vld [vmem:[#allocation21 + $0x89c] sm:$0xf0] }
 0x7b8   : > { %8753 = vmatpush.bf16.msra.mxu0 %v12132_v36  ;;  %v14193_v36 = vld [vmem:[#allocation21 + $0xd24] sm:$0xf] }
 0x7b9   : > { %8779 = vmatpush.bf16.msra.mxu2 %v12136_v30  ;;  %8718 = vmatpush.bf16.msrb.mxu1 %v12636_v33  ;;  %v13028_v30 = vor.u32 %v14209_v57, %v13027_v0  ;;  %v13032_v23 = vor.u32 %v14193_v36, %v13029_v32  ;;  %v13777_v33 = vld [vmem:[#allocation21 + $0x24] sm:$0xf]  ;;  %v12387_v0 = vld [vmem:[#allocation21 + $0x820] sm:$0xf] }
 0x7ba   : > { %8744 = vmatpush.bf16.msrb.mxu3 %v12640_v43  ;;  %v11365_v43 = vld [vmem:[#allocation21 + $0xa0] sm:$0xf0]  ;;  %v12388_v24 = vor.u32 %v14049_v7, %v12387_v0  ;;  %v12779_v0 = vld [vmem:[#allocation21 + $0xb28] sm:$0xf] }
 0x7bb   : > { %v11368_v40 = vor.u32 %v13777_v33, %v11365_v43  ;;  %v12517_v14 = vld [vmem:[#allocation21 + $0x9a0] sm:$0xf0]  ;;  %v13293_v33 = vld [vmem:[#allocation21 + $0xfa8] sm:$0xf0] }
 0x7bc   : > { %8754 = vmatpush.bf16.msra.mxu0 %v12004_v46  ;;  %v14161_v46 = vld [vmem:[#allocation21 + $0xc24] sm:$0xf] }
 0x7bd   : > { %8780 = vmatpush.bf16.msra.mxu2 %v12008_v58  ;;  %8719 = vmatpush.bf16.msrb.mxu1 %v12508_v29  ;;  %v11364_v58 = vor.u32 %v13793_v61, %v11363_v22  ;;  %v12904_v18 = vor.u32 %v14161_v46, %v12901_v27  ;;  %v12268_v29 = vor.u32 %v14018_v53, %v12267_v51  ;;  %v14033_v6 = vld [vmem:[#allocation21 + $0x824] sm:$0xf]  ;;  %v13890_v22 = vld [vmem:[#allocation21 + $0x3a4] sm:$0xf0]  ;;  %v13874_v61 = vld [vmem:[#allocation21 + $0x32c] sm:$0xf] }
 0x7be   : > { %8745 = vmatpush.bf16.msrb.mxu3 %v12512_v11  ;;  %v14145_v11 = vld [vmem:[#allocation21 + $0xb9c] sm:$0xf0]  ;;  %v12389_v36 = vld [vmem:[#allocation21 + $0x8a0] sm:$0xf0]  ;;  %v11760_v51 = vor.u32 %v13874_v61, %v11757_v26  ;;  %v11627_v53 = vld [vmem:[#allocation21 + $0x228] sm:$0xf] }
 0x7bf   : > { %v12772_v50 = vor.u32 %v14145_v11, %v12771_v28  ;;  %v12392_v43 = vor.u32 %v14033_v6, %v12389_v36  ;;  %v13165_v28 = vld [vmem:[#allocation21 + $0xea8] sm:$0xf0]  ;;  %v12147_v36 = vld [vmem:[#allocation21 + $0x630] sm:$0xf]  ;;  %v12651_v26 = vld [vmem:[#allocation21 + $0xa28] sm:$0xf] }
 0x7c0   : > { %8755 = vmatpush.bf16.msra.mxu0 %v11876_v10  ;;  %v14129_v10 = vld [vmem:[#allocation21 + $0xb24] sm:$0xf]  ;;  %v12781_v6 = vld [vmem:[#allocation21 + $0xba8] sm:$0xf0] }
 0x7c1   : > { %8781 = vmatpush.bf16.msra.mxu2 %v11880_v62  ;;  %8720 = vmatpush.bf16.msrb.mxu1 %v12380_v39  ;;  %v13986_v62 = vld [vmem:[#allocation21 + $0x6a4] sm:$0xf0]  ;;  %v12776_v48 = vor.u32 %v14129_v10, %v12773_v47  ;;  %v14113_v39 = vld [vmem:[#allocation21 + $0xa9c] sm:$0xf0] }
 0x7c2   : > { %8746 = vmatpush.bf16.msrb.mxu3 %v12384_v13  ;;  %v12140_v15 = vor.u32 %v13986_v62, %v12139_v56  ;;  %v12645_v13 = vld [vmem:[#allocation21 + $0xaa0] sm:$0xf0]  ;;  %v12644_v19 = vor.u32 %v14113_v39, %v12643_v34  ;;  %v11499_v47 = vld [vmem:[#allocation21 + $0x128] sm:$0xf]  ;;  %v13037_v34 = vld [vmem:[#allocation21 + $0xda8] sm:$0xf0] }
 0x7c3   : > { %v12648_v2 = vor.u32 %v14097_v49, %v12645_v13  ;;  %v13826_v56 = vld [vmem:[#allocation21 + $0x1a4] sm:$0xf0] }
 0x7c4   : > { %8756 = vmatpush.bf16.msra.mxu0 %v11748_v12  ;;  %8721 = vmatmul.bf16.vlgmr.msrb.gmra.mxu1 %v16200_v37  ;;  %v12011_v12 = vld [vmem:[#allocation21 + $0x528] sm:$0xf]  ;;  %v11500_v39 = vor.u32 %v13826_v56, %v11499_v47  ;;  %v13907_v47 = vld [vmem:[#allocation21 + $0x434] sm:$0xf] }
 0x7c5   : > { %8765 = vmatpush.bf16.msra.mxu1 %v13284_v8  ;;  %8782 = vmatpush.bf16.msra.mxu2 %v11752_v1  ;;  %v13954_v8 = vld [vmem:[#allocation21 + $0x5a4] sm:$0xf0]  ;;  %v13938_v1 = vld [vmem:[#allocation21 + $0x52c] sm:$0xf]  ;;  %v11893_v56 = vld [vmem:[#allocation21 + $0x4b0] sm:$0xf0] }
 0x7c6   : > { %8791 = vmatpush.bf16.msra.mxu3 %v13288_v35  ;;  %v12012_v35 = vor.u32 %v13954_v8, %v12011_v12  ;;  %v12016_v45 = vor.u32 %v13938_v1, %v12013_v54  ;;  %v13035_v62 = vld [vmem:[#allocation21 + $0xd28] sm:$0xf] }
 0x7c7   : > { %8747 = vmatmul.bf16.vlgmr.msrb.gmra.mxu3 %v16200_v37  ;;  %v11371_v49 = vld [vmem:[#allocation21 + $0x28] sm:$0xf] }
 0x7c8   : > { %8757 = vmatpush.bf16.msra.mxu0 %v11620_v41  ;;  %v11883_v41 = vld [vmem:[#allocation21 + $0x428] sm:$0xf] }
 0x7c9   : > { %8766 = vmatpush.bf16.msra.mxu1 %v13156_v59  ;;  %8783 = vmatpush.bf16.msra.mxu2 %v11624_v4  ;;  %v13922_v59 = vld [vmem:[#allocation21 + $0x4a4] sm:$0xf0]  ;;  %v13906_v4 = vld [vmem:[#allocation21 + $0x42c] sm:$0xf] }
 0x7ca   : > { %8792 = vmatpush.bf16.msra.mxu3 %v13160_v25  ;;  %v12520_v25 = vor.u32 %v14065_v20, %v12517_v14  ;;  %v11884_v57 = vor.u32 %v13922_v59, %v11883_v41  ;;  %v11888_v32 = vor.u32 %v13906_v4, %v11885_v38  ;;  %v13794_v12 = vld [vmem:[#allocation21 + $0xa4] sm:$0xf0]  ;;  %v14019_v20 = vld [vmem:[#allocation21 + $0x7ac] sm:$0xf0]  ;;  %v14003_v14 = vld [vmem:[#allocation21 + $0x734] sm:$0xf] }
 0x7cb   : > { %v12907_v8 = vld [vmem:[#allocation21 + $0xc28] sm:$0xf]  ;;  %v12277_v41 = vld [vmem:[#allocation21 + $0x7b0] sm:$0xf0] }
 0x7cc   : > { %8758 = vmatpush.bf16.msra.mxu0 %v11492_v44  ;;  %v11755_v44 = vld [vmem:[#allocation21 + $0x328] sm:$0xf]  ;;  %v12280_v7 = vor.u32 %v14003_v14, %v12277_v41 }
 0x7cd   : > { %8767 = vmatpush.bf16.msra.mxu1 %v13028_v30  ;;  %8784 = vmatpush.bf16.msra.mxu2 %v11496_v55  ;;  %v13291_v30 = vld [vmem:[#allocation21 + $0xf28] sm:$0xf]  ;;  %v11756_v46 = vor.u32 %v13890_v22, %v11755_v44  ;;  %v13971_v44 = vld [vmem:[#allocation21 + $0x634] sm:$0xf] }
 0x7ce   : > { %8793 = vmatpush.bf16.msra.mxu3 %v13032_v23  ;;  %v14274_v55 = vld [vmem:[#allocation21 + $0xfa4] sm:$0xf0]  ;;  %v14258_v23 = vld [vmem:[#allocation21 + $0xf2c] sm:$0xf]  ;;  %v12149_v22 = vld [vmem:[#allocation21 + $0x6b0] sm:$0xf0] }
 0x7cf   : > { %v13292_v27 = vor.u32 %v14274_v55, %v13291_v30  ;;  %v13296_v17 = vor.u32 %v14258_v23, %v13293_v33  ;;  %v14178_v1 = vld [vmem:[#allocation21 + $0xca4] sm:$0xf0]  ;;  %v14098_v23 = vld [vmem:[#allocation21 + $0xa2c] sm:$0xf]  ;;  %v12152_v33 = vor.u32 %v13971_v44, %v12149_v22 }
 0x7d0   : > { %8759 = vmatpush.bf16.msra.mxu0 %v11364_v58  ;;  %v13858_v58 = vld [vmem:[#allocation21 + $0x2a4] sm:$0xf0]  ;;  %v12908_v59 = vor.u32 %v14178_v1, %v12907_v8  ;;  %v14275_v8 = vld [vmem:[#allocation21 + $0xfac] sm:$0xf0]  ;;  %v13875_v1 = vld [vmem:[#allocation21 + $0x334] sm:$0xf] }
 0x7d1   : > { %8768 = vmatpush.bf16.msra.mxu1 %v12900_v21  ;;  %8785 = vmatpush.bf16.msra.mxu2 %v11368_v40  ;;  %v14242_v21 = vld [vmem:[#allocation21 + $0xea4] sm:$0xf0]  ;;  %v13842_v40 = vld [vmem:[#allocation21 + $0x22c] sm:$0xf]  ;;  %v11628_v11 = vor.u32 %v13858_v58, %v11627_v53  ;;  %v12021_v53 = vld [vmem:[#allocation21 + $0x5b0] sm:$0xf0] }
 0x7d2   : > { %8794 = vmatpush.bf16.msra.mxu3 %v12904_v18  ;;  %v11629_v18 = vld [vmem:[#allocation21 + $0x2a8] sm:$0xf0]  ;;  %v13164_v10 = vor.u32 %v14242_v21, %v13163_v16 }
 0x7d3   : > { %8760 = vmatmul.bf16.vlgmr.msra.gmra.mxu0 %v16194_v60 }
 0x7d4   : > { %8804 = vmatpush.bf16.msrb.mxu0 %v12268_v29  ;;  %8786 = vmatmul.bf16.vlgmr.msra.gmra.mxu2 %v16194_v60  ;;  %v14226_v29 = vld [vmem:[#allocation21 + $0xe2c] sm:$0xf] }
 0x7d5   : > { %8830 = vmatpush.bf16.msrb.mxu2 %v12272_v42  ;;  %8769 = vmatpush.bf16.msra.mxu1 %v12772_v50  ;;  %v11632_v42 = vor.u32 %v13842_v40, %v11629_v18  ;;  %v13168_v9 = vor.u32 %v14226_v29, %v13165_v28  ;;  %v13810_v50 = vld [vmem:[#allocation21 + $0x12c] sm:$0xf]  ;;  %v12523_v40 = vld [vmem:[#allocation21 + $0x928] sm:$0xf] }
 0x7d6   : > { %8795 = vmatpush.bf16.msra.mxu3 %v12776_v48  ;;  %v11501_v48 = vld [vmem:[#allocation21 + $0x1a8] sm:$0xf0]  ;;  %v14082_v18 = vld [vmem:[#allocation21 + $0x9a4] sm:$0xf0] }
 0x7d7   : > { %v11504_v13 = vor.u32 %v13810_v50, %v11501_v48  ;;  %v14066_v29 = vld [vmem:[#allocation21 + $0x92c] sm:$0xf]  ;;  %v14050_v48 = vld [vmem:[#allocation21 + $0x8a4] sm:$0xf0] }
 0x7d8   : > { %8805 = vmatpush.bf16.msrb.mxu0 %v12140_v15  ;;  %v14194_v15 = vld [vmem:[#allocation21 + $0xd2c] sm:$0xf] }
 0x7d9   : > { %8831 = vmatpush.bf16.msrb.mxu2 %v12144_v52  ;;  %8770 = vmatpush.bf16.msra.mxu1 %v12644_v19  ;;  %v13036_v52 = vor.u32 %v14210_v63, %v13035_v62  ;;  %v13040_v54 = vor.u32 %v14194_v15, %v13037_v34  ;;  %v13778_v19 = vld [vmem:[#allocation21 + $0x2c] sm:$0xf]  ;;  %v12524_v62 = vor.u32 %v14082_v18, %v12523_v40 }
 0x7da   : > { %8796 = vmatpush.bf16.msra.mxu3 %v12648_v2  ;;  %v11373_v2 = vld [vmem:[#allocation21 + $0xa8] sm:$0xf0] }
 0x7db   : > { %v11376_v4 = vor.u32 %v13778_v19, %v11373_v2  ;;  %v14034_v15 = vld [vmem:[#allocation21 + $0x82c] sm:$0xf]  ;;  %v14259_v2 = vld [vmem:[#allocation21 + $0xf34] sm:$0xf] }
 0x7dc   : > { %8806 = vmatpush.bf16.msrb.mxu0 %v12012_v35  ;;  %v14162_v35 = vld [vmem:[#allocation21 + $0xc2c] sm:$0xf] }
 0x7dd   : > { %8832 = vmatpush.bf16.msrb.mxu2 %v12016_v45  ;;  %8771 = vmatpush.bf16.msra.mxu1 %v12516_v5  ;;  %v11372_v45 = vor.u32 %v13794_v12, %v11371_v49  ;;  %v12912_v38 = vor.u32 %v14162_v35, %v12909_v3  ;;  %v12276_v5 = vor.u32 %v14019_v20, %v12275_v31  ;;  %v12397_v34 = vld [vmem:[#allocation21 + $0x8a8] sm:$0xf0]  ;;  %v11763_v49 = vld [vmem:[#allocation21 + $0x330] sm:$0xf]  ;;  %v13301_v35 = vld [vmem:[#allocation21 + $0xfb0] sm:$0xf0] }
 0x7de   : > { %8797 = vmatpush.bf16.msra.mxu3 %v12520_v25  ;;  %v14146_v25 = vld [vmem:[#allocation21 + $0xba4] sm:$0xf0]  ;;  %v16226_v3 = vld [vmem:[#allocation23] sm:$0xff]  ;;  %v12400_v31 = vor.u32 %v14034_v15, %v12397_v34  ;;  %v14004_v15 = vld [vmem:[#allocation21 + $0x73c] sm:$0xf] }
 0x7df   : > { %v12780_v30 = vor.u32 %v14146_v25, %v12779_v0  ;;  %v14243_v0 = vld [vmem:[#allocation21 + $0xeac] sm:$0xf0]  ;;  %v13843_v25 = vld [vmem:[#allocation21 + $0x234] sm:$0xf]  ;;  %v12285_v34 = vld [vmem:[#allocation21 + $0x7b8] sm:$0xf0] }
 0x7e0   : > { %8807 = vmatpush.bf16.msrb.mxu0 %v11884_v57  ;;  %v14130_v57 = vld [vmem:[#allocation21 + $0xb2c] sm:$0xf] }
 0x7e1   : > { %8833 = vmatpush.bf16.msrb.mxu2 %v11888_v32  ;;  %8772 = vmatpush.bf16.msra.mxu1 %v12388_v24  ;;  %v13987_v32 = vld [vmem:[#allocation21 + $0x6ac] sm:$0xf0]  ;;  %v12784_v55 = vor.u32 %v14130_v57, %v12781_v6  ;;  %v14114_v24 = vld [vmem:[#allocation21 + $0xaa4] sm:$0xf0]  ;;  %v11637_v57 = vld [vmem:[#allocation21 + $0x2b0] sm:$0xf0] }
 0x7e2   : > { %8798 = vmatpush.bf16.msra.mxu3 %v12392_v43  ;;  %v12148_v61 = vor.u32 %v13987_v32, %v12147_v36  ;;  %v12653_v43 = vld [vmem:[#allocation21 + $0xaa8] sm:$0xf0]  ;;  %v12652_v58 = vor.u32 %v14114_v24, %v12651_v26  ;;  %v14227_v6 = vld [vmem:[#allocation21 + $0xe34] sm:$0xf]  ;;  %v11640_v22 = vor.u32 %v13843_v25, %v11637_v57 }
 0x7e3   : > { %v12656_v16 = vor.u32 %v14098_v23, %v12653_v43  ;;  %v13173_v36 = vld [vmem:[#allocation21 + $0xeb0] sm:$0xf0]  ;;  %v14211_v23 = vld [vmem:[#allocation21 + $0xdac] sm:$0xf0] }
 0x7e4   : > { %8808 = vmatpush.bf16.msrb.mxu0 %v11756_v46  ;;  %8773 = vmatmul.bf16.vlgmr.msra.gmra.mxu1 %v16200_v37  ;;  %v12019_v46 = vld [vmem:[#allocation21 + $0x530] sm:$0xf]  ;;  %v13176_v26 = vor.u32 %v14227_v6, %v13173_v36  ;;  %v11509_v43 = vld [vmem:[#allocation21 + $0x1b0] sm:$0xf0] }
 0x7e5   : > { %8817 = vmatpush.bf16.msrb.mxu1 %v13292_v27  ;;  %8834 = vmatpush.bf16.msrb.mxu2 %v11760_v51  ;;  %v13955_v27 = vld [vmem:[#allocation21 + $0x5ac] sm:$0xf0]  ;;  %v13939_v51 = vld [vmem:[#allocation21 + $0x534] sm:$0xf] }
 0x7e6   : > { %8843 = vmatpush.bf16.msrb.mxu3 %v13296_v17  ;;  %v12020_v17 = vor.u32 %v13955_v27, %v12019_v46  ;;  %v12024_v28 = vor.u32 %v13939_v51, %v12021_v53  ;;  %v14195_v27 = vld [vmem:[#allocation21 + $0xd34] sm:$0xf]  ;;  %v8481_v53 = vperm.slane %v16226_v3, 1  ;;  %v14115_v6 = vld [vmem:[#allocation21 + $0xaac] sm:$0xf0] }
 0x7e7   : > { %8799 = vmatmul.bf16.vlgmr.msra.gmra.mxu3 %v16200_v37  ;;  %v13045_v51 = vld [vmem:[#allocation21 + $0xdb0] sm:$0xf0] }
 0x7e8   : > { %8809 = vmatpush.bf16.msrb.mxu0 %v11628_v11  ;;  %v12525_v11 = vld [vmem:[#allocation21 + $0x9a8] sm:$0xf0]  ;;  %v14099_v36 = vld [vmem:[#allocation21 + $0xa34] sm:$0xf] }
 0x7e9   : > { %8818 = vmatpush.bf16.msrb.mxu1 %v13164_v10  ;;  %8835 = vmatpush.bf16.msrb.mxu2 %v11632_v42  ;;  %v11891_v10 = vld [vmem:[#allocation21 + $0x430] sm:$0xf]  ;;  %v12528_v63 = vor.u32 %v14066_v29, %v12525_v11 }
 0x7ea   : > { %8844 = vmatpush.bf16.msrb.mxu3 %v13168_v9  ;;  %v13923_v42 = vld [vmem:[#allocation21 + $0x4ac] sm:$0xf0]  ;;  %v12395_v9 = vld [vmem:[#allocation21 + $0x828] sm:$0xf] }
 0x7eb   : > { %v11892_v50 = vor.u32 %v13923_v42, %v11891_v10  ;;  %v12396_v19 = vor.u32 %v14050_v48, %v12395_v9  ;;  %v13795_v11 = vld [vmem:[#allocation21 + $0xac] sm:$0xf0]  ;;  %v13048_v42 = vor.u32 %v14195_v27, %v13045_v51  ;;  %v12917_v9 = vld [vmem:[#allocation21 + $0xcb0] sm:$0xf0] }
 0x7ec   : > { %8810 = vmatpush.bf16.msrb.mxu0 %v11500_v39  ;;  %v11896_v39 = vor.u32 %v13907_v47, %v11893_v56  ;;  %v12915_v10 = vld [vmem:[#allocation21 + $0xc30] sm:$0xf]  ;;  %v13779_v47 = vld [vmem:[#allocation21 + $0x34] sm:$0xf] }
 0x7ed   : > { %8819 = vmatpush.bf16.msrb.mxu1 %v13036_v52  ;;  %8836 = vmatpush.bf16.msrb.mxu2 %v11504_v13  ;;  %v13891_v52 = vld [vmem:[#allocation21 + $0x3ac] sm:$0xf0]  ;;  %v11381_v56 = vld [vmem:[#allocation21 + $0xb0] sm:$0xf0] }
 0x7ee   : > { %8845 = vmatpush.bf16.msrb.mxu3 %v13040_v54  ;;  %v13299_v13 = vld [vmem:[#allocation21 + $0xf30] sm:$0xf]  ;;  %v11765_v54 = vld [vmem:[#allocation21 + $0x3b0] sm:$0xf0]  ;;  %v11764_v20 = vor.u32 %v13891_v52, %v11763_v49  ;;  %v11384_v52 = vor.u32 %v13779_v47, %v11381_v56 }
 0x7ef   : > { %v16222_v21 = vpop.f32.mrf.mxu0  ;;  %v13300_v14 = vor.u32 %v14275_v8, %v13299_v13  ;;  %v11768_v41 = vor.u32 %v13875_v1, %v11765_v54  ;;  %v12787_v54 = vld [vmem:[#allocation21 + $0xb30] sm:$0xf]  ;;  %v14067_v51 = vld [vmem:[#allocation21 + $0x934] sm:$0xf] }
 0x7f0   : > { %8811 = vmatpush.bf16.msrb.mxu0 %v11372_v45  ;;  %v14083_v27 = vld [vmem:[#allocation21 + $0x9ac] sm:$0xf0] }
 0x7f1   : > { %8820 = vmatpush.bf16.msrb.mxu1 %v12908_v59  ;;  %8837 = vmatpush.bf16.msrb.mxu2 %v11376_v4  ;;  %v11635_v59 = vld [vmem:[#allocation21 + $0x230] sm:$0xf] }
 0x7f2   : > { %8846 = vmatpush.bf16.msrb.mxu3 %v12912_v38  ;;  %v13859_v4 = vld [vmem:[#allocation21 + $0x2ac] sm:$0xf0] }
 0x7f3   : > { %8812 = vmatmul.bf16.vlgmr.msrb.gmra.mxu0 %v16194_v60  ;;  %v13171_v38 = vld [vmem:[#allocation21 + $0xe30] sm:$0xf]  ;;  %v11636_v32 = vor.u32 %v13859_v4, %v11635_v59  ;;  %v13972_v59 = vld [vmem:[#allocation21 + $0x63c] sm:$0xf] }
 0x7f4   : > { %8856 = vmatpush.bf16.msra.mxu0 %v12276_v5  ;;  %8838 = vmatmul.bf16.vlgmr.msrb.gmra.mxu2 %v16194_v60  ;;  %v13304_v5 = vor.u32 %v14259_v2, %v13301_v35  ;;  %v13172_v44 = vor.u32 %v14243_v0, %v13171_v38  ;;  %v14131_v2 = vld [vmem:[#allocation21 + $0xb34] sm:$0xf]  ;;  %v12288_v35 = vor.u32 %v14004_v15, %v12285_v34  ;;  %v12157_v4 = vld [vmem:[#allocation21 + $0x6b8] sm:$0xf0]  ;;  %v12403_v47 = vld [vmem:[#allocation21 + $0x830] sm:$0xf] }
 0x7f5   : > { %8882 = vmatpush.bf16.msra.mxu2 %v12280_v7  ;;  %8821 = vmatpush.bf16.msrb.mxu1 %v12780_v30  ;;  %v16224_v12 = vpop.f32.mrf.mxu2  ;;  %v8480_v7 = vperm.slane %v16226_v3, 0  ;;  %v11507_v30 = vld [vmem:[#allocation21 + $0x130] sm:$0xf]  ;;  %v11771_v34 = vld [vmem:[#allocation21 + $0x338] sm:$0xf] }
 0x7f6   : > { %8847 = vmatpush.bf16.msrb.mxu3 %v12784_v55  ;;  %v13827_v55 = vld [vmem:[#allocation21 + $0x1ac] sm:$0xf0] }
 0x7f7   : > { %v8555_v45 = vpop.f32.mrf.mxu0  ;;  %v8554_v46 = vadd.f32 %v16222_v21, %v8480_v7  ;;  %v14179_v21 = vld [vmem:[#allocation21 + $0xcac] sm:$0xf0] }
 0x7f8   : > { %8857 = vmatpush.bf16.msra.mxu0 %v12148_v61  ;;  %v13043_v61 = vld [vmem:[#allocation21 + $0xd30] sm:$0xf]  ;;  %v12916_v49 = vor.u32 %v14179_v21, %v12915_v10  ;;  %v12789_v45 = vld [vmem:[#allocation21 + $0xbb0] sm:$0xf0]  ;;  %v8483_v10 = vperm.slane %v16226_v3, 3 }
 0x7f9   : > { %8883 = vmatpush.bf16.msra.mxu2 %v12152_v33  ;;  %8822 = vmatpush.bf16.msrb.mxu1 %v12652_v58  ;;  %v13811_v33 = vld [vmem:[#allocation21 + $0x134] sm:$0xf]  ;;  %v11508_v58 = vor.u32 %v13827_v55, %v11507_v30  ;;  %v13044_v40 = vor.u32 %v14211_v23, %v13043_v61  ;;  %v12792_v25 = vor.u32 %v14131_v2, %v12789_v45  ;;  %v12659_v7 = vld [vmem:[#allocation21 + $0xa30] sm:$0xf]  ;;  %v12027_v30 = vld [vmem:[#allocation21 + $0x538] sm:$0xf] }
 0x7fa   : > { %8848 = vmatpush.bf16.msrb.mxu3 %v12656_v16  ;;  %v11512_v18 = vor.u32 %v13811_v33, %v11509_v43  ;;  %v13956_v55 = vld [vmem:[#allocation21 + $0x5b4] sm:$0xf0]  ;;  %v13940_v61 = vld [vmem:[#allocation21 + $0x53c] sm:$0xf] }
 0x7fb   : > { %v12028_v33 = vor.u32 %v13956_v55, %v12027_v30  ;;  %v14260_v2 = vld [vmem:[#allocation21 + $0xf3c] sm:$0xf] }
 0x7fc   : > { %8858 = vmatpush.bf16.msra.mxu0 %v12020_v17  ;;  %v11379_v17 = vld [vmem:[#allocation21 + $0x30] sm:$0xf] }
 0x7fd   : > { %8884 = vmatpush.bf16.msra.mxu2 %v12024_v28  ;;  %8823 = vmatpush.bf16.msrb.mxu1 %v12524_v62  ;;  %v8581_v24 = vpop.f32.mrf.mxu2  ;;  %v14163_v62 = vld [vmem:[#allocation21 + $0xc34] sm:$0xf]  ;;  %v11380_v48 = vor.u32 %v13795_v11, %v11379_v17  ;;  %v11899_v17 = vld [vmem:[#allocation21 + $0x438] sm:$0xf]  ;;  %v11901_v11 = vld [vmem:[#allocation21 + $0x4b8] sm:$0xf0] }
 0x7fe   : > { %8849 = vmatpush.bf16.msrb.mxu3 %v12528_v63  ;;  %v12283_v63 = vld [vmem:[#allocation21 + $0x738] sm:$0xf]  ;;  %v12920_v13 = vor.u32 %v14163_v62, %v12917_v9  ;;  %v12660_v24 = vor.u32 %v14115_v6, %v12659_v7  ;;  %v11645_v7 = vld [vmem:[#allocation21 + $0x2b8] sm:$0xf0] }
 0x7ff   : > { %v8566_v16 = vpop.f32.mrf.mxu1 }
 0x800   : > { %8859 = vmatpush.bf16.msra.mxu0 %v11892_v50  ;;  %v8567_v29 = vadd.f32 %v8566_v16, %v8554_v46  ;;  %v16233_v28 = vpop.f32.mrf.mxu0  ;;  %v14020_v50 = vld [vmem:[#allocation21 + $0x7b4] sm:$0xf0]  ;;  %v12531_v46 = vld [vmem:[#allocation21 + $0x930] sm:$0xf]  ;;  %v12533_v16 = vld [vmem:[#allocation21 + $0x9b0] sm:$0xf0] }
 0x801   : > { %8885 = vmatpush.bf16.msra.mxu2 %v11896_v39  ;;  %8824 = vmatpush.bf16.msrb.mxu1 %v12396_v19  ;;  %v8580_v39 = vadd.f32 %v16224_v12, %v8481_v53  ;;  %v12284_v8 = vor.u32 %v14020_v50, %v12283_v63  ;;  %v14147_v19 = vld [vmem:[#allocation21 + $0xbac] sm:$0xf0]  ;;  %v12532_v21 = vor.u32 %v14083_v27, %v12531_v46  ;;  %v14035_v50 = vld [vmem:[#allocation21 + $0x834] sm:$0xf] }
 0x802   : > { %8850 = vmatpush.bf16.msrb.mxu3 %v12400_v31  ;;  %v12536_v56 = vor.u32 %v14067_v51, %v12533_v16  ;;  %v14051_v63 = vld [vmem:[#allocation21 + $0x8ac] sm:$0xf0]  ;;  %v14212_v51 = vld [vmem:[#allocation21 + $0xdb4] sm:$0xf0] }
 0x804   : > { %8860 = vmatpush.bf16.msra.mxu0 %v11764_v20  ;;  %8825 = vmatmul.bf16.vlgmr.msrb.gmra.mxu1 %v16200_v37 }
 0x805   : > { %8869 = vmatpush.bf16.msra.mxu1 %v13300_v14  ;;  %8886 = vmatpush.bf16.msra.mxu2 %v11768_v41  ;;  %v8592_v1 = vpop.f32.mrf.mxu3  ;;  %v12155_v14 = vld [vmem:[#allocation21 + $0x638] sm:$0xf] }
 0x806   : > { %8895 = vmatpush.bf16.msra.mxu3 %v13304_v5  ;;  %v8593_v31 = vadd.f32 %v8592_v1, %v8580_v39  ;;  %v16236_v20 = vpop.f32.mrf.mxu2  ;;  %v13988_v41 = vld [vmem:[#allocation21 + $0x6b4] sm:$0xf0]  ;;  %v12788_v5 = vor.u32 %v14147_v19, %v12787_v54  ;;  %v11773_v1 = vld [vmem:[#allocation21 + $0x3b8] sm:$0xf0]  ;;  %v12404_v54 = vor.u32 %v14051_v63, %v12403_v47 }
 0x807   : > { %8851 = vmatmul.bf16.vlgmr.msrb.gmra.mxu3 %v16200_v37  ;;  %v8568_v12 = vpop.f32.mrf.mxu1  ;;  %v12156_v57 = vor.u32 %v13988_v41, %v12155_v14  ;;  %v13892_v39 = vld [vmem:[#allocation21 + $0x3b4] sm:$0xf0]  ;;  %v13780_v63 = vld [vmem:[#allocation21 + $0x3c] sm:$0xf] }
 0x808   : > { %8861 = vmatpush.bf16.msra.mxu0 %v11636_v32  ;;  %v9408_v38 = vrot.slane %v8593_v31, 7  ;;  %v8607_v0 = vpop.f32.mrf.mxu0  ;;  %v8632_v31 = vadd.f32 %v16236_v20, %v8483_v10  ;;  %v11772_v14 = vor.u32 %v13892_v39, %v11771_v34  ;;  %v12923_v47 = vld [vmem:[#allocation21 + $0xc38] sm:$0xf]  ;;  %v12925_v34 = vld [vmem:[#allocation21 + $0xcb8] sm:$0xf0] }
 0x809   : > { %8870 = vmatpush.bf16.msra.mxu1 %v13172_v44  ;;  %8887 = vmatpush.bf16.msra.mxu2 %v11640_v22  ;;  %v12160_v44 = vor.u32 %v13972_v59, %v12157_v4  ;;  %v12661_v22 = vld [vmem:[#allocation21 + $0xab0] sm:$0xf0]  ;;  %v11643_v4 = vld [vmem:[#allocation21 + $0x238] sm:$0xf]  ;;  %v12291_v39 = vld [vmem:[#allocation21 + $0x740] sm:$0xf] }
 0x80a   : > { %8896 = vmatpush.bf16.msra.mxu3 %v13176_v26  ;;  %v16239_v32 = vsel %vm9436_vm1, %v8567_v29, %v9408_v38  ;;  %v12029_v26 = vld [vmem:[#allocation21 + $0x5b8] sm:$0xf0]  ;;  %v12664_v23 = vor.u32 %v14099_v36, %v12661_v22  ;;  %v13179_v38 = vld [vmem:[#allocation21 + $0xe38] sm:$0xf] }
 0x80b   : > { %v12032_v53 = vor.u32 %v13940_v61, %v12029_v26  ;;  %v13908_v29 = vld [vmem:[#allocation21 + $0x43c] sm:$0xf] }
 0x80c   : > { %8862 = vmatpush.bf16.msra.mxu0 %v11508_v58  ;;  %v11904_v15 = vor.u32 %v13908_v29, %v11901_v11  ;;  %v14228_v36 = vld [vmem:[#allocation21 + $0xe3c] sm:$0xf]  ;;  %v11387_v29 = vld [vmem:[#allocation21 + $0x38] sm:$0xf] }
 0x80d   : > { %8871 = vmatpush.bf16.msra.mxu1 %v13044_v40  ;;  %8888 = vmatpush.bf16.msra.mxu2 %v11512_v18  ;;  %v8594_v43 = vpop.f32.mrf.mxu3  ;;  %v13924_v40 = vld [vmem:[#allocation21 + $0x4b4] sm:$0xf0]  ;;  %v8482_v18 = vperm.slane %v16226_v3, 2 }
 0x80e   : > { %8897 = vmatpush.bf16.msra.mxu3 %v13048_v42  ;;  %v8633_v58 = vpop.f32.mrf.mxu2  ;;  %v11900_v9 = vor.u32 %v13924_v40, %v11899_v17  ;;  %v13051_v43 = vld [vmem:[#allocation21 + $0xd38] sm:$0xf]  ;;  %v14196_v17 = vld [vmem:[#allocation21 + $0xd3c] sm:$0xf] }
 0x80f   : > { %v8618_v42 = vpop.f32.mrf.mxu1  ;;  %v11517_v58 = vld [vmem:[#allocation21 + $0x1b8] sm:$0xf0]  ;;  %v13052_v11 = vor.u32 %v14212_v51, %v13051_v43  ;;  %v12539_v43 = vld [vmem:[#allocation21 + $0x938] sm:$0xf] }
 0x810   : > { %8863 = vmatpush.bf16.msra.mxu0 %v11380_v48  ;;  %v16245_v62 = vpop.f32.mrf.mxu0  ;;  %v12405_v48 = vld [vmem:[#allocation21 + $0x8b0] sm:$0xf0]  ;;  %v13053_v40 = vld [vmem:[#allocation21 + $0xdb8] sm:$0xf0] }
 0x811   : > { %8872 = vmatpush.bf16.msra.mxu1 %v12916_v49  ;;  %8889 = vmatpush.bf16.msra.mxu2 %v11384_v52  ;;  %v13307_v49 = vld [vmem:[#allocation21 + $0xf38] sm:$0xf]  ;;  %v8606_v52 = vadd.f32 %v16233_v28, %v8482_v18  ;;  %v12408_v19 = vor.u32 %v14035_v50, %v12405_v48  ;;  %v14164_v50 = vld [vmem:[#allocation21 + $0xc3c] sm:$0xf] }
 0x812   : > { %8898 = vmatpush.bf16.msra.mxu3 %v12920_v13  ;;  %v14276_v13 = vld [vmem:[#allocation21 + $0xfb4] sm:$0xf0] }
 0x813   : > { %8864 = vmatmul.bf16.vlgmr.msra.gmra.mxu0 %v16194_v60  ;;  %v8619_v45 = vadd.f32 %v8618_v42, %v8606_v52  ;;  %v13308_v41 = vor.u32 %v14276_v13, %v13307_v49  ;;  %v13860_v28 = vld [vmem:[#allocation21 + $0x2b4] sm:$0xf0]  ;;  %v14021_v49 = vld [vmem:[#allocation21 + $0x7bc] sm:$0xf0]  ;;  %v14005_v13 = vld [vmem:[#allocation21 + $0x744] sm:$0xf] }
 0x814   : > { %8908 = vmatpush.bf16.msrb.mxu0 %v12284_v8  ;;  %8890 = vmatmul.bf16.vlgmr.msra.gmra.mxu2 %v16194_v60  ;;  %v13876_v8 = vld [vmem:[#allocation21 + $0x33c] sm:$0xf]  ;;  %v11644_v61 = vor.u32 %v13860_v28, %v11643_v4  ;;  %v13796_v42 = vld [vmem:[#allocation21 + $0xb4] sm:$0xf0]  ;;  %v13973_v4 = vld [vmem:[#allocation21 + $0x644] sm:$0xf] }
 0x815   : > { %8934 = vmatpush.bf16.msrb.mxu2 %v12288_v35  ;;  %8873 = vmatpush.bf16.msra.mxu1 %v12788_v5  ;;  %v13309_v35 = vld [vmem:[#allocation21 + $0xfb8] sm:$0xf0]  ;;  %v11776_v12 = vor.u32 %v13876_v8, %v11773_v1  ;;  %v8644_v59 = vpop.f32.mrf.mxu3  ;;  %v9409_v22 = vrot.slane %v8619_v45, 6  ;;  %v11388_v52 = vor.u32 %v13796_v42, %v11387_v29  ;;  %v12293_v8 = vld [vmem:[#allocation21 + $0x7c0] sm:$0xf0] }
 0x816   : > { %8899 = vmatpush.bf16.msra.mxu3 %v12792_v25  ;;  %v13312_v5 = vor.u32 %v14260_v2, %v13309_v35  ;;  %v8645_v0 = vadd.f32 %v8644_v59, %v8632_v31  ;;  %v14244_v25 = vld [vmem:[#allocation21 + $0xeb4] sm:$0xf0]  ;;  %v12292_v2 = vor.u32 %v14021_v49, %v12291_v39  ;;  %v14132_v45 = vld [vmem:[#allocation21 + $0xb3c] sm:$0xf]  ;;  %v13989_v59 = vld [vmem:[#allocation21 + $0x6bc] sm:$0xf0] }
 0x817   : > { %v8620_v20 = vpop.f32.mrf.mxu1  ;;  %v13180_v26 = vor.u32 %v14244_v25, %v13179_v38  ;;  %v12795_v35 = vld [vmem:[#allocation21 + $0xb38] sm:$0xf]  ;;  %v12165_v28 = vld [vmem:[#allocation21 + $0x6c0] sm:$0xf0]  ;;  %v14277_v39 = vld [vmem:[#allocation21 + $0xfbc] sm:$0xf0] }
 0x818   : > { %8909 = vmatpush.bf16.msrb.mxu0 %v12156_v57  ;;  %v13844_v57 = vld [vmem:[#allocation21 + $0x23c] sm:$0xf]  ;;  %v9410_v30 = vrot.slane %v8645_v0, 5  ;;  %v8659_v55 = vpop.f32.mrf.mxu0  ;;  %v14148_v31 = vld [vmem:[#allocation21 + $0xbb4] sm:$0xf0] }
 0x819   : > { %8935 = vmatpush.bf16.msrb.mxu2 %v12160_v44  ;;  %8874 = vmatpush.bf16.msra.mxu1 %v12660_v24  ;;  %v16249_v6 = vpop.f32.mrf.mxu2  ;;  %v13181_v44 = vld [vmem:[#allocation21 + $0xeb8] sm:$0xf0]  ;;  %v11648_v24 = vor.u32 %v13844_v57, %v11645_v7  ;;  %v12796_v38 = vor.u32 %v14148_v31, %v12795_v35  ;;  %v12667_v57 = vld [vmem:[#allocation21 + $0xa38] sm:$0xf]  ;;  %v13957_v55 = vld [vmem:[#allocation21 + $0x5bc] sm:$0xf0] }
 0x81a   : > { %8900 = vmatpush.bf16.msra.mxu3 %v12664_v23  ;;  %v11515_v23 = vld [vmem:[#allocation21 + $0x138] sm:$0xf]  ;;  %v9439_v46 = vsel %vm9438_vm2, %v9409_v22, %v9410_v30  ;;  %v13184_v27 = vor.u32 %v14228_v36, %v13181_v44  ;;  %v14100_v20 = vld [vmem:[#allocation21 + $0xa3c] sm:$0xf]  ;;  %v12168_v36 = vor.u32 %v13973_v4, %v12165_v28  ;;  %v12035_v30 = vld [vmem:[#allocation21 + $0x540] sm:$0xf] }
 0x81b   : > { %v16255_v16 = vsel %vm9440_vm3, %v16239_v32, %v9439_v46  ;;  %v11389_v32 = vld [vmem:[#allocation21 + $0xb8] sm:$0xf0]  ;;  %v14116_v7 = vld [vmem:[#allocation21 + $0xab4] sm:$0xf0]  ;;  %v13877_v49 = vld [vmem:[#allocation21 + $0x344] sm:$0xf] }
 0x81c   : > { %8910 = vmatpush.bf16.msrb.mxu0 %v12028_v33  ;;  %v13828_v33 = vld [vmem:[#allocation21 + $0x1b4] sm:$0xf0]  ;;  %v12669_v22 = vld [vmem:[#allocation21 + $0xab8] sm:$0xf0]  ;;  %v13845_v4 = vld [vmem:[#allocation21 + $0x244] sm:$0xf] }
 0x81d   : > { %8936 = vmatpush.bf16.msrb.mxu2 %v12032_v53  ;;  %8875 = vmatpush.bf16.msra.mxu1 %v12532_v21  ;;  %v13812_v53 = vld [vmem:[#allocation21 + $0x13c] sm:$0xf]  ;;  %v11516_v18 = vor.u32 %v13828_v33, %v11515_v23  ;;  %v8646_v21 = vpop.f32.mrf.mxu3  ;;  %v12672_v23 = vor.u32 %v14100_v20, %v12669_v22  ;;  %v12036_v33 = vor.u32 %v13957_v55, %v12035_v30  ;;  %v14084_v46 = vld [vmem:[#allocation21 + $0x9b4] sm:$0xf0]  ;;  %v11653_v28 = vld [vmem:[#allocation21 + $0x2c0] sm:$0xf0] }
 0x81e   : > { %8901 = vmatpush.bf16.msra.mxu3 %v12536_v56  ;;  %v11520_v10 = vor.u32 %v13812_v53, %v11517_v58  ;;  %v14180_v56 = vld [vmem:[#allocation21 + $0xcb4] sm:$0xf0]  ;;  %v12541_v53 = vld [vmem:[#allocation21 + $0x9b8] sm:$0xf0]  ;;  %v11907_v58 = vld [vmem:[#allocation21 + $0x440] sm:$0xf] }
 0x81f   : > { %v12924_v1 = vor.u32 %v14180_v56, %v12923_v47  ;;  %v14052_v56 = vld [vmem:[#allocation21 + $0x8b4] sm:$0xf0]  ;;  %v13829_v22 = vld [vmem:[#allocation21 + $0x1bc] sm:$0xf0] }
 0x820   : > { %8911 = vmatpush.bf16.msrb.mxu0 %v11900_v9  ;;  %v13056_v9 = vor.u32 %v14196_v17, %v13053_v40  ;;  %v13925_v17 = vld [vmem:[#allocation21 + $0x4bc] sm:$0xf0]  ;;  %v13909_v40 = vld [vmem:[#allocation21 + $0x444] sm:$0xf] }
 0x821   : > { %8937 = vmatpush.bf16.msrb.mxu2 %v11904_v15  ;;  %8876 = vmatpush.bf16.msra.mxu1 %v12404_v54  ;;  %v8685_v48 = vpop.f32.mrf.mxu2  ;;  %v16258_v15 = vpop.f32.mrf.mxu1  ;;  %v11392_v54 = vor.u32 %v13780_v63, %v11389_v32  ;;  %v11908_v42 = vor.u32 %v13925_v17, %v11907_v58  ;;  %v12413_v63 = vld [vmem:[#allocation21 + $0x8b8] sm:$0xf0]  ;;  %v13059_v30 = vld [vmem:[#allocation21 + $0xd40] sm:$0xf] }
 0x822   : > { %8902 = vmatpush.bf16.msra.mxu3 %v12408_v19  ;;  %v12928_v19 = vor.u32 %v14164_v50, %v12925_v34  ;;  %v11779_v50 = vld [vmem:[#allocation21 + $0x340] sm:$0xf] }
 0x823   : > { %v13893_v48 = vld [vmem:[#allocation21 + $0x3bc] sm:$0xf0] }
 0x824   : > { %8912 = vmatpush.bf16.msrb.mxu0 %v11772_v14  ;;  %8877 = vmatmul.bf16.vlgmr.msra.gmra.mxu1 %v16200_v37  ;;  %v12296_v14 = vor.u32 %v14005_v13, %v12293_v8  ;;  %v13315_v34 = vld [vmem:[#allocation21 + $0xf40] sm:$0xf]  ;;  %v14261_v8 = vld [vmem:[#allocation21 + $0xf44] sm:$0xf] }
 0x825   : > { %8921 = vmatpush.bf16.msrb.mxu1 %v13308_v41  ;;  %8938 = vmatpush.bf16.msrb.mxu2 %v11776_v12  ;;  %v12797_v41 = vld [vmem:[#allocation21 + $0xbb8] sm:$0xf0]  ;;  %v12163_v12 = vld [vmem:[#allocation21 + $0x640] sm:$0xf] }
 0x826   : > { %8947 = vmatpush.bf16.msrb.mxu3 %v13312_v5  ;;  %v12800_v5 = vor.u32 %v14132_v45, %v12797_v41  ;;  %v12164_v0 = vor.u32 %v13989_v59, %v12163_v12  ;;  %v11651_v45 = vld [vmem:[#allocation21 + $0x240] sm:$0xf] }
 0x827   : > { %8903 = vmatmul.bf16.vlgmr.msra.gmra.mxu3 %v16200_v37  ;;  %v13187_v41 = vld [vmem:[#allocation21 + $0xe40] sm:$0xf] }
 0x828   : > { %8913 = vmatpush.bf16.msrb.mxu0 %v11644_v61  ;;  %v13941_v61 = vld [vmem:[#allocation21 + $0x544] sm:$0xf]  ;;  %v14245_v59 = vld [vmem:[#allocation21 + $0xebc] sm:$0xf0] }
 0x829   : > { %8922 = vmatpush.bf16.msrb.mxu1 %v13180_v26  ;;  %8939 = vmatpush.bf16.msrb.mxu2 %v11648_v24  ;;  %v16260_v25 = vpop.f32.mrf.mxu3  ;;  %v8672_v44 = vpop.f32.mrf.mxu1  ;;  %v12037_v26 = vld [vmem:[#allocation21 + $0x5c0] sm:$0xf0]  ;;  %v12668_v24 = vor.u32 %v14116_v7, %v12667_v57  ;;  %v8484_v57 = vperm.slane %v16226_v3, 4  ;;  %v13188_v20 = vor.u32 %v14245_v59, %v13187_v41  ;;  %v12171_v41 = vld [vmem:[#allocation21 + $0x648] sm:$0xf] }
 0x82a   : > { %8948 = vmatpush.bf16.msrb.mxu3 %v13184_v27  ;;  %v14068_v27 = vld [vmem:[#allocation21 + $0x93c] sm:$0xf]  ;;  %v12040_v51 = vor.u32 %v13941_v61, %v12037_v26  ;;  %v11523_v44 = vld [vmem:[#allocation21 + $0x140] sm:$0xf]  ;;  %v13813_v26 = vld [vmem:[#allocation21 + $0x144] sm:$0xf] }
 0x82b   : > { %v12544_v21 = vor.u32 %v14068_v27, %v12541_v53  ;;  %v14213_v61 = vld [vmem:[#allocation21 + $0xdbc] sm:$0xf0]  ;;  %v11524_v27 = vor.u32 %v13829_v22, %v11523_v44  ;;  %v12173_v59 = vld [vmem:[#allocation21 + $0x6c8] sm:$0xf0] }
 0x82c   : > { %8914 = vmatpush.bf16.msrb.mxu0 %v11516_v18  ;;  %v11909_v18 = vld [vmem:[#allocation21 + $0x4c0] sm:$0xf0]  ;;  %v13060_v53 = vor.u32 %v14213_v61, %v13059_v30  ;;  %v13958_v61 = vld [vmem:[#allocation21 + $0x5c4] sm:$0xf0] }
 0x82d   : > { %8923 = vmatpush.bf16.msrb.mxu1 %v13052_v11  ;;  %8940 = vmatpush.bf16.msrb.mxu2 %v11520_v10  ;;  %v12540_v11 = vor.u32 %v14084_v46, %v12539_v43  ;;  %v12411_v10 = vld [vmem:[#allocation21 + $0x838] sm:$0xf]  ;;  %v11912_v32 = vor.u32 %v13909_v40, %v11909_v18  ;;  %v13061_v43 = vld [vmem:[#allocation21 + $0xdc0] sm:$0xf0]  ;;  %v8486_v46 = vperm.slane %v16226_v3, 6 }
 0x82e   : > { %8949 = vmatpush.bf16.msrb.mxu3 %v13056_v9  ;;  %v14036_v9 = vld [vmem:[#allocation21 + $0x83c] sm:$0xf]  ;;  %v12412_v13 = vor.u32 %v14052_v56, %v12411_v10  ;;  %v13797_v40 = vld [vmem:[#allocation21 + $0xbc] sm:$0xf0]  ;;  %v8658_v10 = vadd.f32 %v16245_v62, %v8484_v57  ;;  %v14165_v56 = vld [vmem:[#allocation21 + $0xc44] sm:$0xf] }
 0x82f   : > { %v12931_v18 = vld [vmem:[#allocation21 + $0xc40] sm:$0xf] }
 0x830   : > { %8915 = vmatpush.bf16.msrb.mxu0 %v11388_v52  ;;  %v16264_v29 = vpop.f32.mrf.mxu0  ;;  %v11781_v52 = vld [vmem:[#allocation21 + $0x3c0] sm:$0xf0] }
 0x831   : > { %8924 = vmatpush.bf16.msrb.mxu1 %v12924_v1  ;;  %8941 = vmatpush.bf16.msrb.mxu2 %v11392_v54  ;;  %v8698_v47 = vpop.f32.mrf.mxu3  ;;  %v13317_v1 = vld [vmem:[#allocation21 + $0xfc0] sm:$0xf0]  ;;  %v12416_v54 = vor.u32 %v14036_v9, %v12413_v63  ;;  %v11784_v35 = vor.u32 %v13877_v49, %v11781_v52  ;;  %v14006_v49 = vld [vmem:[#allocation21 + $0x74c] sm:$0xf] }
 0x832   : > { %8950 = vmatpush.bf16.msrb.mxu3 %v12928_v19  ;;  %v11780_v19 = vor.u32 %v13893_v48, %v11779_v50  ;;  %v13320_v12 = vor.u32 %v14261_v8, %v13317_v1  ;;  %v11397_v47 = vld [vmem:[#allocation21 + $0xc0] sm:$0xf0]  ;;  %v12299_v50 = vld [vmem:[#allocation21 + $0x748] sm:$0xf]  ;;  %v12301_v52 = vld [vmem:[#allocation21 + $0x7c8] sm:$0xf0] }
 0x833   : > { %8916 = vmatmul.bf16.vlgmr.msrb.gmra.mxu0 %v16194_v60  ;;  %v14022_v48 = vld [vmem:[#allocation21 + $0x7c4] sm:$0xf0] }
 0x834   : > { %8960 = vmatpush.bf16.msra.mxu0 %v12292_v2  ;;  %8942 = vmatmul.bf16.vlgmr.msrb.gmra.mxu2 %v16194_v60  ;;  %v13316_v2 = vor.u32 %v14277_v39, %v13315_v34  ;;  %v16276_v34 = vadd.f32 %v16258_v15, %v8658_v10  ;;  %v14133_v15 = vld [vmem:[#allocation21 + $0xb44] sm:$0xf]  ;;  %v11915_v10 = vld [vmem:[#allocation21 + $0x448] sm:$0xf] }
 0x835   : > { %8986 = vmatpush.bf16.msra.mxu2 %v12296_v14  ;;  %8925 = vmatpush.bf16.msrb.mxu1 %v12796_v38  ;;  %v13861_v14 = vld [vmem:[#allocation21 + $0x2bc] sm:$0xf0] }
 0x836   : > { %8951 = vmatpush.bf16.msrb.mxu3 %v12800_v5  ;;  %v14229_v5 = vld [vmem:[#allocation21 + $0xe44] sm:$0xf]  ;;  %v11652_v7 = vor.u32 %v13861_v14, %v11651_v45  ;;  %v12304_v45 = vor.u32 %v14006_v49, %v12301_v52  ;;  %v14053_v49 = vld [vmem:[#allocation21 + $0x8bc] sm:$0xf0] }
 0x837   : > { %v16266_v31 = vpop.f32.mrf.mxu2  ;;  %v12805_v14 = vld [vmem:[#allocation21 + $0xbc0] sm:$0xf0] }
 0x838   : > { %8961 = vmatpush.bf16.msra.mxu0 %v12164_v0  ;;  %v8711_v38 = vpop.f32.mrf.mxu0  ;;  %v13189_v0 = vld [vmem:[#allocation21 + $0xec0] sm:$0xf0] }
 0x839   : > { %8987 = vmatpush.bf16.msra.mxu2 %v12168_v36  ;;  %8926 = vmatpush.bf16.msrb.mxu1 %v12668_v24  ;;  %v11656_v36 = vor.u32 %v13845_v4, %v11653_v28  ;;  %v13192_v55 = vor.u32 %v14229_v5, %v13189_v0  ;;  %v11525_v24 = vld [vmem:[#allocation21 + $0x1c0] sm:$0xf0] }
 0x83a   : > { %8952 = vmatpush.bf16.msrb.mxu3 %v12672_v23  ;;  %v8485_v23 = vperm.slane %v16226_v3, 5  ;;  %v11528_v58 = vor.u32 %v13813_v26, %v11525_v24  ;;  %v13942_v26 = vld [vmem:[#allocation21 + $0x54c] sm:$0xf]  ;;  %v14037_v52 = vld [vmem:[#allocation21 + $0x844] sm:$0xf] }
 0x83b   : > { %v12045_v24 = vld [vmem:[#allocation21 + $0x5c8] sm:$0xf0] }
 0x83c   : > { %8962 = vmatpush.bf16.msra.mxu0 %v12036_v33  ;;  %v14197_v33 = vld [vmem:[#allocation21 + $0xd44] sm:$0xf]  ;;  %v8684_v9 = vadd.f32 %v16249_v6, %v8485_v23 }
 0x83d   : > { %8988 = vmatpush.bf16.msra.mxu2 %v12040_v51  ;;  %8927 = vmatpush.bf16.msrb.mxu1 %v12540_v11  ;;  %v11395_v51 = vld [vmem:[#allocation21 + $0x40] sm:$0xf] }
 0x83e   : > { %8953 = vmatpush.bf16.msrb.mxu3 %v12544_v21  ;;  %v14181_v11 = vld [vmem:[#allocation21 + $0xcbc] sm:$0xf0]  ;;  %v13064_v21 = vor.u32 %v14197_v33, %v13061_v43  ;;  %v11396_v39 = vor.u32 %v13797_v40, %v11395_v51  ;;  %v16279_v62 = vadd.f32 %v16260_v25, %v8684_v9  ;;  %v9411_v25 = vrot.slane %v16276_v34, 4  ;;  %v11917_v9 = vld [vmem:[#allocation21 + $0x4c8] sm:$0xf0] }
 0x83f   : > { %v8737_v17 = vpop.f32.mrf.mxu2  ;;  %v12932_v8 = vor.u32 %v14181_v11, %v12931_v18  ;;  %v12547_v51 = vld [vmem:[#allocation21 + $0x940] sm:$0xf]  ;;  %v12048_v18 = vor.u32 %v13942_v26, %v12045_v24  ;;  %v12549_v11 = vld [vmem:[#allocation21 + $0x9c0] sm:$0xf0]  ;;  %v14214_v24 = vld [vmem:[#allocation21 + $0xdc4] sm:$0xf0] }
 0x840   : > { %8963 = vmatpush.bf16.msra.mxu0 %v11908_v42  ;;  %v13781_v42 = vld [vmem:[#allocation21 + $0x44] sm:$0xf]  ;;  %v9412_v4 = vrot.slane %v16279_v62, 3 }
 0x841   : > { %8989 = vmatpush.bf16.msra.mxu2 %v11912_v32  ;;  %8928 = vmatpush.bf16.msrb.mxu1 %v12412_v13  ;;  %v8722_v63 = vpop.f32.mrf.mxu1  ;;  %v12933_v32 = vld [vmem:[#allocation21 + $0xcc0] sm:$0xf0]  ;;  %v8487_v13 = vperm.slane %v16226_v3, 7  ;;  %v11400_v6 = vor.u32 %v13781_v42, %v11397_v47  ;;  %v13974_v3 = vld [vmem:[#allocation21 + $0x64c] sm:$0xf] }
 0x842   : > { %8954 = vmatpush.bf16.msrb.mxu3 %v12416_v54  ;;  %v12936_v1 = vor.u32 %v14165_v56, %v12933_v32  ;;  %v12300_v54 = vor.u32 %v14022_v48, %v12299_v50  ;;  %v12176_v22 = vor.u32 %v13974_v3, %v12173_v59  ;;  %v9443_v17 = vsel %vm9442_vm4, %v9411_v25, %v9412_v4  ;;  %v13910_v56 = vld [vmem:[#allocation21 + $0x44c] sm:$0xf]  ;;  %v12419_v50 = vld [vmem:[#allocation21 + $0x840] sm:$0xf]  ;;  %v12421_v62 = vld [vmem:[#allocation21 + $0x8c0] sm:$0xf0] }
 0x843   : > { %v8736_v28 = vadd.f32 %v16266_v31, %v8487_v13  ;;  %v12043_v31 = vld [vmem:[#allocation21 + $0x548] sm:$0xf]  ;;  %v11920_v13 = vor.u32 %v13910_v56, %v11917_v9  ;;  %v11405_v56 = vld [vmem:[#allocation21 + $0xc8] sm:$0xf0] }
 0x844   : > { %8964 = vmatpush.bf16.msra.mxu0 %v11780_v19  ;;  %8929 = vmatmul.bf16.vlgmr.msrb.gmra.mxu1 %v16200_v37  ;;  %v12803_v19 = vld [vmem:[#allocation21 + $0xb40] sm:$0xf]  ;;  %v11659_v59 = vld [vmem:[#allocation21 + $0x248] sm:$0xf]  ;;  %v14166_v9 = vld [vmem:[#allocation21 + $0xc4c] sm:$0xf] }
 0x845   : > { %8973 = vmatpush.bf16.msra.mxu1 %v13316_v2  ;;  %8990 = vmatpush.bf16.msra.mxu2 %v11784_v35  ;;  %v14149_v2 = vld [vmem:[#allocation21 + $0xbbc] sm:$0xf0]  ;;  %v8710_v35 = vadd.f32 %v16264_v29, %v8486_v46  ;;  %v12808_v29 = vor.u32 %v14133_v15, %v12805_v14  ;;  %v14262_v15 = vld [vmem:[#allocation21 + $0xf4c] sm:$0xf]  ;;  %v12424_v14 = vor.u32 %v14037_v52, %v12421_v62  ;;  %v13862_v4 = vld [vmem:[#allocation21 + $0x2c4] sm:$0xf0] }
 0x846   : > { %8999 = vmatpush.bf16.msra.mxu3 %v13320_v12  ;;  %v13990_v12 = vld [vmem:[#allocation21 + $0x6c4] sm:$0xf0]  ;;  %v12804_v5 = vor.u32 %v14149_v2, %v12803_v19  ;;  %v13878_v19 = vld [vmem:[#allocation21 + $0x34c] sm:$0xf]  ;;  %v12420_v2 = vor.u32 %v14053_v49, %v12419_v50  ;;  %v12307_v50 = vld [vmem:[#allocation21 + $0x750] sm:$0xf] }
 0x847   : > { %8955 = vmatmul.bf16.vlgmr.msrb.gmra.mxu3 %v16200_v37  ;;  %v8723_v38 = vadd.f32 %v8722_v63, %v8710_v35  ;;  %v12172_v57 = vor.u32 %v13990_v12, %v12171_v41  ;;  %v13325_v35 = vld [vmem:[#allocation21 + $0xfc8] sm:$0xf0]  ;;  %v14007_v49 = vld [vmem:[#allocation21 + $0x754] sm:$0xf] }
 0x848   : > { %8965 = vmatpush.bf16.msra.mxu0 %v11652_v7  ;;  %v12675_v7 = vld [vmem:[#allocation21 + $0xa40] sm:$0xf]  ;;  %v12309_v52 = vld [vmem:[#allocation21 + $0x7d0] sm:$0xf0] }
 0x849   : > { %8974 = vmatpush.bf16.msra.mxu1 %v13188_v20  ;;  %8991 = vmatpush.bf16.msra.mxu2 %v11656_v36  ;;  %v14117_v20 = vld [vmem:[#allocation21 + $0xabc] sm:$0xf0]  ;;  %v14101_v36 = vld [vmem:[#allocation21 + $0xa44] sm:$0xf]  ;;  %v8724_v30 = vpop.f32.mrf.mxu1  ;;  %v9413_v23 = vrot.slane %v8723_v38, 2  ;;  %v13328_v38 = vor.u32 %v14262_v15, %v13325_v35 }
 0x84a   : > { %9000 = vmatpush.bf16.msra.mxu3 %v13192_v55  ;;  %v8748_v0 = vpop.f32.mrf.mxu3  ;;  %v12677_v55 = vld [vmem:[#allocation21 + $0xac0] sm:$0xf0]  ;;  %v12676_v43 = vor.u32 %v14117_v20, %v12675_v7  ;;  %v14230_v7 = vld [vmem:[#allocation21 + $0xe4c] sm:$0xf]  ;;  %v12179_v15 = vld [vmem:[#allocation21 + $0x650] sm:$0xf] }
 0x84b   : > { %v8749_v44 = vadd.f32 %v8748_v0, %v8736_v28  ;;  %v12680_v46 = vor.u32 %v14101_v36, %v12677_v55  ;;  %v13195_v28 = vld [vmem:[#allocation21 + $0xe48] sm:$0xf]  ;;  %v13846_v0 = vld [vmem:[#allocation21 + $0x24c] sm:$0xf]  ;;  %v13991_v35 = vld [vmem:[#allocation21 + $0x6cc] sm:$0xf0] }
 0x84c   : > { %8966 = vmatpush.bf16.msra.mxu0 %v11524_v27  ;;  %v12044_v27 = vor.u32 %v13958_v61, %v12043_v31  ;;  %v13197_v20 = vld [vmem:[#allocation21 + $0xec8] sm:$0xf0]  ;;  %v11531_v55 = vld [vmem:[#allocation21 + $0x148] sm:$0xf] }
 0x84d   : > { %8975 = vmatpush.bf16.msra.mxu1 %v13060_v53  ;;  %8992 = vmatpush.bf16.msra.mxu2 %v11528_v58  ;;  %v9414_v33 = vrot.slane %v8749_v44, 1  ;;  %v14085_v53 = vld [vmem:[#allocation21 + $0x9bc] sm:$0xf0]  ;;  %v14069_v58 = vld [vmem:[#allocation21 + $0x944] sm:$0xf]  ;;  %v11660_v44 = vor.u32 %v13862_v4, %v11659_v59  ;;  %v13200_v26 = vor.u32 %v14230_v7, %v13197_v20 }
 0x84e   : > { %9001 = vmatpush.bf16.msra.mxu3 %v13064_v21  ;;  %v13926_v21 = vld [vmem:[#allocation21 + $0x4c4] sm:$0xf0]  ;;  %v12548_v32 = vor.u32 %v14085_v53, %v12547_v51  ;;  %v12552_v48 = vor.u32 %v14069_v58, %v12549_v11  ;;  %v12685_v20 = vld [vmem:[#allocation21 + $0xac8] sm:$0xf0] }
 0x84f   : > { %v9445_v40 = vsel %vm9444_vm5, %v9413_v23, %v9414_v33  ;;  %v13830_v31 = vld [vmem:[#allocation21 + $0x1c4] sm:$0xf0]  ;;  %v13814_v23 = vld [vmem:[#allocation21 + $0x14c] sm:$0xf] }
 0x850   : > { %8967 = vmatpush.bf16.msra.mxu0 %v11396_v39  ;;  %v9447_v42 = vsel %vm9446_vm6, %v9443_v17, %v9445_v40  ;;  %v16291_v47 = vpop.f32.mrf.mxu0  ;;  %v11916_v39 = vor.u32 %v13926_v21, %v11915_v10  ;;  %v13067_v61 = vld [vmem:[#allocation21 + $0xd48] sm:$0xf]  ;;  %v11533_v33 = vld [vmem:[#allocation21 + $0x1c8] sm:$0xf0] }
 0x851   : > { %8976 = vmatpush.bf16.msra.mxu1 %v12932_v8  ;;  %8993 = vmatpush.bf16.msra.mxu2 %v11400_v6  ;;  %v9449_v63 = vsel %vm9448_vm7, %v16255_v16, %v9447_v42  ;;  %v11787_v8 = vld [vmem:[#allocation21 + $0x348] sm:$0xf]  ;;  %v11789_v16 = vld [vmem:[#allocation21 + $0x3c8] sm:$0xf0]  ;;  %v13068_v53 = vor.u32 %v14214_v24, %v13067_v61  ;;  %v11536_v58 = vor.u32 %v13814_v23, %v11533_v33 }
 0x852   : > { %9002 = vmatpush.bf16.msra.mxu3 %v12936_v1  ;;  %9475 = vst [vmem:[%s15407_s8] sm:$0xff] %v9449_v63  ;;  %v8750_v34 = vpop.f32.mrf.mxu3  ;;  %v13894_v6 = vld [vmem:[#allocation21 + $0x3c4] sm:$0xf0]  ;;  %v11792_v25 = vor.u32 %v13878_v19, %v11789_v16  ;;  %v13782_v42 = vld [vmem:[#allocation21 + $0x4c] sm:$0xf]  ;;  %v12312_v16 = vor.u32 %v14007_v49, %v12309_v52  ;;  %v11797_v49 = vld [vmem:[#allocation21 + $0x3d0] sm:$0xf0] }
 0x853   : > { %8968 = vmatmul.bf16.vlgmr.msra.gmra.mxu0 %v16194_v60  ;;  %v13323_v1 = vld [vmem:[#allocation21 + $0xf48] sm:$0xf]  ;;  %v11788_v41 = vor.u32 %v13894_v6, %v11787_v8  ;;  %v14134_v19 = vld [vmem:[#allocation21 + $0xb4c] sm:$0xf] }
 0x854   : > { %9012 = vmatpush.bf16.msrb.mxu0 %v12300_v54  ;;  %8994 = vmatmul.bf16.vlgmr.msra.gmra.mxu2 %v16194_v60  ;;  %v14278_v54 = vld [vmem:[#allocation21 + $0xfc4] sm:$0xf0]  ;;  %v14070_v23 = vld [vmem:[#allocation21 + $0x94c] sm:$0xf] }
 0x855   : > { %9038 = vmatpush.bf16.msrb.mxu2 %v12304_v45  ;;  %8977 = vmatpush.bf16.msra.mxu1 %v12804_v5  ;;  %v16296_v45 = vld [vmem:[#allocation23 + $0x8] sm:$0xff]  ;;  %v13324_v12 = vor.u32 %v14278_v54, %v13323_v1 }
 0x856   : > { %9003 = vmatpush.bf16.msra.mxu3 %v12808_v29  ;;  %v14246_v29 = vld [vmem:[#allocation21 + $0xec4] sm:$0xf0]  ;;  %v8488_v36 = vperm.slane %v16296_v45, 0  ;;  %v8489_v62 = vperm.slane %v16296_v45, 1 }
 0x857   : > { %v16298_v3 = vpop.f32.mrf.mxu2  ;;  %v11403_v51 = vld [vmem:[#allocation21 + $0x48] sm:$0xf] }
 0x858   : > { %9013 = vmatpush.bf16.msrb.mxu0 %v12172_v57  ;;  %v8763_v5 = vpop.f32.mrf.mxu0  ;;  %v11661_v57 = vld [vmem:[#allocation21 + $0x2c8] sm:$0xf0]  ;;  %v13798_v40 = vld [vmem:[#allocation21 + $0xc4] sm:$0xf0]  ;;  %v8762_v10 = vadd.f32 %v16291_v47, %v8488_v36  ;;  %v11408_v47 = vor.u32 %v13782_v42, %v11405_v56  ;;  %v12051_v36 = vld [vmem:[#allocation21 + $0x550] sm:$0xf] }
 0x859   : > { %9039 = vmatpush.bf16.msrb.mxu2 %v12176_v22  ;;  %8978 = vmatpush.bf16.msra.mxu1 %v12676_v43  ;;  %v13196_v22 = vor.u32 %v14246_v29, %v13195_v28  ;;  %v11664_v30 = vor.u32 %v13846_v0, %v11661_v57  ;;  %v14198_v43 = vld [vmem:[#allocation21 + $0xd4c] sm:$0xf]  ;;  %v14182_v11 = vld [vmem:[#allocation21 + $0xcc4] sm:$0xf0]  ;;  %v12180_v28 = vor.u32 %v13991_v35, %v12179_v15 }
 0x85a   : > { %9004 = vmatpush.bf16.msra.mxu3 %v12680_v46  ;;  %v13069_v46 = vld [vmem:[#allocation21 + $0xdc8] sm:$0xf0]  ;;  %v12811_v1 = vld [vmem:[#allocation21 + $0xb48] sm:$0xf] }
 0x85b   : > { %v13072_v21 = vor.u32 %v14198_v43, %v13069_v46  ;;  %v14150_v54 = vld [vmem:[#allocation21 + $0xbc4] sm:$0xf0]  ;;  %v14102_v29 = vld [vmem:[#allocation21 + $0xa4c] sm:$0xf] }
 0x85c   : > { %9014 = vmatpush.bf16.msrb.mxu0 %v12044_v27  ;;  %v11532_v27 = vor.u32 %v13830_v31, %v11531_v55  ;;  %v14118_v5 = vld [vmem:[#allocation21 + $0xac4] sm:$0xf0]  ;;  %v12688_v31 = vor.u32 %v14102_v29, %v12685_v20  ;;  %v12557_v46 = vld [vmem:[#allocation21 + $0x9c8] sm:$0xf0]  ;;  %v11539_v29 = vld [vmem:[#allocation21 + $0x150] sm:$0xf] }
 0x85d   : > { %9040 = vmatpush.bf16.msrb.mxu2 %v12048_v18  ;;  %8979 = vmatpush.bf16.msra.mxu1 %v12548_v32  ;;  %v12939_v18 = vld [vmem:[#allocation21 + $0xc48] sm:$0xf]  ;;  %v12941_v32 = vld [vmem:[#allocation21 + $0xcc8] sm:$0xf0]  ;;  %v14215_v20 = vld [vmem:[#allocation21 + $0xdcc] sm:$0xf0] }
 0x85e   : > { %9005 = vmatpush.bf16.msra.mxu3 %v12552_v48  ;;  %v14023_v48 = vld [vmem:[#allocation21 + $0x7cc] sm:$0xf0]  ;;  %v12944_v8 = vor.u32 %v14166_v9, %v12941_v32  ;;  %v14086_v24 = vld [vmem:[#allocation21 + $0x9c4] sm:$0xf0]  ;;  %v14038_v56 = vld [vmem:[#allocation21 + $0x84c] sm:$0xf] }
 0x85f   : > { %v8789_v17 = vpop.f32.mrf.mxu2  ;;  %v12308_v6 = vor.u32 %v14023_v48, %v12307_v50  ;;  %v14054_v42 = vld [vmem:[#allocation21 + $0x8c4] sm:$0xf0]  ;;  %v12429_v9 = vld [vmem:[#allocation21 + $0x8c8] sm:$0xf0]  ;;  %v11795_v32 = vld [vmem:[#allocation21 + $0x350] sm:$0xf] }
 0x860   : > { %9015 = vmatpush.bf16.msrb.mxu0 %v11916_v39  ;;  %v11404_v39 = vor.u32 %v13798_v40, %v11403_v51  ;;  %v13927_v51 = vld [vmem:[#allocation21 + $0x4cc] sm:$0xf0]  ;;  %v11925_v17 = vld [vmem:[#allocation21 + $0x4d0] sm:$0xf0] }
 0x861   : > { %9041 = vmatpush.bf16.msrb.mxu2 %v11920_v13  ;;  %8980 = vmatpush.bf16.msra.mxu1 %v12420_v2  ;;  %v8774_v63 = vpop.f32.mrf.mxu1  ;;  %v12940_v13 = vor.u32 %v14182_v11, %v12939_v18  ;;  %v12813_v2 = vld [vmem:[#allocation21 + $0xbc8] sm:$0xf0]  ;;  %v12427_v18 = vld [vmem:[#allocation21 + $0x848] sm:$0xf]  ;;  %v12560_v11 = vor.u32 %v14070_v23, %v12557_v46  ;;  %v13895_v50 = vld [vmem:[#allocation21 + $0x3cc] sm:$0xf0] }
 0x862   : > { %9006 = vmatpush.bf16.msra.mxu3 %v12424_v14  ;;  %v8775_v34 = vadd.f32 %v8774_v63, %v8762_v10  ;;  %v13975_v14 = vld [vmem:[#allocation21 + $0x654] sm:$0xf]  ;;  %v12816_v59 = vor.u32 %v14134_v19, %v12813_v2  ;;  %v13331_v48 = vld [vmem:[#allocation21 + $0xf50] sm:$0xf]  ;;  %v12428_v52 = vor.u32 %v14054_v42, %v12427_v18 }
 0x863   : > { %v11667_v19 = vld [vmem:[#allocation21 + $0x250] sm:$0xf]  ;;  %v12949_v18 = vld [vmem:[#allocation21 + $0xcd0] sm:$0xf0] }
 0x864   : > { %9016 = vmatpush.bf16.msrb.mxu0 %v11788_v41  ;;  %8981 = vmatmul.bf16.vlgmr.msra.gmra.mxu1 %v16200_v37  ;;  %v12181_v41 = vld [vmem:[#allocation21 + $0x6d0] sm:$0xf0]  ;;  %v13203_v2 = vld [vmem:[#allocation21 + $0xe50] sm:$0xf] }
 0x865   : > { %9025 = vmatpush.bf16.msrb.mxu1 %v13324_v12  ;;  %9042 = vmatpush.bf16.msrb.mxu2 %v11792_v25  ;;  %v8788_v12 = vadd.f32 %v16298_v3, %v8489_v62  ;;  %v12812_v25 = vor.u32 %v14150_v54, %v12811_v1  ;;  %v12184_v57 = vor.u32 %v13975_v14, %v12181_v41  ;;  %v13959_v3 = vld [vmem:[#allocation21 + $0x5cc] sm:$0xf0]  ;;  %v14263_v62 = vld [vmem:[#allocation21 + $0xf54] sm:$0xf] }
 0x866   : > { %9051 = vmatpush.bf16.msrb.mxu3 %v13328_v38  ;;  %v12683_v38 = vld [vmem:[#allocation21 + $0xa48] sm:$0xf]  ;;  %v12052_v61 = vor.u32 %v13959_v3, %v12051_v36  ;;  %v14247_v14 = vld [vmem:[#allocation21 + $0xecc] sm:$0xf0]  ;;  %v13847_v41 = vld [vmem:[#allocation21 + $0x254] sm:$0xf] }
 0x867   : > { %9007 = vmatmul.bf16.vlgmr.msra.gmra.mxu3 %v16200_v37  ;;  %v12684_v55 = vor.u32 %v14118_v5, %v12683_v38  ;;  %v13204_v38 = vor.u32 %v14247_v14, %v13203_v2  ;;  %v13815_v36 = vld [vmem:[#allocation21 + $0x154] sm:$0xf]  ;;  %v12947_v23 = vld [vmem:[#allocation21 + $0xc50] sm:$0xf] }
 0x868   : > { %9017 = vmatpush.bf16.msrb.mxu0 %v11660_v44  ;;  %v13943_v44 = vld [vmem:[#allocation21 + $0x554] sm:$0xf]  ;;  %v14119_v14 = vld [vmem:[#allocation21 + $0xacc] sm:$0xf0] }
 0x869   : > { %9026 = vmatpush.bf16.msrb.mxu1 %v13196_v22  ;;  %9043 = vmatpush.bf16.msrb.mxu2 %v11664_v30  ;;  %v8776_v7 = vpop.f32.mrf.mxu1  ;;  %v12053_v22 = vld [vmem:[#allocation21 + $0x5d0] sm:$0xf0] }
 0x86a   : > { %9052 = vmatpush.bf16.msrb.mxu3 %v13200_v26  ;;  %v8800_v4 = vpop.f32.mrf.mxu3  ;;  %v12555_v26 = vld [vmem:[#allocation21 + $0x948] sm:$0xf]  ;;  %v12056_v43 = vor.u32 %v13943_v44, %v12053_v22  ;;  %v11541_v3 = vld [vmem:[#allocation21 + $0x1d0] sm:$0xf0] }
 0x86b   : > { %v8801_v0 = vadd.f32 %v8800_v4, %v8788_v12  ;;  %v12556_v40 = vor.u32 %v14086_v24, %v12555_v26  ;;  %v11669_v12 = vld [vmem:[#allocation21 + $0x2d0] sm:$0xf0]  ;;  %v8490_v4 = vperm.slane %v16296_v45, 2  ;;  %v13799_v24 = vld [vmem:[#allocation21 + $0xcc] sm:$0xf0] }
 0x86c   : > { %9018 = vmatpush.bf16.msrb.mxu0 %v11532_v27  ;;  %v11923_v27 = vld [vmem:[#allocation21 + $0x450] sm:$0xf]  ;;  %v11672_v5 = vor.u32 %v13847_v41, %v11669_v12  ;;  %v14199_v44 = vld [vmem:[#allocation21 + $0xd54] sm:$0xf] }
 0x86d   : > { %9027 = vmatpush.bf16.msrb.mxu1 %v13068_v53  ;;  %9044 = vmatpush.bf16.msrb.mxu2 %v11536_v58  ;;  %v9415_v30 = vrot.slane %v8801_v0, 7  ;;  %v13911_v58 = vld [vmem:[#allocation21 + $0x454] sm:$0xf]  ;;  %v13831_v0 = vld [vmem:[#allocation21 + $0x1cc] sm:$0xf0] }
 0x86e   : > { %9053 = vmatpush.bf16.msrb.mxu3 %v13072_v21  ;;  %v11924_v21 = vor.u32 %v13927_v51, %v11923_v27  ;;  %v11928_v63 = vor.u32 %v13911_v58, %v11925_v17  ;;  %v13077_v22 = vld [vmem:[#allocation21 + $0xdd0] sm:$0xf0] }
 0x86f   : > { %v16309_v33 = vsel %vm9436_vm1, %v8775_v34, %v9415_v30  ;;  %v14279_v34 = vld [vmem:[#allocation21 + $0xfcc] sm:$0xf0]  ;;  %v11540_v30 = vor.u32 %v13831_v0, %v11539_v29  ;;  %v13080_v27 = vor.u32 %v14199_v44, %v13077_v22  ;;  %v13783_v51 = vld [vmem:[#allocation21 + $0x54] sm:$0xf] }
 0x870   : > { %9019 = vmatpush.bf16.msrb.mxu0 %v11404_v39  ;;  %v16311_v53 = vpop.f32.mrf.mxu0  ;;  %v13879_v39 = vld [vmem:[#allocation21 + $0x354] sm:$0xf] }
 0x871   : > { %9028 = vmatpush.bf16.msrb.mxu1 %v12940_v13  ;;  %9045 = vmatpush.bf16.msrb.mxu2 %v11408_v47  ;;  %v13333_v13 = vld [vmem:[#allocation21 + $0xfd0] sm:$0xf0]  ;;  %v12432_v47 = vor.u32 %v14038_v56, %v12429_v9  ;;  %v11800_v1 = vor.u32 %v13879_v39, %v11797_v49  ;;  %v8814_v46 = vadd.f32 %v16311_v53, %v8490_v4  ;;  %v14008_v56 = vld [vmem:[#allocation21 + $0x75c] sm:$0xf]  ;;  %v14151_v39 = vld [vmem:[#allocation21 + $0xbcc] sm:$0xf0] }
 0x872   : > { %9054 = vmatpush.bf16.msrb.mxu3 %v12944_v8  ;;  %v8802_v10 = vpop.f32.mrf.mxu3  ;;  %v11796_v8 = vor.u32 %v13895_v50, %v11795_v32  ;;  %v13336_v15 = vor.u32 %v14263_v62, %v13333_v13  ;;  %v11413_v58 = vld [vmem:[#allocation21 + $0xd0] sm:$0xf0]  ;;  %v12317_v9 = vld [vmem:[#allocation21 + $0x7d8] sm:$0xf0]  ;;  %v12187_v13 = vld [vmem:[#allocation21 + $0x658] sm:$0xf] }
 0x873   : > { %9020 = vmatmul.bf16.vlgmr.msrb.gmra.mxu0 %v16194_v60  ;;  %v14167_v17 = vld [vmem:[#allocation21 + $0xc54] sm:$0xf]  ;;  %v14024_v10 = vld [vmem:[#allocation21 + $0x7d4] sm:$0xf0]  ;;  %v11416_v53 = vor.u32 %v13783_v51, %v11413_v58 }
 0x874   : > { %9064 = vmatpush.bf16.msra.mxu0 %v12308_v6  ;;  %9046 = vmatmul.bf16.vlgmr.msrb.gmra.mxu2 %v16194_v60  ;;  %v13332_v6 = vor.u32 %v14279_v34, %v13331_v48  ;;  %v12952_v50 = vor.u32 %v14167_v17, %v12949_v18  ;;  %v12819_v34 = vld [vmem:[#allocation21 + $0xb50] sm:$0xf]  ;;  %v14135_v49 = vld [vmem:[#allocation21 + $0xb54] sm:$0xf] }
 0x875   : > { %9090 = vmatpush.bf16.msra.mxu2 %v12312_v16  ;;  %9029 = vmatpush.bf16.msrb.mxu1 %v12812_v25  ;;  %v13863_v16 = vld [vmem:[#allocation21 + $0x2cc] sm:$0xf0]  ;;  %v14231_v25 = vld [vmem:[#allocation21 + $0xe54] sm:$0xf] }
 0x876   : > { %9055 = vmatpush.bf16.msrb.mxu3 %v12816_v59  ;;  %v13205_v59 = vld [vmem:[#allocation21 + $0xed0] sm:$0xf0] }
 0x877   : > { %v16313_v54 = vpop.f32.mrf.mxu2  ;;  %v13208_v7 = vor.u32 %v14231_v25, %v13205_v59  ;;  %v12821_v62 = vld [vmem:[#allocation21 + $0xbd0] sm:$0xf0] }
 0x878   : > { %9065 = vmatpush.bf16.msra.mxu0 %v12180_v28  ;;  %v8815_v35 = vpop.f32.mrf.mxu0  ;;  %v11668_v28 = vor.u32 %v13863_v16, %v11667_v19  ;;  %v12820_v19 = vor.u32 %v14151_v39, %v12819_v34  ;;  %v12824_v16 = vor.u32 %v14135_v49, %v12821_v62  ;;  %v14103_v41 = vld [vmem:[#allocation21 + $0xa54] sm:$0xf]  ;;  %v11675_v62 = vld [vmem:[#allocation21 + $0x258] sm:$0xf] }
 0x879   : > { %9091 = vmatpush.bf16.msra.mxu2 %v12184_v57  ;;  %9030 = vmatpush.bf16.msrb.mxu1 %v12684_v55  ;;  %v13075_v57 = vld [vmem:[#allocation21 + $0xd50] sm:$0xf]  ;;  %v12693_v4 = vld [vmem:[#allocation21 + $0xad0] sm:$0xf0] }
 0x87a   : > { %9056 = vmatpush.bf16.msrb.mxu3 %v12688_v31  ;;  %v11411_v55 = vld [vmem:[#allocation21 + $0x50] sm:$0xf]  ;;  %v13076_v31 = vor.u32 %v14215_v20, %v13075_v57  ;;  %v14071_v44 = vld [vmem:[#allocation21 + $0x954] sm:$0xf] }
 0x87b   : > { %v11412_v42 = vor.u32 %v13799_v24, %v11411_v55  ;;  %v12691_v35 = vld [vmem:[#allocation21 + $0xa50] sm:$0xf]  ;;  %v12565_v55 = vld [vmem:[#allocation21 + $0x9d0] sm:$0xf0] }
 0x87c   : > { %9066 = vmatpush.bf16.msra.mxu0 %v12052_v61  ;;  %v11544_v61 = vor.u32 %v13815_v36, %v11541_v3  ;;  %v12692_v57 = vor.u32 %v14119_v14, %v12691_v35  ;;  %v12563_v36 = vld [vmem:[#allocation21 + $0x950] sm:$0xf]  ;;  %v12568_v51 = vor.u32 %v14071_v44, %v12565_v55  ;;  %v14039_v18 = vld [vmem:[#allocation21 + $0x854] sm:$0xf]  ;;  %v12955_v44 = vld [vmem:[#allocation21 + $0xc58] sm:$0xf] }
 0x87d   : > { %9092 = vmatpush.bf16.msra.mxu2 %v12056_v43  ;;  %9031 = vmatpush.bf16.msrb.mxu1 %v12556_v40  ;;  %v14183_v43 = vld [vmem:[#allocation21 + $0xccc] sm:$0xf0]  ;;  %v13784_v55 = vld [vmem:[#allocation21 + $0x5c] sm:$0xf] }
 0x87e   : > { %9057 = vmatpush.bf16.msrb.mxu3 %v12560_v11  ;;  %v12315_v11 = vld [vmem:[#allocation21 + $0x758] sm:$0xf]  ;;  %v12948_v32 = vor.u32 %v14183_v43, %v12947_v23  ;;  %v14087_v3 = vld [vmem:[#allocation21 + $0x9cc] sm:$0xf0]  ;;  %v13912_v23 = vld [vmem:[#allocation21 + $0x45c] sm:$0xf] }
 0x87f   : > { %v8841_v26 = vpop.f32.mrf.mxu2  ;;  %v12316_v48 = vor.u32 %v14024_v10, %v12315_v11  ;;  %v11933_v43 = vld [vmem:[#allocation21 + $0x4d8] sm:$0xf0]  ;;  %v12437_v11 = vld [vmem:[#allocation21 + $0x8d0] sm:$0xf0] }
 0x880   : > { %9067 = vmatpush.bf16.msra.mxu0 %v11924_v21  ;;  %v11936_v10 = vor.u32 %v13912_v23, %v11933_v43  ;;  %v12957_v43 = vld [vmem:[#allocation21 + $0xcd8] sm:$0xf0] }
 0x881   : > { %9093 = vmatpush.bf16.msra.mxu2 %v11928_v63  ;;  %9032 = vmatpush.bf16.msrb.mxu1 %v12428_v52  ;;  %v8826_v40 = vpop.f32.mrf.mxu1  ;;  %v8491_v63 = vperm.slane %v16296_v45, 3  ;;  %v12320_v52 = vor.u32 %v14008_v56, %v12317_v9  ;;  %v14280_v56 = vld [vmem:[#allocation21 + $0xfd4] sm:$0xf0]  ;;  %v13880_v9 = vld [vmem:[#allocation21 + $0x35c] sm:$0xf] }
 0x882   : > { %9058 = vmatpush.bf16.msrb.mxu3 %v12432_v47  ;;  %v8827_v21 = vadd.f32 %v8826_v40, %v8814_v46  ;;  %v13992_v47 = vld [vmem:[#allocation21 + $0x6d4] sm:$0xf0]  ;;  %v12564_v46 = vor.u32 %v14087_v3, %v12563_v36  ;;  %v14055_v40 = vld [vmem:[#allocation21 + $0x8cc] sm:$0xf0] }
 0x883   : > { %v13800_v3 = vld [vmem:[#allocation21 + $0xd4] sm:$0xf0] }
 0x884   : > { %9068 = vmatpush.bf16.msra.mxu0 %v11796_v8  ;;  %9033 = vmatmul.bf16.vlgmr.msrb.gmra.mxu1 %v16200_v37  ;;  %v13976_v8 = vld [vmem:[#allocation21 + $0x65c] sm:$0xf]  ;;  %v9416_v29 = vrot.slane %v8827_v21, 6  ;;  %v11803_v21 = vld [vmem:[#allocation21 + $0x358] sm:$0xf] }
 0x885   : > { %9077 = vmatpush.bf16.msra.mxu1 %v13332_v6  ;;  %9094 = vmatpush.bf16.msra.mxu2 %v11800_v1  ;;  %v12189_v6 = vld [vmem:[#allocation21 + $0x6d8] sm:$0xf0]  ;;  %v8840_v1 = vadd.f32 %v16313_v54, %v8491_v63  ;;  %v13960_v54 = vld [vmem:[#allocation21 + $0x5d4] sm:$0xf0] }
 0x886   : > { %9103 = vmatpush.bf16.msra.mxu3 %v13336_v15  ;;  %v12188_v15 = vor.u32 %v13992_v47, %v12187_v13  ;;  %v12192_v25 = vor.u32 %v13976_v8, %v12189_v6  ;;  %v11805_v63 = vld [vmem:[#allocation21 + $0x3d8] sm:$0xf0]  ;;  %v13864_v13 = vld [vmem:[#allocation21 + $0x2d4] sm:$0xf0] }
 0x887   : > { %9059 = vmatmul.bf16.vlgmr.msrb.gmra.mxu3 %v16200_v37  ;;  %v11808_v49 = vor.u32 %v13880_v9, %v11805_v63  ;;  %v13211_v47 = vld [vmem:[#allocation21 + $0xe58] sm:$0xf]  ;;  %v11676_v35 = vor.u32 %v13864_v13, %v11675_v62  ;;  %v12829_v9 = vld [vmem:[#allocation21 + $0xbd8] sm:$0xf0]  ;;  %v12195_v63 = vld [vmem:[#allocation21 + $0x660] sm:$0xf] }
 0x888   : > { %9069 = vmatpush.bf16.msra.mxu0 %v11668_v28  ;;  %v12059_v28 = vld [vmem:[#allocation21 + $0x558] sm:$0xf] }
 0x889   : > { %9078 = vmatpush.bf16.msra.mxu1 %v13204_v38  ;;  %9095 = vmatpush.bf16.msra.mxu2 %v11672_v5  ;;  %v8828_v59 = vpop.f32.mrf.mxu1  ;;  %v13944_v38 = vld [vmem:[#allocation21 + $0x55c] sm:$0xf]  ;;  %v12060_v20 = vor.u32 %v13960_v54, %v12059_v28  ;;  %v14216_v28 = vld [vmem:[#allocation21 + $0xdd4] sm:$0xf0] }
 0x88a   : > { %9104 = vmatpush.bf16.msra.mxu3 %v13208_v7  ;;  %v8852_v2 = vpop.f32.mrf.mxu3  ;;  %v12061_v5 = vld [vmem:[#allocation21 + $0x5d8] sm:$0xf0]  ;;  %v12696_v7 = vor.u32 %v14103_v41, %v12693_v4  ;;  %v13083_v59 = vld [vmem:[#allocation21 + $0xd58] sm:$0xf] }
 0x88b   : > { %v8853_v12 = vadd.f32 %v8852_v2, %v8840_v1  ;;  %v14248_v1 = vld [vmem:[#allocation21 + $0xed4] sm:$0xf0]  ;;  %v14232_v2 = vld [vmem:[#allocation21 + $0xe5c] sm:$0xf] }
 0x88c   : > { %9070 = vmatpush.bf16.msra.mxu0 %v11540_v30  ;;  %v12064_v30 = vor.u32 %v13944_v38, %v12061_v5  ;;  %v13212_v14 = vor.u32 %v14248_v1, %v13211_v47  ;;  %v13816_v54 = vld [vmem:[#allocation21 + $0x15c] sm:$0xf]  ;;  %v12699_v62 = vld [vmem:[#allocation21 + $0xa58] sm:$0xf] }
 0x88d   : > { %9079 = vmatpush.bf16.msra.mxu1 %v13076_v31  ;;  %9096 = vmatpush.bf16.msra.mxu2 %v11544_v61  ;;  %v9417_v0 = vrot.slane %v8853_v12, 5  ;;  %v11931_v31 = vld [vmem:[#allocation21 + $0x458] sm:$0xf]  ;;  %v11549_v38 = vld [vmem:[#allocation21 + $0x1d8] sm:$0xf0] }
 0x88e   : > { %9105 = vmatpush.bf16.msra.mxu3 %v13080_v27  ;;  %v13928_v61 = vld [vmem:[#allocation21 + $0x4d4] sm:$0xf0]  ;;  %v12435_v27 = vld [vmem:[#allocation21 + $0x850] sm:$0xf]  ;;  %v14200_v5 = vld [vmem:[#allocation21 + $0xd5c] sm:$0xf] }
 0x88f   : > { %v9451_v22 = vsel %vm9438_vm2, %v9416_v29, %v9417_v0  ;;  %v11932_v17 = vor.u32 %v13928_v61, %v11931_v31  ;;  %v11547_v12 = vld [vmem:[#allocation21 + $0x158] sm:$0xf]  ;;  %v13085_v29 = vld [vmem:[#allocation21 + $0xdd8] sm:$0xf0] }
 0x890   : > { %9071 = vmatpush.bf16.msra.mxu0 %v11412_v42  ;;  %v16326_v26 = vsel %vm9440_vm3, %v16309_v33, %v9451_v22  ;;  %v16328_v24 = vpop.f32.mrf.mxu0  ;;  %v13896_v33 = vld [vmem:[#allocation21 + $0x3d4] sm:$0xf0]  ;;  %v11421_v31 = vld [vmem:[#allocation21 + $0xd8] sm:$0xf0] }
 0x891   : > { %9080 = vmatpush.bf16.msra.mxu1 %v12948_v32  ;;  %9097 = vmatpush.bf16.msra.mxu2 %v11416_v53  ;;  %v13339_v42 = vld [vmem:[#allocation21 + $0xf58] sm:$0xf]  ;;  %v12436_v32 = vor.u32 %v14055_v40, %v12435_v27  ;;  %v14264_v53 = vld [vmem:[#allocation21 + $0xf5c] sm:$0xf]  ;;  %v11804_v34 = vor.u32 %v13896_v33, %v11803_v21  ;;  %v14025_v27 = vld [vmem:[#allocation21 + $0x7dc] sm:$0xf0] }
 0x892   : > { %9106 = vmatpush.bf16.msra.mxu3 %v12952_v50  ;;  %v8854_v58 = vpop.f32.mrf.mxu3  ;;  %v13341_v50 = vld [vmem:[#allocation21 + $0xfd8] sm:$0xf0]  ;;  %v13340_v39 = vor.u32 %v14280_v56, %v13339_v42  ;;  %v14184_v22 = vld [vmem:[#allocation21 + $0xcd4] sm:$0xf0] }
 0x893   : > { %9072 = vmatmul.bf16.vlgmr.msra.gmra.mxu0 %v16194_v60  ;;  %v13344_v8 = vor.u32 %v14264_v53, %v13341_v50  ;;  %v14168_v61 = vld [vmem:[#allocation21 + $0xc5c] sm:$0xf]  ;;  %v14009_v58 = vld [vmem:[#allocation21 + $0x764] sm:$0xf]  ;;  %v12956_v40 = vor.u32 %v14184_v22, %v12955_v44  ;;  %v12827_v21 = vld [vmem:[#allocation21 + $0xb58] sm:$0xf] }
 0x894   : > { %9116 = vmatpush.bf16.msrb.mxu0 %v12316_v48  ;;  %9098 = vmatmul.bf16.vlgmr.msra.gmra.mxu2 %v16194_v60  ;;  %v12440_v48 = vor.u32 %v14039_v18, %v12437_v11  ;;  %v11424_v18 = vor.u32 %v13784_v55, %v11421_v31  ;;  %v12960_v11 = vor.u32 %v14168_v61, %v12957_v43  ;;  %v14152_v33 = vld [vmem:[#allocation21 + $0xbd4] sm:$0xf0]  ;;  %v14136_v42 = vld [vmem:[#allocation21 + $0xb5c] sm:$0xf]  ;;  %v13977_v53 = vld [vmem:[#allocation21 + $0x664] sm:$0xf] }
 0x895   : > { %9142 = vmatpush.bf16.msrb.mxu2 %v12320_v52  ;;  %9081 = vmatpush.bf16.msra.mxu1 %v12820_v19  ;;  %v13848_v19 = vld [vmem:[#allocation21 + $0x25c] sm:$0xf]  ;;  %v12197_v50 = vld [vmem:[#allocation21 + $0x6e0] sm:$0xf0]  ;;  %v14120_v13 = vld [vmem:[#allocation21 + $0xad4] sm:$0xf0] }
 0x896   : > { %9107 = vmatpush.bf16.msra.mxu3 %v12824_v16  ;;  %v11677_v16 = vld [vmem:[#allocation21 + $0x2d8] sm:$0xf0]  ;;  %v14056_v44 = vld [vmem:[#allocation21 + $0x8d4] sm:$0xf0]  ;;  %v11811_v31 = vld [vmem:[#allocation21 + $0x360] sm:$0xf] }
 0x897   : > { %v16330_v52 = vpop.f32.mrf.mxu2  ;;  %v11680_v41 = vor.u32 %v13848_v19, %v11677_v16  ;;  %v14104_v47 = vld [vmem:[#allocation21 + $0xa5c] sm:$0xf]  ;;  %v12067_v19 = vld [vmem:[#allocation21 + $0x560] sm:$0xf] }
 0x898   : > { %9117 = vmatpush.bf16.msrb.mxu0 %v12188_v15  ;;  %v8867_v6 = vpop.f32.mrf.mxu0  ;;  %v13213_v15 = vld [vmem:[#allocation21 + $0xed8] sm:$0xf0]  ;;  %v13961_v16 = vld [vmem:[#allocation21 + $0x5dc] sm:$0xf0] }
 0x899   : > { %9143 = vmatpush.bf16.msrb.mxu2 %v12192_v25  ;;  %9082 = vmatpush.bf16.msra.mxu1 %v12692_v57  ;;  %v13832_v25 = vld [vmem:[#allocation21 + $0x1d4] sm:$0xf0]  ;;  %v13216_v4 = vor.u32 %v14232_v2, %v13213_v15  ;;  %v12701_v1 = vld [vmem:[#allocation21 + $0xad8] sm:$0xf0]  ;;  %v13945_v2 = vld [vmem:[#allocation21 + $0x564] sm:$0xf] }
 0x89a   : > { %9108 = vmatpush.bf16.msra.mxu3 %v12696_v7  ;;  %v11548_v0 = vor.u32 %v13832_v25, %v11547_v12  ;;  %v11419_v57 = vld [vmem:[#allocation21 + $0x58] sm:$0xf]  ;;  %v13084_v7 = vor.u32 %v14216_v28, %v13083_v59  ;;  %v12069_v15 = vld [vmem:[#allocation21 + $0x5e0] sm:$0xf0]  ;;  %v14072_v59 = vld [vmem:[#allocation21 + $0x95c] sm:$0xf] }
 0x89b   : > { %v12571_v12 = vld [vmem:[#allocation21 + $0x958] sm:$0xf]  ;;  %v12573_v28 = vld [vmem:[#allocation21 + $0x9d8] sm:$0xf0]  ;;  %v13897_v61 = vld [vmem:[#allocation21 + $0x3dc] sm:$0xf0] }
 0x89c   : > { %9118 = vmatpush.bf16.msrb.mxu0 %v12060_v20  ;;  %v11552_v20 = vor.u32 %v13816_v54, %v11549_v38  ;;  %v14088_v25 = vld [vmem:[#allocation21 + $0x9d4] sm:$0xf0]  ;;  %v11939_v54 = vld [vmem:[#allocation21 + $0x460] sm:$0xf]  ;;  %v14040_v22 = vld [vmem:[#allocation21 + $0x85c] sm:$0xf] }
 0x89d   : > { %9144 = vmatpush.bf16.msrb.mxu2 %v12064_v30  ;;  %9083 = vmatpush.bf16.msra.mxu1 %v12564_v46  ;;  %v13088_v30 = vor.u32 %v14200_v5, %v13085_v29  ;;  %v12323_v46 = vld [vmem:[#allocation21 + $0x760] sm:$0xf]  ;;  %v13913_v29 = vld [vmem:[#allocation21 + $0x464] sm:$0xf] }
 0x89e   : > { %9109 = vmatpush.bf16.msra.mxu3 %v12568_v51  ;;  %v11420_v51 = vor.u32 %v13800_v3, %v11419_v57  ;;  %v13929_v38 = vld [vmem:[#allocation21 + $0x4dc] sm:$0xf0]  ;;  %v12572_v57 = vor.u32 %v14088_v25, %v12571_v12  ;;  %v8492_v12 = vperm.slane %v16296_v45, 4  ;;  %v8494_v25 = vperm.slane %v16296_v45, 6 }
 0x89f   : > { %v8893_v36 = vpop.f32.mrf.mxu2  ;;  %v11940_v3 = vor.u32 %v13929_v38, %v11939_v54  ;;  %v13347_v43 = vld [vmem:[#allocation21 + $0xf60] sm:$0xf] }
 0x8a0   : > { %9119 = vmatpush.bf16.msrb.mxu0 %v11932_v17  ;;  %v12325_v17 = vld [vmem:[#allocation21 + $0x7e0] sm:$0xf0] }
 0x8a1   : > { %9145 = vmatpush.bf16.msrb.mxu2 %v11936_v10  ;;  %9084 = vmatpush.bf16.msra.mxu1 %v12436_v32  ;;  %v16334_v23 = vpop.f32.mrf.mxu1  ;;  %v12324_v10 = vor.u32 %v14025_v27, %v12323_v46  ;;  %v12328_v56 = vor.u32 %v14009_v58, %v12325_v17  ;;  %v13993_v32 = vld [vmem:[#allocation21 + $0x6dc] sm:$0xf0]  ;;  %v13881_v27 = vld [vmem:[#allocation21 + $0x364] sm:$0xf] }
 0x8a2   : > { %9110 = vmatpush.bf16.msra.mxu3 %v12440_v48  ;;  %v12828_v48 = vor.u32 %v14152_v33, %v12827_v21  ;;  %v14281_v46 = vld [vmem:[#allocation21 + $0xfdc] sm:$0xf0]  ;;  %v14265_v17 = vld [vmem:[#allocation21 + $0xf64] sm:$0xf] }
 0x8a4   : > { %9120 = vmatpush.bf16.msrb.mxu0 %v11804_v34  ;;  %9085 = vmatmul.bf16.vlgmr.msra.gmra.mxu1 %v16200_v37  ;;  %v12832_v34 = vor.u32 %v14136_v42, %v12829_v9  ;;  %v11683_v42 = vld [vmem:[#allocation21 + $0x260] sm:$0xf] }
 0x8a5   : > { %9129 = vmatpush.bf16.msrb.mxu1 %v13340_v39  ;;  %9146 = vmatpush.bf16.msrb.mxu2 %v11808_v49  ;;  %v12196_v49 = vor.u32 %v13993_v32, %v12195_v63  ;;  %v13219_v9 = vld [vmem:[#allocation21 + $0xe60] sm:$0xf] }
 0x8a6   : > { %9155 = vmatpush.bf16.msrb.mxu3 %v13344_v8  ;;  %v12200_v8 = vor.u32 %v13977_v53, %v12197_v50  ;;  %v14249_v53 = vld [vmem:[#allocation21 + $0xedc] sm:$0xf0]  ;;  %v13849_v50 = vld [vmem:[#allocation21 + $0x264] sm:$0xf] }
 0x8a7   : > { %9111 = vmatmul.bf16.vlgmr.msra.gmra.mxu3 %v16200_v37 }
 0x8a8   : > { %9121 = vmatpush.bf16.msrb.mxu0 %v11676_v35  ;;  %v12700_v35 = vor.u32 %v14120_v13, %v12699_v62  ;;  %v13220_v13 = vor.u32 %v14249_v53, %v13219_v9  ;;  %v12837_v9 = vld [vmem:[#allocation21 + $0xbe0] sm:$0xf0]  ;;  %v12205_v53 = vld [vmem:[#allocation21 + $0x6e8] sm:$0xf0] }
 0x8a9   : > { %9130 = vmatpush.bf16.msrb.mxu1 %v13212_v14  ;;  %9147 = vmatpush.bf16.msrb.mxu2 %v11680_v41  ;;  %v8880_v6 = vpop.f32.mrf.mxu1  ;;  %v12704_v14 = vor.u32 %v14104_v47, %v12701_v1  ;;  %v12068_v41 = vor.u32 %v13961_v16, %v12067_v19  ;;  %v13091_v1 = vld [vmem:[#allocation21 + $0xd60] sm:$0xf] }
 0x8aa   : > { %9156 = vmatpush.bf16.msrb.mxu3 %v13216_v4  ;;  %v16336_v39 = vpop.f32.mrf.mxu3  ;;  %v12072_v4 = vor.u32 %v13945_v2, %v12069_v15  ;;  %v13833_v6 = vld [vmem:[#allocation21 + $0x1dc] sm:$0xf0]  ;;  %v13817_v2 = vld [vmem:[#allocation21 + $0x164] sm:$0xf] }
 0x8ab   : > { %v14217_v16 = vld [vmem:[#allocation21 + $0xddc] sm:$0xf0]  ;;  %v11557_v15 = vld [vmem:[#allocation21 + $0x1e0] sm:$0xf0] }
 0x8ac   : > { %9122 = vmatpush.bf16.msrb.mxu0 %v11548_v0  ;;  %v11941_v0 = vld [vmem:[#allocation21 + $0x4e0] sm:$0xf0]  ;;  %v11560_v54 = vor.u32 %v13817_v2, %v11557_v15  ;;  %v13946_v2 = vld [vmem:[#allocation21 + $0x56c] sm:$0xf] }
 0x8ad   : > { %9131 = vmatpush.bf16.msrb.mxu1 %v13084_v7  ;;  %9148 = vmatpush.bf16.msrb.mxu2 %v11552_v20  ;;  %v12443_v7 = vld [vmem:[#allocation21 + $0x858] sm:$0xf]  ;;  %v12576_v20 = vor.u32 %v14072_v59, %v12573_v28  ;;  %v11944_v55 = vor.u32 %v13913_v29, %v11941_v0  ;;  %v13092_v28 = vor.u32 %v14217_v16, %v13091_v1  ;;  %v13801_v29 = vld [vmem:[#allocation21 + $0xdc] sm:$0xf0]  ;;  %v13962_v16 = vld [vmem:[#allocation21 + $0x5e4] sm:$0xf0] }
 0x8ae   : > { %9157 = vmatpush.bf16.msrb.mxu3 %v13088_v30  ;;  %v12445_v30 = vld [vmem:[#allocation21 + $0x8d8] sm:$0xf0]  ;;  %v12444_v58 = vor.u32 %v14056_v44, %v12443_v7  ;;  %v12963_v0 = vld [vmem:[#allocation21 + $0xc60] sm:$0xf]  ;;  %v12077_v15 = vld [vmem:[#allocation21 + $0x5e8] sm:$0xf0] }
 0x8b0   : > { %9123 = vmatpush.bf16.msrb.mxu0 %v11420_v51  ;;  %v16340_v5 = vpop.f32.mrf.mxu0  ;;  %v11813_v51 = vld [vmem:[#allocation21 + $0x3e0] sm:$0xf0] }
 0x8b1   : > { %9132 = vmatpush.bf16.msrb.mxu1 %v12956_v40  ;;  %9149 = vmatpush.bf16.msrb.mxu2 %v11424_v18  ;;  %v13349_v40 = vld [vmem:[#allocation21 + $0xfe0] sm:$0xf0]  ;;  %v12448_v18 = vor.u32 %v14040_v22, %v12445_v30  ;;  %v11816_v21 = vor.u32 %v13881_v27, %v11813_v51  ;;  %v8495_v51 = vperm.slane %v16296_v45, 7 }
 0x8b2   : > { %9158 = vmatpush.bf16.msrb.mxu3 %v12960_v11  ;;  %v8906_v36 = vpop.f32.mrf.mxu3  ;;  %v11812_v11 = vor.u32 %v13897_v61, %v11811_v31  ;;  %v13352_v63 = vor.u32 %v14265_v17, %v13349_v40  ;;  %v12965_v30 = vld [vmem:[#allocation21 + $0xce0] sm:$0xf0]  ;;  %v14026_v31 = vld [vmem:[#allocation21 + $0x7e4] sm:$0xf0]  ;;  %v8866_v40 = vadd.f32 %v16328_v24, %v8492_v12 }
 0x8b3   : > { %9124 = vmatmul.bf16.vlgmr.msrb.gmra.mxu0 %v16194_v60  ;;  %v11429_v36 = vld [vmem:[#allocation21 + $0xe0] sm:$0xf0] }
 0x8b4   : > { %9168 = vmatpush.bf16.msra.mxu0 %v12324_v10  ;;  %9150 = vmatmul.bf16.vlgmr.msrb.gmra.mxu2 %v16194_v60  ;;  %v13348_v10 = vor.u32 %v14281_v46, %v13347_v43  ;;  %v14010_v43 = vld [vmem:[#allocation21 + $0x76c] sm:$0xf] }
 0x8b5   : > { %9194 = vmatpush.bf16.msra.mxu2 %v12328_v56  ;;  %9133 = vmatpush.bf16.msrb.mxu1 %v12828_v48  ;;  %v13865_v56 = vld [vmem:[#allocation21 + $0x2dc] sm:$0xf0]  ;;  %v11685_v48 = vld [vmem:[#allocation21 + $0x2e0] sm:$0xf0]  ;;  %v12333_v46 = vld [vmem:[#allocation21 + $0x7e8] sm:$0xf0] }
 0x8b6   : > { %9159 = vmatpush.bf16.msrb.mxu3 %v12832_v34  ;;  %v14233_v34 = vld [vmem:[#allocation21 + $0xe64] sm:$0xf]  ;;  %v11684_v62 = vor.u32 %v13865_v56, %v11683_v42  ;;  %v11688_v47 = vor.u32 %v13849_v50, %v11685_v48  ;;  %v8918_v42 = vadd.f32 %v16340_v5, %v8494_v25  ;;  %v12336_v56 = vor.u32 %v14010_v43, %v12333_v46 }
 0x8b7   : > { %v16342_v33 = vpop.f32.mrf.mxu2 }
 0x8b8   : > { %9169 = vmatpush.bf16.msra.mxu0 %v12196_v49  ;;  %v8919_v32 = vpop.f32.mrf.mxu0  ;;  %v13221_v49 = vld [vmem:[#allocation21 + $0xee0] sm:$0xf0]  ;;  %v8944_v24 = vadd.f32 %v16342_v33, %v8495_v51  ;;  %v12075_v33 = vld [vmem:[#allocation21 + $0x568] sm:$0xf] }
 0x8b9   : > { %9195 = vmatpush.bf16.msra.mxu2 %v12200_v8  ;;  %9134 = vmatpush.bf16.msrb.mxu1 %v12700_v35  ;;  %v11555_v8 = vld [vmem:[#allocation21 + $0x160] sm:$0xf]  ;;  %v13224_v19 = vor.u32 %v14233_v34, %v13221_v49  ;;  %v8493_v35 = vperm.slane %v16296_v45, 5  ;;  %v8879_v45 = vadd.f32 %v16334_v23, %v8866_v40  ;;  %v13978_v32 = vld [vmem:[#allocation21 + $0x66c] sm:$0xf] }
 0x8ba   : > { %9160 = vmatpush.bf16.msrb.mxu3 %v12704_v14  ;;  %v14201_v14 = vld [vmem:[#allocation21 + $0xd64] sm:$0xf]  ;;  %v11556_v59 = vor.u32 %v13833_v6, %v11555_v8  ;;  %v12208_v6 = vor.u32 %v13978_v32, %v12205_v53  ;;  %v11819_v40 = vld [vmem:[#allocation21 + $0x368] sm:$0xf] }
 0x8bb   : > { %v8892_v44 = vadd.f32 %v16330_v52, %v8493_v35  ;;  %v14105_v8 = vld [vmem:[#allocation21 + $0xa64] sm:$0xf]  ;;  %v9418_v35 = vrot.slane %v8879_v45, 4 }
 0x8bc   : > { %9170 = vmatpush.bf16.msra.mxu0 %v12068_v41  ;;  %v13093_v41 = vld [vmem:[#allocation21 + $0xde0] sm:$0xf0] }
 0x8bd   : > { %9196 = vmatpush.bf16.msra.mxu2 %v12072_v4  ;;  %9135 = vmatpush.bf16.msrb.mxu1 %v12572_v57  ;;  %v11427_v4 = vld [vmem:[#allocation21 + $0x60] sm:$0xf]  ;;  %v13096_v7 = vor.u32 %v14201_v14, %v13093_v41  ;;  %v8905_v27 = vadd.f32 %v16336_v39, %v8892_v44  ;;  %v13994_v39 = vld [vmem:[#allocation21 + $0x6e4] sm:$0xf0]  ;;  %v13914_v44 = vld [vmem:[#allocation21 + $0x46c] sm:$0xf] }
 0x8be   : > { %9161 = vmatpush.bf16.msrb.mxu3 %v12576_v20  ;;  %v14185_v57 = vld [vmem:[#allocation21 + $0xcdc] sm:$0xf0]  ;;  %v13785_v20 = vld [vmem:[#allocation21 + $0x64] sm:$0xf]  ;;  %v11428_v61 = vor.u32 %v13801_v29, %v11427_v4 }
 0x8bf   : > { %v8945_v38 = vpop.f32.mrf.mxu2  ;;  %v11432_v17 = vor.u32 %v13785_v20, %v11429_v36  ;;  %v9419_v50 = vrot.slane %v8905_v27, 3  ;;  %v12579_v4 = vld [vmem:[#allocation21 + $0x960] sm:$0xf]  ;;  %v13930_v20 = vld [vmem:[#allocation21 + $0x4e4] sm:$0xf0] }
 0x8c0   : > { %9171 = vmatpush.bf16.msra.mxu0 %v11940_v3  ;;  %v14169_v3 = vld [vmem:[#allocation21 + $0xc64] sm:$0xf] }
 0x8c1   : > { %9197 = vmatpush.bf16.msra.mxu2 %v11944_v55  ;;  %9136 = vmatpush.bf16.msrb.mxu1 %v12444_v58  ;;  %v8930_v22 = vpop.f32.mrf.mxu1  ;;  %v12331_v55 = vld [vmem:[#allocation21 + $0x768] sm:$0xf]  ;;  %v12964_v58 = vor.u32 %v14185_v57, %v12963_v0  ;;  %v12968_v52 = vor.u32 %v14169_v3, %v12965_v30  ;;  %v9453_v38 = vsel %vm9442_vm4, %v9418_v35, %v9419_v50  ;;  %v12581_v57 = vld [vmem:[#allocation21 + $0x9e0] sm:$0xf0] }
 0x8c2   : > { %9162 = vmatpush.bf16.msrb.mxu3 %v12448_v18  ;;  %v12332_v18 = vor.u32 %v14026_v31, %v12331_v55  ;;  %v8931_v48 = vadd.f32 %v8930_v22, %v8918_v42  ;;  %v12080_v0 = vor.u32 %v13946_v2, %v12077_v15  ;;  %v11949_v22 = vld [vmem:[#allocation21 + $0x4e8] sm:$0xf0]  ;;  %v12451_v31 = vld [vmem:[#allocation21 + $0x860] sm:$0xf]  ;;  %v14041_v51 = vld [vmem:[#allocation21 + $0x864] sm:$0xf] }
 0x8c3   : > { %v14266_v42 = vld [vmem:[#allocation21 + $0xf6c] sm:$0xf]  ;;  %v11691_v50 = vld [vmem:[#allocation21 + $0x268] sm:$0xf] }
 0x8c4   : > { %9172 = vmatpush.bf16.msra.mxu0 %v11812_v11  ;;  %9137 = vmatmul.bf16.vlgmr.msrb.gmra.mxu1 %v16200_v37  ;;  %v12835_v11 = vld [vmem:[#allocation21 + $0xb60] sm:$0xf]  ;;  %v9420_v14 = vrot.slane %v8931_v48, 2  ;;  %v13227_v48 = vld [vmem:[#allocation21 + $0xe68] sm:$0xf] }
 0x8c5   : > { %9181 = vmatpush.bf16.msra.mxu1 %v13348_v10  ;;  %9198 = vmatpush.bf16.msra.mxu2 %v11816_v21  ;;  %v14153_v10 = vld [vmem:[#allocation21 + $0xbdc] sm:$0xf0]  ;;  %v14137_v21 = vld [vmem:[#allocation21 + $0xb64] sm:$0xf]  ;;  %v13099_v2 = vld [vmem:[#allocation21 + $0xd68] sm:$0xf] }
 0x8c6   : > { %9207 = vmatpush.bf16.msra.mxu3 %v13352_v63  ;;  %v12203_v63 = vld [vmem:[#allocation21 + $0x668] sm:$0xf]  ;;  %v12836_v34 = vor.u32 %v14153_v10, %v12835_v11  ;;  %v12840_v49 = vor.u32 %v14137_v21, %v12837_v9  ;;  %v13882_v10 = vld [vmem:[#allocation21 + $0x36c] sm:$0xf]  ;;  %v16366_v9 = vld [vmem:[#allocation23 + $0x10] sm:$0xff] }
 0x8c7   : > { %9163 = vmatmul.bf16.vlgmr.msrb.gmra.mxu3 %v16200_v37  ;;  %v14282_v11 = vld [vmem:[#allocation21 + $0xfe4] sm:$0xf0] }
 0x8c8   : > { %9173 = vmatpush.bf16.msra.mxu0 %v11684_v62  ;;  %v12204_v62 = vor.u32 %v13994_v39, %v12203_v63  ;;  %v14218_v35 = vld [vmem:[#allocation21 + $0xde4] sm:$0xf0] }
 0x8c9   : > { %9182 = vmatpush.bf16.msra.mxu1 %v13220_v13  ;;  %9199 = vmatpush.bf16.msra.mxu2 %v11688_v47  ;;  %v12707_v13 = vld [vmem:[#allocation21 + $0xa60] sm:$0xf]  ;;  %v8932_v1 = vpop.f32.mrf.mxu1 }
 0x8ca   : > { %9208 = vmatpush.bf16.msra.mxu3 %v13224_v19  ;;  %v8956_v5 = vpop.f32.mrf.mxu3  ;;  %v14121_v47 = vld [vmem:[#allocation21 + $0xadc] sm:$0xf0]  ;;  %v12709_v19 = vld [vmem:[#allocation21 + $0xae0] sm:$0xf0] }
 0x8cb   : > { %v8957_v23 = vadd.f32 %v8956_v5, %v8944_v24  ;;  %v12708_v12 = vor.u32 %v14121_v47, %v12707_v13  ;;  %v12712_v25 = vor.u32 %v14105_v8, %v12709_v19  ;;  %v13866_v24 = vld [vmem:[#allocation21 + $0x2e4] sm:$0xf0]  ;;  %v11693_v13 = vld [vmem:[#allocation21 + $0x2e8] sm:$0xf0] }
 0x8cc   : > { %9174 = vmatpush.bf16.msra.mxu0 %v11556_v59  ;;  %v12076_v59 = vor.u32 %v13962_v16, %v12075_v33  ;;  %v14250_v5 = vld [vmem:[#allocation21 + $0xee4] sm:$0xf0]  ;;  %v14234_v47 = vld [vmem:[#allocation21 + $0xe6c] sm:$0xf] }
 0x8cd   : > { %9183 = vmatpush.bf16.msra.mxu1 %v13092_v28  ;;  %9200 = vmatpush.bf16.msra.mxu2 %v11560_v54  ;;  %v9421_v41 = vrot.slane %v8957_v23, 1  ;;  %v14089_v28 = vld [vmem:[#allocation21 + $0x9dc] sm:$0xf0]  ;;  %v14073_v54 = vld [vmem:[#allocation21 + $0x964] sm:$0xf]  ;;  %v8496_v23 = vperm.slane %v16366_v9, 0  ;;  %v13228_v1 = vor.u32 %v14250_v5, %v13227_v48 }
 0x8ce   : > { %9209 = vmatpush.bf16.msra.mxu3 %v13096_v7  ;;  %v11947_v7 = vld [vmem:[#allocation21 + $0x468] sm:$0xf]  ;;  %v12580_v55 = vor.u32 %v14089_v28, %v12579_v4  ;;  %v12584_v43 = vor.u32 %v14073_v54, %v12581_v57  ;;  %v13229_v8 = vld [vmem:[#allocation21 + $0xee8] sm:$0xf0]  ;;  %v13100_v28 = vor.u32 %v14218_v35, %v13099_v2 }
 0x8cf   : > { %v9454_v29 = vsel %vm9444_vm5, %v9420_v14, %v9421_v41  ;;  %v11948_v27 = vor.u32 %v13930_v20, %v11947_v7  ;;  %v11563_v33 = vld [vmem:[#allocation21 + $0x168] sm:$0xf]  ;;  %v13232_v15 = vor.u32 %v14234_v47, %v13229_v8  ;;  %v13818_v14 = vld [vmem:[#allocation21 + $0x16c] sm:$0xf] }
 0x8d0   : > { %9175 = vmatpush.bf16.msra.mxu0 %v11428_v61  ;;  %v9455_v36 = vsel %vm9446_vm6, %v9453_v38, %v9454_v29  ;;  %v16361_v3 = vpop.f32.mrf.mxu0  ;;  %v14057_v61 = vld [vmem:[#allocation21 + $0x8dc] sm:$0xf0]  ;;  %v13834_v16 = vld [vmem:[#allocation21 + $0x1e4] sm:$0xf0]  ;;  %v11565_v41 = vld [vmem:[#allocation21 + $0x1e8] sm:$0xf0] }
 0x8d1   : > { %9184 = vmatpush.bf16.msra.mxu1 %v12964_v58  ;;  %9201 = vmatpush.bf16.msra.mxu2 %v11432_v17  ;;  %v9456_v30 = vsel %vm9448_vm7, %v16326_v26, %v9455_v36  ;;  %v12453_v58 = vld [vmem:[#allocation21 + $0x8e0] sm:$0xf0]  ;;  %v11952_v17 = vor.u32 %v13914_v44, %v11949_v22  ;;  %v11821_v26 = vld [vmem:[#allocation21 + $0x3e8] sm:$0xf0]  ;;  %v12452_v21 = vor.u32 %v14057_v61, %v12451_v31  ;;  %v11435_v4 = vld [vmem:[#allocation21 + $0x68] sm:$0xf] }
 0x8d2   : > { %9210 = vmatpush.bf16.msra.mxu3 %v12968_v52  ;;  %9476 = vst [vmem:[%s15407_s8 + $0x8] sm:$0xff] %v9456_v30  ;;  %v8958_v46 = vpop.f32.mrf.mxu3  ;;  %v13898_v52 = vld [vmem:[#allocation21 + $0x3e4] sm:$0xf0]  ;;  %v12456_v63 = vor.u32 %v14041_v51, %v12453_v58  ;;  %v11824_v32 = vor.u32 %v13882_v10, %v11821_v26  ;;  %v11568_v54 = vor.u32 %v13818_v14, %v11565_v41  ;;  %v13786_v36 = vld [vmem:[#allocation21 + $0x6c] sm:$0xf]  ;;  %v8497_v58 = vperm.slane %v16366_v9, 1 }
 0x8d3   : > { %9176 = vmatmul.bf16.vlgmr.msra.gmra.mxu0 %v16194_v60  ;;  %v11820_v39 = vor.u32 %v13898_v52, %v11819_v40  ;;  %v13802_v29 = vld [vmem:[#allocation21 + $0xe4] sm:$0xf0]  ;;  %v8970_v7 = vadd.f32 %v16361_v3, %v8496_v23  ;;  %v11437_v44 = vld [vmem:[#allocation21 + $0xe8] sm:$0xf0]  ;;  %v12339_v31 = vld [vmem:[#allocation21 + $0x770] sm:$0xf] }
 0x8d4   : > { %9220 = vmatpush.bf16.msrb.mxu0 %v12332_v18  ;;  %9202 = vmatmul.bf16.vlgmr.msra.gmra.mxu2 %v16194_v60  ;;  %v13355_v18 = vld [vmem:[#allocation21 + $0xf68] sm:$0xf]  ;;  %v14170_v22 = vld [vmem:[#allocation21 + $0xc6c] sm:$0xf]  ;;  %v14027_v61 = vld [vmem:[#allocation21 + $0x7ec] sm:$0xf0]  ;;  %v11436_v46 = vor.u32 %v13802_v29, %v11435_v4  ;;  %v11440_v3 = vor.u32 %v13786_v36, %v11437_v44 }
 0x8d5   : > { %9246 = vmatpush.bf16.msrb.mxu2 %v12336_v56  ;;  %9185 = vmatpush.bf16.msra.mxu1 %v12836_v34  ;;  %v13357_v56 = vld [vmem:[#allocation21 + $0xfe8] sm:$0xf0]  ;;  %v13356_v45 = vor.u32 %v14282_v11, %v13355_v18  ;;  %v14186_v57 = vld [vmem:[#allocation21 + $0xce4] sm:$0xf0]  ;;  %v12341_v51 = vld [vmem:[#allocation21 + $0x7f0] sm:$0xf0]  ;;  %v12340_v52 = vor.u32 %v14027_v61, %v12339_v31 }
 0x8d6   : > { %9211 = vmatpush.bf16.msra.mxu3 %v12840_v49  ;;  %v13360_v34 = vor.u32 %v14266_v42, %v13357_v56  ;;  %v12843_v18 = vld [vmem:[#allocation21 + $0xb68] sm:$0xf]  ;;  %v14138_v10 = vld [vmem:[#allocation21 + $0xb6c] sm:$0xf]  ;;  %v12211_v42 = vld [vmem:[#allocation21 + $0x670] sm:$0xf] }
 0x8d7   : > { %v16368_v53 = vpop.f32.mrf.mxu2  ;;  %v14154_v11 = vld [vmem:[#allocation21 + $0xbe4] sm:$0xf0]  ;;  %v13995_v56 = vld [vmem:[#allocation21 + $0x6ec] sm:$0xf0]  ;;  %v14106_v5 = vld [vmem:[#allocation21 + $0xa6c] sm:$0xf] }
 0x8d8   : > { %9221 = vmatpush.bf16.msrb.mxu0 %v12204_v62  ;;  %v8971_v49 = vpop.f32.mrf.mxu0  ;;  %v13850_v62 = vld [vmem:[#allocation21 + $0x26c] sm:$0xf]  ;;  %v12212_v48 = vor.u32 %v13995_v56, %v12211_v42  ;;  %v12083_v23 = vld [vmem:[#allocation21 + $0x570] sm:$0xf]  ;;  %v14090_v35 = vld [vmem:[#allocation21 + $0x9e4] sm:$0xf0] }
 0x8d9   : > { %9247 = vmatpush.bf16.msrb.mxu2 %v12208_v6  ;;  %9186 = vmatpush.bf16.msra.mxu1 %v12708_v12  ;;  %v11692_v6 = vor.u32 %v13866_v24, %v11691_v50  ;;  %v11696_v19 = vor.u32 %v13850_v62, %v11693_v13  ;;  %v14202_v12 = vld [vmem:[#allocation21 + $0xd6c] sm:$0xf]  ;;  %v14122_v49 = vld [vmem:[#allocation21 + $0xae4] sm:$0xf0]  ;;  %v13931_v4 = vld [vmem:[#allocation21 + $0x4ec] sm:$0xf0] }
 0x8da   : > { %9212 = vmatpush.bf16.msra.mxu3 %v12712_v25  ;;  %v13101_v25 = vld [vmem:[#allocation21 + $0xde8] sm:$0xf0]  ;;  %v14058_v36 = vld [vmem:[#allocation21 + $0x8e4] sm:$0xf0]  ;;  %v13899_v31 = vld [vmem:[#allocation21 + $0x3ec] sm:$0xf0] }
 0x8db   : > { %v13104_v20 = vor.u32 %v14202_v12, %v13101_v25  ;;  %v12717_v8 = vld [vmem:[#allocation21 + $0xae8] sm:$0xf0]  ;;  %v13363_v61 = vld [vmem:[#allocation21 + $0xf70] sm:$0xf] }
 0x8dc   : > { %9222 = vmatpush.bf16.msrb.mxu0 %v12076_v59  ;;  %v11564_v59 = vor.u32 %v13834_v16, %v11563_v33  ;;  %v12720_v16 = vor.u32 %v14106_v5, %v12717_v8  ;;  %v14074_v14 = vld [vmem:[#allocation21 + $0x96c] sm:$0xf]  ;;  %v11571_v5 = vld [vmem:[#allocation21 + $0x170] sm:$0xf] }
 0x8dd   : > { %9248 = vmatpush.bf16.msrb.mxu2 %v12080_v0  ;;  %9187 = vmatpush.bf16.msra.mxu1 %v12580_v55  ;;  %v12971_v0 = vld [vmem:[#allocation21 + $0xc68] sm:$0xf]  ;;  %v12973_v55 = vld [vmem:[#allocation21 + $0xce8] sm:$0xf0]  ;;  %v14219_v8 = vld [vmem:[#allocation21 + $0xdec] sm:$0xf0] }
 0x8de   : > { %9213 = vmatpush.bf16.msra.mxu3 %v12584_v43  ;;  %v12976_v40 = vor.u32 %v14170_v22, %v12973_v55  ;;  %v12589_v25 = vld [vmem:[#allocation21 + $0x9e8] sm:$0xf0]  ;;  %v11827_v55 = vld [vmem:[#allocation21 + $0x370] sm:$0xf] }
 0x8df   : > { %v8997_v38 = vpop.f32.mrf.mxu2  ;;  %v14042_v44 = vld [vmem:[#allocation21 + $0x86c] sm:$0xf] }
 0x8e0   : > { %9223 = vmatpush.bf16.msrb.mxu0 %v11948_v27  ;;  %v14011_v27 = vld [vmem:[#allocation21 + $0x774] sm:$0xf]  ;;  %v12461_v22 = vld [vmem:[#allocation21 + $0x8e8] sm:$0xf0] }
 0x8e1   : > { %9249 = vmatpush.bf16.msrb.mxu2 %v11952_v17  ;;  %9188 = vmatpush.bf16.msra.mxu1 %v12452_v21  ;;  %v8982_v30 = vpop.f32.mrf.mxu1  ;;  %v12972_v17 = vor.u32 %v14186_v57, %v12971_v0  ;;  %v12344_v26 = vor.u32 %v14011_v27, %v12341_v51  ;;  %v12845_v21 = vld [vmem:[#allocation21 + $0xbe8] sm:$0xf0]  ;;  %v11957_v38 = vld [vmem:[#allocation21 + $0x4f0] sm:$0xf0]  ;;  %v12459_v0 = vld [vmem:[#allocation21 + $0x868] sm:$0xf]  ;;  %v12592_v57 = vor.u32 %v14074_v14, %v12589_v25 }
 0x8e2   : > { %9214 = vmatpush.bf16.msra.mxu3 %v12456_v63  ;;  %v8983_v43 = vadd.f32 %v8982_v30, %v8970_v7  ;;  %v13979_v63 = vld [vmem:[#allocation21 + $0x674] sm:$0xf]  ;;  %v12848_v50 = vor.u32 %v14138_v10, %v12845_v21  ;;  %v12460_v51 = vor.u32 %v14058_v36, %v12459_v0  ;;  %v11699_v10 = vld [vmem:[#allocation21 + $0x270] sm:$0xf] }
 0x8e3   : > { %v11829_v27 = vld [vmem:[#allocation21 + $0x3f0] sm:$0xf0]  ;;  %v13235_v21 = vld [vmem:[#allocation21 + $0xe70] sm:$0xf] }
 0x8e4   : > { %9224 = vmatpush.bf16.msrb.mxu0 %v11820_v39  ;;  %9189 = vmatmul.bf16.vlgmr.msra.gmra.mxu1 %v16200_v37  ;;  %v12213_v39 = vld [vmem:[#allocation21 + $0x6f0] sm:$0xf0]  ;;  %v12979_v14 = vld [vmem:[#allocation21 + $0xc70] sm:$0xf] }
 0x8e5   : > { %9233 = vmatpush.bf16.msrb.mxu1 %v13356_v45  ;;  %9250 = vmatpush.bf16.msrb.mxu2 %v11824_v32  ;;  %v8996_v45 = vadd.f32 %v16368_v53, %v8497_v58  ;;  %v12844_v32 = vor.u32 %v14154_v11, %v12843_v18  ;;  %v12216_v13 = vor.u32 %v13979_v63, %v12213_v39  ;;  %v13963_v53 = vld [vmem:[#allocation21 + $0x5ec] sm:$0xf0]  ;;  %v14267_v58 = vld [vmem:[#allocation21 + $0xf74] sm:$0xf] }
 0x8e6   : > { %9259 = vmatpush.bf16.msrb.mxu3 %v13360_v34  ;;  %v12715_v34 = vld [vmem:[#allocation21 + $0xa68] sm:$0xf]  ;;  %v12084_v2 = vor.u32 %v13963_v53, %v12083_v23  ;;  %v14251_v63 = vld [vmem:[#allocation21 + $0xeec] sm:$0xf0]  ;;  %v13851_v39 = vld [vmem:[#allocation21 + $0x274] sm:$0xf] }
 0x8e7   : > { %9215 = vmatmul.bf16.vlgmr.msra.gmra.mxu3 %v16200_v37  ;;  %v12716_v33 = vor.u32 %v14122_v49, %v12715_v34  ;;  %v13236_v34 = vor.u32 %v14251_v63, %v13235_v21  ;;  %v13819_v23 = vld [vmem:[#allocation21 + $0x174] sm:$0xf]  ;;  %v14123_v63 = vld [vmem:[#allocation21 + $0xaec] sm:$0xf0] }
 0x8e8   : > { %9225 = vmatpush.bf16.msrb.mxu0 %v11692_v6  ;;  %v13947_v6 = vld [vmem:[#allocation21 + $0x574] sm:$0xf] }
 0x8e9   : > { %9234 = vmatpush.bf16.msrb.mxu1 %v13228_v1  ;;  %9251 = vmatpush.bf16.msrb.mxu2 %v11696_v19  ;;  %v8984_v47 = vpop.f32.mrf.mxu1  ;;  %v12085_v1 = vld [vmem:[#allocation21 + $0x5f0] sm:$0xf0] }
 0x8ea   : > { %9260 = vmatpush.bf16.msrb.mxu3 %v13232_v15  ;;  %v9008_v24 = vpop.f32.mrf.mxu3  ;;  %v12587_v15 = vld [vmem:[#allocation21 + $0x968] sm:$0xf]  ;;  %v12088_v12 = vor.u32 %v13947_v6, %v12085_v1  ;;  %v11573_v53 = vld [vmem:[#allocation21 + $0x1f0] sm:$0xf0] }
 0x8eb   : > { %v9009_v62 = vadd.f32 %v9008_v24, %v8996_v45  ;;  %v12588_v29 = vor.u32 %v14090_v35, %v12587_v15  ;;  %v11701_v45 = vld [vmem:[#allocation21 + $0x2f0] sm:$0xf0]  ;;  %v8498_v24 = vperm.slane %v16366_v9, 2  ;;  %v13803_v35 = vld [vmem:[#allocation21 + $0xec] sm:$0xf0] }
 0x8ec   : > { %9226 = vmatpush.bf16.msrb.mxu0 %v11564_v59  ;;  %v11955_v59 = vld [vmem:[#allocation21 + $0x470] sm:$0xf]  ;;  %v11704_v49 = vor.u32 %v13851_v39, %v11701_v45  ;;  %v14203_v6 = vld [vmem:[#allocation21 + $0xd74] sm:$0xf] }
 0x8ed   : > { %9235 = vmatpush.bf16.msrb.mxu1 %v13100_v28  ;;  %9252 = vmatpush.bf16.msrb.mxu2 %v11568_v54  ;;  %v9422_v19 = vrot.slane %v9009_v62, 7  ;;  %v13915_v54 = vld [vmem:[#allocation21 + $0x474] sm:$0xf]  ;;  %v13835_v62 = vld [vmem:[#allocation21 + $0x1ec] sm:$0xf0] }
 0x8ee   : > { %9261 = vmatpush.bf16.msrb.mxu3 %v13104_v20  ;;  %v11956_v20 = vor.u32 %v13931_v4, %v11955_v59  ;;  %v11960_v30 = vor.u32 %v13915_v54, %v11957_v38  ;;  %v13109_v1 = vld [vmem:[#allocation21 + $0xdf0] sm:$0xf0] }
 0x8ef   : > { %v16379_v41 = vsel %vm9436_vm1, %v8983_v43, %v9422_v19  ;;  %v14283_v43 = vld [vmem:[#allocation21 + $0xfec] sm:$0xf0]  ;;  %v11572_v19 = vor.u32 %v13835_v62, %v11571_v5  ;;  %v13112_v59 = vor.u32 %v14203_v6, %v13109_v1  ;;  %v13787_v4 = vld [vmem:[#allocation21 + $0x74] sm:$0xf] }
 0x8f0   : > { %9227 = vmatpush.bf16.msrb.mxu0 %v11436_v46  ;;  %v16381_v28 = vpop.f32.mrf.mxu0  ;;  %v13883_v46 = vld [vmem:[#allocation21 + $0x374] sm:$0xf] }
 0x8f1   : > { %9236 = vmatpush.bf16.msrb.mxu1 %v12972_v17  ;;  %9253 = vmatpush.bf16.msrb.mxu2 %v11440_v3  ;;  %v13365_v17 = vld [vmem:[#allocation21 + $0xff0] sm:$0xf0]  ;;  %v12464_v3 = vor.u32 %v14042_v44, %v12461_v22  ;;  %v11832_v18 = vor.u32 %v13883_v46, %v11829_v27  ;;  %v9022_v25 = vadd.f32 %v16381_v28, %v8498_v24  ;;  %v14012_v44 = vld [vmem:[#allocation21 + $0x77c] sm:$0xf]  ;;  %v14155_v46 = vld [vmem:[#allocation21 + $0xbec] sm:$0xf0] }
 0x8f2   : > { %9262 = vmatpush.bf16.msrb.mxu3 %v12976_v40  ;;  %v9010_v7 = vpop.f32.mrf.mxu3  ;;  %v11828_v40 = vor.u32 %v13899_v31, %v11827_v55  ;;  %v13368_v42 = vor.u32 %v14267_v58, %v13365_v17  ;;  %v11445_v54 = vld [vmem:[#allocation21 + $0xf0] sm:$0xf0]  ;;  %v12349_v22 = vld [vmem:[#allocation21 + $0x7f8] sm:$0xf0]  ;;  %v12219_v17 = vld [vmem:[#allocation21 + $0x678] sm:$0xf] }
 0x8f3   : > { %9228 = vmatmul.bf16.vlgmr.msrb.gmra.mxu0 %v16194_v60  ;;  %v14171_v38 = vld [vmem:[#allocation21 + $0xc74] sm:$0xf]  ;;  %v14028_v7 = vld [vmem:[#allocation21 + $0x7f4] sm:$0xf0]  ;;  %v11448_v28 = vor.u32 %v13787_v4, %v11445_v54 }
 0x8f4   : > { %9272 = vmatpush.bf16.msra.mxu0 %v12340_v52  ;;  %9254 = vmatmul.bf16.vlgmr.msrb.gmra.mxu2 %v16194_v60  ;;  %v13364_v52 = vor.u32 %v14283_v43, %v13363_v61  ;;  %v12981_v0 = vld [vmem:[#allocation21 + $0xcf0] sm:$0xf0]  ;;  %v12851_v43 = vld [vmem:[#allocation21 + $0xb70] sm:$0xf] }
 0x8f5   : > { %9298 = vmatpush.bf16.msra.mxu2 %v12344_v26  ;;  %9237 = vmatpush.bf16.msrb.mxu1 %v12844_v32  ;;  %v13867_v26 = vld [vmem:[#allocation21 + $0x2ec] sm:$0xf0]  ;;  %v14235_v32 = vld [vmem:[#allocation21 + $0xe74] sm:$0xf]  ;;  %v12984_v31 = vor.u32 %v14171_v38, %v12981_v0 }
 0x8f6   : > { %9263 = vmatpush.bf16.msrb.mxu3 %v12848_v50  ;;  %v13237_v50 = vld [vmem:[#allocation21 + $0xef0] sm:$0xf0] }
 0x8f7   : > { %v16383_v11 = vpop.f32.mrf.mxu2  ;;  %v13240_v47 = vor.u32 %v14235_v32, %v13237_v50  ;;  %v14139_v27 = vld [vmem:[#allocation21 + $0xb74] sm:$0xf] }
 0x8f8   : > { %9273 = vmatpush.bf16.msra.mxu0 %v12212_v48  ;;  %v9023_v56 = vpop.f32.mrf.mxu0  ;;  %v11700_v48 = vor.u32 %v13867_v26, %v11699_v10  ;;  %v12853_v58 = vld [vmem:[#allocation21 + $0xbf0] sm:$0xf0]  ;;  %v12852_v10 = vor.u32 %v14155_v46, %v12851_v43 }
 0x8f9   : > { %9299 = vmatpush.bf16.msra.mxu2 %v12216_v13  ;;  %9238 = vmatpush.bf16.msrb.mxu1 %v12716_v33  ;;  %v13107_v13 = vld [vmem:[#allocation21 + $0xd70] sm:$0xf]  ;;  %v12856_v26 = vor.u32 %v14139_v27, %v12853_v58  ;;  %v14107_v39 = vld [vmem:[#allocation21 + $0xa74] sm:$0xf]  ;;  %v11707_v58 = vld [vmem:[#allocation21 + $0x278] sm:$0xf] }
 0x8fa   : > { %9264 = vmatpush.bf16.msrb.mxu3 %v12720_v16  ;;  %v11443_v33 = vld [vmem:[#allocation21 + $0x70] sm:$0xf]  ;;  %v13108_v16 = vor.u32 %v14219_v8, %v13107_v13  ;;  %v12725_v24 = vld [vmem:[#allocation21 + $0xaf0] sm:$0xf0] }
 0x8fb   : > { %v11444_v36 = vor.u32 %v13803_v35, %v11443_v33  ;;  %v12723_v56 = vld [vmem:[#allocation21 + $0xa70] sm:$0xf]  ;;  %v14075_v6 = vld [vmem:[#allocation21 + $0x974] sm:$0xf] }
 0x8fc   : > { %9274 = vmatpush.bf16.msra.mxu0 %v12084_v2  ;;  %v11576_v2 = vor.u32 %v13819_v23, %v11573_v53  ;;  %v12724_v13 = vor.u32 %v14123_v63, %v12723_v56  ;;  %v12595_v23 = vld [vmem:[#allocation21 + $0x970] sm:$0xf]  ;;  %v12597_v33 = vld [vmem:[#allocation21 + $0x9f0] sm:$0xf0] }
 0x8fd   : > { %9300 = vmatpush.bf16.msra.mxu2 %v12088_v12  ;;  %9239 = vmatpush.bf16.msrb.mxu1 %v12588_v29  ;;  %v14187_v12 = vld [vmem:[#allocation21 + $0xcec] sm:$0xf0]  ;;  %v12600_v4 = vor.u32 %v14075_v6, %v12597_v33  ;;  %v14043_v0 = vld [vmem:[#allocation21 + $0x874] sm:$0xf]  ;;  %v12987_v6 = vld [vmem:[#allocation21 + $0xc78] sm:$0xf] }
 0x8fe   : > { %9265 = vmatpush.bf16.msrb.mxu3 %v12592_v57  ;;  %v12347_v57 = vld [vmem:[#allocation21 + $0x778] sm:$0xf]  ;;  %v12980_v55 = vor.u32 %v14187_v12, %v12979_v14  ;;  %v14091_v53 = vld [vmem:[#allocation21 + $0x9ec] sm:$0xf0]  ;;  %v13916_v14 = vld [vmem:[#allocation21 + $0x47c] sm:$0xf] }
 0x8ff   : > { %v9049_v15 = vpop.f32.mrf.mxu2  ;;  %v12348_v61 = vor.u32 %v14028_v7, %v12347_v57  ;;  %v11965_v12 = vld [vmem:[#allocation21 + $0x4f8] sm:$0xf0]  ;;  %v12469_v57 = vld [vmem:[#allocation21 + $0x8f0] sm:$0xf0] }
 0x900   : > { %9275 = vmatpush.bf16.msra.mxu0 %v11956_v20  ;;  %v11968_v7 = vor.u32 %v13916_v14, %v11965_v12  ;;  %v13788_v33 = vld [vmem:[#allocation21 + $0x7c] sm:$0xf] }
 0x901   : > { %9301 = vmatpush.bf16.msra.mxu2 %v11960_v30  ;;  %9240 = vmatpush.bf16.msrb.mxu1 %v12460_v51  ;;  %v9034_v29 = vpop.f32.mrf.mxu1  ;;  %v8499_v30 = vperm.slane %v16366_v9, 3  ;;  %v12352_v51 = vor.u32 %v14012_v44, %v12349_v22  ;;  %v14284_v44 = vld [vmem:[#allocation21 + $0xff4] sm:$0xf0]  ;;  %v13884_v22 = vld [vmem:[#allocation21 + $0x37c] sm:$0xf] }
 0x902   : > { %9266 = vmatpush.bf16.msrb.mxu3 %v12464_v3  ;;  %v9035_v20 = vadd.f32 %v9034_v29, %v9022_v25  ;;  %v13996_v3 = vld [vmem:[#allocation21 + $0x6f4] sm:$0xf0]  ;;  %v12596_v25 = vor.u32 %v14091_v53, %v12595_v23  ;;  %v14059_v29 = vld [vmem:[#allocation21 + $0x8ec] sm:$0xf0]  ;;  %v14172_v14 = vld [vmem:[#allocation21 + $0xc7c] sm:$0xf] }
 0x903   : > { %v11451_v23 = vld [vmem:[#allocation21 + $0x78] sm:$0xf]  ;;  %v12989_v12 = vld [vmem:[#allocation21 + $0xcf8] sm:$0xf0] }
 0x904   : > { %9276 = vmatpush.bf16.msra.mxu0 %v11828_v40  ;;  %9241 = vmatmul.bf16.vlgmr.msrb.gmra.mxu1 %v16200_v37  ;;  %v13980_v40 = vld [vmem:[#allocation21 + $0x67c] sm:$0xf]  ;;  %v9423_v5 = vrot.slane %v9035_v20, 6  ;;  %v11835_v20 = vld [vmem:[#allocation21 + $0x378] sm:$0xf] }
 0x905   : > { %9285 = vmatpush.bf16.msra.mxu1 %v13364_v52  ;;  %9302 = vmatpush.bf16.msra.mxu2 %v11832_v18  ;;  %v12221_v52 = vld [vmem:[#allocation21 + $0x6f8] sm:$0xf0]  ;;  %v9048_v18 = vadd.f32 %v16383_v11, %v8499_v30  ;;  %v13964_v11 = vld [vmem:[#allocation21 + $0x5f4] sm:$0xf0] }
 0x906   : > { %9311 = vmatpush.bf16.msra.mxu3 %v13368_v42  ;;  %v12220_v42 = vor.u32 %v13996_v3, %v12219_v17  ;;  %v12224_v32 = vor.u32 %v13980_v40, %v12221_v52  ;;  %v11837_v30 = vld [vmem:[#allocation21 + $0x3f8] sm:$0xf0]  ;;  %v13868_v17 = vld [vmem:[#allocation21 + $0x2f4] sm:$0xf0] }
 0x907   : > { %9267 = vmatmul.bf16.vlgmr.msrb.gmra.mxu3 %v16200_v37  ;;  %v11840_v27 = vor.u32 %v13884_v22, %v11837_v30  ;;  %v13243_v3 = vld [vmem:[#allocation21 + $0xe78] sm:$0xf]  ;;  %v11708_v56 = vor.u32 %v13868_v17, %v11707_v58  ;;  %v14108_v30 = vld [vmem:[#allocation21 + $0xa7c] sm:$0xf] }
 0x908   : > { %9277 = vmatpush.bf16.msra.mxu0 %v11700_v48  ;;  %v12091_v48 = vld [vmem:[#allocation21 + $0x578] sm:$0xf] }
 0x909   : > { %9286 = vmatpush.bf16.msra.mxu1 %v13236_v34  ;;  %9303 = vmatpush.bf16.msra.mxu2 %v11704_v49  ;;  %v9036_v50 = vpop.f32.mrf.mxu1  ;;  %v13948_v34 = vld [vmem:[#allocation21 + $0x57c] sm:$0xf]  ;;  %v12092_v8 = vor.u32 %v13964_v11, %v12091_v48  ;;  %v14220_v48 = vld [vmem:[#allocation21 + $0xdf4] sm:$0xf0] }
 0x90a   : > { %9312 = vmatpush.bf16.msra.mxu3 %v13240_v47  ;;  %v9060_v21 = vpop.f32.mrf.mxu3  ;;  %v12093_v49 = vld [vmem:[#allocation21 + $0x5f8] sm:$0xf0]  ;;  %v12728_v47 = vor.u32 %v14107_v39, %v12725_v24  ;;  %v13115_v50 = vld [vmem:[#allocation21 + $0xd78] sm:$0xf] }
 0x90b   : > { %v9061_v45 = vadd.f32 %v9060_v21, %v9048_v18  ;;  %v14252_v18 = vld [vmem:[#allocation21 + $0xef4] sm:$0xf0]  ;;  %v14236_v21 = vld [vmem:[#allocation21 + $0xe7c] sm:$0xf] }
 0x90c   : > { %9278 = vmatpush.bf16.msra.mxu0 %v11572_v19  ;;  %v12096_v19 = vor.u32 %v13948_v34, %v12093_v49  ;;  %v13244_v63 = vor.u32 %v14252_v18, %v13243_v3  ;;  %v13820_v11 = vld [vmem:[#allocation21 + $0x17c] sm:$0xf]  ;;  %v13804_v53 = vld [vmem:[#allocation21 + $0xf4] sm:$0xf0] }
 0x90d   : > { %9287 = vmatpush.bf16.msra.mxu1 %v13108_v16  ;;  %9304 = vmatpush.bf16.msra.mxu2 %v11576_v2  ;;  %v9424_v62 = vrot.slane %v9061_v45, 5  ;;  %v11963_v16 = vld [vmem:[#allocation21 + $0x478] sm:$0xf]  ;;  %v11581_v34 = vld [vmem:[#allocation21 + $0x1f8] sm:$0xf0] }
 0x90e   : > { %9313 = vmatpush.bf16.msra.mxu3 %v13112_v59  ;;  %v13932_v2 = vld [vmem:[#allocation21 + $0x4f4] sm:$0xf0]  ;;  %v12467_v59 = vld [vmem:[#allocation21 + $0x870] sm:$0xf]  ;;  %v14204_v49 = vld [vmem:[#allocation21 + $0xd7c] sm:$0xf] }
 0x90f   : > { %v9458_v1 = vsel %vm9438_vm2, %v9423_v5, %v9424_v62  ;;  %v11964_v38 = vor.u32 %v13932_v2, %v11963_v16  ;;  %v11579_v45 = vld [vmem:[#allocation21 + $0x178] sm:$0xf]  ;;  %v13117_v5 = vld [vmem:[#allocation21 + $0xdf8] sm:$0xf0] }
 0x910   : > { %9279 = vmatpush.bf16.msra.mxu0 %v11444_v36  ;;  %v16396_v15 = vsel %vm9440_vm3, %v16379_v41, %v9458_v1  ;;  %v16398_v35 = vpop.f32.mrf.mxu0  ;;  %v13900_v41 = vld [vmem:[#allocation21 + $0x3f4] sm:$0xf0]  ;;  %v13120_v1 = vor.u32 %v14204_v49, %v13117_v5  ;;  %v11453_v16 = vld [vmem:[#allocation21 + $0xf8] sm:$0xf0] }
 0x911   : > { %9288 = vmatpush.bf16.msra.mxu1 %v12980_v55  ;;  %9305 = vmatpush.bf16.msra.mxu2 %v11448_v28  ;;  %v13371_v36 = vld [vmem:[#allocation21 + $0xf78] sm:$0xf]  ;;  %v12468_v55 = vor.u32 %v14059_v29, %v12467_v59  ;;  %v14268_v28 = vld [vmem:[#allocation21 + $0xf7c] sm:$0xf]  ;;  %v11836_v43 = vor.u32 %v13900_v41, %v11835_v20 }
 0x912   : > { %9314 = vmatpush.bf16.msra.mxu3 %v12984_v31  ;;  %v9062_v54 = vpop.f32.mrf.mxu3  ;;  %v13373_v31 = vld [vmem:[#allocation21 + $0xff8] sm:$0xf0]  ;;  %v13372_v46 = vor.u32 %v14284_v44, %v13371_v36  ;;  %v14156_v29 = vld [vmem:[#allocation21 + $0xbf4] sm:$0xf0] }
 0x913   : > { %9280 = vmatmul.bf16.vlgmr.msra.gmra.mxu0 %v16194_v60  ;;  %v13376_v40 = vor.u32 %v14268_v28, %v13373_v31  ;;  %v12992_v54 = vor.u32 %v14172_v14, %v12989_v12  ;;  %v12731_v36 = vld [vmem:[#allocation21 + $0xa78] sm:$0xf] }
 0x914   : > { %9324 = vmatpush.bf16.msrb.mxu0 %v12348_v61  ;;  %9306 = vmatmul.bf16.vlgmr.msra.gmra.mxu2 %v16194_v60  ;;  %v12472_v61 = vor.u32 %v14043_v0, %v12469_v57  ;;  %v14140_v0 = vld [vmem:[#allocation21 + $0xb7c] sm:$0xf]  ;;  %v14124_v44 = vld [vmem:[#allocation21 + $0xaf4] sm:$0xf0] }
 0x915   : > { %9350 = vmatpush.bf16.msrb.mxu2 %v12352_v51  ;;  %9289 = vmatpush.bf16.msra.mxu1 %v12852_v10  ;;  %v13852_v10 = vld [vmem:[#allocation21 + $0x27c] sm:$0xf]  ;;  %v12732_v28 = vor.u32 %v14124_v44, %v12731_v36  ;;  %v14060_v18 = vld [vmem:[#allocation21 + $0x8f4] sm:$0xf0] }
 0x916   : > { %9315 = vmatpush.bf16.msra.mxu3 %v12856_v26  ;;  %v11709_v26 = vld [vmem:[#allocation21 + $0x2f8] sm:$0xf0] }
 0x917   : > { %v16400_v51 = vpop.f32.mrf.mxu2  ;;  %v11712_v39 = vor.u32 %v13852_v10, %v11709_v26  ;;  %v12861_v57 = vld [vmem:[#allocation21 + $0xbf8] sm:$0xf0] }
 0x918   : > { %9325 = vmatpush.bf16.msrb.mxu0 %v12220_v42  ;;  %v9075_v52 = vpop.f32.mrf.mxu0  ;;  %v13245_v42 = vld [vmem:[#allocation21 + $0xef8] sm:$0xf0]  ;;  %v12864_v20 = vor.u32 %v14140_v0, %v12861_v57 }
 0x919   : > { %9351 = vmatpush.bf16.msrb.mxu2 %v12224_v32  ;;  %9290 = vmatpush.bf16.msra.mxu1 %v12724_v13  ;;  %v13836_v32 = vld [vmem:[#allocation21 + $0x1f4] sm:$0xf0]  ;;  %v13248_v24 = vor.u32 %v14236_v21, %v13245_v42  ;;  %v13116_v13 = vor.u32 %v14220_v48, %v13115_v50  ;;  %v14044_v10 = vld [vmem:[#allocation21 + $0x87c] sm:$0xf]  ;;  %v8503_v48 = vperm.slane %v16366_v9, 7 }
 0x91a   : > { %9316 = vmatpush.bf16.msra.mxu3 %v12728_v47  ;;  %v11580_v62 = vor.u32 %v13836_v32, %v11579_v45  ;;  %v11584_v47 = vor.u32 %v13820_v11, %v11581_v34  ;;  %v12475_v52 = vld [vmem:[#allocation21 + $0x878] sm:$0xf]  ;;  %v12477_v26 = vld [vmem:[#allocation21 + $0x8f8] sm:$0xf0]  ;;  %v8500_v45 = vperm.slane %v16366_v9, 4  ;;  %v8502_v32 = vperm.slane %v16366_v9, 6 }
 0x91b   : > { %v12480_v21 = vor.u32 %v14044_v10, %v12477_v26  ;;  %v5915_v12 = vld [vmem:[#allocation23 + $0x18] sm:$0xff] }
 0x91c   : > { %9326 = vmatpush.bf16.msrb.mxu0 %v12092_v8  ;;  %v9074_v11 = vadd.f32 %v16398_v35, %v8500_v45 }
 0x91d   : > { %9352 = vmatpush.bf16.msrb.mxu2 %v12096_v19  ;;  %9291 = vmatpush.bf16.msra.mxu1 %v12596_v25  ;;  %v14188_v19 = vld [vmem:[#allocation21 + $0xcf4] sm:$0xf0]  ;;  %v11452_v25 = vor.u32 %v13804_v53, %v11451_v23 }
 0x91e   : > { %9317 = vmatpush.bf16.msra.mxu3 %v12600_v4  ;;  %v12988_v59 = vor.u32 %v14188_v19, %v12987_v6  ;;  %v11456_v4 = vor.u32 %v13788_v33, %v11453_v16 }
 0x91f   : > { %v9101_v8 = vpop.f32.mrf.mxu2 }
 0x920   : > { %9327 = vmatpush.bf16.msrb.mxu0 %v11964_v38  ;;  %v12859_v38 = vld [vmem:[#allocation21 + $0xb78] sm:$0xf] }
 0x921   : > { %9353 = vmatpush.bf16.msrb.mxu2 %v11968_v7  ;;  %9292 = vmatpush.bf16.msra.mxu1 %v12468_v55  ;;  %v16404_v2 = vpop.f32.mrf.mxu1  ;;  %v12860_v7 = vor.u32 %v14156_v29, %v12859_v38  ;;  %v12733_v55 = vld [vmem:[#allocation21 + $0xaf8] sm:$0xf0]  ;;  %v8505_v29 = vperm.slane %v5915_v12, 1 }
 0x922   : > { %9318 = vmatpush.bf16.msra.mxu3 %v12472_v61  ;;  %v12736_v31 = vor.u32 %v14108_v30, %v12733_v55  ;;  %v12603_v61 = vld [vmem:[#allocation21 + $0x978] sm:$0xf]  ;;  %v9087_v5 = vadd.f32 %v16404_v2, %v9074_v11  ;;  %v8506_v55 = vperm.slane %v5915_v12, 2  ;;  %v8509_v11 = vperm.slane %v5915_v12, 5 }
 0x924   : > { %9328 = vmatpush.bf16.msrb.mxu0 %v11836_v43  ;;  %9293 = vmatmul.bf16.vlgmr.msra.gmra.mxu1 %v16200_v37  ;;  %v14092_v43 = vld [vmem:[#allocation21 + $0x9f4] sm:$0xf0]  ;;  %v9425_v53 = vrot.slane %v9087_v5, 4  ;;  %v8510_v5 = vperm.slane %v5915_v12, 6 }
 0x925   : > { %9337 = vmatpush.bf16.msrb.mxu1 %v13372_v46  ;;  %9354 = vmatpush.bf16.msrb.mxu2 %v11840_v27  ;;  %v14076_v46 = vld [vmem:[#allocation21 + $0x97c] sm:$0xf]  ;;  %v12604_v17 = vor.u32 %v14092_v43, %v12603_v61 }
 0x926   : > { %9363 = vmatpush.bf16.msrb.mxu3 %v13376_v40  ;;  %v12605_v27 = vld [vmem:[#allocation21 + $0x9f8] sm:$0xf0] }
 0x927   : > { %9319 = vmatmul.bf16.vlgmr.msra.gmra.mxu3 %v16200_v37  ;;  %v12608_v3 = vor.u32 %v14076_v46, %v12605_v27  ;;  %v8507_v46 = vperm.slane %v5915_v12, 3 }
 0x928   : > { %9329 = vmatpush.bf16.msrb.mxu0 %v11708_v56 }
 0x929   : > { %9338 = vmatpush.bf16.msrb.mxu1 %v13244_v63  ;;  %9355 = vmatpush.bf16.msrb.mxu2 %v11712_v39  ;;  %v9088_v22 = vpop.f32.mrf.mxu1  ;;  %v8501_v63 = vperm.slane %v16366_v9, 5 }
 0x92a   : > { %9364 = vmatpush.bf16.msrb.mxu3 %v13248_v24  ;;  %v9112_v41 = vpop.f32.mrf.mxu3 }
 0x92b   : > { %v9100_v24 = vadd.f32 %v16400_v51, %v8501_v63 }
 0x92c   : > { %9330 = vmatpush.bf16.msrb.mxu0 %v11580_v62 }
 0x92d   : > { %9339 = vmatpush.bf16.msrb.mxu1 %v13116_v13  ;;  %9356 = vmatpush.bf16.msrb.mxu2 %v11584_v47  ;;  %v9113_v34 = vadd.f32 %v9112_v41, %v9100_v24 }
 0x92e   : > { %9365 = vmatpush.bf16.msrb.mxu3 %v13120_v1 }
 0x92f   : > { %v9426_v47 = vrot.slane %v9113_v34, 3 }
 0x930   : > { %9331 = vmatpush.bf16.msrb.mxu0 %v11452_v25  ;;  %v9125_v58 = vpop.f32.mrf.mxu0  ;;  %v8504_v25 = vperm.slane %v5915_v12, 0 }
 0x931   : > { %9340 = vmatpush.bf16.msrb.mxu1 %v12988_v59  ;;  %9357 = vmatpush.bf16.msrb.mxu2 %v11456_v4  ;;  %v9126_v49 = vadd.f32 %v9125_v58, %v8502_v32  ;;  %v9460_v51 = vsel %vm9442_vm4, %v9425_v53, %v9426_v47 }
 0x932   : > { %9366 = vmatpush.bf16.msrb.mxu3 %v12992_v54  ;;  %v9114_v40 = vpop.f32.mrf.mxu3 }
 0x933   : > { %9332 = vmatmul.bf16.vlgmr.msrb.gmra.mxu0 %v16194_v60 }
 0x934   : > { %9358 = vmatmul.bf16.vlgmr.msrb.gmra.mxu2 %v16194_v60  ;;  %v12476_v60 = vor.u32 %v14060_v18, %v12475_v52 }
 0x935   : > { %9341 = vmatpush.bf16.msrb.mxu1 %v12860_v7 }
 0x936   : > { %9367 = vmatpush.bf16.msrb.mxu3 %v12864_v20 }
 0x937   : > { %v9151_v42 = vpop.f32.mrf.mxu2 }
 0x938   : > { %v9127_v56 = vpop.f32.mrf.mxu0 }
 0x939   : > { %9342 = vmatpush.bf16.msrb.mxu1 %v12732_v28 }
 0x93a   : > { %9368 = vmatpush.bf16.msrb.mxu3 %v12736_v31 }
 0x93d   : > { %9343 = vmatpush.bf16.msrb.mxu1 %v12604_v17 }
 0x93e   : > { %9369 = vmatpush.bf16.msrb.mxu3 %v12608_v3 }
 0x93f   : > { %v9153_v39 = vpop.f32.mrf.mxu2 }
 0x941   : > { %9344 = vmatpush.bf16.msrb.mxu1 %v12476_v60  ;;  %v9138_v50 = vpop.f32.mrf.mxu1 }
 0x942   : > { %9370 = vmatpush.bf16.msrb.mxu3 %v12480_v21  ;;  %v9139_v62 = vadd.f32 %v9138_v50, %v9126_v49  ;;  %v8508_v49 = vperm.slane %v5915_v12, 4 }
 0x944   : > { %9345 = vmatmul.bf16.vlgmr.msrb.gmra.mxu1 %v16200_v37  ;;  %v9427_v6 = vrot.slane %v9139_v62, 2 }
 0x945   : > { %9371 = vmatmul.bf16.vlgmr.msrb.gmra.mxu3 %v16200_v37  ;;  %v9152_v37 = vadd.f32 %v9151_v42, %v8503_v48 }
 0x949   : > { %v9140_v23 = vpop.f32.mrf.mxu1 }
 0x94a   : > { %v9164_v13 = vpop.f32.mrf.mxu3 }
 0x94b   : > { %v9165_v8 = vadd.f32 %v9164_v13, %v9152_v37  ;;  %v8511_v13 = vperm.slane %v5915_v12, 7 }
 0x94d   : > { %v9428_v1 = vrot.slane %v9165_v8, 1 }
 0x94f   : > { %v9461_v9 = vsel %vm9444_vm5, %v9427_v6, %v9428_v1 }
 0x950   : > { %v9462_v35 = vsel %vm9446_vm6, %v9460_v51, %v9461_v9  ;;  %v9177_v19 = vpop.f32.mrf.mxu0 }
 0x951   : > { %v9463_v33 = vsel %vm9448_vm7, %v16396_v15, %v9462_v35  ;;  %v9178_v4 = vadd.f32 %v9177_v19, %v8504_v25 }
 0x952   : > { %9477 = vst [vmem:[%s15407_s8 + $0x10] sm:$0xff] %v9463_v33  ;;  %v9166_v16 = vpop.f32.mrf.mxu3 }
 0x957   : > { %v9203_v2 = vpop.f32.mrf.mxu2 }
 0x958   : > { %v9179_v14 = vpop.f32.mrf.mxu0  ;;  %v9204_v0 = vadd.f32 %v9203_v2, %v8505_v29 }
 0x95f   : > { %v9205_v59 = vpop.f32.mrf.mxu2 }
 0x961   : > { %v9190_v54 = vpop.f32.mrf.mxu1 }
 0x962   : > { %v9191_v38 = vadd.f32 %v9190_v54, %v9178_v4 }
 0x969   : > { %v9192_v20 = vpop.f32.mrf.mxu1 }
 0x96a   : > { %v9216_v57 = vpop.f32.mrf.mxu3 }
 0x96b   : > { %v9217_v7 = vadd.f32 %v9216_v57, %v9204_v0 }
 0x96d   : > { %v9429_v41 = vrot.slane %v9217_v7, 7 }
 0x96f   : > { %v9464_v36 = vsel %vm9436_vm1, %v9191_v38, %v9429_v41 }
 0x970   : > { %v9229_v44 = vpop.f32.mrf.mxu0 }
 0x971   : > { %v9230_v31 = vadd.f32 %v9229_v44, %v8506_v55 }
 0x972   : > { %v9218_v15 = vpop.f32.mrf.mxu3 }
 0x977   : > { %v9255_v22 = vpop.f32.mrf.mxu2 }
 0x978   : > { %v9231_v30 = vpop.f32.mrf.mxu0  ;;  %v9256_v27 = vadd.f32 %v9255_v22, %v8507_v46 }
 0x97f   : > { %v9257_v28 = vpop.f32.mrf.mxu2 }
 0x981   : > { %v9242_v61 = vpop.f32.mrf.mxu1 }
 0x982   : > { %v9243_v43 = vadd.f32 %v9242_v61, %v9230_v31 }
 0x984   : > { %v9430_v40 = vrot.slane %v9243_v43, 6 }
 0x989   : > { %v9244_v3 = vpop.f32.mrf.mxu1 }
 0x98a   : > { %v9268_v58 = vpop.f32.mrf.mxu3 }
 0x98b   : > { %v9269_v17 = vadd.f32 %v9268_v58, %v9256_v27 }
 0x98d   : > { %v9431_v52 = vrot.slane %v9269_v17, 5 }
 0x98f   : > { %v9465_v18 = vsel %vm9438_vm2, %v9430_v40, %v9431_v52 }
 0x990   : > { %v9466_v10 = vsel %vm9440_vm3, %v9464_v36, %v9465_v18  ;;  %v9281_v26 = vpop.f32.mrf.mxu0 }
 0x991   : > { %v9282_v47 = vadd.f32 %v9281_v26, %v8508_v49 }
 0x992   : > { %v9270_v60 = vpop.f32.mrf.mxu3 }
 0x997   : > { %v9307_v21 = vpop.f32.mrf.mxu2 }
 0x998   : > { %v9283_v42 = vpop.f32.mrf.mxu0  ;;  %v9308_v62 = vadd.f32 %v9307_v21, %v8509_v11 }
 0x99f   : > { %v9309_v56 = vpop.f32.mrf.mxu2 }
 0x9a1   : > { %v9294_v63 = vpop.f32.mrf.mxu1 }
 0x9a2   : > { %v9295_v53 = vadd.f32 %v9294_v63, %v9282_v47 }
 0x9a4   : > { %v9432_v33 = vrot.slane %v9295_v53, 4 }
 0x9a9   : > { %v9296_v45 = vpop.f32.mrf.mxu1 }
 0x9aa   : > { %v9320_v39 = vpop.f32.mrf.mxu3 }
 0x9ab   : > { %v9321_v8 = vadd.f32 %v9320_v39, %v9308_v62 }
 0x9ad   : > { %v9433_v9 = vrot.slane %v9321_v8, 3 }
 0x9af   : > { %v9467_v14 = vsel %vm9442_vm4, %v9432_v33, %v9433_v9 }
 0x9b0   : > { %v9333_v32 = vpop.f32.mrf.mxu0 }
 0x9b1   : > { %v9334_v23 = vadd.f32 %v9333_v32, %v8510_v5 }
 0x9b2   : > { %v9322_v50 = vpop.f32.mrf.mxu3 }
 0x9b7   : > { %v9359_v24 = vpop.f32.mrf.mxu2 }
 0x9b8   : > { %v9335_v48 = vpop.f32.mrf.mxu0  ;;  %v9360_v6 = vadd.f32 %v9359_v24, %v8511_v13 }
 0x9bf   : > { %v9361_v34 = vpop.f32.mrf.mxu2 }
 0x9c1   : > { %v9346_v37 = vpop.f32.mrf.mxu1 }
 0x9c2   : > { %v9347_v1 = vadd.f32 %v9346_v37, %v9334_v23 }
 0x9c4   : > { %v9434_v16 = vrot.slane %v9347_v1, 2 }
 0x9c8   : > { %v9372_v51 = vpop.f32.mrf.mxu3 }
 0x9c9   : > { %v9373_v35 = vadd.f32 %v9372_v51, %v9360_v6  ;;  %v9348_v19 = vpop.f32.mrf.mxu1 }
 0x9cb   : > { %v9435_v2 = vrot.slane %v9373_v35, 1 }
 0x9cd   : > { %v9468_v25 = vsel %vm9444_vm5, %v9434_v16, %v9435_v2 }
 0x9ce   : > { %v9469_v12 = vsel %vm9446_vm6, %v9467_v14, %v9468_v25 }
 0x9cf   : > { %v9470_v59 = vsel %vm9448_vm7, %v9466_v10, %v9469_v12 }
 0x9d0   : > { %9478 = vst [vmem:[%s15407_s8 + $0x18] sm:$0xff] %v9470_v59  ;;  %v9374_v4 = vpop.f32.mrf.mxu3 }
 0x9d1 PF: > { %s16564_s11 = sld [smem:[#allocation38_spill]]  ;;  %s9492_s26 = sshll.u32 %s15407_s8, 4  ;;  %s9493_s26 = int_to_ptr.vmem [resolvable:$true] %s9492_s26 }
 0x9d2   : > { %s16566_s15 = sld [smem:[#allocation54_spill]]  ;;  %s9480_s14 = scalar_lea.sflag [#allocation5], %s660_s6 }
 0x9d7   : > { %s13378_s20 = sshll.u32 %s16564_s11, 5 }
 0x9d8   : > { %s16567_s2 = smov %s16566_s15  ;;  %s9490_s25 = scalar_lea.hbm %s16566_s15, %s13378_s20 }
 0x9d9   : > { %s9494_s27 = sshll.u32 %s9490_s25, 4  ;;  %s14951_s7 = scalar_lea.hbm %s16567_s2, 64  ;;  %s9495_s27 = int_to_ptr.hbm [resolvable:$true] %s9494_s27 }
 0x9da   : > { %s14945_s1 = sshra.s32 %s9495_s27, 4  ;;  %s14946_s1 = int_to_ptr.hbm [resolvable:$true] %s14945_s1 }
 0x9db   : > { %s14947_s28 = scalar_lea.hbm %s14946_s1, 32  ;;  %p14952_p0 = scmp.lt.s32.totalorder %s14946_s1, %s16567_s2 }
 0x9dc   : > { %p14948_p9 = scmp.ne.s32.totalorder %s14946_s1, %s14947_s28  ;;  %p14953_p2 = scmp.lt.s32.totalorder %s14951_s7, %s14947_s28 }
 0x9de   : > { %p14949_p12 = pnand %p14948_p9, %p15346_p6  ;;  %p14954_p4 = por %p14953_p2, %p14952_p0 }
 0x9e0   : > { %p14950_p13 = pneg %p14949_p12 }
 0x9e2   : > { %p14955_p5 = pnand %p14954_p4, %p14950_p13 }
 0x9e4   : > { %14958 = shalt.err (!%p14955_p5)
}
 0x9e5   : > { %14352 = dma.vmem_to_hbm [thread:$0]  (%p15346_p6), %s9493_s26, 512, %s9495_s27, %s9480_s14  }
 0x9e6 PF: > { %s16568_s6 = sld [smem:[#allocation33_spill]]  ;;  %p14424_p7 = scmp.ge.s32.totalorder %s15077_s18, 2 }
 0x9e8   : > { %p14396_p8 = pnand %p14424_p7, %p15359_p10 }
 0x9ea   : > { %p14397_p11 = pneg %p14396_p8 }
 0x9ec   : > { %s9506_s8 = sand.u32 1, %s16568_s6  }
 0x9ed   : > { %s9507_s11 = scalar_lea.sflag [#allocation5], %s9506_s8 }
 0x9ee   : > { %15032 = dma.done.wait (%p14397_p11), %s9507_s11, 512  }
 0x9ef   : > { %15034 = vsyncadd (%p14397_p11), %s9507_s11, 4294966784  ;;  %s35_s18 = sadd.s32 1, %s15077_s18   ;;  %s16569_s25 = sld [smem:[#allocation34_spill]] }
 0x9f0   : > { %p32_p3 = scmp.ge.s32.totalorder %s35_s18, 8   ;;  %s16570_s26 = sld [smem:[#allocation35_spill]] }
 0x9f1   : > { %s16571_s27 = smov %s16586_s21  ;;  %s16572_s28 = smov %s15053_s29 }
 0x9f2   : > { %s16573_s29 = smov %s15057_s30  ;;  %s16574_s30 = smov %s15354_s22 }
 0x9f3   : > { %s16575_s14 = smov %s15069_s16  ;;  %s16576_s15 = smov %s15073_s17 }
 0x9f4   : > { %s16577_s16 = smov %s16580_s3  ;;  %s16578_s17 = smov %s16584_s12 }
 0x9f5   :  { %34 = sbr.rel (!%p32_p3) target bundleno = 30 (0x1e), region = 173 }
 0x9fa   :  { %9513 = vsyncpa [#allocation4], 1 }
 0x9fb   :  { %9515 = vsyncpa [#allocation4 + $0x1], 1 }
 0x9fc   :  { %9516 = vsyncpa [#allocation7], 1 }
 0x9fd   :  { %9517 = vsyncpa [#allocation10], 1 }
 0x9fe   :  { %9518 = vsyncpa [#allocation13], 1 }
 0x9ff   :  { %9519 = vsyncpa [#allocation16], 1 }
 0xa00   :  { %9520 = vsyncpa [#allocation19], 1 }
 0xa01   :  { %9521 = vsyncpa [#allocation22], 1 }
 0xa02   :  { %9522 = vsyncpa [#allocation5], 1 }
 0xa03   :  { %9524 = vsyncpa [#allocation5 + $0x1], 1 }

</bundles_post_ra>
